<compile_context>
chip_gen: v5e
topology: v5e:2x2
jax: 0.10.0
libtpu: 0.0.40
codegen_flags: <defaults>
</compile_context>

<pallas_src>
import numpy as np
import jax
import jax.numpy as jnp
from jax import lax
from jax.experimental import pallas as pl
from jax.experimental.pallas import tpu as pltpu


def _round_up(v, m):
    return (v + m - 1) // m * m


# ---------------------------------------------------------------------------
# Fused kernel: one grid step per batch tile, everything in VMEM.
# ---------------------------------------------------------------------------
def _fused_cnn_kernel(x_ref, band1_ref, bias1_ref, band2_ref, bias2_ref,
                      wf1_ref, bf1_ref, wf2_ref, bf2_ref, out_ref, fc_scr):
    f32, bf16 = jnp.float32, jnp.bfloat16

    b_tile, h_in, _ = x_ref.shape
    k = band1_ref.shape[0]                 # conv kernel height (5)
    n1 = band1_ref.shape[2] // 2           # Cout1 * pooled_width1 (6*14 = 84)
    n2 = band2_ref.shape[2] // 2           # Cout2 * pooled_width2 (8*5  = 40)
    oh1 = h_in - k + 1                     # conv1 output height (28)
    ph1 = oh1 // 2                         # pooled height 1 (14)
    oh2 = ph1 - k + 1                      # conv2 output height (10)
    ph2 = fc_scr.shape[0]                  # pooled height 2 (5)
    half = h_in // 2                       # rows per parity block of the reordered x

    # -------------------- per-sample conv stage -------------------------------
    def per_sample(b, carry):
        x = x_ref[b]                       # (H, W*Cin) f32, rows ordered [even | odd]

        # conv1 + bias + relu with BOTH 2x2-pool directions folded in:
        #   width  pool -> merged even|odd column band + elementwise max,
        #   height pool -> separate even/odd conv-output-row accumulations
        #                  (host reordered input rows so every slice is static).
        def conv1_rows(p):                 # p = conv-output-row parity (0/1)
            acc = jnp.zeros((ph1, 2 * n1), f32)
            for kh in range(k):
                q = (p + kh) % 2           # parity of the needed input row
                start = q * half + (p + kh - q) // 2
                acc = acc + jnp.dot(x[start:start + ph1, :].astype(bf16),
                                    band1_ref[kh], preferred_element_type=f32)
            return jnp.maximum(jnp.maximum(acc[:, :n1], acc[:, n1:])
                               + bias1_ref[...], 0.0)

        p1 = jnp.maximum(conv1_rows(0), conv1_rows(1))          # (14, 84) f32

        # conv2 + bias + relu, width pool folded in (same merged-band trick).
        acc2 = jnp.zeros((oh2, 2 * n2), f32)
        for kh in range(k):
            acc2 = acc2 + jnp.dot(p1[kh:kh + oh2, :].astype(bf16),
                                  band2_ref[kh], preferred_element_type=f32)
        y2 = jnp.maximum(jnp.maximum(acc2[:, :n2], acc2[:, n2:])
                         + bias2_ref[...], 0.0)                  # (10, 40) f32

        # Height pool of conv2 (static row-pair max) fused with the scatter of this
        # sample's activations into the batched fc scratch (per-h slabs whose column
        # layout matches the host-permuted fc1 weight slabs).
        for hh in range(ph2):
            row = jnp.maximum(y2[2 * hh:2 * hh + 1, :],
                              y2[2 * hh + 1:2 * hh + 2, :])      # (1, 40)
            fc_scr[hh, pl.ds(b, 1), :] = row
        return carry

    lax.fori_loop(0, b_tile, per_sample, 0)

    # -------------------- batched fc stage (M = B_TILE) -----------------------
    # fc1 + relu: (B_TILE, ph2*40) @ (ph2*40, 550) as ph2 accumulated slab matmuls.
    hid = jnp.zeros((b_tile, bf1_ref.shape[1]), f32)
    for hh in range(ph2):
        hid = hid + jnp.dot(fc_scr[hh].astype(bf16), wf1_ref[hh],
                            preferred_element_type=f32)
    hid = jnp.maximum(hid + bf1_ref[...], 0.0)                   # (B_TILE, 550)

    # fc2: bf16 weights, f32 accumulation, lane-dense padded output (4352 lanes).
    out = jnp.dot(hid.astype(bf16), wf2_ref[...], preferred_element_type=f32)
    out_ref[...] = out + bf2_ref[...]                            # (B_TILE, 4352)


# ---------------------------------------------------------------------------
# One-time host-side parameter preparation
# ---------------------------------------------------------------------------
def _build_band(w, w_in, cin_major):
    """Merged even|odd banded (Toeplitz) matrices for a VALID stride-1 conv expressed
    as row-wise matmuls, with the width-direction 2x max-pool folded in.

    w: (K, K, Cin, Cout) weights (HWIO, cross-correlation like torch).
    Input-row column layout: col = wpos*Cin + ci (NHWC rows) if not cin_major,
    col = ci*w_in + wpos (channel-major pooled layout) if cin_major.
    Output column co*PW + pw is conv column 2*pw (first half) / 2*pw+1 (second half).
    """
    K, _, cin, cout = w.shape
    ow = w_in - K + 1
    assert ow % 2 == 0, "2x2 max-pool needs an even conv output width"
    pw_n = ow // 2
    halves = []
    for parity in (0, 1):
        B = np.zeros((K, w_in * cin, cout * pw_n), np.float32)
        for kh in range(K):
            for kw in range(K):
                for ci in range(cin):
                    for co in range(cout):
                        for pw in range(pw_n):
                            wpos = 2 * pw + parity + kw
                            col_in = ci * w_in + wpos if cin_major else wpos * cin + ci
                            B[kh, col_in, co * pw_n + pw] = w[kh, kw, ci, co]
        halves.append(B)
    return np.concatenate(halves, axis=-1)      # (K, w_in*cin, 2*cout*pw_n)


def prepare_kernel_params(params, input_height, input_width, n_channels):
    """Convert module parameters into the fused-kernel operand set."""
    w1, b1, w2, b2, wf1, bf1, wf2, bf2 = [np.asarray(p, np.float32) for p in params]
    k = w1.shape[0]
    c1, c2 = w1.shape[3], w2.shape[3]
    oh1, ow1 = input_height - k + 1, input_width - k + 1
    ph1, pw1 = oh1 // 2, ow1 // 2
    oh2, ow2 = ph1 - k + 1, pw1 - k + 1
    ph2, pw2 = oh2 // 2, ow2 // 2
    assert oh1 % 2 == 0 and ow1 % 2 == 0 and oh2 % 2 == 0 and ow2 % 2 == 0

    band1 = _build_band(w1, input_width, cin_major=False)   # (k, W*Cin, 2*c1*pw1)
    band2 = _build_band(w2, pw1, cin_major=True)            # (k, c1*pw1, 2*c2*pw2)
    bias1 = np.repeat(b1, pw1)[None, :]                     # (1, c1*pw1), col = co*pw1+pw
    bias2 = np.repeat(b2, pw2)[None, :]                     # (1, c2*pw2)

    # fc1: reorder rows from torch's NCHW flatten (c, h, w) to the kernel's (h, c, w)
    # layout and split into per-h slabs -> no in-kernel flatten/transpose needed.
    n_hidden = wf1.shape[1]
    perm = np.empty(c2 * ph2 * pw2, np.int64)
    for h in range(ph2):
        for c in range(c2):
            for w in range(pw2):
                perm[h * (c2 * pw2) + c * pw2 + w] = c * (ph2 * pw2) + h * pw2 + w
    wf1_k = wf1[perm, :].reshape(ph2, c2 * pw2, n_hidden)

    # fc2: pad output columns to a multiple of 128 lanes (unmasked stores).
    n_out = wf2.shape[1]
    n_out_pad = _round_up(n_out, 128)
    wf2_pad = np.zeros((wf2.shape[0], n_out_pad), np.float32)
    wf2_pad[:, :n_out] = wf2
    bf2_pad = np.zeros((1, n_out_pad), np.float32)
    bf2_pad[0, :n_out] = bf2

    return dict(
        band1=jnp.asarray(band1, jnp.bfloat16),
        bias1=jnp.asarray(bias1),
        band2=jnp.asarray(band2, jnp.bfloat16),
        bias2=jnp.asarray(bias2),
        wf1=jnp.asarray(wf1_k, jnp.bfloat16),
        bf1=jnp.asarray(bf1[None, :]),
        wf2=jnp.asarray(wf2_pad, jnp.bfloat16),
        bf2=jnp.asarray(bf2_pad),
        n_out=n_out, n_out_pad=n_out_pad,
        ph2=ph2, n2=c2 * pw2,
    )


# ---------------------------------------------------------------------------
# Forward pass (single pallas_call, grid over batch tiles)
# ---------------------------------------------------------------------------
def basic_cnn_forward(x_nchw, kp, b_tile=None):
    n, c, hgt, wdt = x_nchw.shape
    assert hgt % 2 == 0, "row-reorder height-pool trick needs an even input height"
    if b_tile is None:
        # v5e MXU has 128 rows, v6e/v7x have 256: cap at 256, but only round small
        # batches up to a sublane multiple (don't pad a batch of 2 to 256 rows).
        b_tile = 256 if n >= 256 else _round_up(n, 8)
    n_pad = _round_up(n, b_tile)

    # NHWC rows (channel fastest).  Reorder rows to [even | odd] blocks so the
    # in-kernel conv1 height pooling needs only static contiguous slices
    # (no selector matmuls, no strided loads).
    x_rows = jnp.transpose(x_nchw, (0, 2, 3, 1)).reshape(n, hgt, wdt * c)
    x_rows = jnp.concatenate([x_rows[:, 0::2, :], x_rows[:, 1::2, :]], axis=1)
    if n_pad != n:
        x_rows = jnp.pad(x_rows, ((0, n_pad - n), (0, 0), (0, 0)))

    operands = (x_rows, kp["band1"], kp["bias1"], kp["band2"], kp["bias2"],
                kp["wf1"], kp["bf1"], kp["wf2"], kp["bf2"])

    def const_spec(arr):
        zeros = (0,) * arr.ndim
        return pl.BlockSpec(arr.shape, lambda i, _z=zeros: _z)

    in_specs = [pl.BlockSpec((b_tile, hgt, wdt * c), lambda i: (i, 0, 0))]
    in_specs += [const_spec(a) for a in operands[1:]]

    n_out_pad = kp["n_out_pad"]
    out_pad = pl.pallas_call(
        _fused_cnn_kernel,
        out_shape=jax.ShapeDtypeStruct((n_pad, n_out_pad), jnp.float32),
        grid=(n_pad // b_tile,),
        in_specs=in_specs,
        out_specs=pl.BlockSpec((b_tile, n_out_pad), lambda i: (i, 0)),
        scratch_shapes=[pltpu.VMEM((kp["ph2"], b_tile, kp["n2"]), jnp.float32)],
        compiler_params=pltpu.CompilerParams(
            dimension_semantics=("parallel",),        # batch tiles shard across TCs on v7x
            vmem_limit_bytes=32 * 1024 * 1024),       # fits v5e/v6e/v7x; ~22 MiB @ B_TILE=256
    )(*operands)
    return out_pad[:n, :kp["n_out"]]


# ---------------------------------------------------------------------------
# Independent pure-JAX reference (f32, HIGHEST precision)
# ---------------------------------------------------------------------------
def reference_forward(x_nchw, params):
    w1, b1, w2, b2, wf1, bf1, wf2, bf2 = params
    hp = jax.lax.Precision.HIGHEST

    def conv_relu(x, w, b):                           # x: NCHW, w: HWIO
        y = jax.lax.conv_general_dilated(
            x, w, window_strides=(1, 1), padding="VALID",
            dimension_numbers=("NCHW", "HWIO", "NCHW"), precision=hp)
        return jnp.maximum(y + b[None, :, None, None], 0.0)

    def pool(x):                                      # 2x2 / stride 2 max pool, NCHW
        nn, cc, hh, ww = x.shape
        return x.reshape(nn, cc, hh // 2, 2, ww // 2, 2).max(axis=(3, 5))

    x = pool(conv_relu(x_nchw, w1, b1))
    x = pool(conv_relu(x, w2, b2))
    x = x.reshape(x.shape[0], -1)                     # torch.flatten(x, 1) on NCHW
    x = jnp.maximum(jnp.dot(x, wf1, precision=hp) + bf1, 0.0)
    return jnp.dot(x, wf2, precision=hp) + bf2


def init_params(key, input_height, input_width, n_channels):
    """Deterministic synthetic parameters matching the nn.Module's shapes.
    Conv weights are HWIO; linear weights are (in, out); fc1's row order matches
    torch.flatten(x, 1) on an NCHW tensor."""
    out1_h, out1_w = input_height - 4, input_width - 4
    pool1_h, pool1_w = out1_h // 2, out1_w // 2
    out2_h, out2_w = pool1_h - 4, pool1_w - 4
    pool2_h, pool2_w = out2_h // 2, out2_w // 2
    fc1_in = 8 * pool2_h * pool2_w

    ks = jax.random.split(key, 8)
    w1 = jax.random.normal(ks[0], (5, 5, n_channels, 6), jnp.float32) * 0.1
    b1 = jax.random.normal(ks[1], (6,), jnp.float32) * 0.1
    w2 = jax.random.normal(ks[2], (5, 5, 6, 8), jnp.float32) * 0.1
    b2 = jax.random.normal(ks[3], (8,), jnp.float32) * 0.1
    wf1 = jax.random.normal(ks[4], (fc1_in, 550), jnp.float32) * 0.05
    bf1 = jax.random.normal(ks[5], (550,), jnp.float32) * 0.05
    wf2 = jax.random.normal(ks[6], (550, 4251), jnp.float32) * 0.05
    bf2 = jax.random.normal(ks[7], (4251,), jnp.float32) * 0.05
    return (w1, b1, w2, b2, wf1, bf1, wf2, bf2)


if __name__ == "__main__":
    batch, n_channels, height, width = 2, 1, 32, 32   # 32 -> 28 -> 14 -> 10 -> 5, fc1_in = 200
    key = jax.random.PRNGKey(0)
    k_x, k_p = jax.random.split(key)
    x = jax.random.normal(k_x, (batch, n_channels, height, width), jnp.float32)
    params = init_params(k_p, height, width, n_channels)
    kparams = prepare_kernel_params(params, height, width, n_channels)

    fwd = jax.jit(lambda xx: basic_cnn_forward(xx, kparams))
    out = jax.block_until_ready(fwd(x))
    ref = jax.block_until_ready(reference_forward(x, params))

    assert out.shape == (batch, 4251), out.shape
    assert bool(jnp.all(jnp.isfinite(out)))
    max_err = float(jnp.max(jnp.abs(out - ref)))
    # bf16 conv bands + fc weights + bf16 matmul LHS casts (intentional, per perf
    # review) -> tolerance looser than a pure-f32 kernel would need.
    assert jnp.allclose(out, ref, atol=4e-2, rtol=4e-2), max_err
    print("KERNEL_OK")
</pallas_src>

<mosaic_0001>
module attributes {stable_mosaic.version = 11 : i64} {
  func.func @_fused_cnn_kernel(%arg0: i32, %arg1: memref<8x32x32xf32, #tpu.memory_space<vmem>>, %arg2: memref<5x32x168xbf16, #tpu.memory_space<vmem>>, %arg3: memref<1x84xf32, #tpu.memory_space<vmem>>, %arg4: memref<5x84x80xbf16, #tpu.memory_space<vmem>>, %arg5: memref<1x40xf32, #tpu.memory_space<vmem>>, %arg6: memref<5x40x550xbf16, #tpu.memory_space<vmem>>, %arg7: memref<1x550xf32, #tpu.memory_space<vmem>>, %arg8: memref<550x4352xbf16, #tpu.memory_space<vmem>>, %arg9: memref<1x4352xf32, #tpu.memory_space<vmem>>, %arg10: memref<8x4352xf32, #tpu.memory_space<vmem>>, %arg11: memref<5x8x40xf32, #tpu.memory_space<vmem>>) attributes {dimension_semantics = [#tpu.dimension_semantics<parallel>], iteration_bounds = array<i64: 1>, scalar_prefetch = 0 : i64, scratch_operands = 1 : i64, tpu.core_type = #tpu.core_type<tc>, window_params = [{transform_indices = @transform_0, window_bounds = array<i64: 8, 32, 32>}, {pipeline_mode = #tpu.pipeline_mode<synchronous>, transform_indices = @transform_1, window_bounds = array<i64: 5, 32, 168>}, {pipeline_mode = #tpu.pipeline_mode<synchronous>, transform_indices = @transform_2, window_bounds = array<i64: 1, 84>}, {pipeline_mode = #tpu.pipeline_mode<synchronous>, transform_indices = @transform_3, window_bounds = array<i64: 5, 84, 80>}, {pipeline_mode = #tpu.pipeline_mode<synchronous>, transform_indices = @transform_4, window_bounds = array<i64: 1, 40>}, {pipeline_mode = #tpu.pipeline_mode<synchronous>, transform_indices = @transform_5, window_bounds = array<i64: 5, 40, 550>}, {pipeline_mode = #tpu.pipeline_mode<synchronous>, transform_indices = @transform_6, window_bounds = array<i64: 1, 550>}, {pipeline_mode = #tpu.pipeline_mode<synchronous>, transform_indices = @transform_7, window_bounds = array<i64: 550, 4352>}, {pipeline_mode = #tpu.pipeline_mode<synchronous>, transform_indices = @transform_8, window_bounds = array<i64: 1, 4352>}, {transform_indices = @transform_9, window_bounds = array<i64: 8, 4352>}]} {
    %c0_i32 = arith.constant 0 : i32
    %c8_i32 = arith.constant 8 : i32
    %0 = arith.addi %c0_i32, %c8_i32 : i32
    %c1_i32 = arith.constant 1 : i32
    scf.for %arg12 = %c0_i32 to %0 step %c1_i32  : i32 {
      %49 = arith.index_cast %arg12 : i32 to index
      %c0_41 = arith.constant 0 : index
      %c0_42 = arith.constant 0 : index
      %50 = vector.load %arg1[%49, %c0_41, %c0_42] : memref<8x32x32xf32, #tpu.memory_space<vmem>>, vector<1x32x32xf32>
      %51 = vector.shape_cast %50 : vector<1x32x32xf32> to vector<32x32xf32>
      %cst_43 = arith.constant 0.000000e+00 : f32
      %52 = vector.broadcast %cst_43 : f32 to vector<14x168xf32>
      %53 = vector.extract_strided_slice %51 {offsets = [0, 0], sizes = [14, 32], strides = [1, 1]} : vector<32x32xf32> to vector<14x32xf32>
      %54 = arith.truncf %53 : vector<14x32xf32> to vector<14x32xbf16>
      %c0_44 = arith.constant 0 : index
      %c0_45 = arith.constant 0 : index
      %c0_46 = arith.constant 0 : index
      %55 = vector.load %arg2[%c0_44, %c0_45, %c0_46] : memref<5x32x168xbf16, #tpu.memory_space<vmem>>, vector<1x32x168xbf16>
      %56 = vector.shape_cast %55 : vector<1x32x168xbf16> to vector<32x168xbf16>
      %cst_47 = arith.constant dense<0.000000e+00> : vector<14x168xf32>
      %57 = tpu.matmul %54, %56, %cst_47 {dimension_numbers = #tpu.dot_dimension_numbers<[1], [0], [0], [1], [0, 0, 1, 1], [], []>} : vector<14x32xbf16>, vector<32x168xbf16>, vector<14x168xf32> -> vector<14x168xf32>
      %58 = arith.addf %52, %57 : vector<14x168xf32>
      %59 = vector.extract_strided_slice %51 {offsets = [16, 0], sizes = [14, 32], strides = [1, 1]} : vector<32x32xf32> to vector<14x32xf32>
      %60 = arith.truncf %59 : vector<14x32xf32> to vector<14x32xbf16>
      %c1_48 = arith.constant 1 : index
      %c0_49 = arith.constant 0 : index
      %c0_50 = arith.constant 0 : index
      %61 = vector.load %arg2[%c1_48, %c0_49, %c0_50] : memref<5x32x168xbf16, #tpu.memory_space<vmem>>, vector<1x32x168xbf16>
      %62 = vector.shape_cast %61 : vector<1x32x168xbf16> to vector<32x168xbf16>
      %cst_51 = arith.constant dense<0.000000e+00> : vector<14x168xf32>
      %63 = tpu.matmul %60, %62, %cst_51 {dimension_numbers = #tpu.dot_dimension_numbers<[1], [0], [0], [1], [0, 0, 1, 1], [], []>} : vector<14x32xbf16>, vector<32x168xbf16>, vector<14x168xf32> -> vector<14x168xf32>
      %64 = arith.addf %58, %63 : vector<14x168xf32>
      %65 = vector.extract_strided_slice %51 {offsets = [1, 0], sizes = [14, 32], strides = [1, 1]} : vector<32x32xf32> to vector<14x32xf32>
      %66 = arith.truncf %65 : vector<14x32xf32> to vector<14x32xbf16>
      %c2_52 = arith.constant 2 : index
      %c0_53 = arith.constant 0 : index
      %c0_54 = arith.constant 0 : index
      %67 = vector.load %arg2[%c2_52, %c0_53, %c0_54] : memref<5x32x168xbf16, #tpu.memory_space<vmem>>, vector<1x32x168xbf16>
      %68 = vector.shape_cast %67 : vector<1x32x168xbf16> to vector<32x168xbf16>
      %cst_55 = arith.constant dense<0.000000e+00> : vector<14x168xf32>
      %69 = tpu.matmul %66, %68, %cst_55 {dimension_numbers = #tpu.dot_dimension_numbers<[1], [0], [0], [1], [0, 0, 1, 1], [], []>} : vector<14x32xbf16>, vector<32x168xbf16>, vector<14x168xf32> -> vector<14x168xf32>
      %70 = arith.addf %64, %69 : vector<14x168xf32>
      %71 = vector.extract_strided_slice %51 {offsets = [17, 0], sizes = [14, 32], strides = [1, 1]} : vector<32x32xf32> to vector<14x32xf32>
      %72 = arith.truncf %71 : vector<14x32xf32> to vector<14x32xbf16>
      %c3_56 = arith.constant 3 : index
      %c0_57 = arith.constant 0 : index
      %c0_58 = arith.constant 0 : index
      %73 = vector.load %arg2[%c3_56, %c0_57, %c0_58] : memref<5x32x168xbf16, #tpu.memory_space<vmem>>, vector<1x32x168xbf16>
      %74 = vector.shape_cast %73 : vector<1x32x168xbf16> to vector<32x168xbf16>
      %cst_59 = arith.constant dense<0.000000e+00> : vector<14x168xf32>
      %75 = tpu.matmul %72, %74, %cst_59 {dimension_numbers = #tpu.dot_dimension_numbers<[1], [0], [0], [1], [0, 0, 1, 1], [], []>} : vector<14x32xbf16>, vector<32x168xbf16>, vector<14x168xf32> -> vector<14x168xf32>
      %76 = arith.addf %70, %75 : vector<14x168xf32>
      %77 = vector.extract_strided_slice %51 {offsets = [2, 0], sizes = [14, 32], strides = [1, 1]} : vector<32x32xf32> to vector<14x32xf32>
      %78 = arith.truncf %77 : vector<14x32xf32> to vector<14x32xbf16>
      %c4_60 = arith.constant 4 : index
      %c0_61 = arith.constant 0 : index
      %c0_62 = arith.constant 0 : index
      %79 = vector.load %arg2[%c4_60, %c0_61, %c0_62] : memref<5x32x168xbf16, #tpu.memory_space<vmem>>, vector<1x32x168xbf16>
      %80 = vector.shape_cast %79 : vector<1x32x168xbf16> to vector<32x168xbf16>
      %cst_63 = arith.constant dense<0.000000e+00> : vector<14x168xf32>
      %81 = tpu.matmul %78, %80, %cst_63 {dimension_numbers = #tpu.dot_dimension_numbers<[1], [0], [0], [1], [0, 0, 1, 1], [], []>} : vector<14x32xbf16>, vector<32x168xbf16>, vector<14x168xf32> -> vector<14x168xf32>
      %82 = arith.addf %76, %81 : vector<14x168xf32>
      %83 = vector.extract_strided_slice %82 {offsets = [0, 0], sizes = [14, 84], strides = [1, 1]} : vector<14x168xf32> to vector<14x84xf32>
      %84 = vector.extract_strided_slice %82 {offsets = [0, 84], sizes = [14, 84], strides = [1, 1]} : vector<14x168xf32> to vector<14x84xf32>
      %85 = arith.maximumf %83, %84 : vector<14x84xf32>
      %c0_64 = arith.constant 0 : index
      %c0_65 = arith.constant 0 : index
      %86 = vector.load %arg3[%c0_64, %c0_65] : memref<1x84xf32, #tpu.memory_space<vmem>>, vector<1x84xf32>
      %87 = vector.broadcast %86 : vector<1x84xf32> to vector<14x84xf32>
      %88 = arith.addf %85, %87 : vector<14x84xf32>
      %cst_66 = arith.constant 0.000000e+00 : f32
      %89 = vector.broadcast %cst_66 : f32 to vector<14x84xf32>
      %90 = arith.maximumf %88, %89 : vector<14x84xf32>
      %cst_67 = arith.constant 0.000000e+00 : f32
      %91 = vector.broadcast %cst_67 : f32 to vector<14x168xf32>
      %92 = vector.extract_strided_slice %51 {offsets = [16, 0], sizes = [14, 32], strides = [1, 1]} : vector<32x32xf32> to vector<14x32xf32>
      %93 = arith.truncf %92 : vector<14x32xf32> to vector<14x32xbf16>
      %c0_68 = arith.constant 0 : index
      %c0_69 = arith.constant 0 : index
      %c0_70 = arith.constant 0 : index
      %94 = vector.load %arg2[%c0_68, %c0_69, %c0_70] : memref<5x32x168xbf16, #tpu.memory_space<vmem>>, vector<1x32x168xbf16>
      %95 = vector.shape_cast %94 : vector<1x32x168xbf16> to vector<32x168xbf16>
      %cst_71 = arith.constant dense<0.000000e+00> : vector<14x168xf32>
      %96 = tpu.matmul %93, %95, %cst_71 {dimension_numbers = #tpu.dot_dimension_numbers<[1], [0], [0], [1], [0, 0, 1, 1], [], []>} : vector<14x32xbf16>, vector<32x168xbf16>, vector<14x168xf32> -> vector<14x168xf32>
      %97 = arith.addf %91, %96 : vector<14x168xf32>
      %98 = vector.extract_strided_slice %51 {offsets = [1, 0], sizes = [14, 32], strides = [1, 1]} : vector<32x32xf32> to vector<14x32xf32>
      %99 = arith.truncf %98 : vector<14x32xf32> to vector<14x32xbf16>
      %c1_72 = arith.constant 1 : index
      %c0_73 = arith.constant 0 : index
      %c0_74 = arith.constant 0 : index
      %100 = vector.load %arg2[%c1_72, %c0_73, %c0_74] : memref<5x32x168xbf16, #tpu.memory_space<vmem>>, vector<1x32x168xbf16>
      %101 = vector.shape_cast %100 : vector<1x32x168xbf16> to vector<32x168xbf16>
      %cst_75 = arith.constant dense<0.000000e+00> : vector<14x168xf32>
      %102 = tpu.matmul %99, %101, %cst_75 {dimension_numbers = #tpu.dot_dimension_numbers<[1], [0], [0], [1], [0, 0, 1, 1], [], []>} : vector<14x32xbf16>, vector<32x168xbf16>, vector<14x168xf32> -> vector<14x168xf32>
      %103 = arith.addf %97, %102 : vector<14x168xf32>
      %104 = vector.extract_strided_slice %51 {offsets = [17, 0], sizes = [14, 32], strides = [1, 1]} : vector<32x32xf32> to vector<14x32xf32>
      %105 = arith.truncf %104 : vector<14x32xf32> to vector<14x32xbf16>
      %c2_76 = arith.constant 2 : index
      %c0_77 = arith.constant 0 : index
      %c0_78 = arith.constant 0 : index
      %106 = vector.load %arg2[%c2_76, %c0_77, %c0_78] : memref<5x32x168xbf16, #tpu.memory_space<vmem>>, vector<1x32x168xbf16>
      %107 = vector.shape_cast %106 : vector<1x32x168xbf16> to vector<32x168xbf16>
      %cst_79 = arith.constant dense<0.000000e+00> : vector<14x168xf32>
      %108 = tpu.matmul %105, %107, %cst_79 {dimension_numbers = #tpu.dot_dimension_numbers<[1], [0], [0], [1], [0, 0, 1, 1], [], []>} : vector<14x32xbf16>, vector<32x168xbf16>, vector<14x168xf32> -> vector<14x168xf32>
      %109 = arith.addf %103, %108 : vector<14x168xf32>
      %110 = vector.extract_strided_slice %51 {offsets = [2, 0], sizes = [14, 32], strides = [1, 1]} : vector<32x32xf32> to vector<14x32xf32>
      %111 = arith.truncf %110 : vector<14x32xf32> to vector<14x32xbf16>
      %c3_80 = arith.constant 3 : index
      %c0_81 = arith.constant 0 : index
      %c0_82 = arith.constant 0 : index
      %112 = vector.load %arg2[%c3_80, %c0_81, %c0_82] : memref<5x32x168xbf16, #tpu.memory_space<vmem>>, vector<1x32x168xbf16>
      %113 = vector.shape_cast %112 : vector<1x32x168xbf16> to vector<32x168xbf16>
      %cst_83 = arith.constant dense<0.000000e+00> : vector<14x168xf32>
      %114 = tpu.matmul %111, %113, %cst_83 {dimension_numbers = #tpu.dot_dimension_numbers<[1], [0], [0], [1], [0, 0, 1, 1], [], []>} : vector<14x32xbf16>, vector<32x168xbf16>, vector<14x168xf32> -> vector<14x168xf32>
      %115 = arith.addf %109, %114 : vector<14x168xf32>
      %116 = vector.extract_strided_slice %51 {offsets = [18, 0], sizes = [14, 32], strides = [1, 1]} : vector<32x32xf32> to vector<14x32xf32>
      %117 = arith.truncf %116 : vector<14x32xf32> to vector<14x32xbf16>
      %c4_84 = arith.constant 4 : index
      %c0_85 = arith.constant 0 : index
      %c0_86 = arith.constant 0 : index
      %118 = vector.load %arg2[%c4_84, %c0_85, %c0_86] : memref<5x32x168xbf16, #tpu.memory_space<vmem>>, vector<1x32x168xbf16>
      %119 = vector.shape_cast %118 : vector<1x32x168xbf16> to vector<32x168xbf16>
      %cst_87 = arith.constant dense<0.000000e+00> : vector<14x168xf32>
      %120 = tpu.matmul %117, %119, %cst_87 {dimension_numbers = #tpu.dot_dimension_numbers<[1], [0], [0], [1], [0, 0, 1, 1], [], []>} : vector<14x32xbf16>, vector<32x168xbf16>, vector<14x168xf32> -> vector<14x168xf32>
      %121 = arith.addf %115, %120 : vector<14x168xf32>
      %122 = vector.extract_strided_slice %121 {offsets = [0, 0], sizes = [14, 84], strides = [1, 1]} : vector<14x168xf32> to vector<14x84xf32>
      %123 = vector.extract_strided_slice %121 {offsets = [0, 84], sizes = [14, 84], strides = [1, 1]} : vector<14x168xf32> to vector<14x84xf32>
      %124 = arith.maximumf %122, %123 : vector<14x84xf32>
      %c0_88 = arith.constant 0 : index
      %c0_89 = arith.constant 0 : index
      %125 = vector.load %arg3[%c0_88, %c0_89] : memref<1x84xf32, #tpu.memory_space<vmem>>, vector<1x84xf32>
      %126 = vector.broadcast %125 : vector<1x84xf32> to vector<14x84xf32>
      %127 = arith.addf %124, %126 : vector<14x84xf32>
      %cst_90 = arith.constant 0.000000e+00 : f32
      %128 = vector.broadcast %cst_90 : f32 to vector<14x84xf32>
      %129 = arith.maximumf %127, %128 : vector<14x84xf32>
      %130 = arith.maximumf %90, %129 : vector<14x84xf32>
      %cst_91 = arith.constant 0.000000e+00 : f32
      %131 = vector.broadcast %cst_91 : f32 to vector<10x80xf32>
      %132 = vector.extract_strided_slice %130 {offsets = [0, 0], sizes = [10, 84], strides = [1, 1]} : vector<14x84xf32> to vector<10x84xf32>
      %133 = arith.truncf %132 : vector<10x84xf32> to vector<10x84xbf16>
      %c0_92 = arith.constant 0 : index
      %c0_93 = arith.constant 0 : index
      %c0_94 = arith.constant 0 : index
      %134 = vector.load %arg4[%c0_92, %c0_93, %c0_94] : memref<5x84x80xbf16, #tpu.memory_space<vmem>>, vector<1x84x80xbf16>
      %135 = vector.shape_cast %134 : vector<1x84x80xbf16> to vector<84x80xbf16>
      %cst_95 = arith.constant dense<0.000000e+00> : vector<10x80xf32>
      %136 = tpu.matmul %133, %135, %cst_95 {dimension_numbers = #tpu.dot_dimension_numbers<[1], [0], [0], [1], [0, 0, 1, 1], [], []>} : vector<10x84xbf16>, vector<84x80xbf16>, vector<10x80xf32> -> vector<10x80xf32>
      %137 = arith.addf %131, %136 : vector<10x80xf32>
      %138 = vector.extract_strided_slice %130 {offsets = [1, 0], sizes = [10, 84], strides = [1, 1]} : vector<14x84xf32> to vector<10x84xf32>
      %139 = arith.truncf %138 : vector<10x84xf32> to vector<10x84xbf16>
      %c1_96 = arith.constant 1 : index
      %c0_97 = arith.constant 0 : index
      %c0_98 = arith.constant 0 : index
      %140 = vector.load %arg4[%c1_96, %c0_97, %c0_98] : memref<5x84x80xbf16, #tpu.memory_space<vmem>>, vector<1x84x80xbf16>
      %141 = vector.shape_cast %140 : vector<1x84x80xbf16> to vector<84x80xbf16>
      %cst_99 = arith.constant dense<0.000000e+00> : vector<10x80xf32>
      %142 = tpu.matmul %139, %141, %cst_99 {dimension_numbers = #tpu.dot_dimension_numbers<[1], [0], [0], [1], [0, 0, 1, 1], [], []>} : vector<10x84xbf16>, vector<84x80xbf16>, vector<10x80xf32> -> vector<10x80xf32>
      %143 = arith.addf %137, %142 : vector<10x80xf32>
      %144 = vector.extract_strided_slice %130 {offsets = [2, 0], sizes = [10, 84], strides = [1, 1]} : vector<14x84xf32> to vector<10x84xf32>
      %145 = arith.truncf %144 : vector<10x84xf32> to vector<10x84xbf16>
      %c2_100 = arith.constant 2 : index
      %c0_101 = arith.constant 0 : index
      %c0_102 = arith.constant 0 : index
      %146 = vector.load %arg4[%c2_100, %c0_101, %c0_102] : memref<5x84x80xbf16, #tpu.memory_space<vmem>>, vector<1x84x80xbf16>
      %147 = vector.shape_cast %146 : vector<1x84x80xbf16> to vector<84x80xbf16>
      %cst_103 = arith.constant dense<0.000000e+00> : vector<10x80xf32>
      %148 = tpu.matmul %145, %147, %cst_103 {dimension_numbers = #tpu.dot_dimension_numbers<[1], [0], [0], [1], [0, 0, 1, 1], [], []>} : vector<10x84xbf16>, vector<84x80xbf16>, vector<10x80xf32> -> vector<10x80xf32>
      %149 = arith.addf %143, %148 : vector<10x80xf32>
      %150 = vector.extract_strided_slice %130 {offsets = [3, 0], sizes = [10, 84], strides = [1, 1]} : vector<14x84xf32> to vector<10x84xf32>
      %151 = arith.truncf %150 : vector<10x84xf32> to vector<10x84xbf16>
      %c3_104 = arith.constant 3 : index
      %c0_105 = arith.constant 0 : index
      %c0_106 = arith.constant 0 : index
      %152 = vector.load %arg4[%c3_104, %c0_105, %c0_106] : memref<5x84x80xbf16, #tpu.memory_space<vmem>>, vector<1x84x80xbf16>
      %153 = vector.shape_cast %152 : vector<1x84x80xbf16> to vector<84x80xbf16>
      %cst_107 = arith.constant dense<0.000000e+00> : vector<10x80xf32>
      %154 = tpu.matmul %151, %153, %cst_107 {dimension_numbers = #tpu.dot_dimension_numbers<[1], [0], [0], [1], [0, 0, 1, 1], [], []>} : vector<10x84xbf16>, vector<84x80xbf16>, vector<10x80xf32> -> vector<10x80xf32>
      %155 = arith.addf %149, %154 : vector<10x80xf32>
      %156 = vector.extract_strided_slice %130 {offsets = [4, 0], sizes = [10, 84], strides = [1, 1]} : vector<14x84xf32> to vector<10x84xf32>
      %157 = arith.truncf %156 : vector<10x84xf32> to vector<10x84xbf16>
      %c4_108 = arith.constant 4 : index
      %c0_109 = arith.constant 0 : index
      %c0_110 = arith.constant 0 : index
      %158 = vector.load %arg4[%c4_108, %c0_109, %c0_110] : memref<5x84x80xbf16, #tpu.memory_space<vmem>>, vector<1x84x80xbf16>
      %159 = vector.shape_cast %158 : vector<1x84x80xbf16> to vector<84x80xbf16>
      %cst_111 = arith.constant dense<0.000000e+00> : vector<10x80xf32>
      %160 = tpu.matmul %157, %159, %cst_111 {dimension_numbers = #tpu.dot_dimension_numbers<[1], [0], [0], [1], [0, 0, 1, 1], [], []>} : vector<10x84xbf16>, vector<84x80xbf16>, vector<10x80xf32> -> vector<10x80xf32>
      %161 = arith.addf %155, %160 : vector<10x80xf32>
      %162 = vector.extract_strided_slice %161 {offsets = [0, 0], sizes = [10, 40], strides = [1, 1]} : vector<10x80xf32> to vector<10x40xf32>
      %163 = vector.extract_strided_slice %161 {offsets = [0, 40], sizes = [10, 40], strides = [1, 1]} : vector<10x80xf32> to vector<10x40xf32>
      %164 = arith.maximumf %162, %163 : vector<10x40xf32>
      %c0_112 = arith.constant 0 : index
      %c0_113 = arith.constant 0 : index
      %165 = vector.load %arg5[%c0_112, %c0_113] : memref<1x40xf32, #tpu.memory_space<vmem>>, vector<1x40xf32>
      %166 = vector.broadcast %165 : vector<1x40xf32> to vector<10x40xf32>
      %167 = arith.addf %164, %166 : vector<10x40xf32>
      %cst_114 = arith.constant 0.000000e+00 : f32
      %168 = vector.broadcast %cst_114 : f32 to vector<10x40xf32>
      %169 = arith.maximumf %167, %168 : vector<10x40xf32>
      %170 = vector.extract_strided_slice %169 {offsets = [0, 0], sizes = [1, 40], strides = [1, 1]} : vector<10x40xf32> to vector<1x40xf32>
      %171 = vector.extract_strided_slice %169 {offsets = [1, 0], sizes = [1, 40], strides = [1, 1]} : vector<10x40xf32> to vector<1x40xf32>
      %172 = arith.maximumf %170, %171 : vector<1x40xf32>
      %c0_115 = arith.constant 0 : index
      %173 = arith.index_cast %arg12 : i32 to index
      %c0_116 = arith.constant 0 : index
      %174 = vector.load %arg11[%c0_115, %173, %c0_116] : memref<5x8x40xf32, #tpu.memory_space<vmem>>, vector<1x1x40xf32>
      %175 = vector.shape_cast %174 : vector<1x1x40xf32> to vector<1x40xf32>
      %176 = vector.shape_cast %172 : vector<1x40xf32> to vector<1x1x40xf32>
      tpu.vector_store %arg11[%c0_115, %173, %c0_116], %176 {strides = array<i32>} : memref<5x8x40xf32, #tpu.memory_space<vmem>>, vector<1x1x40xf32>,
      %177 = vector.extract_strided_slice %169 {offsets = [2, 0], sizes = [1, 40], strides = [1, 1]} : vector<10x40xf32> to vector<1x40xf32>
      %178 = vector.extract_strided_slice %169 {offsets = [3, 0], sizes = [1, 40], strides = [1, 1]} : vector<10x40xf32> to vector<1x40xf32>
      %179 = arith.maximumf %177, %178 : vector<1x40xf32>
      %c1_117 = arith.constant 1 : index
      %180 = arith.index_cast %arg12 : i32 to index
      %c0_118 = arith.constant 0 : index
      %181 = vector.load %arg11[%c1_117, %180, %c0_118] : memref<5x8x40xf32, #tpu.memory_space<vmem>>, vector<1x1x40xf32>
      %182 = vector.shape_cast %181 : vector<1x1x40xf32> to vector<1x40xf32>
      %183 = vector.shape_cast %179 : vector<1x40xf32> to vector<1x1x40xf32>
      tpu.vector_store %arg11[%c1_117, %180, %c0_118], %183 {strides = array<i32>} : memref<5x8x40xf32, #tpu.memory_space<vmem>>, vector<1x1x40xf32>,
      %184 = vector.extract_strided_slice %169 {offsets = [4, 0], sizes = [1, 40], strides = [1, 1]} : vector<10x40xf32> to vector<1x40xf32>
      %185 = vector.extract_strided_slice %169 {offsets = [5, 0], sizes = [1, 40], strides = [1, 1]} : vector<10x40xf32> to vector<1x40xf32>
      %186 = arith.maximumf %184, %185 : vector<1x40xf32>
      %c2_119 = arith.constant 2 : index
      %187 = arith.index_cast %arg12 : i32 to index
      %c0_120 = arith.constant 0 : index
      %188 = vector.load %arg11[%c2_119, %187, %c0_120] : memref<5x8x40xf32, #tpu.memory_space<vmem>>, vector<1x1x40xf32>
      %189 = vector.shape_cast %188 : vector<1x1x40xf32> to vector<1x40xf32>
      %190 = vector.shape_cast %186 : vector<1x40xf32> to vector<1x1x40xf32>
      tpu.vector_store %arg11[%c2_119, %187, %c0_120], %190 {strides = array<i32>} : memref<5x8x40xf32, #tpu.memory_space<vmem>>, vector<1x1x40xf32>,
      %191 = vector.extract_strided_slice %169 {offsets = [6, 0], sizes = [1, 40], strides = [1, 1]} : vector<10x40xf32> to vector<1x40xf32>
      %192 = vector.extract_strided_slice %169 {offsets = [7, 0], sizes = [1, 40], strides = [1, 1]} : vector<10x40xf32> to vector<1x40xf32>
      %193 = arith.maximumf %191, %192 : vector<1x40xf32>
      %c3_121 = arith.constant 3 : index
      %194 = arith.index_cast %arg12 : i32 to index
      %c0_122 = arith.constant 0 : index
      %195 = vector.load %arg11[%c3_121, %194, %c0_122] : memref<5x8x40xf32, #tpu.memory_space<vmem>>, vector<1x1x40xf32>
      %196 = vector.shape_cast %195 : vector<1x1x40xf32> to vector<1x40xf32>
      %197 = vector.shape_cast %193 : vector<1x40xf32> to vector<1x1x40xf32>
      tpu.vector_store %arg11[%c3_121, %194, %c0_122], %197 {strides = array<i32>} : memref<5x8x40xf32, #tpu.memory_space<vmem>>, vector<1x1x40xf32>,
      %198 = vector.extract_strided_slice %169 {offsets = [8, 0], sizes = [1, 40], strides = [1, 1]} : vector<10x40xf32> to vector<1x40xf32>
      %199 = vector.extract_strided_slice %169 {offsets = [9, 0], sizes = [1, 40], strides = [1, 1]} : vector<10x40xf32> to vector<1x40xf32>
      %200 = arith.maximumf %198, %199 : vector<1x40xf32>
      %c4_123 = arith.constant 4 : index
      %201 = arith.index_cast %arg12 : i32 to index
      %c0_124 = arith.constant 0 : index
      %202 = vector.load %arg11[%c4_123, %201, %c0_124] : memref<5x8x40xf32, #tpu.memory_space<vmem>>, vector<1x1x40xf32>
      %203 = vector.shape_cast %202 : vector<1x1x40xf32> to vector<1x40xf32>
      %204 = vector.shape_cast %200 : vector<1x40xf32> to vector<1x1x40xf32>
      tpu.vector_store %arg11[%c4_123, %201, %c0_124], %204 {strides = array<i32>} : memref<5x8x40xf32, #tpu.memory_space<vmem>>, vector<1x1x40xf32>,
    }
    %c8_i32_0 = arith.constant 8 : i32
    %cst = arith.constant 0.000000e+00 : f32
    %1 = vector.broadcast %cst : f32 to vector<8x550xf32>
    %c0 = arith.constant 0 : index
    %c0_1 = arith.constant 0 : index
    %c0_2 = arith.constant 0 : index
    %2 = vector.load %arg11[%c0, %c0_1, %c0_2] : memref<5x8x40xf32, #tpu.memory_space<vmem>>, vector<1x8x40xf32>
    %3 = vector.shape_cast %2 : vector<1x8x40xf32> to vector<8x40xf32>
    %4 = arith.truncf %3 : vector<8x40xf32> to vector<8x40xbf16>
    %c0_3 = arith.constant 0 : index
    %c0_4 = arith.constant 0 : index
    %c0_5 = arith.constant 0 : index
    %5 = vector.load %arg6[%c0_3, %c0_4, %c0_5] : memref<5x40x550xbf16, #tpu.memory_space<vmem>>, vector<1x40x550xbf16>
    %6 = vector.shape_cast %5 : vector<1x40x550xbf16> to vector<40x550xbf16>
    %cst_6 = arith.constant dense<0.000000e+00> : vector<8x550xf32>
    %7 = tpu.matmul %4, %6, %cst_6 {dimension_numbers = #tpu.dot_dimension_numbers<[1], [0], [0], [1], [0, 0, 1, 1], [], []>} : vector<8x40xbf16>, vector<40x550xbf16>, vector<8x550xf32> -> vector<8x550xf32>
    %8 = arith.addf %1, %7 : vector<8x550xf32>
    %c1 = arith.constant 1 : index
    %c0_7 = arith.constant 0 : index
    %c0_8 = arith.constant 0 : index
    %9 = vector.load %arg11[%c1, %c0_7, %c0_8] : memref<5x8x40xf32, #tpu.memory_space<vmem>>, vector<1x8x40xf32>
    %10 = vector.shape_cast %9 : vector<1x8x40xf32> to vector<8x40xf32>
    %11 = arith.truncf %10 : vector<8x40xf32> to vector<8x40xbf16>
    %c1_9 = arith.constant 1 : index
    %c0_10 = arith.constant 0 : index
    %c0_11 = arith.constant 0 : index
    %12 = vector.load %arg6[%c1_9, %c0_10, %c0_11] : memref<5x40x550xbf16, #tpu.memory_space<vmem>>, vector<1x40x550xbf16>
    %13 = vector.shape_cast %12 : vector<1x40x550xbf16> to vector<40x550xbf16>
    %cst_12 = arith.constant dense<0.000000e+00> : vector<8x550xf32>
    %14 = tpu.matmul %11, %13, %cst_12 {dimension_numbers = #tpu.dot_dimension_numbers<[1], [0], [0], [1], [0, 0, 1, 1], [], []>} : vector<8x40xbf16>, vector<40x550xbf16>, vector<8x550xf32> -> vector<8x550xf32>
    %15 = arith.addf %8, %14 : vector<8x550xf32>
    %c2 = arith.constant 2 : index
    %c0_13 = arith.constant 0 : index
    %c0_14 = arith.constant 0 : index
    %16 = vector.load %arg11[%c2, %c0_13, %c0_14] : memref<5x8x40xf32, #tpu.memory_space<vmem>>, vector<1x8x40xf32>
    %17 = vector.shape_cast %16 : vector<1x8x40xf32> to vector<8x40xf32>
    %18 = arith.truncf %17 : vector<8x40xf32> to vector<8x40xbf16>
    %c2_15 = arith.constant 2 : index
    %c0_16 = arith.constant 0 : index
    %c0_17 = arith.constant 0 : index
    %19 = vector.load %arg6[%c2_15, %c0_16, %c0_17] : memref<5x40x550xbf16, #tpu.memory_space<vmem>>, vector<1x40x550xbf16>
    %20 = vector.shape_cast %19 : vector<1x40x550xbf16> to vector<40x550xbf16>
    %cst_18 = arith.constant dense<0.000000e+00> : vector<8x550xf32>
    %21 = tpu.matmul %18, %20, %cst_18 {dimension_numbers = #tpu.dot_dimension_numbers<[1], [0], [0], [1], [0, 0, 1, 1], [], []>} : vector<8x40xbf16>, vector<40x550xbf16>, vector<8x550xf32> -> vector<8x550xf32>
    %22 = arith.addf %15, %21 : vector<8x550xf32>
    %c3 = arith.constant 3 : index
    %c0_19 = arith.constant 0 : index
    %c0_20 = arith.constant 0 : index
    %23 = vector.load %arg11[%c3, %c0_19, %c0_20] : memref<5x8x40xf32, #tpu.memory_space<vmem>>, vector<1x8x40xf32>
    %24 = vector.shape_cast %23 : vector<1x8x40xf32> to vector<8x40xf32>
    %25 = arith.truncf %24 : vector<8x40xf32> to vector<8x40xbf16>
    %c3_21 = arith.constant 3 : index
    %c0_22 = arith.constant 0 : index
    %c0_23 = arith.constant 0 : index
    %26 = vector.load %arg6[%c3_21, %c0_22, %c0_23] : memref<5x40x550xbf16, #tpu.memory_space<vmem>>, vector<1x40x550xbf16>
    %27 = vector.shape_cast %26 : vector<1x40x550xbf16> to vector<40x550xbf16>
    %cst_24 = arith.constant dense<0.000000e+00> : vector<8x550xf32>
    %28 = tpu.matmul %25, %27, %cst_24 {dimension_numbers = #tpu.dot_dimension_numbers<[1], [0], [0], [1], [0, 0, 1, 1], [], []>} : vector<8x40xbf16>, vector<40x550xbf16>, vector<8x550xf32> -> vector<8x550xf32>
    %29 = arith.addf %22, %28 : vector<8x550xf32>
    %c4 = arith.constant 4 : index
    %c0_25 = arith.constant 0 : index
    %c0_26 = arith.constant 0 : index
    %30 = vector.load %arg11[%c4, %c0_25, %c0_26] : memref<5x8x40xf32, #tpu.memory_space<vmem>>, vector<1x8x40xf32>
    %31 = vector.shape_cast %30 : vector<1x8x40xf32> to vector<8x40xf32>
    %32 = arith.truncf %31 : vector<8x40xf32> to vector<8x40xbf16>
    %c4_27 = arith.constant 4 : index
    %c0_28 = arith.constant 0 : index
    %c0_29 = arith.constant 0 : index
    %33 = vector.load %arg6[%c4_27, %c0_28, %c0_29] : memref<5x40x550xbf16, #tpu.memory_space<vmem>>, vector<1x40x550xbf16>
    %34 = vector.shape_cast %33 : vector<1x40x550xbf16> to vector<40x550xbf16>
    %cst_30 = arith.constant dense<0.000000e+00> : vector<8x550xf32>
    %35 = tpu.matmul %32, %34, %cst_30 {dimension_numbers = #tpu.dot_dimension_numbers<[1], [0], [0], [1], [0, 0, 1, 1], [], []>} : vector<8x40xbf16>, vector<40x550xbf16>, vector<8x550xf32> -> vector<8x550xf32>
    %36 = arith.addf %29, %35 : vector<8x550xf32>
    %c0_31 = arith.constant 0 : index
    %c0_32 = arith.constant 0 : index
    %37 = vector.load %arg7[%c0_31, %c0_32] : memref<1x550xf32, #tpu.memory_space<vmem>>, vector<1x550xf32>
    %38 = vector.broadcast %37 : vector<1x550xf32> to vector<8x550xf32>
    %39 = arith.addf %36, %38 : vector<8x550xf32>
    %cst_33 = arith.constant 0.000000e+00 : f32
    %40 = vector.broadcast %cst_33 : f32 to vector<8x550xf32>
    %41 = arith.maximumf %39, %40 : vector<8x550xf32>
    %42 = arith.truncf %41 : vector<8x550xf32> to vector<8x550xbf16>
    %c0_34 = arith.constant 0 : index
    %c0_35 = arith.constant 0 : index
    %43 = vector.load %arg8[%c0_34, %c0_35] : memref<550x4352xbf16, #tpu.memory_space<vmem>>, vector<550x4352xbf16>
    %cst_36 = arith.constant dense<0.000000e+00> : vector<8x4352xf32>
    %44 = tpu.matmul %42, %43, %cst_36 {dimension_numbers = #tpu.dot_dimension_numbers<[1], [0], [0], [1], [0, 0, 1, 1], [], []>} : vector<8x550xbf16>, vector<550x4352xbf16>, vector<8x4352xf32> -> vector<8x4352xf32>
    %c0_37 = arith.constant 0 : index
    %c0_38 = arith.constant 0 : index
    %45 = vector.load %arg9[%c0_37, %c0_38] : memref<1x4352xf32, #tpu.memory_space<vmem>>, vector<1x4352xf32>
    %46 = vector.broadcast %45 : vector<1x4352xf32> to vector<8x4352xf32>
    %47 = arith.addf %44, %46 : vector<8x4352xf32>
    %c0_39 = arith.constant 0 : index
    %c0_40 = arith.constant 0 : index
    %48 = vector.load %arg10[%c0_39, %c0_40] : memref<8x4352xf32, #tpu.memory_space<vmem>>, vector<8x4352xf32>
    tpu.vector_store %arg10[%c0_39, %c0_40], %47 {strides = array<i32>} : memref<8x4352xf32, #tpu.memory_space<vmem>>, vector<8x4352xf32>,
    return
  }
  func.func @transform_0(%arg0: i32) -> (i32, i32, i32) {
    %c0_i32 = arith.constant 0 : i32
    %c0_i32_0 = arith.constant 0 : i32
    %c0_i32_1 = arith.constant 0 : i32
    return %arg0, %c0_i32, %c0_i32_0 : i32, i32, i32
  }
  func.func @transform_1(%arg0: i32) -> (i32, i32, i32) {
    %c0_i32 = arith.constant 0 : i32
    %c0_i32_0 = arith.constant 0 : i32
    %c0_i32_1 = arith.constant 0 : i32
    %c0_i32_2 = arith.constant 0 : i32
    return %c0_i32, %c0_i32_0, %c0_i32_1 : i32, i32, i32
  }
  func.func @transform_2(%arg0: i32) -> (i32, i32) {
    %c0_i32 = arith.constant 0 : i32
    %c0_i32_0 = arith.constant 0 : i32
    %c0_i32_1 = arith.constant 0 : i32
    return %c0_i32, %c0_i32_0 : i32, i32
  }
  func.func @transform_3(%arg0: i32) -> (i32, i32, i32) {
    %c0_i32 = arith.constant 0 : i32
    %c0_i32_0 = arith.constant 0 : i32
    %c0_i32_1 = arith.constant 0 : i32
    %c0_i32_2 = arith.constant 0 : i32
    return %c0_i32, %c0_i32_0, %c0_i32_1 : i32, i32, i32
  }
  func.func @transform_4(%arg0: i32) -> (i32, i32) {
    %c0_i32 = arith.constant 0 : i32
    %c0_i32_0 = arith.constant 0 : i32
    %c0_i32_1 = arith.constant 0 : i32
    return %c0_i32, %c0_i32_0 : i32, i32
  }
  func.func @transform_5(%arg0: i32) -> (i32, i32, i32) {
    %c0_i32 = arith.constant 0 : i32
    %c0_i32_0 = arith.constant 0 : i32
    %c0_i32_1 = arith.constant 0 : i32
    %c0_i32_2 = arith.constant 0 : i32
    return %c0_i32, %c0_i32_0, %c0_i32_1 : i32, i32, i32
  }
  func.func @transform_6(%arg0: i32) -> (i32, i32) {
    %c0_i32 = arith.constant 0 : i32
    %c0_i32_0 = arith.constant 0 : i32
    %c0_i32_1 = arith.constant 0 : i32
    return %c0_i32, %c0_i32_0 : i32, i32
  }
  func.func @transform_7(%arg0: i32) -> (i32, i32) {
    %c0_i32 = arith.constant 0 : i32
    %c0_i32_0 = arith.constant 0 : i32
    %c0_i32_1 = arith.constant 0 : i32
    return %c0_i32, %c0_i32_0 : i32, i32
  }
  func.func @transform_8(%arg0: i32) -> (i32, i32) {
    %c0_i32 = arith.constant 0 : i32
    %c0_i32_0 = arith.constant 0 : i32
    %c0_i32_1 = arith.constant 0 : i32
    return %c0_i32, %c0_i32_0 : i32, i32
  }
  func.func @transform_9(%arg0: i32) -> (i32, i32) {
    %c0_i32 = arith.constant 0 : i32
    %c0_i32_0 = arith.constant 0 : i32
    return %arg0, %c0_i32 : i32, i32
  }
}

</mosaic_0001>

<bundles_post_ra>
// kernel: _lambda_.1
= control target key start
LH: loop header
LB: loop body
LE: loop exit
PB: predicated region body
PF: predicated region fallthrough
CT: control target
= control target key end

     0   :  { %14 = vsyncpa [#allocation4], 0  ;;  %s19037_s0 = inlined_call_operand.vmem [shape: f32[8,32,32], index: 0, kind: input, shape index: {}]   ;;  %s19038_s1 = inlined_call_operand.hbm [shape: bf16[5,32,168], index: 1, kind: input, shape index: {}]   ;;  %s19039_s2 = inlined_call_operand.hbm [shape: f32[1,84], index: 2, kind: input, shape index: {}]   ;;  %s19040_s3 = inlined_call_operand.hbm [shape: bf16[5,84,80], index: 3, kind: input, shape index: {}]   ;;  %s19041_s4 = inlined_call_operand.hbm [shape: f32[1,40], index: 4, kind: input, shape index: {}]   ;;  %s19042_s5 = inlined_call_operand.hbm [shape: bf16[5,40,550], index: 5, kind: input, shape index: {}]   ;;  %s19043_s6 = inlined_call_operand.hbm [shape: f32[1,550], index: 6, kind: input, shape index: {}]   ;;  %s19044_s7 = inlined_call_operand.hbm [shape: bf16[550,4352], index: 7, kind: input, shape index: {}]   ;;  %s19045_s8 = inlined_call_operand.hbm [shape: f32[1,4352], index: 8, kind: input, shape index: {}]   ;;  %s19046_s9 = inlined_call_operand.vmem [shape: f32[8,4352], index: 9, kind: output, shape index: {}]  }
   0x1   :  { %15 = vsyncpa [#allocation6], 0 }
   0x2   :  { %16 = vsyncpa [#allocation9], 0 }
   0x3   :  { %17 = vsyncpa [#allocation12], 0  ;;  %s39_s11 = sshll.u32 %s19039_s2, 4  ;;  %s40_s11 = int_to_ptr.hbm [resolvable:$true] %s39_s11 }
   0x4   :  { %18 = vsyncpa [#allocation15], 0  ;;  %s18022_s12 = smov [#allocation5]   ;;  %s63_s16 = sshll.u32 %s19041_s4, 4  ;;  %s64_s16 = int_to_ptr.hbm [resolvable:$true] %s63_s16 }
   0x5   :  { %s41_s13 = sshll.u32 %s18022_s12, 4  ;;  %s18023_s17 = smov [#allocation8]   ;;  %s42_s13 = int_to_ptr.vmem [resolvable:$true] %s41_s13 }
   0x6   :  { %44 = dma.hbm_to_vmem [thread:$0]  %s40_s11, 16, %s42_s13, [#allocation6]  }
   0x7   :  { %s65_s18 = sshll.u32 %s18023_s17, 4  ;;  %s87_s21 = sshll.u32 %s19043_s6, 4  ;;  %s66_s18 = int_to_ptr.vmem [resolvable:$true] %s65_s18  ;;  %s88_s21 = int_to_ptr.hbm [resolvable:$true] %s87_s21 }
   0x8   :  { %68 = dma.hbm_to_vmem [thread:$0]  %s64_s16, 16, %s66_s18, [#allocation9]  }
   0x9   :  { %s25_s23 = sshll.u32 %s19038_s1, 4  ;;  %s18024_s24 = smov [#allocation11]   ;;  %s26_s23 = int_to_ptr.hbm [resolvable:$true] %s25_s23 }
   0xa   :  { %s89_s25 = sshll.u32 %s18024_s24, 4  ;;  %s18025_s4 = smov [#allocation3]   ;;  %s90_s25 = int_to_ptr.vmem [resolvable:$true] %s89_s25 }
   0xb   :  { %92 = dma.hbm_to_vmem [thread:$0]  %s88_s21, 80, %s90_s25, [#allocation12]  }
   0xc   :  { %s27_s26 = sshll.u32 %s18025_s4, 4  ;;  %s18026_s27 = smov 128   ;;  %s28_s26 = int_to_ptr.vmem [resolvable:$true] %s27_s26 }
   0xd   :  { %s18027_s28 = smov 8   ;;  %s49_s30 = sshll.u32 %s19040_s3, 4  ;;  %s50_s30 = int_to_ptr.hbm [resolvable:$true] %s49_s30 }
   0xe   :  { %33 = dma.hbm_to_vmem [thread:$0]  %s26_s23, 2560, %s28_s26, [#allocation4], %s18026_s27, %s18026_s27, %s18027_s28  }
   0xf   :  { %s18028_s10 = smov [#allocation7]   ;;  %s73_s13 = sshll.u32 %s19042_s5, 4  ;;  %s74_s13 = int_to_ptr.hbm [resolvable:$true] %s73_s13 }
  0x10   :  { %s51_s11 = sshll.u32 %s18028_s10, 4  ;;  %s18029_s14 = smov 64   ;;  %s52_s11 = int_to_ptr.vmem [resolvable:$true] %s51_s11 }
  0x11   :  { %s18030_s15 = smov 4   ;;  %s18031_s16 = smov [#allocation10]  }
  0x12   :  { %57 = dma.hbm_to_vmem [thread:$0]  %s50_s30, 3520, %s52_s11, [#allocation6], %s18029_s14, %s18029_s14, %s18030_s15  }
  0x13   :  { %s75_s17 = sshll.u32 %s18031_s16, 4  ;;  %s18032_s18 = smov 320   ;;  %s76_s17 = int_to_ptr.vmem [resolvable:$true] %s75_s17 }
  0x14   :  { %s18033_s19 = smov 20   ;;  %s97_s21 = sshll.u32 %s19044_s7, 4  ;;  %s98_s21 = int_to_ptr.hbm [resolvable:$true] %s97_s21 }
  0x15   :  { %81 = dma.hbm_to_vmem [thread:$0]  %s74_s13, 8000, %s76_s17, [#allocation9], %s18032_s18, %s18032_s18, %s18033_s19  }
  0x16   :  { %s18034_s2 = smov [#allocation13]   ;;  %s111_s24 = sshll.u32 %s19045_s8, 4  ;;  %s112_s24 = int_to_ptr.hbm [resolvable:$true] %s111_s24 }
  0x17   :  { %s99_s22 = sshll.u32 %s18034_s2, 4  ;;  %s18035_s25 = smov 2176   ;;  %s100_s22 = int_to_ptr.vmem [resolvable:$true] %s99_s22 }
  0x18   :  { %s18036_s4 = smov 136   ;;  %s18037_s26 = smov [#allocation14]  }
  0x19   :  { %105 = dma.hbm_to_vmem [thread:$0]  %s98_s21, 150144, %s100_s22, [#allocation12], %s18035_s25, %s18035_s25, %s18036_s4  }
  0x1a   :  { %s113_s27 = sshll.u32 %s18037_s26, 4  ;;  %s114_s27 = int_to_ptr.vmem [resolvable:$true] %s113_s27 }
  0x1b   :  { %116 = dma.hbm_to_vmem [thread:$0]  %s112_s24, 544, %s114_s27, [#allocation15]  }
  0x1c   :  { %18008 = dma.done.wait [#allocation4], 2560  }
  0x1d   :  { %18009 = vsyncadd [#allocation4], 4294964736 }
  0x1e   :  { %18010 = dma.done.wait [#allocation6], 3536  }
  0x1f   :  { %18011 = vsyncadd [#allocation6], 4294963760 }
  0x20   :  { %18012 = dma.done.wait [#allocation9], 8016  }
  0x21   :  { %18013 = vsyncadd [#allocation9], 4294959280 }
  0x22   :  { %18014 = dma.done.wait [#allocation12], 150224  }
  0x23   :  { %18015 = vsyncadd [#allocation12], 4294817072 }
  0x24   :  { %18016 = dma.done.wait [#allocation15], 544  }
  0x25   :  { %18017 = vsyncadd [#allocation15], 4294966752  ;;  %s18114_s7 = smov 0  }
  0x26 LB: > { %v11447_v0 = vld [vmem:[#allocation3 + $0x30] sm:$0xf]  ;;  %v16536_v1 = vld [vmem:[#allocation3 + $0x34] sm:$0xf0]  ;;  %v11439_v5 = vld [vmem:[#allocation3 + $0x20] sm:$0xf]  ;;  %s18020_s7 = sphi %s18114_s7, %s155_s7  }
  0x27   : > { %v11465_v2 = vld [vmem:[#allocation3 + $0x10] sm:$0xf]  ;;  %v18119_v3 = vor.u32 %v16536_v1, %v11447_v0  ;;  %v16532_v4 = vld [vmem:[#allocation3 + $0x14] sm:$0xf0]  ;;  %v16534_v6 = vld [vmem:[#allocation3 + $0x24] sm:$0xf0] }
  0x28   : > { %v18121_v7 = vor.u32 %v16532_v4, %v11465_v2  ;;  %v11457_v8 = vld [vmem:[#allocation3] sm:$0xf]  ;;  %v16530_v9 = vld [vmem:[#allocation3 + $0x4] sm:$0xf0]  ;;  %v16531_v10 = vld [vmem:[#allocation3 + $0x14] sm:$0xf]  ;;  %v18124_v11 = vor.u32 %v16534_v6, %v11439_v5 }
  0x29   : > { %203 = vmatpush.bf16.msra.mxu1 %v18119_v3  ;;  %v11467_v12 = vld [vmem:[#allocation3 + $0x18] sm:$0xf0]  ;;  %s11436_s8 = sshll.u32 %s18020_s7, 5  ;;  %v16535_v13 = vld [vmem:[#allocation3 + $0x34] sm:$0xf]  ;;  %v18128_v14 = vor.u32 %v16530_v9, %v11457_v8  ;;  %vm193_vm0 = vcmask 261120  }
  0x2a   : > { %254 = vmatpush.bf16.msra.mxu2 %v18121_v7  ;;  %v18130_v15 = vor.u32 %v16531_v10, %v11467_v12  ;;  %s157_s6 = scalar_lea.vmem %s19037_s0, %s11436_s8  ;;  %v11449_v16 = vld [vmem:[#allocation3 + $0x38] sm:$0xf0]  ;;  %v16529_v17 = vld [vmem:[#allocation3 + $0x4] sm:$0xf]  ;;  %v11459_v18 = vld [vmem:[#allocation3 + $0x8] sm:$0xf0] }
  0x2b   : > { %v160_v19 = vld [vmem:[%s157_s6 + $0x10] sm:$0xff]  ;;  %v161_v20 = vld [vmem:[%s157_s6 + $0x18] sm:$0xff]  ;;  %v18135_v21 = vor.u32 %v16535_v13, %v11449_v16  ;;  %v158_v22 = vld [vmem:[%s157_s6] sm:$0xff]  ;;  %v18140_v25 = vor.u32 %v16529_v17, %v11459_v18  ;;  %s18038_s30 = smov 44   ;;  %vm746_vm1 = vcmask 1041408   ;;  %vm482_vm2 = vcmask 359424  }
  0x2c   : > { %268 = vmatpush.bf16.msra.mxu3 %v18130_v15  ;;  %v18138_v23 = vpack.c.bf16 %v161_v20, %v160_v19  ;;  %v159_v24 = vld [vmem:[%s157_s6 + $0x8] sm:$0xff]  ;;  %v11483_v26 = vld [vmem:[#allocation3 + $0x50] sm:$0xf]  ;;  %v16540_v27 = vld [vmem:[#allocation3 + $0x54] sm:$0xf0]  ;;  %vm742_vm3 = vcmask 687104  }
  0x2d   : > { %204 = vmatpush.bf16.msra.mxu1 %v18124_v11  ;;  %v18143_v28 = vpack.c.bf16 %v159_v24, %v158_v22  ;;  %v18145_v29 = vor.u32 %v16540_v27, %v11483_v26  ;;  %v11475_v30 = vld [vmem:[#allocation3 + $0x40] sm:$0xf]  ;;  %v16538_v31 = vld [vmem:[#allocation3 + $0x44] sm:$0xf0]  ;;  %v16533_v32 = vld [vmem:[#allocation3 + $0x24] sm:$0xf] }
  0x2e   : > { %255 = vmatpush.bf16.msra.mxu2 %v18128_v14  ;;  %v18149_v33 = vor.u32 %v16538_v31, %v11475_v30  ;;  %v11441_v34 = vld [vmem:[#allocation3 + $0x28] sm:$0xf0]  ;;  %v11501_v35 = vld [vmem:[#allocation3 + $0x70] sm:$0xf]  ;;  %v16544_v36 = vld [vmem:[#allocation3 + $0x74] sm:$0xf0] }
  0x2f   : > { %316 = vmatpush.bf16.msra.mxu0 %v18145_v29  ;;  %v11444_v37 = vor.u32 %v16533_v32, %v11441_v34  ;;  %v281_v38 = vshrl.u32 %v18143_v28, 16  ;;  %v283_v39 = vshll.u32 %v18143_v28, 16  ;;  %v18154_v40 = vor.u32 %v16544_v36, %v11501_v35  ;;  %v16543_v41 = vld [vmem:[#allocation3 + $0x74] sm:$0xf]  ;;  %v11503_v42 = vld [vmem:[#allocation3 + $0x78] sm:$0xf0] }
  0x30   : > { %11453 = vmatmul.msk.bf16.vlgmr.msra.gmra.mxu1 %vm193_vm0, %v18138_v23  ;;  %269 = vmatpush.bf16.msra.mxu3 %v18140_v25  ;;  %v18159_v43 = vor.u32 %v16543_v41, %v11503_v42  ;;  %v11493_v44 = vld [vmem:[#allocation3 + $0x60] sm:$0xf]  ;;  %v16542_v45 = vld [vmem:[#allocation3 + $0x64] sm:$0xf0]  ;;  %v16539_v46 = vld [vmem:[#allocation3 + $0x54] sm:$0xf] }
  0x31   : > { %217 = vmatpush.bf16.msrb.mxu1 %v18135_v21  ;;  %11471 = vmatmul.msk.bf16.vlgmr.msra.gmra.mxu2 %vm193_vm0, %v18143_v28  ;;  %v285_v47 = vrot.slane %v283_v39, 1  ;;  %v11485_v48 = vld [vmem:[#allocation3 + $0x58] sm:$0xf0]  ;;  %v11494_v49 = vor.u32 %v16542_v45, %v11493_v44  ;;  %v16541_v51 = vld [vmem:[#allocation3 + $0x64] sm:$0xf]  ;;  %v349_v62 = vshll.u32 %v18138_v23, 16 }
  0x32   : > { %382 = vmatpush.bf16.msrb.mxu2 %v18154_v40  ;;  %v11488_v50 = vor.u32 %v16539_v46, %v11485_v48  ;;  %v11495_v52 = vld [vmem:[#allocation3 + $0x68] sm:$0xf0]  ;;  %v11519_v53 = vld [vmem:[#allocation3 + $0x90] sm:$0xf]  ;;  %v16548_v55 = vld [vmem:[#allocation3 + $0x94] sm:$0xf0] }
  0x33   : > { %11472 = vmatmul.msk.bf16.vlgmr.msra.gmra.mxu3 %vm193_vm0, %v18143_v28  ;;  %317 = vmatpush.bf16.msra.mxu0 %v18149_v33  ;;  %v286_v54 = vor.u32 %v285_v47, %v281_v38  ;;  %v11511_v56 = vld [vmem:[#allocation3 + $0x80] sm:$0xf]  ;;  %v11498_v57 = vor.u32 %v16541_v51, %v11495_v52  ;;  %v11520_v58 = vor.u32 %v16548_v55, %v11519_v53  ;;  %v16546_v59 = vld [vmem:[#allocation3 + $0x84] sm:$0xf0]  ;;  %v16537_v60 = vld [vmem:[#allocation3 + $0x44] sm:$0xf] }
  0x34   : > { %396 = vmatpush.bf16.msrb.mxu3 %v18159_v43  ;;  %v11477_v61 = vld [vmem:[#allocation3 + $0x48] sm:$0xf0]  ;;  %v11512_v0 = vor.u32 %v16546_v59, %v11511_v56  ;;  %v347_v1 = vshrl.u32 %v18138_v23, 16  ;;  %v351_v2 = vrot.slane %v349_v62, 1  ;;  %v16547_v4 = vld [vmem:[#allocation3 + $0x94] sm:$0xf] }
  0x35   : > { %218 = vmatpush.bf16.msrb.mxu1 %v11444_v37  ;;  %v11480_v63 = vor.u32 %v16537_v60, %v11477_v61  ;;  %v11521_v5 = vld [vmem:[#allocation3 + $0x98] sm:$0xf0]  ;;  %v16545_v9 = vld [vmem:[#allocation3 + $0x84] sm:$0xf]  ;;  %v11513_v10 = vld [vmem:[#allocation3 + $0x88] sm:$0xf0] }
  0x36   : > { %11489 = vmatmul.msk.bf16.vlgmr.msra.gmra.mxu0 %vm193_vm0, %v286_v54  ;;  %383 = vmatpush.bf16.msrb.mxu2 %v11494_v49  ;;  %v352_v6 = vor.u32 %v351_v2, %v347_v1  ;;  %v11524_v8 = vor.u32 %v16547_v4, %v11521_v5  ;;  %v414_v12 = vrot.slane %v18143_v28, 1  ;;  %s18039_s10 = smov 88   ;;  %vm1050_vm4 = vcmask 321538   ;;  %s1045_s11 = scalar_lea.vmem [#allocation2], %s18020_s7 }
  0x37   : > { %444 = vmatpush.bf16.msrb.mxu0 %v11520_v58  ;;  %vm1054_vm5 = vcmask 323588   ;;  %vm1058_vm6 = vcmask 325638   ;;  %vm1046_vm7 = vcmask 319488   ;;  %s155_s7 = sadd.s32 1, %s18020_s7  }
  0x38   : > { %397 = vmatpush.bf16.msrb.mxu3 %v11498_v57  ;;  %p152_p0 = scmp.ge.s32.totalorder %s155_s7, 8  }
  0x39   : > { %330 = vmatpush.bf16.msra.mxu1 %v11488_v50  ;;  %vm1172_vm8 = vcmask (%p152_p0), 1043456   ;;  %vm1168_vm9 = vcmask (%p152_p0), 326656   ;;  %vm9064_vm10 = vcmask (%p152_p0), 1042432   ;;  %vm9060_vm11 = vcmask (%p152_p0), 310272  }
  0x3a   : > { %503 = vmatpush.bf16.msra.mxu2 %v18119_v3  ;;  %v11516_v3 = vor.u32 %v16545_v9, %v11513_v10 }
  0x3b   : > { %445 = vmatpush.bf16.msrb.mxu0 %v11512_v0 }
  0x3c   : > { %517 = vmatpush.bf16.msra.mxu3 %v18135_v21 }
  0x3d   : > { %331 = vmatpush.bf16.msra.mxu1 %v11480_v63 }
  0x3e   : > { %504 = vmatpush.bf16.msra.mxu2 %v18124_v11 }
  0x3f   : > { %531 = vmatpush.bf16.msra.mxu0 %v18121_v7  ;;  %v618_v7 = vrot.slane %v18138_v23, 1 }
  0x40   : > { %518 = vmatpush.bf16.msra.mxu3 %v11444_v37  ;;  %11454 = vmatmul.msk.bf16.vlgmr.msrb.gmra.mxu1 %vm193_vm0, %v18138_v23 }
  0x41   : > { %11507 = vmatmul.msk.bf16.vlgmr.msrb.gmra.mxu2 %vm193_vm0, %v352_v6  ;;  %458 = vmatpush.bf16.msrb.mxu1 %v11524_v8 }
  0x42   : > { %559 = vmatpush.bf16.msrb.mxu2 %v18145_v29 }
  0x43   : > { %532 = vmatpush.bf16.msra.mxu0 %v18128_v14  ;;  %11508 = vmatmul.msk.bf16.vlgmr.msrb.gmra.mxu3 %vm193_vm0, %v352_v6 }
  0x44   : > { %573 = vmatpush.bf16.msrb.mxu3 %v11488_v50 }
  0x45   : > { %459 = vmatpush.bf16.msrb.mxu1 %v11516_v3 }
  0x46   : > { %11525 = vmatmul.msk.bf16.vlgmr.msrb.gmra.mxu0 %vm193_vm0, %v414_v12  ;;  %560 = vmatpush.bf16.msrb.mxu2 %v18149_v33 }
  0x47   : > { %591 = vmatpush.bf16.msrb.mxu0 %v18154_v40 }
  0x48   : > { %574 = vmatpush.bf16.msrb.mxu3 %v11480_v63 }
  0x4b   : > { %592 = vmatpush.bf16.msrb.mxu0 %v11494_v49 }
  0x50   : > { %11490 = vmatmul.msk.bf16.vlgmr.msra.gmra.mxu1 %vm193_vm0, %v286_v54 }
  0x51   : > { %11527 = vmatmul.msk.bf16.vlgmr.msra.gmra.mxu2 %vm193_vm0, %v286_v54  ;;  %545 = vmatpush.bf16.msra.mxu1 %v18130_v15 }
  0x52   : > { %628 = vmatpush.bf16.msra.mxu2 %v11520_v58 }
  0x53   : > { %11528 = vmatmul.msk.bf16.vlgmr.msra.gmra.mxu3 %vm193_vm0, %v286_v54 }
  0x54   : > { %642 = vmatpush.bf16.msra.mxu3 %v11524_v8 }
  0x55   : > { %546 = vmatpush.bf16.msra.mxu1 %v18140_v25 }
  0x56   : > { %11529 = vmatmul.msk.bf16.vlgmr.msra.gmra.mxu0 %vm193_vm0, %v18138_v23  ;;  %629 = vmatpush.bf16.msra.mxu2 %v11512_v0 }
  0x58   : > { %643 = vmatpush.bf16.msra.mxu3 %v11516_v3 }
  0x60   : > { %11526 = vmatmul.msk.bf16.vlgmr.msrb.gmra.mxu1 %vm193_vm0, %v414_v12 }
  0x61   : > { %11531 = vmatmul.msk.bf16.vlgmr.msrb.gmra.mxu2 %vm193_vm0, %v352_v6  ;;  %605 = vmatpush.bf16.msrb.mxu1 %v18159_v43 }
  0x63   : > { %11532 = vmatmul.msk.bf16.vlgmr.msrb.gmra.mxu3 %vm193_vm0, %v352_v6 }
  0x65   : > { %606 = vmatpush.bf16.msrb.mxu1 %v11498_v57 }
  0x66   : > { %11533 = vmatmul.msk.bf16.vlgmr.msrb.gmra.mxu0 %vm193_vm0, %v414_v12 }
  0x70   : > { %11530 = vmatmul.msk.bf16.vlgmr.msra.gmra.mxu1 %vm193_vm0, %v18138_v23 }
  0x71   : > { %11535 = vmatmul.msk.bf16.vlgmr.msra.gmra.mxu2 %vm193_vm0, %v618_v7 }
  0x73   : > { %11536 = vmatmul.msk.bf16.vlgmr.msra.gmra.mxu3 %vm193_vm0, %v618_v7 }
  0x80   : > { %11534 = vmatmul.msk.bf16.vlgmr.msrb.gmra.mxu1 %vm193_vm0, %v414_v12 }
  0xad   : > { %v206_v11 = vpop.f32.mrf.mxu1 }
  0xb3   : > { %v319_v13 = vpop.f32.mrf.mxu0 }
  0xb4   : > { %v257_v14 = vpop.f32.mrf.mxu2 }
  0xb5   : > { %v208_v15 = vpop.f32.mrf.mxu1  ;;  %v258_v21 = vadd.f32 %v257_v14, %v206_v11 }
  0xb6   : > { %v271_v16 = vpop.f32.mrf.mxu3 }
  0xb7   : > { %v338_v22 = vadd.f32 %v319_v13, %v258_v21 }
  0xbb   : > { %v321_v17 = vpop.f32.mrf.mxu0 }
  0xbc   : > { %v259_v18 = vpop.f32.mrf.mxu2 }
  0xbd   : > { %v220_v19 = vpop.f32.mrf.mxu1  ;;  %v260_v28 = vadd.f32 %v259_v18, %v208_v15 }
  0xbe   : > { %v273_v20 = vpop.f32.mrf.mxu3  ;;  %v272_v39 = vadd.f32 %v271_v16, %v220_v19 }
  0xbf   : > { %v340_v30 = vadd.f32 %v321_v17, %v260_v28 }
  0xc3   : > { %v447_v24 = vpop.f32.mrf.mxu0 }
  0xc4   : > { %v385_v25 = vpop.f32.mrf.mxu2 }
  0xc5   : > { %v404_v23 = vadd.f32 %v385_v25, %v338_v22  ;;  %v222_v26 = vpop.f32.mrf.mxu1  ;;  %v701_v22 = vld [vmem:[#allocation7 + $0x54] sm:$0x3]  ;;  %v827_v25 = vld [vmem:[#allocation7 + $0x80] sm:$0x3] }
  0xc6   : > { %v399_v27 = vpop.f32.mrf.mxu3  ;;  %v274_v46 = vadd.f32 %v273_v20, %v222_v26  ;;  %v689_v20 = vld [vmem:[#allocation7 + $0x28] sm:$0x3]  ;;  %v851_v26 = vunpack.c.l.b16 %v827_v25 }
  0xc7   : > { %v18203_v29 = vadd.f32 %v447_v24, %v404_v23  ;;  %v785_v21 = vunpack.c.l.b16 %v689_v20  ;;  %v730_v24 = vunpack.c.l.b16 %v701_v22 }
  0xc9   : > { %474 = vrot.lane.b32.xlu0 %v18203_v29, %s18038_s30  ;;  %v791_v23 = vpack.c.b16 %v785_v21, %v785_v21 }
  0xcb   : > { %v449_v32 = vpop.f32.mrf.mxu0  ;;  %v800_v28 = vsel %vm746_vm1, %v791_v23, 0 }
  0xcc   : > { %v387_v31 = vpop.f32.mrf.mxu2  ;;  %804 = vmatpush.bf16.msra.mxu1 %v800_v28 }
  0xcd   : > { %v406_v33 = vadd.f32 %v387_v31, %v340_v30  ;;  %v333_v34 = vpop.f32.mrf.mxu1  ;;  %v857_v30 = vpack.c.b16 %v851_v26, %v851_v26 }
  0xce   : > { %v401_v35 = vpop.f32.mrf.mxu3  ;;  %v339_v41 = vadd.f32 %v333_v34, %v272_v39 }
  0xcf   : > { %v18207_v36 = vadd.f32 %v449_v32, %v406_v33  ;;  %v16553_v32 = vld [vmem:[#allocation7 + $0x20] sm:$0xff]  ;;  %v896_v33 = vld [vmem:[#allocation7 + $0xac] sm:$0x3]  ;;  %v867_v34 = vsel %vm746_vm1, %v857_v30, 0 }
  0xd0   : > { %v405_v44 = vadd.f32 %v399_v27, %v339_v41  ;;  %v736_v27 = vpack.c.b16 %v730_v24, %v730_v24  ;;  %871 = vmatpush.bf16.msrb.mxu2 %v867_v34  ;;  %805 = vmatpush.bf16.msra.mxu1 %v16553_v32 }
  0xd1   : > { %478 = vrot.lane.b32.xlu1 %v18207_v36, %s18038_s30 }
  0xd2   : > { %v748_v31 = vsel %vm746_vm1, %v736_v27, 0 }
  0xd3   : > { %v534_v42 = vpop.f32.mrf.mxu0  ;;  %752 = vmatpush.bf16.msra.mxu0 %v748_v31 }
  0xd4   : > { %v506_v37 = vpop.f32.mrf.mxu2 }
  0xd5   : > { %v335_v38 = vpop.f32.mrf.mxu1  ;;  %v535_v57 = vadd.f32 %v534_v42, %v506_v37  ;;  %v921_v37 = vunpack.c.l.b16 %v896_v33  ;;  %v16557_v42 = vld [vmem:[#allocation7 + $0x44] sm:$0xff] }
  0xd6   : > { %v520_v40 = vpop.f32.mrf.mxu3  ;;  %v341_v49 = vadd.f32 %v335_v38, %v274_v46  ;;  %v16563_v38 = vld [vmem:[#allocation7 + $0x78] sm:$0xff] }
  0xd7   : > { %v927_v39 = vpack.c.b16 %v921_v37, %v921_v37  ;;  %872 = vmatpush.bf16.msrb.mxu2 %v16563_v38  ;;  %v16556_v46 = vld [vmem:[#allocation7 + $0x3c] sm:$0xff] }
  0xd8   : > { %v407_v52 = vadd.f32 %v401_v35, %v341_v49  ;;  %v16558_v35 = vld [vmem:[#allocation7 + $0x4c] sm:$0xff] }
  0xd9   : > { %753 = vmatpush.bf16.msra.mxu0 %v16558_v35  ;;  %v937_v41 = vsel %vm746_vm1, %v927_v39, 0  ;;  %v16550_v49 = vld [vmem:[#allocation7 + $0x8] sm:$0xff] }
  0xda   : > { %941 = vmatpush.bf16.msrb.mxu3 %v937_v41 }
  0xdb   : > { %v536_v50 = vpop.f32.mrf.mxu0 }
  0xdc   : > { %v508_v43 = vpop.f32.mrf.mxu2 }
  0xdd   : > { %v461_v45 = vpop.f32.mrf.mxu1  ;;  %v537_v0 = vadd.f32 %v536_v50, %v508_v43  ;;  %v16562_v43 = vld [vmem:[#allocation7 + $0x70] sm:$0xff]  ;;  %754 = vmatpush.bf16.msra.mxu0 %v16557_v42 }
  0xde   : > { %v467_v47 = vadd.f32 %v461_v45, %v405_v44  ;;  %v522_v48 = vpop.f32.mrf.mxu3  ;;  %v16568_v44 = vld [vmem:[#allocation7 + $0xa4] sm:$0xff]  ;;  %873 = vmatpush.bf16.msrb.mxu2 %v16562_v43  ;;  %v16551_v45 = vld [vmem:[#allocation7 + $0x10] sm:$0xff] }
  0xdf   : > { %942 = vmatpush.bf16.msrb.mxu3 %v16568_v44  ;;  %v16555_v50 = vld [vmem:[#allocation7 + $0x34] sm:$0xff] }
  0xe0   : > { %476 = vrot.lane.b32.xlu0 %v467_v47, %s18038_s30  ;;  %v16561_v47 = vld [vmem:[#allocation7 + $0x68] sm:$0xff] }
  0xe1   : > { %755 = vmatpush.bf16.msra.mxu0 %v16556_v46 }
  0xe2   : > { %874 = vmatpush.bf16.msrb.mxu2 %v16561_v47 }
  0xe3   : > { %v594_v59 = vpop.f32.mrf.mxu0 }
  0xe4   : > { %v562_v51 = vpop.f32.mrf.mxu2 }
  0xe5   : > { %v463_v53 = vpop.f32.mrf.mxu1  ;;  %v581_v60 = vadd.f32 %v562_v51, %v535_v57  ;;  %v16560_v51 = vld [vmem:[#allocation7 + $0x60] sm:$0xff]  ;;  %756 = vmatpush.bf16.msra.mxu0 %v16555_v50 }
  0xe6   : > { %v469_v54 = vadd.f32 %v463_v53, %v407_v52  ;;  %v576_v55 = vpop.f32.mrf.mxu3  ;;  %v16566_v52 = vld [vmem:[#allocation7 + $0x94] sm:$0xff]  ;;  %875 = vmatpush.bf16.msrb.mxu2 %v16560_v51 }
  0xe7   : > { %v613_v61 = vadd.f32 %v594_v59, %v581_v60  ;;  %v966_v53 = vld [vmem:[#allocation7 + $0xd8] sm:$0x3]  ;;  %v16565_v59 = vld [vmem:[#allocation7 + $0x8c] sm:$0xff] }
  0xe8   : > { %480 = vrot.lane.b32.xlu1 %v469_v54, %s18038_s30  ;;  %v989_v54 = vunpack.c.l.b16 %v966_v53 }
  0xea   : > { %v995_v57 = vpack.c.b16 %v989_v54, %v989_v54 }
  0xeb   : > { %v596_v6 = vpop.f32.mrf.mxu0 }
  0xec   : > { %v564_v56 = vpop.f32.mrf.mxu2  ;;  %v1005_v60 = vsel %vm746_vm1, %v995_v57, 0 }
  0xed   : > { %v548_v58 = vpop.f32.mrf.mxu1  ;;  %v583_v4 = vadd.f32 %v564_v56, %v537_v0  ;;  %v16554_v56 = vld [vmem:[#allocation7 + $0x2c] sm:$0xff] }
  0xee   : > { %v578_v62 = vpop.f32.mrf.mxu3  ;;  %v549_v5 = vadd.f32 %v548_v58, %v520_v40  ;;  %v16552_v40 = vld [vmem:[#allocation7 + $0x18] sm:$0xff]  ;;  %757 = vmatpush.bf16.msra.mxu0 %v16554_v56 }
  0xef   : > { %v615_v8 = vadd.f32 %v596_v6, %v583_v4  ;;  %806 = vmatpush.bf16.msra.mxu1 %v16552_v40  ;;  %v16559_v58 = vld [vmem:[#allocation7 + $0x58] sm:$0xff]  ;;  %v16572_v4 = vld [vmem:[#allocation7 + $0xc8] sm:$0xff] }
  0xf0   : > { %v582_v10 = vadd.f32 %v576_v55, %v549_v5  ;;  %v16549_v55 = vld [vmem:[#allocation7] sm:$0xff]  ;;  %876 = vmatpush.bf16.msrb.mxu2 %v16559_v58  ;;  %v17807_v58 = vld [vmem:[#allocation8] ss:$0 sm:$0xff] }
  0xf1   : > { %v16571_v5 = vld [vmem:[#allocation7 + $0xc0] sm:$0xff] }
  0xf2   : > { %1009 = vmatpush.bf16.msrb.mxu0 %v1005_v60 }
  0xf3   : > { %807 = vmatpush.bf16.msra.mxu1 %v16551_v45 }
  0xf4   : > { %v631_v63 = vpop.f32.mrf.mxu2 }
  0xf5   : > { %v18213_v1 = vadd.f32 %v631_v63, %v613_v61  ;;  %v550_v2 = vpop.f32.mrf.mxu1  ;;  %v16573_v63 = vld [vmem:[#allocation7 + $0xd0] sm:$0xff] }
  0xf6   : > { %v645_v3 = vpop.f32.mrf.mxu3  ;;  %v551_v13 = vadd.f32 %v550_v2, %v522_v48  ;;  %v16567_v48 = vld [vmem:[#allocation7 + $0x9c] sm:$0xff]  ;;  %1010 = vmatpush.bf16.msrb.mxu0 %v16573_v63 }
  0xf7   : > { %658 = vrot.lane.b32.xlu2 %v18213_v1, %s18038_s30  ;;  %943 = vmatpush.bf16.msrb.mxu3 %v16567_v48 }
  0xf8   : > { %v584_v15 = vadd.f32 %v578_v62, %v551_v13  ;;  %808 = vmatpush.bf16.msra.mxu1 %v16550_v49  ;;  %v16564_v62 = vld [vmem:[#allocation7 + $0x84] sm:$0xff] }
  0xfa   : > { %1011 = vmatpush.bf16.msrb.mxu0 %v16572_v4 }
  0xfb   : > { %944 = vmatpush.bf16.msrb.mxu3 %v16566_v52 }
  0xfc   : > { %v633_v9 = vpop.f32.mrf.mxu2  ;;  %809 = vmatpush.bf16.msra.mxu1 %v16549_v55 }
  0xfd   : > { %v18217_v12 = vadd.f32 %v633_v9, %v615_v8  ;;  %v608_v7 = vpop.f32.mrf.mxu1 }
  0xfe   : > { %v614_v11 = vadd.f32 %v608_v7, %v582_v10  ;;  %v647_v18 = vpop.f32.mrf.mxu3  ;;  %1012 = vmatpush.bf16.msrb.mxu0 %v16571_v5 }
  0xff   : > { %662 = vrot.lane.b32.xlu0 %v18217_v12, %s18038_s30  ;;  %945 = vmatpush.bf16.msrb.mxu3 %v16565_v59 }
 0x100   : > { %v651_v14 = vadd.f32 %v645_v3, %v614_v11  ;;  %v16570_v3 = vld [vmem:[#allocation7 + $0xb8] sm:$0xff] }
 0x102   : > { %660 = vrot.lane.b32.xlu2 %v651_v14, %s18038_s30  ;;  %1013 = vmatpush.bf16.msrb.mxu0 %v16570_v3  ;;  %v16569_v14 = vld [vmem:[#allocation7 + $0xb0] sm:$0xff]  ;;  %v1101_v3 = vld [vmem:[#allocation10 + $0xbc] sm:$0xff] (%p152_p0) }
 0x103   : > { %946 = vmatpush.bf16.msrb.mxu3 %v16564_v62 }
 0x105   : > { %v610_v16 = vpop.f32.mrf.mxu1 }
 0x106   : > { %v616_v17 = vadd.f32 %v610_v16, %v584_v15  ;;  %v17806_v15 = vld [vmem:[#allocation5] ss:$0 sm:$0xff]  ;;  %1014 = vmatpush.bf16.msrb.mxu0 %v16569_v14  ;;  %v1141_v14 = vunpack.c.h.b16 (%p152_p0), %v1101_v3 }
 0x108   : > { %v653_v19 = vadd.f32 %v647_v18, %v616_v17 }
 0x10a   : > { %664 = vrot.lane.b32.xlu1 %v653_v19, %s18038_s30 }
 0x13b   : > { %v475_v0 = vpop.permute.xlu0 %474 }
 0x143   : > { %v479_v2 = vpop.permute.xlu1 %478 }
 0x151   : > { %v659_v61 = vpop.permute.xlu2 %658 }
 0x152   : > { %v477_v8 = vpop.permute.xlu0 %476 }
 0x153   : > { %v483_v7 = vsel %vm482_vm2, %v475_v0, %v477_v8 }
 0x154   : > { %v487_v16 = vmax.f32 %v18203_v29, %v483_v7 }
 0x156   : > { %v493_v22 = vadd.f32 %v17806_v15, %v487_v16  ;;  %v16591_v16 = vld [vmem:[#allocation10 + $0x9c] sm:$0xf0] (%p152_p0) }
 0x15a   : > { %v481_v9 = vpop.permute.xlu1 %480 }
 0x15b   : > { %v484_v11 = vsel %vm482_vm2, %v479_v2, %v481_v9 }
 0x15c   : > { %v661_v6 = vpop.permute.xlu2 %660  ;;  %v488_v17 = vmax.f32 %v18207_v36, %v484_v11 }
 0x15d   : > { %v666_v10 = vsel %vm482_vm2, %v659_v61, %v661_v6 }
 0x15e   : > { %v670_v13 = vmax.f32 %v18213_v1, %v666_v10  ;;  %v494_v24 = vadd.f32 %v17806_v15, %v488_v17  ;;  %v495_v1 = vmax.f32 %v493_v22, 0.0  ;;  %v1100_v10 = vld [vmem:[#allocation10 + $0xb4] sm:$0xff] (%p152_p0)  ;;  %v16589_v17 = vld [vmem:[#allocation10 + $0x90] sm:$0xf] (%p152_p0)  ;;  %v11670_v22 = vld [vmem:[#allocation10 + $0xa0] sm:$0xf0] (%p152_p0) }
 0x15f   :  { %v1138_v7 = vunpack.c.l.b16 (%p152_p0), %v1100_v10  ;;  %v1139_v11 = vunpack.c.h.b16 (%p152_p0), %v1100_v10 }
 0x160   : > { %v672_v18 = vadd.f32 %v17806_v15, %v670_v13  ;;  %v496_v27 = vmax.f32 %v494_v24, 0.0  ;;  %v1140_v13 = vunpack.c.l.b16 (%p152_p0), %v1101_v3  ;;  %v11676_v24 = vld [vmem:[#allocation10 + $0x94] sm:$0xf] (%p152_p0) }
 0x162   : > { %v674_v23 = vmax.f32 %v672_v18, 0.0  ;;  %v1153_v18 = vpack.c.b16 (%p152_p0), %v1138_v7, %v1138_v7 }
 0x164   : > { %v676_v30 = vmax.f32 %v495_v1, %v674_v23  ;;  %v16590_v23 = vld [vmem:[#allocation10 + $0x98] sm:$0xf] (%p152_p0)  ;;  %v11648_v1 = vld [vmem:[#allocation10 + $0x64] sm:$0xf] (%p152_p0) }
 0x171   : > { %v663_v19 = vpop.permute.xlu0 %662 }
 0x17c   : > { %v665_v20 = vpop.permute.xlu1 %664 }
 0x17d   : > { %v667_v21 = vsel %vm482_vm2, %v663_v19, %v665_v20  ;;  %v1154_v19 = vpack.c.b16 (%p152_p0), %v1139_v11, %v1139_v11  ;;  %v1155_v20 = vpack.c.b16 (%p152_p0), %v1140_v13, %v1140_v13  ;;  %v16582_v13 = vld [vmem:[#allocation10 + $0x40] sm:$0xf0] (%p152_p0) }
 0x17e   : > { %v671_v25 = vmax.f32 %v18217_v12, %v667_v21  ;;  %v1156_v21 = vpack.c.b16 (%p152_p0), %v1141_v14, %v1141_v14  ;;  %v11664_v14 = vld [vmem:[#allocation10 + $0x74] sm:$0xf] (%p152_p0) }
 0x180   : > { %v673_v26 = vadd.f32 %v17806_v15, %v671_v25  ;;  %v11668_v15 = vld [vmem:[#allocation10 + $0x8c] sm:$0xf] (%p152_p0)  ;;  %v16592_v25 = vld [vmem:[#allocation10 + $0xa4] sm:$0xf0] (%p152_p0) }
 0x182   : > { %v675_v28 = vmax.f32 %v673_v26, 0.0  ;;  %v11678_v26 = vld [vmem:[#allocation10 + $0xa8] sm:$0xf0] (%p152_p0) }
 0x184   : > { %v677_v31 = vmax.f32 %v496_v27, %v675_v28  ;;  %v1174_v27 = vsel (%p152_p0), %vm1172_vm8, %v1153_v18, 0  ;;  %v1177_v28 = vsel (%p152_p0), %vm1172_vm8, %v1154_v19, 0 }
 0x186   : > { %v678_v29 = vpack.c.bf16 %v677_v31, %v676_v30  ;;  %v1180_v30 = vsel (%p152_p0), %vm1172_vm8, %v1155_v20, 0  ;;  %v1183_v31 = vsel (%p152_p0), %vm1172_vm8, %v1156_v21, 0 }
 0x187   :  { %1219 = vmatpush.bf16.msra.mxu2 (%p152_p0), %v1180_v30  ;;  %1232 = vmatpush.bf16.msra.mxu3 (%p152_p0), %v1183_v31 }
 0x188   : > { %11578 = vmatmul.msk.bf16.vlgmr.msra.gmra.mxu1 %vm742_vm3, %v678_v29  ;;  %v829_v36 = vrot.slane %v678_v29, 1  ;;  %v703_v32 = vshrl.u32 %v678_v29, 16  ;;  %v705_v33 = vshll.u32 %v678_v29, 16  ;;  %v967_v12 = vrot.slane %v678_v29, 2  ;;  %v16586_v29 = vld [vmem:[#allocation10 + $0x74] sm:$0xf0] (%p152_p0) }
 0x189   :  { %1206 = vmatpush.bf16.msra.mxu1 (%p152_p0), %v1177_v28  ;;  %v16577_v28 = vld [vmem:[#allocation10 + $0x18] sm:$0xf0] (%p152_p0) }
 0x18a   : > { %11599 = vmatmul.msk.bf16.vlgmr.msrb.gmra.mxu2 %vm742_vm3, %v829_v36  ;;  %v707_v34 = vrot.slane %v705_v33, 1  ;;  %v897_v35 = vrot.slane %v703_v32, 1  ;;  %v898_v37 = vrot.slane %v705_v33, 2  ;;  %v11669_v36 = vor.u32 (%p152_p0), %v16591_v16, %v11668_v15  ;;  %v16584_v33 = vld [vmem:[#allocation10 + $0x68] sm:$0xf] (%p152_p0) }
 0x18b   :  { %v16588_v15 = vld [vmem:[#allocation10 + $0x84] sm:$0xf0] (%p152_p0)  ;;  %v11693_v16 = vld [vmem:[#allocation10] sm:$0xf] (%p152_p0) }
 0x18c   : > { %v708_v38 = vor.u32 %v707_v34, %v703_v32  ;;  %v899_v39 = vor.u32 %v898_v37, %v897_v35  ;;  %v11673_v32 = vor.u32 (%p152_p0), %v16589_v17, %v11670_v22  ;;  %v11650_v34 = vld [vmem:[#allocation10 + $0x78] sm:$0xf0] (%p152_p0)  ;;  %v11656_v35 = vld [vmem:[#allocation10 + $0x6c] sm:$0xf] (%p152_p0)  ;;  %v11677_v37 = vor.u32 (%p152_p0), %v16592_v25, %v11676_v24  ;;  %v16576_v17 = vld [vmem:[#allocation10 + $0x10] sm:$0xf0] (%p152_p0) }
 0x18d   :  { %v16574_v25 = vld [vmem:[#allocation10 + $0x4] sm:$0xf] (%p152_p0) }
 0x18e   : > { %11557 = vmatmul.msk.bf16.vlgmr.msra.gmra.mxu0 %vm742_vm3, %v708_v38  ;;  %11620 = vmatmul.msk.bf16.vlgmr.msrb.gmra.mxu3 %vm742_vm3, %v899_v39  ;;  %v11681_v38 = vor.u32 (%p152_p0), %v16590_v23, %v11678_v26  ;;  %v1102_v39 = vld [vmem:[#allocation10 + $0xc4] sm:$0xf] (%p152_p0)  ;;  %v11665_v23 = vor.u32 (%p152_p0), %v16588_v15, %v11664_v14  ;;  %v11694_v26 = vor.u32 (%p152_p0), %v16576_v17, %v11693_v16  ;;  %v16600_v14 = vld [vmem:[#allocation10 + $0xfc] sm:$0xf] (%p152_p0)  ;;  %v11768_v15 = vld [vmem:[#allocation10 + $0x10c] sm:$0xf0] (%p152_p0) }
 0x18f   :  { %1193 = vmatpush.bf16.msra.mxu0 (%p152_p0), %v1174_v27  ;;  %1207 = vmatpush.bf16.msra.mxu1 (%p152_p0), %v11673_v32  ;;  %v11701_v27 = vld [vmem:[#allocation10 + $0x8] sm:$0xf] (%p152_p0) }
 0x190   :  { %1220 = vmatpush.bf16.msra.mxu2 (%p152_p0), %v11677_v37  ;;  %1233 = vmatpush.bf16.msra.mxu3 (%p152_p0), %v11681_v38  ;;  %v11702_v38 = vor.u32 (%p152_p0), %v16577_v28, %v11701_v27  ;;  %v1590_v27 = vld [vmem:[#allocation10 + $0x184] sm:$0xff] (%p152_p0) }
 0x193   :  { %1194 = vmatpush.bf16.msra.mxu0 (%p152_p0), %v11669_v36  ;;  %v11723_v36 = vld [vmem:[#allocation10 + $0x44] sm:$0xf0] (%p152_p0) }
 0x19e   : > { %11641 = vmatmul.msk.bf16.vlgmr.msrb.gmra.mxu0 %vm742_vm3, %v967_v12  ;;  %v1081_v12 = vld [vmem:[#allocation10 + $0x50] sm:$0xff] (%p152_p0) }
 0x205   : > { %v811_v41 = vpop.f32.mrf.mxu1 }
 0x20b   : > { %v759_v40 = vpop.f32.mrf.mxu0 }
 0x20c   : > { %v812_v44 = vadd.f32 %v811_v41, %v759_v40  ;;  %v1082_v40 = vld [vmem:[#allocation10 + $0x58] sm:$0xff] (%p152_p0)  ;;  %v16587_v41 = vld [vmem:[#allocation10 + $0x7c] sm:$0xf0] (%p152_p0) }
 0x20d   : > { %v878_v42 = vpop.f32.mrf.mxu2  ;;  %v813_v48 = vpop.f32.mrf.mxu1 }
 0x20e   : > { %v883_v46 = vadd.f32 %v878_v42, %v812_v44  ;;  %v16585_v42 = vld [vmem:[#allocation10 + $0x70] sm:$0xf] (%p152_p0)  ;;  %v1142_v44 = vunpack.c.l.b16 (%p152_p0), %v1102_v39 }
 0x20f   :  { %v11758_v39 = vld [vmem:[#allocation10 + $0xf0] sm:$0xf] (%p152_p0) }
 0x211   : > { %v948_v45 = vpop.f32.mrf.mxu3 }
 0x212   : > { %v953_v47 = vadd.f32 %v948_v45, %v883_v46  ;;  %v1288_v45 = vunpack.c.l.b16 (%p152_p0), %v1081_v12  ;;  %v1289_v46 = vunpack.c.h.b16 (%p152_p0), %v1081_v12  ;;  %v1418_v12 = vld [vmem:[#allocation10 + $0x120] sm:$0xff] (%p152_p0) }
 0x213   : > { %v761_v43 = vpop.f32.mrf.mxu0 }
 0x214   : > { %v814_v50 = vadd.f32 %v813_v48, %v761_v43  ;;  %v11658_v43 = vld [vmem:[#allocation10 + $0x80] sm:$0xf0] (%p152_p0)  ;;  %v11649_v48 = vor.u32 (%p152_p0), %v16586_v29, %v11648_v1  ;;  %v11695_v1 = vld [vmem:[#allocation10 + $0x14] sm:$0xf0] (%p152_p0)  ;;  %v16580_v29 = vld [vmem:[#allocation10 + $0x34] sm:$0xf] (%p152_p0) }
 0x215   : > { %v880_v52 = vpop.f32.mrf.mxu2  ;;  %v11698_v37 = vor.u32 (%p152_p0), %v16574_v25, %v11695_v1  ;;  %v16595_v1 = vld [vmem:[#allocation10 + $0xd4] sm:$0xf] (%p152_p0) }
 0x216   : > { %v884_v54 = vadd.f32 %v880_v52, %v814_v50  ;;  %v1303_v52 = vpack.c.b16 (%p152_p0), %v1288_v45, %v1288_v45  ;;  %1195 = vmatpush.bf16.msra.mxu0 (%p152_p0), %v11649_v48  ;;  %v11726_v45 = vor.u32 (%p152_p0), %v16580_v29, %v11723_v36  ;;  %v11760_v48 = vld [vmem:[#allocation10 + $0x104] sm:$0xf0] (%p152_p0)  ;;  %v11754_v29 = vld [vmem:[#allocation10 + $0xd8] sm:$0xf] (%p152_p0)  ;;  %v1591_v36 = vld [vmem:[#allocation10 + $0x18c] sm:$0xf] (%p152_p0) }
 0x219   : > { %v950_v53 = vpop.f32.mrf.mxu3 }
 0x21a   : > { %v954_v55 = vadd.f32 %v950_v53, %v884_v54  ;;  %v11657_v53 = vor.u32 (%p152_p0), %v16587_v41, %v11656_v35  ;;  %v11661_v54 = vor.u32 (%p152_p0), %v16585_v42, %v11658_v43  ;;  %v16583_v35 = vld [vmem:[#allocation10 + $0x48] sm:$0xf0] (%p152_p0)  ;;  %v1419_v41 = vld [vmem:[#allocation10 + $0x128] sm:$0xf] (%p152_p0)  ;;  %v18260_v42 = vld [vmem:[#allocation10 + $0x17c] sm:$0xff] (%p152_p0) }
 0x21b   : > { %v1016_v49 = vpop.f32.mrf.mxu0 }
 0x21c   : > { %v1021_v51 = vadd.f32 %v1016_v49, %v953_v47  ;;  %v1290_v47 = vunpack.c.l.b16 (%p152_p0), %v1082_v40  ;;  %v11653_v49 = vor.u32 (%p152_p0), %v16584_v33, %v11650_v34  ;;  %1221 = vmatpush.bf16.msra.mxu2 (%p152_p0), %v11657_v53  ;;  %1234 = vmatpush.bf16.msra.mxu3 (%p152_p0), %v11661_v54  ;;  %v11729_v34 = vld [vmem:[#allocation10 + $0x38] sm:$0xf] (%p152_p0)  ;;  %v11703_v53 = vld [vmem:[#allocation10 + $0x1c] sm:$0xf0] (%p152_p0)  ;;  %v1459_v54 = vunpack.c.l.b16 (%p152_p0), %v1419_v41 }
 0x21e   : > { %1025 = vrot.lane.b32.xlu2 %v1021_v51, %s18039_s10  ;;  %1208 = vmatpush.bf16.msra.mxu1 (%p152_p0), %v11653_v49 }
 0x223   : > { %v1018_v56 = vpop.f32.mrf.mxu0 }
 0x224   : > { %v1022_v57 = vadd.f32 %v1018_v56, %v954_v55  ;;  %v1304_v55 = vpack.c.b16 (%p152_p0), %v1289_v46, %v1289_v46  ;;  %v1305_v56 = vpack.c.b16 (%p152_p0), %v1290_v47, %v1290_v47  ;;  %v11730_v46 = vor.u32 (%p152_p0), %v16583_v35, %v11729_v34  ;;  %v16599_v47 = vld [vmem:[#allocation10 + $0xf4] sm:$0xf] (%p152_p0)  ;;  %v16606_v34 = vld [vmem:[#allocation10 + $0x13c] sm:$0xf0] (%p152_p0) }
 0x225   :  { %v1628_v35 = vunpack.c.h.b16 (%p152_p0), %v18260_v42 }
 0x226   : > { %1027 = vrot.lane.b32.xlu0 %v1022_v57, %s18039_s10  ;;  %v1325_v10 = vsel (%p152_p0), %vm1172_vm8, %v1304_v55, 0  ;;  %v1328_v3 = vsel (%p152_p0), %vm1172_vm8, %v1305_v56, 0  ;;  %v1627_v55 = vunpack.c.l.b16 (%p152_p0), %v18260_v42  ;;  %v16609_v42 = vld [vmem:[#allocation10 + $0x158] sm:$0xf] (%p152_p0) }
 0x227   :  { %1354 = vmatpush.bf16.msrb.mxu2 (%p152_p0), %v1325_v10  ;;  %1367 = vmatpush.bf16.msrb.mxu3 (%p152_p0), %v1328_v3 }
 0x228   :  { %v1642_v10 = vpack.c.b16 (%p152_p0), %v1627_v55, %v1627_v55  ;;  %v16610_v55 = vld [vmem:[#allocation10 + $0x160] sm:$0xf] (%p152_p0) }
 0x278   : > { %v1026_v59 = vpop.permute.xlu2 %1025 }
 0x279   : > { %v1031_v60 = vmax.f32 %v1021_v51, %v1026_v59  ;;  %v1157_v51 = vpack.c.b16 (%p152_p0), %v1142_v44, %v1142_v44 }
 0x27b   : > { %v1037_v61 = vadd.f32 %v17807_v58, %v1031_v60  ;;  %v1186_v60 = vsel (%p152_p0), %vm1172_vm8, %v1157_v51, 0  ;;  %v1458_v51 = vunpack.c.h.b16 (%p152_p0), %v1418_v12 }
 0x27c   :  { %1245 = vmatpush.bf16.msrb.mxu0 (%p152_p0), %v1186_v60  ;;  %v16578_v60 = vld [vmem:[#allocation10 + $0x20] sm:$0xf0] (%p152_p0) }
 0x27d   : > { %v1039_v62 = vmax.f32 %v1037_v61, 0.0  ;;  %v1322_v61 = vsel (%p152_p0), %vm1172_vm8, %v1303_v52, 0  ;;  %v16575_v52 = vld [vmem:[#allocation10 + $0xc] sm:$0xf] (%p152_p0) }
 0x27e   :  { %1341 = vmatpush.bf16.msrb.mxu1 (%p152_p0), %v1322_v61  ;;  %v11738_v61 = vld [vmem:[#allocation10 + $0xc8] sm:$0xf] (%p152_p0) }
 0x27f   : > { %v1042_v63 = vrot.slane %v1039_v62, 1 }
 0x281   : > { %v1044_v0 = vmax.f32 %v1039_v62, %v1042_v63  ;;  %v11713_v62 = vld [vmem:[#allocation10 + $0x28] sm:$0xf] (%p152_p0)  ;;  %v16581_v63 = vld [vmem:[#allocation10 + $0x38] sm:$0xf0] (%p152_p0) }
 0x282   :  { %v11714_v11 = vor.u32 (%p152_p0), %v16581_v63, %v11713_v62  ;;  %v16596_v63 = vld [vmem:[#allocation10 + $0xd8] sm:$0xf0] (%p152_p0) }
 0x283   : > { %11642 = vst.msk [vmem:[%s1045_s11 + $0x6] sm:$0x4] %vm1050_vm4, %v1044_v0  ;;  %v11739_v3 = vor.u32 (%p152_p0), %v16596_v63, %v11738_v61  ;;  %v16613_v61 = vld [vmem:[#allocation10 + $0x174] sm:$0xf0] (%p152_p0) }
 0x284   : > { %11643 = vst.msk [vmem:[%s1045_s11 + $0xc] sm:$0x10] %vm1054_vm5, %v1044_v0  ;;  %1342 = vmatpush.bf16.msrb.mxu1 (%p152_p0), %v11714_v11  ;;  %v11766_v11 = vld [vmem:[#allocation10 + $0xf8] sm:$0xf] (%p152_p0) }
 0x285   : > { %11644 = vst.msk [vmem:[%s1045_s11 + $0x12] sm:$0x40] %vm1058_vm6, %v1044_v0 }
 0x286   : > { %1047 = vst.msk [vmem:[%s1045_s11] sm:$0x1] %vm1046_vm7, %v1044_v0  ;;  %v1291_v0 = vunpack.c.h.b16 (%p152_p0), %v1082_v40  ;;  %v16601_v40 = vld [vmem:[#allocation10 + $0x100] sm:$0xf0] (%p152_p0) }
 0x287   :  { %v11759_v56 = vor.u32 (%p152_p0), %v16601_v40, %v11758_v39  ;;  %v1631_v40 = vunpack.c.l.b16 (%p152_p0), %v1591_v36  ;;  %v11856_v36 = vld [vmem:[#allocation10 + $0x1c0] sm:$0xf] (%p152_p0) }
 0x288   :  { %v1306_v20 = vpack.c.b16 (%p152_p0), %v1291_v0, %v1291_v0  ;;  %1343 = vmatpush.bf16.msrb.mxu1 (%p152_p0), %v11694_v26  ;;  %v16594_v0 = vld [vmem:[#allocation10 + $0xcc] sm:$0xf] (%p152_p0)  ;;  %v16597_v26 = vld [vmem:[#allocation10 + $0xe0] sm:$0xf0] (%p152_p0) }
 0x28a   :  { %v1331_v32 = vsel (%p152_p0), %vm1172_vm8, %v1306_v20, 0  ;;  %v1661_v20 = vsel (%p152_p0), %vm1172_vm8, %v1642_v10, 0  ;;  %v11793_v10 = vld [vmem:[#allocation10 + $0x148] sm:$0xf0] (%p152_p0) }
 0x298   : > { %v1028_v2 = vpop.permute.xlu0 %1027 }
 0x299   : > { %v1032_v4 = vmax.f32 %v1022_v57, %v1028_v2  ;;  %v11684_v57 = vld [vmem:[#allocation10 + $0x9c] sm:$0xf] (%p152_p0)  ;;  %v1083_v2 = vld [vmem:[#allocation10 + $0x60] sm:$0xf] (%p152_p0) }
 0x29b   : > { %v1038_v5 = vadd.f32 %v17807_v58, %v1032_v4  ;;  %v16593_v58 = vld [vmem:[#allocation10 + $0xac] sm:$0xf0] (%p152_p0)  ;;  %v1417_v4 = vld [vmem:[#allocation10 + $0x118] sm:$0xff] (%p152_p0) }
 0x29c   :  { %v11685_v7 = vor.u32 (%p152_p0), %v16593_v58, %v11684_v57  ;;  %v1455_v18 = vunpack.c.l.b16 (%p152_p0), %v1417_v4  ;;  %v1456_v19 = vunpack.c.h.b16 (%p152_p0), %v1417_v4  ;;  %v11763_v57 = vor.u32 (%p152_p0), %v16599_v47, %v11760_v48  ;;  %v11709_v58 = vld [vmem:[#allocation10 + $0x10] sm:$0xf] (%p152_p0) }
 0x29d   : > { %v1040_v6 = vmax.f32 %v1038_v5, 0.0  ;;  %v16579_v5 = vld [vmem:[#allocation10 + $0x2c] sm:$0xf] (%p152_p0)  ;;  %v1646_v48 = vpack.c.b16 (%p152_p0), %v1631_v40, %v1631_v40  ;;  %v16616_v40 = vld [vmem:[#allocation10 + $0x1a0] sm:$0xf0] (%p152_p0) }
 0x29e   :  { %1246 = vmatpush.bf16.msrb.mxu0 (%p152_p0), %v11685_v7  ;;  %v1470_v30 = vpack.c.b16 (%p152_p0), %v1455_v18, %v1455_v18  ;;  %v1471_v31 = vpack.c.b16 (%p152_p0), %v1456_v19, %v1456_v19  ;;  %v11774_v18 = vld [vmem:[#allocation10 + $0x100] sm:$0xf] (%p152_p0)  ;;  %v16603_v19 = vld [vmem:[#allocation10 + $0x110] sm:$0xf0] (%p152_p0) }
 0x29f   : > { %v1061_v8 = vrot.slane %v1040_v6, 1  ;;  %154 = sbr.rel (!%p152_p0) target bundleno = 38 (0x26), region = 117  ;;  %v11775_v28 = vor.u32 (%p152_p0), %v16603_v19, %v11774_v18 }
 0x2a0   :  { %v1489_v43 = vsel (%p152_p0), %vm1172_vm8, %v1470_v30, 0  ;;  %v1492_v44 = vsel (%p152_p0), %vm1172_vm8, %v1471_v31, 0  ;;  %v11748_v31 = vld [vmem:[#allocation10 + $0xe4] sm:$0xf0] (%p152_p0) }
 0x2a1   : > { %v1063_v9 = vmax.f32 %v1040_v6, %v1061_v8  ;;  %v11715_v6 = vld [vmem:[#allocation10 + $0x3c] sm:$0xf0] (%p152_p0)  ;;  %v11721_v8 = vld [vmem:[#allocation10 + $0x30] sm:$0xf] (%p152_p0)  ;;  %v11751_v39 = vor.u32 (%p152_p0), %v16595_v1, %v11748_v31  ;;  %v11848_v1 = vld [vmem:[#allocation10 + $0x1b8] sm:$0xf] (%p152_p0) }
 0x2a2   :  { %v11718_v22 = vor.u32 (%p152_p0), %v16579_v5, %v11715_v6  ;;  %v11722_v24 = vor.u32 (%p152_p0), %v16582_v13, %v11721_v8  ;;  %1247 = vmatpush.bf16.msrb.mxu0 (%p152_p0), %v11665_v23  ;;  %v1473_v5 = vpack.c.b16 (%p152_p0), %v1458_v51, %v1458_v51  ;;  %v11706_v6 = vor.u32 (%p152_p0), %v16575_v52, %v11703_v53  ;;  %v16602_v13 = vld [vmem:[#allocation10 + $0x108] sm:$0xf0] (%p152_p0)  ;;  %v11811_v51 = vld [vmem:[#allocation10 + $0x15c] sm:$0xf] (%p152_p0)  ;;  %v16612_v52 = vld [vmem:[#allocation10 + $0x16c] sm:$0xf0] (%p152_p0) }
 0x2a3   : > { %11645 = vst.msk [vmem:[%s1045_s11 + $0x20] sm:$0x1] %vm1046_vm7, %v1063_v9  ;;  %v1292_v9 = vunpack.c.l.b16 (%p152_p0), %v1083_v2  ;;  %v11740_v2 = vld [vmem:[#allocation10 + $0xdc] sm:$0xf0] (%p152_p0)  ;;  %v11710_v8 = vor.u32 (%p152_p0), %v16578_v60, %v11709_v58  ;;  %v11767_v25 = vor.u32 (%p152_p0), %v16602_v13, %v11766_v11  ;;  %v11771_v23 = vor.u32 (%p152_p0), %v16600_v14, %v11768_v15  ;;  %v11819_v60 = vld [vmem:[#allocation10 + $0x164] sm:$0xf] (%p152_p0) }
 0x2a4   :  { %1355 = vmatpush.bf16.msrb.mxu2 %v11718_v22  ;;  %1368 = vmatpush.bf16.msrb.mxu3 %v11722_v24  ;;  %v11743_v7 = vor.u32 %v16594_v0, %v11740_v2  ;;  %v1498_v17 = vsel %vm1172_vm8, %v1473_v5, 0  ;;  %v16611_v22 = vld [vmem:[#allocation10 + $0x164] sm:$0xf0]  ;;  %v11746_v24 = vld [vmem:[#allocation10 + $0xd0] sm:$0xf]  ;;  %v1673_v58 = vsel %vm1172_vm8, %v1646_v48, 0  ;;  %v11812_v0 = vor.u32 %v16612_v52, %v11811_v51 }
 0x2a5   :  { %v1307_v21 = vpack.c.b16 %v1292_v9, %v1292_v9  ;;  %v1474_v9 = vpack.c.b16 %v1459_v54, %v1459_v54  ;;  %v16604_v2 = vld [vmem:[#allocation10 + $0x130] sm:$0xf]  ;;  %v11791_v5 = vld [vmem:[#allocation10 + $0x134] sm:$0xf]  ;;  %v1761_v11 = vld [vmem:[#allocation10 + $0x1e0] sm:$0xff] }
 0x2a6   :  { %v1762_v13 = vld [vmem:[#allocation10 + $0x1e8] sm:$0xff]  ;;  %v1799_v18 = vunpack.c.l.b16 %v1761_v11  ;;  %v1800_v19 = vunpack.c.h.b16 %v1761_v11  ;;  %v16615_v48 = vld [vmem:[#allocation10 + $0x19c] sm:$0xf] }
 0x2a7   :  { %v1334_v33 = vsel %vm1172_vm8, %v1307_v21, 0  ;;  %v11803_v21 = vld [vmem:[#allocation10 + $0x154] sm:$0xf]  ;;  %v13913_v11 = vld [vmem:[#allocation13 + $0xff0] sm:$0xf] }
 0x2a8   :  { %1356 = vmatpush.bf16.msrb.mxu2 %v11698_v37  ;;  %1369 = vmatpush.bf16.msrb.mxu3 %v11702_v38  ;;  %v11804_v30 = vor.u32 %v16611_v22, %v11803_v21  ;;  %v1629_v37 = vunpack.c.l.b16 %v1590_v27  ;;  %v11747_v38 = vor.u32 %v16597_v26, %v11746_v24  ;;  %v1814_v22 = vpack.c.b16 %v1799_v18, %v1799_v18  ;;  %v17389_v18 = vld [vmem:[#allocation13 + $0x17e4] sm:$0xf0] }
 0x2a9   :  { %v1815_v24 = vpack.c.b16 %v1800_v19, %v1800_v19  ;;  %v15953_v19 = vld [vmem:[#allocation13 + $0x1fe0] sm:$0xf] }
 0x2aa   :  { %v1085_v50 = vld [vmem:[#allocation2 + $0x8] sm:$0xff]  ;;  %v1067_v49 = vld [vmem:[#allocation2] sm:$0xff]  ;;  %v1574_v21 = vld [vmem:[#allocation2 + $0x18] sm:$0xff]  ;;  %v1833_v31 = vsel %vm1172_vm8, %v1814_v22, 0 }
 0x2ab   :  { %v18244_v59 = vpack.c.bf16 %v1085_v50, %v1085_v50  ;;  %v1457_v50 = vunpack.c.l.b16 %v1418_v12  ;;  %v18265_v62 = vpack.c.bf16 %v1067_v49, %v1067_v49  ;;  %v1630_v12 = vunpack.c.h.b16 %v1590_v27  ;;  %v16621_v27 = vld [vmem:[#allocation10 + $0x1c8] sm:$0xf0]  ;;  %v17661_v22 = vld [vmem:[#allocation13 + $0x2064] sm:$0xf0] }
 0x2ac   :  { %v1575_v26 = vpack.c.bf16 %v1574_v21, %v1574_v21 }
 0x2ad   :  { %11686 = vmatmul.msk.bf16.vlgmr.msra.gmra.mxu0 %vm1168_vm9, %v18244_v59  ;;  %11687 = vmatmul.msk.bf16.vlgmr.msra.gmra.mxu1 %vm1168_vm9, %v18244_v59  ;;  %v1472_v4 = vpack.c.b16 %v1457_v50, %v1457_v50  ;;  %v1645_v47 = vpack.c.b16 %v1630_v12, %v1630_v12  ;;  %v11805_v50 = vld [vmem:[#allocation10 + $0x168] sm:$0xf0]  ;;  %v11828_v12 = vld [vmem:[#allocation10 + $0x190] sm:$0xf] }
 0x2ae   :  { %11688 = vmatmul.msk.bf16.vlgmr.msra.gmra.mxu2 %vm1168_vm9, %v18244_v59  ;;  %11689 = vmatmul.msk.bf16.vlgmr.msra.gmra.mxu3 %vm1168_vm9, %v18244_v59  ;;  %v11808_v63 = vor.u32 %v16609_v42, %v11805_v50  ;;  %v11838_v42 = vld [vmem:[#allocation10 + $0x1ac] sm:$0xf0] }
 0x2af   :  { %1380 = vmatpush.bf16.msra.mxu0 %v1331_v32  ;;  %1393 = vmatpush.bf16.msra.mxu1 %v1334_v33  ;;  %v1495_v16 = vsel %vm1172_vm8, %v1472_v4, 0  ;;  %v16598_v32 = vld [vmem:[#allocation10 + $0xe8] sm:$0xf0]  ;;  %v11785_v4 = vld [vmem:[#allocation10 + $0x140] sm:$0xf0] }
 0x2b0   :  { %1508 = vmatpush.bf16.msra.mxu2 %v1489_v43  ;;  %1521 = vmatpush.bf16.msra.mxu3 %v1492_v44  ;;  %v11783_v33 = vld [vmem:[#allocation10 + $0x12c] sm:$0xf]  ;;  %v11755_v41 = vor.u32 %v16598_v32, %v11754_v29  ;;  %v11788_v14 = vor.u32 %v16604_v2, %v11785_v4  ;;  %v1836_v29 = vsel %vm1172_vm8, %v1815_v24, 0  ;;  %v16622_v32 = vld [vmem:[#allocation10 + $0x1d0] sm:$0xf0]  ;;  %v1746_v2 = vld [vmem:[#allocation2 + $0x20] sm:$0xff] }
 0x2b1   :  { %v11784_v43 = vor.u32 %v16606_v34, %v11783_v33  ;;  %v1402_v44 = vld [vmem:[#allocation2 + $0x10] sm:$0xff]  ;;  %v1763_v50 = vld [vmem:[#allocation10 + $0x1f0] sm:$0xf]  ;;  %v1747_v4 = vpack.c.bf16 %v1746_v2, %v1746_v2  ;;  %v13777_v24 = vld [vmem:[#allocation13 + $0xee0] sm:$0xf] }
 0x2b2   :  { %v18280_v49 = vpack.c.bf16 %v1402_v44, %v1402_v44 }
 0x2b3   :  { %1381 = vmatpush.bf16.msra.mxu0 %v11726_v45  ;;  %1394 = vmatpush.bf16.msra.mxu1 %v11730_v46  ;;  %v1643_v45 = vpack.c.b16 %v1628_v35, %v1628_v35  ;;  %v1644_v46 = vpack.c.b16 %v1629_v37, %v1629_v37  ;;  %v16620_v35 = vld [vmem:[#allocation10 + $0x1c4] sm:$0xf]  ;;  %v11858_v37 = vld [vmem:[#allocation10 + $0x1d4] sm:$0xf0] }
 0x2b4   :  { %1509 = vmatpush.bf16.msra.mxu2 %v11759_v56  ;;  %1522 = vmatpush.bf16.msra.mxu3 %v11763_v57  ;;  %v11813_v56 = vld [vmem:[#allocation10 + $0x170] sm:$0xf0]  ;;  %v1670_v57 = vsel %vm1172_vm8, %v1645_v47, 0  ;;  %v11861_v44 = vor.u32 %v16620_v35, %v11858_v37  ;;  %v16617_v47 = vld [vmem:[#allocation10 + $0x1a8] sm:$0xf0] }
 0x2b5   :  { %v1664_v53 = vsel %vm1172_vm8, %v1643_v45, 0  ;;  %v1667_v54 = vsel %vm1172_vm8, %v1644_v46, 0  ;;  %v11830_v45 = vld [vmem:[#allocation10 + $0x1a4] sm:$0xf0]  ;;  %v11836_v46 = vld [vmem:[#allocation10 + $0x198] sm:$0xf] }
 0x2b6   :  { %v11837_v52 = vor.u32 %v16617_v47, %v11836_v46  ;;  %v14593_v37 = vld [vmem:[#allocation13 + $0x1540] sm:$0xf] }
 0x2b7   :  { %1382 = vmatpush.bf16.msra.mxu0 %v11706_v6  ;;  %1395 = vmatpush.bf16.msra.mxu1 %v11710_v8  ;;  %v11820_v6 = vor.u32 %v16613_v61, %v11819_v60  ;;  %v16607_v8 = vld [vmem:[#allocation10 + $0x144] sm:$0xf0]  ;;  %v11844_v61 = vld [vmem:[#allocation10 + $0x1a0] sm:$0xf] }
 0x2b8   :  { %1510 = vmatpush.bf16.msra.mxu2 %v11739_v3  ;;  %1523 = vmatpush.bf16.msra.mxu3 %v11743_v7  ;;  %v11799_v3 = vld [vmem:[#allocation10 + $0x13c] sm:$0xf]  ;;  %v16608_v7 = vld [vmem:[#allocation10 + $0x14c] sm:$0xf0]  ;;  %v11792_v15 = vor.u32 %v16607_v8, %v11791_v5 }
 0x2b9   :  { %v17423_v8 = vld [vmem:[#allocation13 + $0x18f4] sm:$0xf0] }
 0x2bd   :  { %11690 = vmatmul.msk.bf16.vlgmr.msrb.gmra.mxu0 %vm1168_vm9, %v18244_v59  ;;  %11731 = vmatmul.msk.bf16.vlgmr.msrb.gmra.mxu1 %vm1168_vm9, %v18265_v62  ;;  %v1501_v59 = vsel %vm1172_vm8, %v1474_v9, 0  ;;  %v16605_v9 = vld [vmem:[#allocation10 + $0x138] sm:$0xf] }
 0x2be   :  { %11732 = vmatmul.msk.bf16.vlgmr.msrb.gmra.mxu2 %vm1168_vm9, %v18265_v62  ;;  %11733 = vmatmul.msk.bf16.vlgmr.msrb.gmra.mxu3 %vm1168_vm9, %v18265_v62 }
 0x2bf   :  { %1534 = vmatpush.bf16.msrb.mxu0 %v1495_v16  ;;  %1547 = vmatpush.bf16.msrb.mxu1 %v1498_v17  ;;  %v11796_v16 = vor.u32 %v16605_v9, %v11793_v10  ;;  %v11800_v17 = vor.u32 %v16608_v7, %v11799_v3  ;;  %v16089_v9 = vld [vmem:[#allocation13 + $0x20f0] sm:$0xf]  ;;  %v17695_v3 = vld [vmem:[#allocation13 + $0x2174] sm:$0xf0] }
 0x2c0   :  { %1560 = vmatpush.bf16.msrb.mxu2 %v1501_v59  ;;  %1680 = vmatpush.bf16.msrb.mxu3 %v1661_v20  ;;  %v1801_v59 = vunpack.c.l.b16 %v1762_v13  ;;  %v1802_v20 = vunpack.c.h.b16 %v1762_v13  ;;  %v16090_v7 = vor.u32 %v17695_v3, %v16089_v9  ;;  %v17151_v13 = vld [vmem:[#allocation13 + $0x1074] sm:$0xf0] }
 0x2c3   :  { %1535 = vmatpush.bf16.msrb.mxu0 %v11767_v25  ;;  %1548 = vmatpush.bf16.msrb.mxu1 %v11771_v23  ;;  %v1816_v25 = vpack.c.b16 %v1801_v59, %v1801_v59  ;;  %v1817_v23 = vpack.c.b16 %v1802_v20, %v1802_v20 }
 0x2c4   :  { %1561 = vmatpush.bf16.msrb.mxu2 %v11775_v28  ;;  %1681 = vmatpush.bf16.msrb.mxu3 %v11804_v30  ;;  %v16619_v28 = vld [vmem:[#allocation10 + $0x1bc] sm:$0xf]  ;;  %v11850_v30 = vld [vmem:[#allocation10 + $0x1cc] sm:$0xf0] }
 0x2c5   :  { %v1839_v33 = vsel %vm1172_vm8, %v1816_v25, 0  ;;  %v1842_v34 = vsel %vm1172_vm8, %v1817_v23, 0  ;;  %v17117_v25 = vld [vmem:[#allocation13 + $0xf64] sm:$0xf0]  ;;  %v15954_v23 = vor.u32 %v17661_v22, %v15953_v19  ;;  %v16811_v19 = vld [vmem:[#allocation13 + $0x5d4] sm:$0xf0] }
 0x2c6   :  { %v15273_v22 = vld [vmem:[#allocation13 + $0x1a90] sm:$0xf] }
 0x2c7   :  { %1536 = vmatpush.bf16.msrb.mxu0 %v11747_v38  ;;  %1549 = vmatpush.bf16.msrb.mxu1 %v11751_v39  ;;  %v11849_v38 = vor.u32 %v16621_v27, %v11848_v1  ;;  %v11853_v39 = vor.u32 %v16619_v28, %v11850_v30  ;;  %v14729_v1 = vld [vmem:[#allocation13 + $0x1650] sm:$0xf]  ;;  %v17355_v27 = vld [vmem:[#allocation13 + $0x16d4] sm:$0xf0] }
 0x2c8   :  { %1562 = vmatpush.bf16.msrb.mxu2 %v11755_v41  ;;  %1682 = vmatpush.bf16.msrb.mxu3 %v11784_v43  ;;  %v16614_v41 = vld [vmem:[#allocation10 + $0x194] sm:$0xf]  ;;  %v11857_v43 = vor.u32 %v16622_v32, %v11856_v36  ;;  %v15817_v28 = vld [vmem:[#allocation13 + $0x1ed0] sm:$0xf]  ;;  %v14730_v30 = vor.u32 %v17355_v27, %v14729_v1 }
 0x2c9   :  { %v11833_v51 = vor.u32 %v16614_v41, %v11830_v45  ;;  %v13641_v36 = vld [vmem:[#allocation13 + $0xdd0] sm:$0xf]  ;;  %v17083_v32 = vld [vmem:[#allocation13 + $0xe54] sm:$0xf0]  ;;  %v17049_v45 = vld [vmem:[#allocation13 + $0xd44] sm:$0xf0] }
 0x2ca   :  { %v16947_v1 = vld [vmem:[#allocation13 + $0xa14] sm:$0xf0] }
 0x2cd   :  { %11734 = vmatmul.msk.bf16.vlgmr.msra.gmra.mxu0 %vm1168_vm9, %v18265_v62  ;;  %11735 = vmatmul.msk.bf16.vlgmr.msra.gmra.mxu1 %vm1168_vm9, %v18265_v62  ;;  %v11816_v62 = vor.u32 %v16610_v55, %v11813_v56 }
 0x2ce   :  { %11776 = vmatmul.msk.bf16.vlgmr.msra.gmra.mxu2 %vm1168_vm9, %v18280_v49  ;;  %11777 = vmatmul.msk.bf16.vlgmr.msra.gmra.mxu3 %vm1168_vm9, %v18280_v49 }
 0x2cf   :  { %1693 = vmatpush.bf16.msra.mxu0 %v1664_v53  ;;  %1706 = vmatpush.bf16.msra.mxu1 %v1667_v54  ;;  %v11841_v53 = vor.u32 %v16615_v48, %v11838_v42  ;;  %v1803_v54 = vunpack.c.l.b16 %v1763_v50  ;;  %v12825_v48 = vld [vmem:[#allocation13 + $0x770] sm:$0xf]  ;;  %v16879_v42 = vld [vmem:[#allocation13 + $0x7f4] sm:$0xf0] }
 0x2d0   :  { %1719 = vmatpush.bf16.msra.mxu2 %v1670_v57  ;;  %1732 = vmatpush.bf16.msra.mxu3 %v1673_v58  ;;  %v11864_v57 = vld [vmem:[#allocation10 + $0x1c8] sm:$0xf]  ;;  %v16623_v58 = vld [vmem:[#allocation10 + $0x1d8] sm:$0xf0] }
 0x2d1   :  { %v1818_v55 = vpack.c.b16 %v1803_v54, %v1803_v54  ;;  %v11865_v60 = vor.u32 %v16623_v58, %v11864_v57  ;;  %v14457_v50 = vld [vmem:[#allocation13 + $0x1430] sm:$0xf]  ;;  %v17015_v57 = vld [vmem:[#allocation13 + $0xc34] sm:$0xf0] }
 0x2d3   :  { %1694 = vmatpush.bf16.msra.mxu0 %v11808_v63  ;;  %1707 = vmatpush.bf16.msra.mxu1 %v11812_v0  ;;  %v1845_v56 = vsel %vm1172_vm8, %v1818_v55, 0  ;;  %v16618_v63 = vld [vmem:[#allocation10 + $0x1b0] sm:$0xf0] }
 0x2d4   :  { %1720 = vmatpush.bf16.msra.mxu2 %v11816_v62  ;;  %1733 = vmatpush.bf16.msra.mxu3 %v11820_v6  ;;  %v11845_v0 = vor.u32 %v16618_v63, %v11844_v61  ;;  %v15001_v6 = vld [vmem:[#allocation13 + $0x1870] sm:$0xf]  ;;  %v16845_v61 = vld [vmem:[#allocation13 + $0x6e4] sm:$0xf0] }
 0x2d5   :  { %v15002_v10 = vor.u32 %v17423_v8, %v15001_v6  ;;  %v17253_v6 = vld [vmem:[#allocation13 + $0x13a4] sm:$0xf0]  ;;  %v15409_v8 = vld [vmem:[#allocation13 + $0x1ba0] sm:$0xf] }
 0x2d7   :  { %1695 = vmatpush.bf16.msra.mxu0 %v11788_v14  ;;  %1708 = vmatpush.bf16.msra.mxu1 %v11792_v15  ;;  %v13914_v14 = vor.u32 %v17151_v13, %v13913_v11  ;;  %v13233_v11 = vld [vmem:[#allocation13 + $0xaa0] sm:$0xf]  ;;  %v16981_v13 = vld [vmem:[#allocation13 + $0xb24] sm:$0xf0] }
 0x2d8   :  { %1721 = vmatpush.bf16.msra.mxu2 %v11796_v16  ;;  %1734 = vmatpush.bf16.msra.mxu3 %v11800_v17  ;;  %v14865_v17 = vld [vmem:[#allocation13 + $0x1760] sm:$0xf] }
 0x2d9   :  { %v14866_v21 = vor.u32 %v17389_v18, %v14865_v17  ;;  %v13234_v17 = vor.u32 %v16981_v13, %v13233_v11  ;;  %v12553_v18 = vld [vmem:[#allocation13 + $0x550] sm:$0xf] }
 0x2dd   :  { %11778 = vmatmul.msk.bf16.vlgmr.msrb.gmra.mxu0 %vm1168_vm9, %v18280_v49  ;;  %11779 = vmatmul.msk.bf16.vlgmr.msrb.gmra.mxu1 %vm1168_vm9, %v18280_v49 }
 0x2de   :  { %11780 = vmatmul.msk.bf16.vlgmr.msrb.gmra.mxu2 %vm1168_vm9, %v18280_v49  ;;  %11821 = vmatmul.msk.bf16.vlgmr.msrb.gmra.mxu3 %vm1168_vm9, %v1575_v26  ;;  %v11829_v49 = vor.u32 %v16616_v40, %v11828_v12 }
 0x2df   :  { %1852 = vmatpush.bf16.msrb.mxu0 %v1833_v31  ;;  %1865 = vmatpush.bf16.msrb.mxu1 %v1836_v29  ;;  %v17627_v31 = vld [vmem:[#allocation13 + $0x1f54] sm:$0xf0] }
 0x2e0   :  { %1878 = vmatpush.bf16.msrb.mxu2 %v1839_v33  ;;  %1891 = vmatpush.bf16.msrb.mxu3 %v1842_v34  ;;  %v15818_v29 = vor.u32 %v17627_v31, %v15817_v28  ;;  %v13642_v33 = vor.u32 %v17083_v32, %v13641_v36  ;;  %v12417_v28 = vld [vmem:[#allocation13 + $0x440] sm:$0xf] }
 0x2e1   :  { %v14049_v32 = vld [vmem:[#allocation13 + $0x1100] sm:$0xf] }
 0x2e3   :  { %1853 = vmatpush.bf16.msrb.mxu0 %v11849_v38  ;;  %1866 = vmatpush.bf16.msrb.mxu1 %v11853_v39  ;;  %v17321_v38 = vld [vmem:[#allocation13 + $0x15c4] sm:$0xf0]  ;;  %v15681_v39 = vld [vmem:[#allocation13 + $0x1dc0] sm:$0xf] }
 0x2e4   :  { %1879 = vmatpush.bf16.msrb.mxu2 %v11857_v43  ;;  %1892 = vmatpush.bf16.msrb.mxu3 %v11861_v44  ;;  %v14594_v41 = vor.u32 %v17321_v38, %v14593_v37  ;;  %v17593_v43 = vld [vmem:[#allocation13 + $0x1e44] sm:$0xf0]  ;;  %v13505_v44 = vld [vmem:[#allocation13 + $0xcc0] sm:$0xf] }
 0x2e5   :  { %v15682_v46 = vor.u32 %v17593_v43, %v15681_v39  ;;  %v13506_v47 = vor.u32 %v17049_v45, %v13505_v44  ;;  %v17457_v39 = vld [vmem:[#allocation13 + $0x1a04] sm:$0xf0] }
 0x2e6   :  { %v16913_v43 = vld [vmem:[#allocation13 + $0x904] sm:$0xf0] }
 0x2e7   :  { %1854 = vmatpush.bf16.msrb.mxu0 %v11829_v49  ;;  %1867 = vmatpush.bf16.msrb.mxu1 %v11833_v51  ;;  %v12826_v49 = vor.u32 %v16879_v42, %v12825_v48  ;;  %v17287_v51 = vld [vmem:[#allocation13 + $0x14b4] sm:$0xf0]  ;;  %v17406_v48 = vld [vmem:[#allocation13 + $0x1874] sm:$0xf] }
 0x2e8   :  { %1880 = vmatpush.bf16.msrb.mxu2 %v11837_v52  ;;  %1893 = vmatpush.bf16.msrb.mxu3 %v11841_v53  ;;  %v15545_v52 = vld [vmem:[#allocation13 + $0x1cb0] sm:$0xf]  ;;  %v17559_v53 = vld [vmem:[#allocation13 + $0x1d34] sm:$0xf0]  ;;  %v14458_v54 = vor.u32 %v17287_v51, %v14457_v50  ;;  %v15003_v50 = vld [vmem:[#allocation13 + $0x18f8] sm:$0xf0] }
 0x2e9   :  { %v15546_v55 = vor.u32 %v17559_v53, %v15545_v52  ;;  %v16743_v51 = vld [vmem:[#allocation13 + $0x3b4] sm:$0xf0]  ;;  %v15006_v52 = vor.u32 %v17406_v48, %v15003_v50 }
 0x2ed   :  { %11822 = vmatmul.msk.bf16.vlgmr.msra.gmra.mxu0 %vm1168_vm9, %v1575_v26  ;;  %11823 = vmatmul.msk.bf16.vlgmr.msra.gmra.mxu1 %vm1168_vm9, %v1575_v26 }
 0x2ee   :  { %11824 = vmatmul.msk.bf16.vlgmr.msra.gmra.mxu2 %vm1168_vm9, %v1575_v26  ;;  %11825 = vmatmul.msk.bf16.vlgmr.msra.gmra.mxu3 %vm1168_vm9, %v1575_v26  ;;  %v13778_v26 = vor.u32 %v17117_v25, %v13777_v24  ;;  %v17491_v24 = vld [vmem:[#allocation13 + $0x1b14] sm:$0xf0] }
 0x2ef   :  { %1904 = vmatpush.bf16.msra.mxu0 %v1845_v56  ;;  %9193 = vmatpush.bf16.msra.mxu3 %v15002_v10  ;;  %v13369_v56 = vld [vmem:[#allocation13 + $0xbb0] sm:$0xf] }
 0x2f0   :  { %9180 = vmatpush.bf16.msra.mxu2 %v13914_v14  ;;  %9167 = vmatpush.bf16.msra.mxu1 %v12826_v49  ;;  %v13370_v58 = vor.u32 %v17015_v57, %v13369_v56  ;;  %v12281_v49 = vld [vmem:[#allocation13 + $0x330] sm:$0xf]  ;;  %v17100_v57 = vld [vmem:[#allocation13 + $0xee4] sm:$0xf] }
 0x2f1   :  { %v12282_v53 = vor.u32 %v16743_v51, %v12281_v49  ;;  %v16998_v51 = vld [vmem:[#allocation13 + $0xbb4] sm:$0xf] }
 0x2f3   :  { %1905 = vmatpush.bf16.msra.mxu0 %v11865_v60  ;;  %9194 = vmatpush.bf16.msra.mxu3 %v14866_v21  ;;  %v12689_v60 = vld [vmem:[#allocation13 + $0x660] sm:$0xf]  ;;  %v17219_v21 = vld [vmem:[#allocation13 + $0x1294] sm:$0xf0] }
 0x2f4   :  { %9181 = vmatpush.bf16.msra.mxu2 %v13778_v26  ;;  %v12690_v63 = vor.u32 %v16845_v61, %v12689_v60  ;;  %v13097_v26 = vld [vmem:[#allocation13 + $0x990] sm:$0xf]  ;;  %v17372_v60 = vld [vmem:[#allocation13 + $0x1764] sm:$0xf] }
 0x2f5   :  { %v13098_v27 = vor.u32 %v16947_v1, %v13097_v26  ;;  %v16794_v26 = vld [vmem:[#allocation13 + $0x554] sm:$0xf]  ;;  %v12555_v1 = vld [vmem:[#allocation13 + $0x5d8] sm:$0xf0] }
 0x2f6   :  { %9168 = vmatpush.bf16.msra.mxu1 %v12690_v63  ;;  %v14867_v63 = vld [vmem:[#allocation13 + $0x17e8] sm:$0xf0] }
 0x2f7   :  { %1906 = vmatpush.bf16.msra.mxu0 %v11845_v0  ;;  %9195 = vmatpush.bf16.msra.mxu3 %v14730_v30  ;;  %v16777_v30 = vld [vmem:[#allocation13 + $0x4c4] sm:$0xf0] }
 0x2f8   :  { %9182 = vmatpush.bf16.msra.mxu2 %v13642_v33  ;;  %v12418_v31 = vor.u32 %v16777_v30, %v12417_v28  ;;  %v17185_v33 = vld [vmem:[#allocation13 + $0x1184] sm:$0xf0]  ;;  %v18339_v28 = vld [vmem:[#allocation13 + $0x2420] sm:$0x77] }
 0x2f9   :  { %v14050_v38 = vor.u32 %v17185_v33, %v14049_v32  ;;  %v17032_v30 = vld [vmem:[#allocation13 + $0xcc4] sm:$0xf]  ;;  %v14595_v33 = vld [vmem:[#allocation13 + $0x15c8] sm:$0xf0] }
 0x2fb   :  { %9196 = vmatpush.bf16.msra.mxu3 %v14594_v41  ;;  %v12961_v41 = vld [vmem:[#allocation13 + $0x880] sm:$0xf] }
 0x2fc   :  { %9183 = vmatpush.bf16.msra.mxu2 %v13506_v47  ;;  %v12962_v45 = vor.u32 %v16913_v43, %v12961_v41  ;;  %v13915_v47 = vld [vmem:[#allocation13 + $0x1078] sm:$0xf0]  ;;  %v16760_v43 = vld [vmem:[#allocation13 + $0x444] sm:$0xf] }
 0x2fd   :  { %11866 = vmatmul.msk.bf16.vlgmr.msrb.gmra.mxu0 %vm1168_vm9, %v1747_v4  ;;  %11867 = vmatmul.msk.bf16.vlgmr.msrb.gmra.mxu1 %vm1168_vm9, %v1747_v4 }
 0x2fe   :  { %11868 = vmatmul.msk.bf16.vlgmr.msrb.gmra.mxu2 %vm1168_vm9, %v1747_v4  ;;  %11869 = vmatmul.msk.bf16.vlgmr.msrb.gmra.mxu3 %vm1168_vm9, %v1747_v4 }
 0x2ff   :  { %9206 = vmatpush.bf16.msrb.mxu0 %v16090_v7  ;;  %9197 = vmatpush.bf16.msra.mxu3 %v14458_v54  ;;  %v17525_v7 = vld [vmem:[#allocation13 + $0x1c24] sm:$0xf0]  ;;  %v16862_v54 = vld [vmem:[#allocation13 + $0x774] sm:$0xf] }
 0x300   :  { %9184 = vmatpush.bf16.msra.mxu2 %v13370_v58  ;;  %v15410_v14 = vor.u32 %v17525_v7, %v15409_v8  ;;  %v13779_v58 = vld [vmem:[#allocation13 + $0xf68] sm:$0xf0]  ;;  %v14870_v8 = vor.u32 %v17372_v60, %v14867_v63  ;;  %v17763_v63 = vld [vmem:[#allocation13 + $0x2394] sm:$0xf0] }
 0x301   :  { %v13782_v61 = vor.u32 %v17100_v57, %v13779_v58  ;;  %v16726_v57 = vld [vmem:[#allocation13 + $0x334] sm:$0xf]  ;;  %v12283_v58 = vld [vmem:[#allocation13 + $0x3b8] sm:$0xf0] }
 0x302   :  { %v12286_v60 = vor.u32 %v16726_v57, %v12283_v58  ;;  %v18355_v58 = vld [vmem:[#allocation11] sm:$0x1f] }
 0x303   :  { %9207 = vmatpush.bf16.msrb.mxu0 %v15954_v23  ;;  %v15274_v23 = vor.u32 %v17491_v24, %v15273_v22  ;;  %v12009_v22 = vld [vmem:[#allocation13 + $0x110] sm:$0xf]  ;;  %v16675_v24 = vld [vmem:[#allocation13 + $0x194] sm:$0xf0] }
 0x304   :  { %9185 = vmatpush.bf16.msra.mxu2 %v13234_v17 }
 0x307   :  { %9208 = vmatpush.bf16.msrb.mxu0 %v15818_v29 }
 0x308   :  { %9186 = vmatpush.bf16.msra.mxu2 %v13098_v27  ;;  %v12558_v27 = vor.u32 %v16794_v26, %v12555_v1  ;;  %v13099_v26 = vld [vmem:[#allocation13 + $0xa18] sm:$0xf0] }
 0x30b   :  { %9209 = vmatpush.bf16.msrb.mxu0 %v15682_v46  ;;  %v17134_v46 = vld [vmem:[#allocation13 + $0xff4] sm:$0xf] }
 0x30c   :  { %v13918_v42 = vor.u32 %v17134_v46, %v13915_v47  ;;  %9187 = vmatpush.bf16.msra.mxu2 %v12962_v45 }
 0x30d   :  { %11870 = vmatmul.msk.bf16.vlgmr.msra.gmra.mxu0 %vm1168_vm9, %v1747_v4  ;;  %v14321_v4 = vld [vmem:[#allocation13 + $0x1320] sm:$0xf] }
 0x30e   :  { %v14322_v3 = vor.u32 %v17253_v6, %v14321_v4  ;;  %v12145_v4 = vld [vmem:[#allocation13 + $0x220] sm:$0xf]  ;;  %v16709_v6 = vld [vmem:[#allocation13 + $0x2a4] sm:$0xf0] }
 0x30f   :  { %9210 = vmatpush.bf16.msrb.mxu0 %v15546_v55  ;;  %v12827_v55 = vld [vmem:[#allocation13 + $0x7f8] sm:$0xf0] }
 0x310   :  { %9198 = vmatpush.bf16.msra.mxu3 %v14322_v3  ;;  %v12830_v56 = vor.u32 %v16862_v54, %v12827_v55  ;;  %v12691_v3 = vld [vmem:[#allocation13 + $0x6e8] sm:$0xf0]  ;;  %v17270_v54 = vld [vmem:[#allocation13 + $0x1434] sm:$0xf]  ;;  %v14459_v55 = vld [vmem:[#allocation13 + $0x14b8] sm:$0xf0] }
 0x312   :  { %9232 = vmatpush.bf16.msrb.mxu2 %v12830_v56  ;;  %v14462_v56 = vor.u32 %v17270_v54, %v14459_v55 }
 0x313   :  { %9211 = vmatpush.bf16.msrb.mxu0 %v15410_v14 }
 0x317   :  { %9212 = vmatpush.bf16.msrb.mxu0 %v15274_v23  ;;  %v12010_v23 = vor.u32 %v16675_v24, %v12009_v22 }
 0x32a   :  { %v18315_v5 = vpop.f32.mrf.mxu0  ;;  %v18317_v62 = vpop.f32.mrf.mxu1 }
 0x331   :  { %v18319_v15 = vpop.f32.mrf.mxu2  ;;  %v18321_v16 = vpop.f32.mrf.mxu3 }
 0x332   :  { %v1199_v59 = vpop.f32.mrf.mxu0  ;;  %v1212_v20 = vpop.f32.mrf.mxu1 }
 0x333   :  { %v14185_v59 = vld [vmem:[#allocation13 + $0x1210] sm:$0xf]  ;;  %v12554_v20 = vor.u32 %v16811_v19, %v12553_v18  ;;  %v17066_v18 = vld [vmem:[#allocation13 + $0xdd4] sm:$0xf]  ;;  %v13643_v19 = vld [vmem:[#allocation13 + $0xe58] sm:$0xf0] }
 0x334   :  { %v14186_v25 = vor.u32 %v17219_v21, %v14185_v59  ;;  %v17338_v59 = vld [vmem:[#allocation13 + $0x1654] sm:$0xf]  ;;  %v14731_v21 = vld [vmem:[#allocation13 + $0x16d8] sm:$0xf0] }
 0x335   :  { %9169 = vmatpush.bf16.msra.mxu1 %v12554_v20  ;;  %v13646_v20 = vor.u32 %v17066_v18, %v13643_v19  ;;  %v16225_v19 = vld [vmem:[#allocation13 + $0x2200] sm:$0xf] }
 0x336   :  { %9199 = vmatpush.bf16.msra.mxu3 %v14186_v25  ;;  %v14734_v25 = vor.u32 %v17338_v59, %v14731_v21  ;;  %v17729_v59 = vld [vmem:[#allocation13 + $0x2284] sm:$0xf0] }
 0x337   :  { %v16226_v22 = vor.u32 %v17729_v59, %v16225_v19 }
 0x339   :  { %v1225_v34 = vpop.f32.mrf.mxu2  ;;  %v1238_v35 = vpop.f32.mrf.mxu3  ;;  %9170 = vmatpush.bf16.msra.mxu1 %v12418_v31  ;;  %v13507_v31 = vld [vmem:[#allocation13 + $0xd48] sm:$0xf0] }
 0x33a   :  { %v18323_v12 = vpop.f32.mrf.mxu0  ;;  %v18325_v40 = vpop.f32.mrf.mxu1  ;;  %v15137_v34 = vld [vmem:[#allocation13 + $0x1980] sm:$0xf]  ;;  %9200 = vmatpush.bf16.msra.mxu3 %v14050_v38  ;;  %v13510_v32 = vor.u32 %v17032_v30, %v13507_v31  ;;  %v16641_v38 = vld [vmem:[#allocation13 + $0x84] sm:$0xf0]  ;;  %v14187_v30 = vld [vmem:[#allocation13 + $0x1298] sm:$0xf0] }
 0x33b   :  { %v15138_v44 = vor.u32 %v17457_v39, %v15137_v34  ;;  %v11873_v34 = vld [vmem:[#allocation13] sm:$0xf]  ;;  %v16658_v31 = vld [vmem:[#allocation13 + $0x114] sm:$0xf] }
 0x33c   :  { %v11874_v41 = vor.u32 %v16641_v38, %v11873_v34  ;;  %v12963_v34 = vld [vmem:[#allocation13 + $0x908] sm:$0xf0]  ;;  %v17168_v38 = vld [vmem:[#allocation13 + $0x1104] sm:$0xf] }
 0x33d   :  { %9213 = vmatpush.bf16.msrb.mxu0 %v15138_v44  ;;  %9171 = vmatpush.bf16.msra.mxu1 %v12282_v53  ;;  %v12419_v44 = vld [vmem:[#allocation13 + $0x4c8] sm:$0xf0] }
 0x33e   :  { %9245 = vmatpush.bf16.msrb.mxu3 %v13918_v42  ;;  %v12422_v48 = vor.u32 %v16760_v43, %v12419_v44  ;;  %v16624_v43 = vld [vmem:[#allocation13 + $0x4] sm:$0xf]  ;;  %v11875_v44 = vld [vmem:[#allocation13 + $0x88] sm:$0xf0] }
 0x341   :  { %v18327_v0 = vpop.f32.mrf.mxu2  ;;  %v18329_v2 = vpop.f32.mrf.mxu3  ;;  %9258 = vmatpush.bf16.msra.mxu0 %v15006_v52  ;;  %v13371_v52 = vld [vmem:[#allocation13 + $0xc38] sm:$0xf0] }
 0x342   :  { %v1251_v9 = vpop.f32.mrf.mxu0  ;;  %v1347_v10 = vpop.f32.mrf.mxu1  ;;  %9246 = vmatpush.bf16.msrb.mxu3 %v13782_v61  ;;  %v13374_v53 = vor.u32 %v16998_v51, %v13371_v52  ;;  %v16361_v61 = vld [vmem:[#allocation13 + $0x2310] sm:$0xf]  ;;  %v1359_v57 = vadd.f32 %v18327_v0, %v18317_v62  ;;  %v1372_v0 = vadd.f32 %v18329_v2, %v18319_v15  ;;  %v1922_v15 = vperm.slane %v18355_v58, 3 }
 0x343   :  { %v12146_v9 = vor.u32 %v16709_v6, %v12145_v4  ;;  %v16828_v10 = vld [vmem:[#allocation13 + $0x664] sm:$0xf]  ;;  %v16362_v4 = vor.u32 %v17763_v63, %v16361_v61  ;;  %v1919_v63 = vperm.slane %v18355_v58, 0 }
 0x344   :  { %v12694_v13 = vor.u32 %v16828_v10, %v12691_v3  ;;  %v16964_v6 = vld [vmem:[#allocation13 + $0xaa4] sm:$0xf]  ;;  %v14323_v3 = vld [vmem:[#allocation13 + $0x13a8] sm:$0xf0] }
 0x345   :  { %9259 = vmatpush.bf16.msra.mxu0 %v14870_v8  ;;  %9172 = vmatpush.bf16.msra.mxu1 %v12146_v9  ;;  %v13235_v8 = vld [vmem:[#allocation13 + $0xb28] sm:$0xf0]  ;;  %v17236_v9 = vld [vmem:[#allocation13 + $0x1324] sm:$0xf] }
 0x346   :  { %9233 = vmatpush.bf16.msrb.mxu2 %v12694_v13  ;;  %9247 = vmatpush.bf16.msrb.mxu3 %v13646_v20  ;;  %v13238_v10 = vor.u32 %v16964_v6, %v13235_v8  ;;  %v16692_v13 = vld [vmem:[#allocation13 + $0x224] sm:$0xf] }
 0x349   :  { %v1360_v29 = vpop.f32.mrf.mxu2  ;;  %v1373_v36 = vpop.f32.mrf.mxu3  ;;  %9260 = vmatpush.bf16.msra.mxu0 %v14734_v25  ;;  %9173 = vmatpush.bf16.msra.mxu1 %v12010_v23  ;;  %v16930_v23 = vld [vmem:[#allocation13 + $0x994] sm:$0xf] }
 0x34a   :  { %v18331_v35 = vpop.f32.mrf.mxu0  ;;  %v18333_v37 = vpop.f32.mrf.mxu1  ;;  %v17304_v29 = vld [vmem:[#allocation13 + $0x1544] sm:$0xf]  ;;  %v6680_v36 = vunpack.c.l.b16 %v18339_v28  ;;  %9234 = vmatpush.bf16.msrb.mxu2 %v12558_v27  ;;  %9248 = vmatpush.bf16.msrb.mxu3 %v13510_v32  ;;  %v13102_v1 = vor.u32 %v16930_v23, %v13099_v26  ;;  %v17202_v27 = vld [vmem:[#allocation13 + $0x1214] sm:$0xf] }
 0x34b   :  { %v14598_v39 = vor.u32 %v17304_v29, %v14595_v33  ;;  %v14190_v29 = vor.u32 %v17202_v27, %v14187_v30  ;;  %v16896_v33 = vld [vmem:[#allocation13 + $0x884] sm:$0xf] }
 0x34c   :  { %v7870_v45 = vpack.c.b16 %v6680_v36, %v6680_v36  ;;  %v12011_v36 = vld [vmem:[#allocation13 + $0x198] sm:$0xf0]  ;;  %v17644_v26 = vld [vmem:[#allocation13 + $0x1fe4] sm:$0xf] }
 0x34d   :  { %9261 = vmatpush.bf16.msra.mxu0 %v14598_v39  ;;  %9174 = vmatpush.bf16.msra.mxu1 %v11874_v41  ;;  %v12014_v32 = vor.u32 %v16658_v31, %v12011_v36  ;;  %v12966_v39 = vor.u32 %v16896_v33, %v12963_v34  ;;  %v14051_v41 = vld [vmem:[#allocation13 + $0x1188] sm:$0xf0]  ;;  %v16363_v31 = vld [vmem:[#allocation13 + $0x2398] sm:$0xf0] }
 0x34e   :  { %v9066_v49 = vsel %vm9064_vm10, %v7870_v45, 0  ;;  %9235 = vmatpush.bf16.msrb.mxu2 %v12422_v48  ;;  %9249 = vmatpush.bf16.msrb.mxu3 %v13374_v53  ;;  %v14054_v45 = vor.u32 %v17168_v38, %v14051_v41  ;;  %v12833_v38 = vld [vmem:[#allocation13 + $0x778] sm:$0xf] }
 0x34f   :  { %v13921_v41 = vld [vmem:[#allocation13 + $0xff8] sm:$0xf] }
 0x351   :  { %v18335_v7 = vpop.f32.mrf.mxu2  ;;  %v18337_v11 = vpop.f32.mrf.mxu3  ;;  %9224 = vmatpush.bf16.msrb.mxu1 %v9066_v49  ;;  %9262 = vmatpush.bf16.msra.mxu0 %v14462_v56  ;;  %v1346_v56 = vadd.f32 %v18325_v40, %v18315_v5 }
 0x352   :  { %v1386_v14 = vpop.f32.mrf.mxu0  ;;  %v1399_v17 = vpop.f32.mrf.mxu1  ;;  %9236 = vmatpush.bf16.msrb.mxu2 %v12286_v60  ;;  %9250 = vmatpush.bf16.msrb.mxu3 %v13238_v10  ;;  %v1569_v61 = vadd.f32 %v18337_v11, %v1359_v57  ;;  %v1920_v10 = vperm.slane %v18355_v58, 1 }
 0x353   :  { %v12147_v14 = vld [vmem:[#allocation13 + $0x2a8] sm:$0xf0]  ;;  %v14326_v17 = vor.u32 %v17236_v9, %v14323_v3  ;;  %v1568_v60 = vadd.f32 %v18335_v7, %v1346_v56  ;;  %v6681_v3 = vunpack.c.h.b16 %v18339_v28  ;;  %v1385_v7 = vadd.f32 %v18331_v35, %v18321_v16 }
 0x354   :  { %v12150_v18 = vor.u32 %v16692_v13, %v12147_v14  ;;  %v15955_v16 = vld [vmem:[#allocation13 + $0x2068] sm:$0xf0] }
 0x355   :  { %9225 = vmatpush.bf16.msrb.mxu1 %v16362_v4  ;;  %9263 = vmatpush.bf16.msra.mxu0 %v14326_v17  ;;  %v17678_v17 = vld [vmem:[#allocation13 + $0x20f4] sm:$0xf]  ;;  %v7871_v19 = vpack.c.b16 %v6681_v3, %v6681_v3  ;;  %v15958_v34 = vor.u32 %v17644_v26, %v15955_v16  ;;  %v1923_v3 = vperm.slane %v18355_v58, 4  ;;  %v13513_v26 = vld [vmem:[#allocation13 + $0xcc8] sm:$0xf] }
 0x356   :  { %9237 = vmatpush.bf16.msrb.mxu2 %v12150_v18  ;;  %9251 = vmatpush.bf16.msrb.mxu3 %v13102_v1  ;;  %v16091_v18 = vld [vmem:[#allocation13 + $0x2178] sm:$0xf0]  ;;  %v17050_v16 = vld [vmem:[#allocation13 + $0xd4c] sm:$0xf0] }
 0x357   :  { %v16094_v2 = vor.u32 %v17678_v17, %v16091_v18  ;;  %v13649_v18 = vld [vmem:[#allocation13 + $0xdd8] sm:$0xf] }
 0x359   :  { %v1514_v46 = vpop.f32.mrf.mxu2  ;;  %v1527_v47 = vpop.f32.mrf.mxu3  ;;  %9226 = vmatpush.bf16.msrb.mxu1 %v16226_v22  ;;  %9264 = vmatpush.bf16.msra.mxu0 %v14190_v29 }
 0x35a   :  { %v18342_v42 = vpop.f32.mrf.mxu0  ;;  %v18344_v50 = vpop.f32.mrf.mxu1  ;;  %9238 = vmatpush.bf16.msrb.mxu2 %v12014_v32  ;;  %v11878_v46 = vor.u32 %v16624_v43, %v11875_v44  ;;  %9252 = vmatpush.bf16.msrb.mxu3 %v12966_v39  ;;  %v16880_v39 = vld [vmem:[#allocation13 + $0x7fc] sm:$0xf0] }
 0x35b   :  { %v1570_v59 = vadd.f32 %v18342_v42, %v1372_v0  ;;  %v9069_v42 = vsel %vm9064_vm10, %v7871_v19, 0  ;;  %v12834_v57 = vor.u32 %v16880_v39, %v12833_v38  ;;  %v12289_v38 = vld [vmem:[#allocation13 + $0x338] sm:$0xf]  ;;  %v16744_v39 = vld [vmem:[#allocation13 + $0x3bc] sm:$0xf0] }
 0x35d   :  { %9265 = vmatpush.bf16.msra.mxu0 %v14054_v45  ;;  %v17152_v45 = vld [vmem:[#allocation13 + $0x107c] sm:$0xf0] }
 0x35e   :  { %9239 = vmatpush.bf16.msrb.mxu2 %v11878_v46  ;;  %v17610_v46 = vld [vmem:[#allocation13 + $0x1ed4] sm:$0xf] }
 0x361   :  { %v18347_v20 = vpop.f32.mrf.mxu2  ;;  %v1684_v21 = vpop.f32.mrf.mxu3 }
 0x362   :  { %v1540_v24 = vpop.f32.mrf.mxu0  ;;  %v1553_v25 = vpop.f32.mrf.mxu1  ;;  %v1740_v4 = vadd.f32 %v1684_v21, %v1568_v60  ;;  %v1571_v21 = vadd.f32 %v18344_v50, %v1385_v7  ;;  %v17746_v50 = vld [vmem:[#allocation13 + $0x2314] sm:$0xf]  ;;  %v13922_v60 = vor.u32 %v17152_v45, %v13921_v41  ;;  %v13377_v41 = vld [vmem:[#allocation13 + $0xbb8] sm:$0xf] }
 0x363   :  { %v1921_v24 = vperm.slane %v18355_v58, 2  ;;  %v17084_v58 = vld [vmem:[#allocation13 + $0xe5c] sm:$0xf0] }
 0x369   :  { %v1566_v47 = vpop.f32.mrf.mxu2  ;;  %v1686_v48 = vpop.f32.mrf.mxu3 }
 0x36a   :  { %v1697_v49 = vpop.f32.mrf.mxu0  ;;  %v1710_v51 = vpop.f32.mrf.mxu1  ;;  %v15819_v47 = vld [vmem:[#allocation13 + $0x1f58] sm:$0xf0]  ;;  %v16366_v48 = vor.u32 %v17746_v50, %v16363_v31  ;;  %v17508_v50 = vld [vmem:[#allocation13 + $0x1ba4] sm:$0xf] }
 0x36b   :  { %v1741_v6 = vadd.f32 %v1697_v49, %v1569_v61  ;;  %v1742_v25 = vadd.f32 %v1710_v51, %v1570_v59  ;;  %v1398_v49 = vadd.f32 %v18333_v37, %v18323_v12  ;;  %v17712_v51 = vld [vmem:[#allocation13 + $0x2204] sm:$0xf]  ;;  %v15822_v61 = vor.u32 %v17610_v46, %v15819_v47  ;;  %v17542_v59 = vld [vmem:[#allocation13 + $0x1cb4] sm:$0xf]  ;;  %v15275_v47 = vld [vmem:[#allocation13 + $0x1b18] sm:$0xf0] }
 0x36c   :  { %v17474_v46 = vld [vmem:[#allocation13 + $0x1a94] sm:$0xf] }
 0x36d   :  { %v1572_v56 = vadd.f32 %v18347_v20, %v1398_v49  ;;  %v15683_v20 = vld [vmem:[#allocation13 + $0x1e48] sm:$0xf0]  ;;  %v17628_v49 = vld [vmem:[#allocation13 + $0x1f5c] sm:$0xf0] }
 0x371   :  { %v1723_v52 = vpop.f32.mrf.mxu2  ;;  %v18349_v53 = vpop.f32.mrf.mxu3 }
 0x372   :  { %v1699_v54 = vpop.f32.mrf.mxu0  ;;  %v1712_v55 = vpop.f32.mrf.mxu1  ;;  %v1743_v23 = vadd.f32 %v1723_v52, %v1571_v21  ;;  %v16227_v52 = vld [vmem:[#allocation13 + $0x2288] sm:$0xf0]  ;;  %v1744_v37 = vadd.f32 %v18349_v53, %v1572_v56  ;;  %v16812_v53 = vld [vmem:[#allocation13 + $0x5dc] sm:$0xf0]  ;;  %v15547_v21 = vld [vmem:[#allocation13 + $0x1d38] sm:$0xf0] }
 0x373   :  { %v16230_v12 = vor.u32 %v17712_v51, %v16227_v52  ;;  %v12290_v51 = vor.u32 %v16744_v39, %v12289_v38  ;;  %v13241_v56 = vld [vmem:[#allocation13 + $0xaa8] sm:$0xf]  ;;  %v17764_v39 = vld [vmem:[#allocation13 + $0x239c] sm:$0xf0] }
 0x379   :  { %v1725_v8 = vpop.f32.mrf.mxu2  ;;  %v1738_v9 = vpop.f32.mrf.mxu3 }
 0x37a   :  { %v1856_v5 = vpop.f32.mrf.mxu0  ;;  %v1869_v40 = vpop.f32.mrf.mxu1  ;;  %v16846_v8 = vld [vmem:[#allocation13 + $0x6ec] sm:$0xf0]  ;;  %v13785_v9 = vld [vmem:[#allocation13 + $0xee8] sm:$0xf] }
 0x37b   :  { %v1912_v13 = vadd.f32 %v1856_v5, %v1740_v4  ;;  %v1913_v62 = vadd.f32 %v1869_v40, %v1741_v6  ;;  %v17576_v5 = vld [vmem:[#allocation13 + $0x1dc4] sm:$0xf] }
 0x37c   :  { %v15686_v17 = vor.u32 %v17576_v5, %v15683_v20  ;;  %v15009_v5 = vld [vmem:[#allocation13 + $0x1878] sm:$0xf]  ;;  %v17424_v20 = vld [vmem:[#allocation13 + $0x18fc] sm:$0xf0] }
 0x37d   :  { %v1929_v11 = vadd.f32 %v1919_v63, %v1912_v13  ;;  %v1930_v14 = vadd.f32 %v1920_v10, %v1913_v62  ;;  %v12697_v63 = vld [vmem:[#allocation13 + $0x668] sm:$0xf]  ;;  %v17118_v10 = vld [vmem:[#allocation13 + $0xf6c] sm:$0xf0] }
 0x37e   :  { %v12698_v7 = vor.u32 %v16846_v8, %v12697_v63  ;;  %v17440_v63 = vld [vmem:[#allocation13 + $0x1984] sm:$0xf]  ;;  %v18393_v8 = vld [vmem:[#allocation13 + $0x2428] sm:$0x77] }
 0x37f   :  { %v1934_v28 = vmax.f32 %v1929_v11, 0.0  ;;  %v1935_v22 = vmax.f32 %v1930_v14, 0.0  ;;  %v13786_v11 = vor.u32 %v17118_v10, %v13785_v9  ;;  %v12561_v14 = vld [vmem:[#allocation13 + $0x558] sm:$0xf]  ;;  %v15139_v9 = vld [vmem:[#allocation13 + $0x1a08] sm:$0xf0] }
 0x380   :  { %v15689_v10 = vld [vmem:[#allocation13 + $0x1dc8] sm:$0xf] }
 0x381   :  { %v18370_v35 = vpack.c.bf16 %v1934_v28, %v1934_v28  ;;  %v18372_v1 = vpack.c.bf16 %v1935_v22, %v1935_v22  ;;  %v1882_v27 = vpop.f32.mrf.mxu2  ;;  %v1895_v30 = vpop.f32.mrf.mxu3  ;;  %v16097_v28 = vld [vmem:[#allocation13 + $0x20f8] sm:$0xf]  ;;  %v17696_v22 = vld [vmem:[#allocation13 + $0x217c] sm:$0xf0] }
 0x382   :  { %v1914_v29 = vadd.f32 %v1882_v27, %v1742_v25  ;;  %v1915_v36 = vadd.f32 %v1895_v30, %v1743_v23  ;;  %v1858_v32 = vpop.f32.mrf.mxu0  ;;  %v1871_v33 = vpop.f32.mrf.mxu1  ;;  %v12562_v25 = vor.u32 %v16812_v53, %v12561_v14  ;;  %v13650_v23 = vor.u32 %v17084_v58, %v13649_v18  ;;  %v15553_v53 = vld [vmem:[#allocation13 + $0x1cb8] sm:$0xf]  ;;  %v17560_v18 = vld [vmem:[#allocation13 + $0x1d3c] sm:$0xf0] }
 0x383   :  { %9175 = vmatmul.bf16.vlgmr.msra.gmra.mxu1 %v18370_v35  ;;  %9188 = vmatmul.bf16.vlgmr.msra.gmra.mxu2 %v18372_v1  ;;  %v15550_v30 = vor.u32 %v17542_v59, %v15547_v21  ;;  %v17662_v32 = vld [vmem:[#allocation13 + $0x206c] sm:$0xf0]  ;;  %v14873_v59 = vld [vmem:[#allocation13 + $0x1768] sm:$0xf] }
 0x384   :  { %v1931_v43 = vadd.f32 %v1921_v24, %v1914_v29  ;;  %v1932_v44 = vadd.f32 %v1922_v15, %v1915_v36  ;;  %9271 = vmatpush.bf16.msra.mxu1 %v16094_v2  ;;  %9289 = vmatpush.bf16.msra.mxu2 %v9069_v42  ;;  %v12425_v15 = vld [vmem:[#allocation13 + $0x448] sm:$0xf]  ;;  %v16778_v2 = vld [vmem:[#allocation13 + $0x4cc] sm:$0xf0]  ;;  %v16098_v42 = vor.u32 %v17696_v22, %v16097_v28  ;;  %v15411_v29 = vld [vmem:[#allocation13 + $0x1c28] sm:$0xf0] }
 0x385   :  { %v15961_v36 = vld [vmem:[#allocation13 + $0x1fe8] sm:$0xf]  ;;  %v12426_v33 = vor.u32 %v16778_v2, %v12425_v15  ;;  %v17390_v21 = vld [vmem:[#allocation13 + $0x17ec] sm:$0xf0]  ;;  %v15554_v15 = vor.u32 %v17560_v18, %v15553_v53  ;;  %v16863_v2 = vld [vmem:[#allocation13 + $0x77c] sm:$0xf] }
 0x386   :  { %v1936_v54 = vmax.f32 %v1931_v43, 0.0  ;;  %v1937_v55 = vmax.f32 %v1932_v44, 0.0  ;;  %v17016_v43 = vld [vmem:[#allocation13 + $0xc3c] sm:$0xf0]  ;;  %v15414_v44 = vor.u32 %v17508_v50, %v15411_v29  ;;  %v15962_v45 = vor.u32 %v17662_v32, %v15961_v36  ;;  %v11881_v28 = vld [vmem:[#allocation13 + $0x8] sm:$0xf] }
 0x387   :  { %v13378_v52 = vor.u32 %v17016_v43, %v13377_v41  ;;  %v16642_v22 = vld [vmem:[#allocation13 + $0x8c] sm:$0xf0]  ;;  %v14737_v29 = vld [vmem:[#allocation13 + $0x1658] sm:$0xf]  ;;  %v17356_v36 = vld [vmem:[#allocation13 + $0x16dc] sm:$0xf0] }
 0x388   :  { %v18380_v4 = vpack.c.bf16 %v1936_v54, %v1936_v54  ;;  %v18382_v6 = vpack.c.bf16 %v1937_v55, %v1937_v55  ;;  %9272 = vmatpush.bf16.msra.mxu1 %v15958_v34  ;;  %9290 = vmatpush.bf16.msra.mxu2 %v16366_v48  ;;  %v13514_v34 = vor.u32 %v17050_v16, %v13513_v26  ;;  %v15825_v48 = vld [vmem:[#allocation13 + $0x1ed8] sm:$0xf]  ;;  %v12153_v54 = vld [vmem:[#allocation13 + $0x228] sm:$0xf]  ;;  %v16710_v55 = vld [vmem:[#allocation13 + $0x2ac] sm:$0xf0] }
 0x389   :  { %v1884_v40 = vpop.f32.mrf.mxu2  ;;  %v1897_v13 = vpop.f32.mrf.mxu3  ;;  %v12835_v26 = vld [vmem:[#allocation13 + $0x800] sm:$0xf0]  ;;  %v14874_v16 = vor.u32 %v17390_v21, %v14873_v59  ;;  %v11882_v50 = vor.u32 %v16642_v22, %v11881_v28  ;;  %v16829_v41 = vld [vmem:[#allocation13 + $0x66c] sm:$0xf]  ;;  %v12699_v43 = vld [vmem:[#allocation13 + $0x6f0] sm:$0xf0] }
 0x38a   :  { %9201 = vmatmul.bf16.vlgmr.msra.gmra.mxu3 %v18380_v4  ;;  %9214 = vmatmul.bf16.vlgmr.msrb.gmra.mxu0 %v18382_v6  ;;  %v1908_v62 = vpop.f32.mrf.mxu0  ;;  %v12017_v40 = vld [vmem:[#allocation13 + $0x118] sm:$0xf]  ;;  %v16676_v13 = vld [vmem:[#allocation13 + $0x19c] sm:$0xf0]  ;;  %v15963_v53 = vld [vmem:[#allocation13 + $0x2070] sm:$0xf0] }
 0x38b   :  { %9297 = vmatpush.bf16.msra.mxu3 %v12834_v57  ;;  %9310 = vmatpush.bf16.msrb.mxu0 %v13922_v60  ;;  %v1916_v0 = vadd.f32 %v1908_v62, %v1744_v37  ;;  %v16982_v57 = vld [vmem:[#allocation13 + $0xb2c] sm:$0xf0]  ;;  %v15278_v60 = vor.u32 %v17474_v46, %v15275_v47  ;;  %v12154_v37 = vor.u32 %v16710_v55, %v12153_v54  ;;  %v13105_v62 = vld [vmem:[#allocation13 + $0x998] sm:$0xf]  ;;  %v17492_v46 = vld [vmem:[#allocation13 + $0x1b1c] sm:$0xf0] }
 0x38c   :  { %9273 = vmatpush.bf16.msra.mxu1 %v15822_v61  ;;  %9291 = vmatpush.bf16.msra.mxu2 %v16230_v12  ;;  %v15826_v61 = vor.u32 %v17628_v49, %v15825_v48  ;;  %v17594_v12 = vld [vmem:[#allocation13 + $0x1e4c] sm:$0xf0]  ;;  %v12018_v58 = vor.u32 %v16676_v13, %v12017_v40  ;;  %v14601_v47 = vld [vmem:[#allocation13 + $0x1548] sm:$0xf]  ;;  %v16795_v55 = vld [vmem:[#allocation13 + $0x55c] sm:$0xf] }
 0x38d   :  { %v1933_v19 = vadd.f32 %v1923_v3, %v1916_v0  ;;  %v13242_v3 = vor.u32 %v16982_v57, %v13241_v56  ;;  %v16948_v0 = vld [vmem:[#allocation13 + $0xa1c] sm:$0xf0]  ;;  %v15690_v14 = vor.u32 %v17594_v12, %v15689_v10  ;;  %v17322_v48 = vld [vmem:[#allocation13 + $0x15cc] sm:$0xf0]  ;;  %v12563_v57 = vld [vmem:[#allocation13 + $0x5e0] sm:$0xf0] }
 0x38e   :  { %v17730_v54 = vld [vmem:[#allocation13 + $0x228c] sm:$0xf0]  ;;  %v16099_v10 = vld [vmem:[#allocation13 + $0x2180] sm:$0xf0]  ;;  %v14465_v12 = vld [vmem:[#allocation13 + $0x1438] sm:$0xf]  ;;  %v12566_v40 = vor.u32 %v16795_v55, %v12563_v57 }
 0x38f   :  { %v1938_v24 = vmax.f32 %v1933_v19, 0.0  ;;  %9298 = vmatpush.bf16.msra.mxu3 %v12698_v7  ;;  %9311 = vmatpush.bf16.msrb.mxu0 %v13786_v11  ;;  %v6682_v7 = vunpack.c.l.b16 %v18393_v8  ;;  %v15142_v11 = vor.u32 %v17440_v63, %v15139_v9  ;;  %v13106_v19 = vor.u32 %v16948_v0, %v13105_v62  ;;  %v17679_v9 = vld [vmem:[#allocation13 + $0x20fc] sm:$0xf]  ;;  %v16761_v0 = vld [vmem:[#allocation13 + $0x44c] sm:$0xf] }
 0x390   :  { %9274 = vmatpush.bf16.msra.mxu1 %v15686_v17  ;;  %v15010_v17 = vor.u32 %v17424_v20, %v15009_v5  ;;  %v14602_v63 = vor.u32 %v17322_v48, %v14601_v47  ;;  %v15011_v5 = vld [vmem:[#allocation13 + $0x1900] sm:$0xf0]  ;;  %v16102_v62 = vor.u32 %v17679_v9, %v16099_v10  ;;  %v14329_v18 = vld [vmem:[#allocation13 + $0x1328] sm:$0xf]  ;;  %v14875_v59 = vld [vmem:[#allocation13 + $0x17f0] sm:$0xf0] }
 0x391   :  { %v18388_v27 = vpack.c.bf16 %v1938_v24, %v1938_v24  ;;  %v12969_v24 = vld [vmem:[#allocation13 + $0x888] sm:$0xf]  ;;  %v16727_v22 = vld [vmem:[#allocation13 + $0x33c] sm:$0xf]  ;;  %v13923_v47 = vld [vmem:[#allocation13 + $0x1080] sm:$0xf0] }
 0x392   :  { %v1910_v31 = vpop.f32.mrf.mxu0  ;;  %v15555_v57 = vld [vmem:[#allocation13 + $0x1d40] sm:$0xf0]  ;;  %v17101_v10 = vld [vmem:[#allocation13 + $0xeec] sm:$0xf] }
 0x393   :  { %9299 = vmatpush.bf16.msra.mxu3 %v12562_v25  ;;  %9312 = vmatpush.bf16.msrb.mxu0 %v13650_v23  ;;  %v16914_v25 = vld [vmem:[#allocation13 + $0x90c] sm:$0xf0]  ;;  %v7872_v23 = vpack.c.b16 %v6682_v7, %v6682_v7  ;;  %v12427_v7 = vld [vmem:[#allocation13 + $0x4d0] sm:$0xf0] }
 0x394   :  { %16495 = vmatmul.msk.bf16.vlgmr.msrb.gmra.mxu1 %vm9060_vm11, %v18388_v27  ;;  %9240 = vmatmul.bf16.vlgmr.msrb.gmra.mxu2 %v18370_v35  ;;  %v12970_v31 = vor.u32 %v16914_v25, %v12969_v24  ;;  %v12430_v21 = vor.u32 %v16761_v0, %v12427_v7  ;;  %v12291_v24 = vld [vmem:[#allocation13 + $0x3c0] sm:$0xf0]  ;;  %v17237_v0 = vld [vmem:[#allocation13 + $0x132c] sm:$0xf]  ;;  %v14331_v7 = vld [vmem:[#allocation13 + $0x13b0] sm:$0xf0] }
 0x395   :  { %9275 = vmatpush.bf16.msra.mxu1 %v15550_v30  ;;  %9336 = vmatpush.bf16.msrb.mxu2 %v16098_v42  ;;  %v15417_v30 = vld [vmem:[#allocation13 + $0x1ba8] sm:$0xf]  ;;  %v17526_v42 = vld [vmem:[#allocation13 + $0x1c2c] sm:$0xf0]  ;;  %v9072_v32 = vsel %vm9064_vm10, %v7872_v23, 0 }
 0x396   :  { %v15418_v38 = vor.u32 %v17526_v42, %v15417_v30  ;;  %v17339_v30 = vld [vmem:[#allocation13 + $0x165c] sm:$0xf]  ;;  %v14739_v42 = vld [vmem:[#allocation13 + $0x16e0] sm:$0xf0] }
 0x397   :  { %9300 = vmatpush.bf16.msra.mxu3 %v12426_v33  ;;  %9313 = vmatpush.bf16.msrb.mxu0 %v13514_v34  ;;  %v12838_v33 = vor.u32 %v16863_v2, %v12835_v26  ;;  %v16369_v34 = vld [vmem:[#allocation13 + $0x2318] sm:$0xf]  ;;  %v15827_v2 = vld [vmem:[#allocation13 + $0x1f60] sm:$0xf0] }
 0x398   :  { %v16370_v49 = vor.u32 %v17764_v39, %v16369_v34  ;;  %v14193_v26 = vld [vmem:[#allocation13 + $0x1218] sm:$0xf]  ;;  %v17577_v34 = vld [vmem:[#allocation13 + $0x1dcc] sm:$0xf]  ;;  %v14057_v39 = vld [vmem:[#allocation13 + $0x1108] sm:$0xf] }
 0x399   :  { %9276 = vmatpush.bf16.msra.mxu1 %v15414_v44  ;;  %9337 = vmatpush.bf16.msrb.mxu2 %v15962_v45  ;;  %v14738_v44 = vor.u32 %v17356_v36, %v14737_v29  ;;  %v15281_v45 = vld [vmem:[#allocation13 + $0x1a98] sm:$0xf]  ;;  %v16693_v29 = vld [vmem:[#allocation13 + $0x22c] sm:$0xf]  ;;  %v12155_v36 = vld [vmem:[#allocation13 + $0x2b0] sm:$0xf0] }
 0x39a   :  { %9253 = vmatmul.bf16.vlgmr.msrb.gmra.mxu3 %v18372_v1  ;;  %9266 = vmatmul.bf16.vlgmr.msra.gmra.mxu0 %v18380_v4  ;;  %v15282_v56 = vor.u32 %v17492_v46, %v15281_v45  ;;  %v12158_v45 = vor.u32 %v16693_v29, %v12155_v36  ;;  %v17135_v46 = vld [vmem:[#allocation13 + $0xffc] sm:$0xf]  ;;  %v17169_v29 = vld [vmem:[#allocation13 + $0x110c] sm:$0xf]  ;;  %v14059_v36 = vld [vmem:[#allocation13 + $0x1190] sm:$0xf0] }
 0x39b   :  { %9301 = vmatpush.bf16.msra.mxu3 %v12290_v51  ;;  %9314 = vmatpush.bf16.msrb.mxu0 %v13378_v52  ;;  %v12702_v51 = vor.u32 %v16829_v41, %v12699_v43  ;;  %v16233_v52 = vld [vmem:[#allocation13 + $0x2208] sm:$0xf]  ;;  %v17186_v41 = vld [vmem:[#allocation13 + $0x118c] sm:$0xf0]  ;;  %v17305_v43 = vld [vmem:[#allocation13 + $0x154c] sm:$0xf] }
 0x39c   :  { %v16234_v20 = vor.u32 %v17730_v54, %v16233_v52  ;;  %v6683_v52 = vunpack.c.h.b16 %v18393_v8  ;;  %v14058_v54 = vor.u32 %v17186_v41, %v14057_v39  ;;  %v11883_v8 = vld [vmem:[#allocation13 + $0x90] sm:$0xf0]  ;;  %v17697_v39 = vld [vmem:[#allocation13 + $0x2184] sm:$0xf0]  ;;  %v16999_v41 = vld [vmem:[#allocation13 + $0xbbc] sm:$0xf] }
 0x39d   :  { %9277 = vmatpush.bf16.msra.mxu1 %v15278_v60  ;;  %9338 = vmatpush.bf16.msrb.mxu2 %v15826_v61  ;;  %v15145_v60 = vld [vmem:[#allocation13 + $0x1988] sm:$0xf]  ;;  %v17458_v61 = vld [vmem:[#allocation13 + $0x1a0c] sm:$0xf0] }
 0x39e   :  { %v15146_v13 = vor.u32 %v17458_v61, %v15145_v60  ;;  %v13926_v60 = vor.u32 %v17135_v46, %v13923_v47  ;;  %v17271_v61 = vld [vmem:[#allocation13 + $0x143c] sm:$0xf]  ;;  %v13929_v46 = vld [vmem:[#allocation13 + $0x1000] sm:$0xf]  ;;  %v17153_v47 = vld [vmem:[#allocation13 + $0x1084] sm:$0xf0] }
 0x39f   :  { %9302 = vmatpush.bf16.msra.mxu3 %v12154_v37  ;;  %9315 = vmatpush.bf16.msrb.mxu0 %v13242_v3  ;;  %v17288_v37 = vld [vmem:[#allocation13 + $0x14bc] sm:$0xf0]  ;;  %v17407_v3 = vld [vmem:[#allocation13 + $0x187c] sm:$0xf] }
 0x3a1   :  { %9278 = vmatpush.bf16.msra.mxu1 %v15142_v11  ;;  %9339 = vmatpush.bf16.msrb.mxu2 %v15690_v14  ;;  %v14466_v11 = vor.u32 %v17288_v37, %v14465_v12  ;;  %v15014_v14 = vor.u32 %v17407_v3, %v15011_v5  ;;  %v13787_v12 = vld [vmem:[#allocation13 + $0xf70] sm:$0xf0]  ;;  %v16625_v3 = vld [vmem:[#allocation13 + $0xc] sm:$0xf]  ;;  %v7873_v5 = vpack.c.b16 %v6683_v52, %v6683_v52 }
 0x3a3   :  { %9303 = vmatpush.bf16.msra.mxu3 %v12018_v58  ;;  %9316 = vmatpush.bf16.msrb.mxu0 %v13106_v19  ;;  %v17254_v58 = vld [vmem:[#allocation13 + $0x13ac] sm:$0xf0]  ;;  %v17373_v19 = vld [vmem:[#allocation13 + $0x176c] sm:$0xf] }
 0x3a4   :  { %9279 = vmatmul.bf16.vlgmr.msra.gmra.mxu1 %v18382_v6  ;;  %16496 = vmatmul.msk.bf16.vlgmr.msra.gmra.mxu2 %vm9060_vm11, %v18388_v27  ;;  %v14330_v25 = vor.u32 %v17254_v58, %v14329_v18  ;;  %v14878_v23 = vor.u32 %v17373_v19, %v14875_v59  ;;  %v9075_v18 = vsel %vm9064_vm10, %v7873_v5, 0  ;;  %v17475_v58 = vld [vmem:[#allocation13 + $0x1a9c] sm:$0xf]  ;;  %v14334_v19 = vor.u32 %v17237_v0, %v14331_v7  ;;  %v15283_v59 = vld [vmem:[#allocation13 + $0x1b20] sm:$0xf0] }
 0x3a5   :  { %9323 = vmatpush.bf16.msrb.mxu1 %v15010_v17  ;;  %9340 = vmatpush.bf16.msrb.mxu2 %v15554_v15  ;;  %v17645_v17 = vld [vmem:[#allocation13 + $0x1fec] sm:$0xf]  ;;  %v17611_v15 = vld [vmem:[#allocation13 + $0x1edc] sm:$0xf]  ;;  %v17357_v5 = vld [vmem:[#allocation13 + $0x16e4] sm:$0xf0] }
 0x3a6   :  { %v15966_v28 = vor.u32 %v17645_v17, %v15963_v53  ;;  %v13651_v17 = vld [vmem:[#allocation13 + $0xe60] sm:$0xf0]  ;;  %v13657_v7 = vld [vmem:[#allocation13 + $0xde0] sm:$0xf] }
 0x3a7   :  { %9304 = vmatpush.bf16.msra.mxu3 %v11882_v50  ;;  %9317 = vmatpush.bf16.msrb.mxu0 %v12970_v31  ;;  %v12294_v50 = vor.u32 %v16727_v22, %v12291_v24  ;;  %v15830_v31 = vor.u32 %v17611_v15, %v15827_v2  ;;  %v17203_v24 = vld [vmem:[#allocation13 + $0x121c] sm:$0xf]  ;;  %v13515_v15 = vld [vmem:[#allocation13 + $0xd50] sm:$0xf0]  ;;  %v15286_v2 = vor.u32 %v17475_v58, %v15283_v59  ;;  %v13107_v0 = vld [vmem:[#allocation13 + $0xa20] sm:$0xf0] }
 0x3a8   :  { %v17323_v58 = vld [vmem:[#allocation13 + $0x15d4] sm:$0xf0] }
 0x3a9   :  { %9324 = vmatpush.bf16.msrb.mxu1 %v14874_v16  ;;  %9341 = vmatpush.bf16.msrb.mxu2 %v15418_v38  ;;  %v17220_v16 = vld [vmem:[#allocation13 + $0x129c] sm:$0xf0]  ;;  %v15691_v38 = vld [vmem:[#allocation13 + $0x1e50] sm:$0xf0]  ;;  %v17595_v59 = vld [vmem:[#allocation13 + $0x1e54] sm:$0xf0] }
 0x3aa   :  { %9305 = vmatmul.bf16.vlgmr.msra.gmra.mxu3 %v18370_v35  ;;  %9318 = vmatmul.bf16.vlgmr.msrb.gmra.mxu0 %v18372_v1  ;;  %v15694_v48 = vor.u32 %v17577_v34, %v15691_v38  ;;  %v17425_v34 = vld [vmem:[#allocation13 + $0x1904] sm:$0xf0]  ;;  %v16105_v38 = vld [vmem:[#allocation13 + $0x2100] sm:$0xf] }
 0x3ab   :  { %9354 = vmatpush.bf16.msrb.mxu3 %v9072_v32  ;;  %9362 = vmatpush.bf16.msra.mxu0 %v12838_v33  ;;  %v14194_v32 = vor.u32 %v17220_v16, %v14193_v26  ;;  %v14742_v33 = vor.u32 %v17339_v30, %v14739_v42  ;;  %v17441_v16 = vld [vmem:[#allocation13 + $0x198c] sm:$0xf]  ;;  %v15147_v30 = vld [vmem:[#allocation13 + $0x1a10] sm:$0xf0] }
 0x3ac   :  { %v17713_v42 = vld [vmem:[#allocation13 + $0x220c] sm:$0xf] }
 0x3ad   :  { %9325 = vmatpush.bf16.msrb.mxu1 %v14738_v44  ;;  %9342 = vmatpush.bf16.msrb.mxu2 %v15282_v56  ;;  %v14603_v44 = vld [vmem:[#allocation13 + $0x15d0] sm:$0xf0]  ;;  %v17543_v56 = vld [vmem:[#allocation13 + $0x1cbc] sm:$0xf] }
 0x3ae   :  { %v14606_v55 = vor.u32 %v17305_v43, %v14603_v44  ;;  %v15558_v37 = vor.u32 %v17543_v56, %v15555_v57  ;;  %v13379_v43 = vld [vmem:[#allocation13 + $0xc40] sm:$0xf0]  ;;  %v15150_v44 = vor.u32 %v17441_v16, %v15147_v30  ;;  %v15969_v56 = vld [vmem:[#allocation13 + $0x1ff0] sm:$0xf]  ;;  %v13930_v57 = vor.u32 %v17153_v47, %v13929_v46  ;;  %v14473_v30 = vld [vmem:[#allocation13 + $0x1440] sm:$0xf] }
 0x3af   :  { %9355 = vmatpush.bf16.msrb.mxu3 %v16370_v49  ;;  %9363 = vmatpush.bf16.msra.mxu0 %v12702_v51  ;;  %v16659_v49 = vld [vmem:[#allocation13 + $0x11c] sm:$0xf]  ;;  %v12019_v51 = vld [vmem:[#allocation13 + $0x1a0] sm:$0xf0]  ;;  %v13382_v52 = vor.u32 %v16999_v41, %v13379_v43  ;;  %v14337_v43 = vld [vmem:[#allocation13 + $0x1330] sm:$0xf] }
 0x3b0   :  { %v12022_v9 = vor.u32 %v16659_v49, %v12019_v51  ;;  %v16106_v51 = vor.u32 %v17697_v39, %v16105_v38  ;;  %v16847_v38 = vld [vmem:[#allocation13 + $0x6f4] sm:$0xf0]  ;;  %v15425_v47 = vld [vmem:[#allocation13 + $0x1bb0] sm:$0xf] }
 0x3b1   :  { %9326 = vmatpush.bf16.msrb.mxu1 %v14602_v63  ;;  %9343 = vmatpush.bf16.msrb.mxu2 %v15146_v13  ;;  %v14467_v63 = vld [vmem:[#allocation13 + $0x14c0] sm:$0xf0]  ;;  %v15419_v13 = vld [vmem:[#allocation13 + $0x1c30] sm:$0xf0] }
 0x3b3   :  { %9356 = vmatpush.bf16.msrb.mxu3 %v16234_v20  ;;  %9364 = vmatpush.bf16.msra.mxu0 %v12566_v40  ;;  %v14470_v20 = vor.u32 %v17271_v61, %v14467_v63  ;;  %v17509_v40 = vld [vmem:[#allocation13 + $0x1bac] sm:$0xf]  ;;  %v13243_v63 = vld [vmem:[#allocation13 + $0xb30] sm:$0xf0] }
 0x3b4   :  { %9344 = vmatmul.bf16.vlgmr.msrb.gmra.mxu2 %v18382_v6  ;;  %v15422_v53 = vor.u32 %v17509_v40, %v15419_v13  ;;  %v16965_v61 = vld [vmem:[#allocation13 + $0xaac] sm:$0xf]  ;;  %v17629_v13 = vld [vmem:[#allocation13 + $0x1f64] sm:$0xf0] }
 0x3b5   :  { %9327 = vmatpush.bf16.msrb.mxu1 %v14466_v11  ;;  %9388 = vmatpush.bf16.msra.mxu2 %v15014_v14  ;;  %v11886_v11 = vor.u32 %v16625_v3, %v11883_v8  ;;  %v17067_v14 = vld [vmem:[#allocation13 + $0xddc] sm:$0xf]  ;;  %v13246_v3 = vor.u32 %v16965_v61, %v13243_v63  ;;  %v14745_v8 = vld [vmem:[#allocation13 + $0x1660] sm:$0xf] }
 0x3b6   :  { %v13654_v22 = vor.u32 %v17067_v14, %v13651_v17  ;;  %v14746_v14 = vor.u32 %v17357_v5, %v14745_v8  ;;  %v14609_v17 = vld [vmem:[#allocation13 + $0x1550] sm:$0xf]  ;;  %v16779_v8 = vld [vmem:[#allocation13 + $0x4d4] sm:$0xf0] }
 0x3b7   :  { %9401 = vmatpush.bf16.msra.mxu3 %v16102_v62  ;;  %9365 = vmatpush.bf16.msra.mxu0 %v12430_v21  ;;  %v13790_v62 = vor.u32 %v17101_v10, %v13787_v12  ;;  %v17747_v21 = vld [vmem:[#allocation13 + $0x231c] sm:$0xf]  ;;  %v17119_v10 = vld [vmem:[#allocation13 + $0xf74] sm:$0xf0] }
 0x3b9   :  { %9328 = vmatpush.bf16.msrb.mxu1 %v14330_v25  ;;  %9389 = vmatpush.bf16.msra.mxu2 %v14878_v23  ;;  %v14195_v25 = vld [vmem:[#allocation13 + $0x12a0] sm:$0xf0]  ;;  %v17033_v23 = vld [vmem:[#allocation13 + $0xccc] sm:$0xf] }
 0x3ba   :  { %16497 = vmatmul.msk.bf16.vlgmr.msrb.gmra.mxu3 %vm9060_vm11, %v18388_v27 }
 0x3bb   :  { %9402 = vmatpush.bf16.msra.mxu3 %v15966_v28  ;;  %9366 = vmatpush.bf16.msra.mxu0 %v12294_v50  ;;  %v16371_v28 = vld [vmem:[#allocation13 + $0x23a0] sm:$0xf0]  ;;  %v14198_v50 = vor.u32 %v17203_v24, %v14195_v25  ;;  %v13521_v24 = vld [vmem:[#allocation13 + $0xcd0] sm:$0xf]  ;;  %v17051_v25 = vld [vmem:[#allocation13 + $0xd54] sm:$0xf0] }
 0x3bc   :  { %v16374_v26 = vor.u32 %v17747_v21, %v16371_v28  ;;  %v16897_v28 = vld [vmem:[#allocation13 + $0x88c] sm:$0xf] }
 0x3bd   :  { %9329 = vmatpush.bf16.msrb.mxu1 %v14194_v32  ;;  %9390 = vmatpush.bf16.msra.mxu2 %v14742_v33  ;;  %v13518_v32 = vor.u32 %v17033_v23, %v13515_v15  ;;  %v15017_v33 = vld [vmem:[#allocation13 + $0x1880] sm:$0xf]  ;;  %v16881_v15 = vld [vmem:[#allocation13 + $0x804] sm:$0xf0] }
 0x3be   :  { %v15018_v49 = vor.u32 %v17425_v34, %v15017_v33  ;;  %v12841_v23 = vld [vmem:[#allocation13 + $0x780] sm:$0xf]  ;;  %v17017_v33 = vld [vmem:[#allocation13 + $0xc44] sm:$0xf0]  ;;  %v12705_v34 = vld [vmem:[#allocation13 + $0x670] sm:$0xf] }
 0x3bf   :  { %9403 = vmatpush.bf16.msra.mxu3 %v15830_v31  ;;  %9367 = vmatpush.bf16.msra.mxu0 %v12158_v45  ;;  %v16235_v31 = vld [vmem:[#allocation13 + $0x2290] sm:$0xf0]  ;;  %v12706_v46 = vor.u32 %v16847_v38, %v12705_v34 }
 0x3c0   :  { %v16238_v45 = vor.u32 %v17713_v42, %v16235_v31  ;;  %v17289_v42 = vld [vmem:[#allocation13 + $0x14c4] sm:$0xf0]  ;;  %v12842_v31 = vor.u32 %v16881_v15, %v12841_v23 }
 0x3c1   :  { %9330 = vmatpush.bf16.msrb.mxu1 %v14058_v54  ;;  %9391 = vmatpush.bf16.msra.mxu2 %v14606_v55  ;;  %v14881_v54 = vld [vmem:[#allocation13 + $0x1770] sm:$0xf]  ;;  %v17391_v55 = vld [vmem:[#allocation13 + $0x17f4] sm:$0xf0]  ;;  %v14474_v39 = vor.u32 %v17289_v42, %v14473_v30 }
 0x3c2   :  { %v14882_v12 = vor.u32 %v17391_v55, %v14881_v54  ;;  %v16813_v54 = vld [vmem:[#allocation13 + $0x5e4] sm:$0xf0] }
 0x3c3   :  { %9404 = vmatpush.bf16.msra.mxu3 %v15694_v48  ;;  %9368 = vmatpush.bf16.msra.mxu0 %v12022_v9  ;;  %v14062_v48 = vor.u32 %v17169_v29, %v14059_v36  ;;  %v13793_v9 = vld [vmem:[#allocation13 + $0xef0] sm:$0xf]  ;;  %v15561_v29 = vld [vmem:[#allocation13 + $0x1cc0] sm:$0xf]  ;;  %v17561_v36 = vld [vmem:[#allocation13 + $0x1d44] sm:$0xf0] }
 0x3c4   :  { %9331 = vmatmul.bf16.vlgmr.msrb.gmra.mxu1 %v18380_v4  ;;  %v13794_v40 = vor.u32 %v17119_v10, %v13793_v9  ;;  %v15562_v41 = vor.u32 %v17561_v36, %v15561_v29  ;;  %v15289_v9 = vld [vmem:[#allocation13 + $0x1aa0] sm:$0xf]  ;;  %v17493_v10 = vld [vmem:[#allocation13 + $0x1b24] sm:$0xf0]  ;;  %v12161_v29 = vld [vmem:[#allocation13 + $0x230] sm:$0xf] }
 0x3c5   :  { %9375 = vmatpush.bf16.msra.mxu1 %v13926_v60  ;;  %9392 = vmatpush.bf16.msra.mxu2 %v14470_v20  ;;  %v17663_v60 = vld [vmem:[#allocation13 + $0x2074] sm:$0xf0]  ;;  %v15833_v20 = vld [vmem:[#allocation13 + $0x1ee0] sm:$0xf] }
 0x3c6   :  { %v16711_v36 = vld [vmem:[#allocation13 + $0x2b4] sm:$0xf0] }
 0x3c7   :  { %9405 = vmatpush.bf16.msra.mxu3 %v15558_v37  ;;  %9369 = vmatpush.bf16.msra.mxu0 %v11886_v11  ;;  %v15970_v37 = vor.u32 %v17663_v60, %v15969_v56  ;;  %v17085_v11 = vld [vmem:[#allocation13 + $0xe64] sm:$0xf0] }
 0x3c8   :  { %v13658_v21 = vor.u32 %v17085_v11, %v13657_v7  ;;  %v17221_v60 = vld [vmem:[#allocation13 + $0x12a4] sm:$0xf0]  ;;  %v12977_v7 = vld [vmem:[#allocation13 + $0x890] sm:$0xf] }
 0x3c9   :  { %9376 = vmatpush.bf16.msra.mxu1 %v13790_v62  ;;  %9393 = vmatpush.bf16.msra.mxu2 %v14334_v19  ;;  %v16931_v62 = vld [vmem:[#allocation13 + $0x99c] sm:$0xf]  ;;  %v15697_v19 = vld [vmem:[#allocation13 + $0x1dd0] sm:$0xf] }
 0x3ca   :  { %9370 = vmatmul.bf16.vlgmr.msra.gmra.mxu0 %v18370_v35 }
 0x3cb   :  { %9406 = vmatpush.bf16.msra.mxu3 %v15422_v53  ;;  %9419 = vmatpush.bf16.msrb.mxu0 %v9075_v18  ;;  %v15834_v53 = vor.u32 %v17629_v13, %v15833_v20  ;;  %v13110_v18 = vor.u32 %v16931_v62, %v13107_v0  ;;  %v14065_v20 = vld [vmem:[#allocation13 + $0x1110] sm:$0xf]  ;;  %v15290_v13 = vor.u32 %v17493_v10, %v15289_v9  ;;  %v17459_v0 = vld [vmem:[#allocation13 + $0x1a14] sm:$0xf0]  ;;  %v17306_v9 = vld [vmem:[#allocation13 + $0x1554] sm:$0xf] }
 0x3cc   :  { %v15153_v62 = vld [vmem:[#allocation13 + $0x1990] sm:$0xf]  ;;  %v14611_v10 = vld [vmem:[#allocation13 + $0x15d8] sm:$0xf0] }
 0x3cd   :  { %9377 = vmatpush.bf16.msra.mxu1 %v13654_v22  ;;  %9394 = vmatpush.bf16.msra.mxu2 %v14198_v50  ;;  %v12971_v22 = vld [vmem:[#allocation13 + $0x910] sm:$0xf0]  ;;  %v13522_v50 = vor.u32 %v17051_v25, %v13521_v24  ;;  %v12843_v24 = vld [vmem:[#allocation13 + $0x808] sm:$0xf0]  ;;  %v15154_v25 = vor.u32 %v17459_v0, %v15153_v62 }
 0x3ce   :  { %v12974_v16 = vor.u32 %v16897_v28, %v12971_v22  ;;  %v16745_v28 = vld [vmem:[#allocation13 + $0x3c4] sm:$0xf0]  ;;  %v16864_v22 = vld [vmem:[#allocation13 + $0x784] sm:$0xf]  ;;  %v13387_v62 = vld [vmem:[#allocation13 + $0xc48] sm:$0xf0] }
 0x3cf   :  { %9407 = vmatpush.bf16.msra.mxu3 %v15286_v2  ;;  %9420 = vmatpush.bf16.msrb.mxu0 %v16374_v26  ;;  %v14610_v2 = vor.u32 %v17323_v58, %v14609_v17  ;;  %v15698_v26 = vor.u32 %v17595_v59, %v15697_v19  ;;  %v16915_v17 = vld [vmem:[#allocation13 + $0x914] sm:$0xf0]  ;;  %v17408_v58 = vld [vmem:[#allocation13 + $0x1884] sm:$0xf]  ;;  %v15019_v19 = vld [vmem:[#allocation13 + $0x1908] sm:$0xf0]  ;;  %v12846_v42 = vor.u32 %v16864_v22, %v12843_v24 }
 0x3d0   :  { %v12297_v59 = vld [vmem:[#allocation13 + $0x340] sm:$0xf]  ;;  %v12978_v15 = vor.u32 %v16915_v17, %v12977_v7  ;;  %v16728_v17 = vld [vmem:[#allocation13 + $0x344] sm:$0xf]  ;;  %v13251_v22 = vld [vmem:[#allocation13 + $0xb38] sm:$0xf0] }
 0x3d1   :  { %9378 = vmatpush.bf16.msra.mxu1 %v13518_v32  ;;  %9395 = vmatpush.bf16.msra.mxu2 %v14062_v48  ;;  %v13385_v32 = vld [vmem:[#allocation13 + $0xbc0] sm:$0xf]  ;;  %v17527_v48 = vld [vmem:[#allocation13 + $0x1c34] sm:$0xf0]  ;;  %v12298_v30 = vor.u32 %v16745_v28, %v12297_v59  ;;  %v17765_v59 = vld [vmem:[#allocation13 + $0x23a4] sm:$0xf0] }
 0x3d2   :  { %v15426_v56 = vor.u32 %v17527_v48, %v15425_v47  ;;  %v14747_v47 = vld [vmem:[#allocation13 + $0x16e8] sm:$0xf0]  ;;  %v12025_v48 = vld [vmem:[#allocation13 + $0x120] sm:$0xf]  ;;  %v16966_v28 = vld [vmem:[#allocation13 + $0xab4] sm:$0xf] }
 0x3d3   :  { %9408 = vmatpush.bf16.msra.mxu3 %v15150_v44  ;;  %9421 = vmatpush.bf16.msrb.mxu0 %v16238_v45  ;;  %v17255_v44 = vld [vmem:[#allocation13 + $0x13b4] sm:$0xf0]  ;;  %v13386_v45 = vor.u32 %v17017_v33, %v13385_v32  ;;  %v16830_v32 = vld [vmem:[#allocation13 + $0x674] sm:$0xf]  ;;  %v12707_v33 = vld [vmem:[#allocation13 + $0x6f8] sm:$0xf0] }
 0x3d4   :  { %9396 = vmatmul.bf16.vlgmr.msra.gmra.mxu2 %v18380_v4  ;;  %v14338_v55 = vor.u32 %v17255_v44, %v14337_v43  ;;  %v18416_v43 = vld [vmem:[#allocation13 + $0x2430] sm:$0x77]  ;;  %v12162_v44 = vor.u32 %v16711_v36, %v12161_v29  ;;  %v16107_v29 = vld [vmem:[#allocation13 + $0x2188] sm:$0xf0]  ;;  %v16932_v36 = vld [vmem:[#allocation13 + $0x9a4] sm:$0xf] }
 0x3d5   :  { %9379 = vmatpush.bf16.msra.mxu1 %v13382_v52  ;;  %9440 = vmatpush.bf16.msrb.mxu2 %v13930_v57  ;;  %v12569_v52 = vld [vmem:[#allocation13 + $0x560] sm:$0xf] }
 0x3d6   :  { %9409 = vmatmul.bf16.vlgmr.msra.gmra.mxu3 %v18382_v6  ;;  %v14201_v57 = vld [vmem:[#allocation13 + $0x1220] sm:$0xf]  ;;  %v12570_v63 = vor.u32 %v16813_v54, %v12569_v52  ;;  %v12571_v52 = vld [vmem:[#allocation13 + $0x5e8] sm:$0xf0] }
 0x3d7   :  { %9453 = vmatpush.bf16.msrb.mxu3 %v15018_v49  ;;  %9466 = vmatpush.bf16.msra.mxu0 %v16106_v51  ;;  %v13249_v49 = vld [vmem:[#allocation13 + $0xab0] sm:$0xf]  ;;  %v16983_v51 = vld [vmem:[#allocation13 + $0xb34] sm:$0xf0]  ;;  %v14202_v5 = vor.u32 %v17221_v60, %v14201_v57  ;;  %v17034_v57 = vld [vmem:[#allocation13 + $0xcd4] sm:$0xf] }
 0x3d8   :  { %v13250_v61 = vor.u32 %v16983_v51, %v13249_v49  ;;  %v16677_v49 = vld [vmem:[#allocation13 + $0x1a4] sm:$0xf0]  ;;  %v16796_v51 = vld [vmem:[#allocation13 + $0x564] sm:$0xf]  ;;  %v13523_v60 = vld [vmem:[#allocation13 + $0xd58] sm:$0xf0] }
 0x3d9   :  { %9380 = vmatpush.bf16.msra.mxu1 %v13246_v3  ;;  %9441 = vmatpush.bf16.msrb.mxu2 %v13794_v40  ;;  %v12433_v3 = vld [vmem:[#allocation13 + $0x450] sm:$0xf]  ;;  %v17187_v40 = vld [vmem:[#allocation13 + $0x1194] sm:$0xf0] }
 0x3da   :  { %16498 = vmatmul.msk.bf16.vlgmr.msrb.gmra.mxu0 %vm9060_vm11, %v18388_v27 }
 0x3db   :  { %9454 = vmatpush.bf16.msrb.mxu3 %v14882_v12  ;;  %9467 = vmatpush.bf16.msra.mxu0 %v15970_v37  ;;  %v13113_v12 = vld [vmem:[#allocation13 + $0x9a0] sm:$0xf]  ;;  %v16949_v37 = vld [vmem:[#allocation13 + $0xa24] sm:$0xf0] }
 0x3dc   :  { %v13114_v11 = vor.u32 %v16949_v37, %v13113_v12  ;;  %v11889_v12 = vld [vmem:[#allocation13 + $0x10] sm:$0xf]  ;;  %v16643_v37 = vld [vmem:[#allocation13 + $0x94] sm:$0xf0] }
 0x3dd   :  { %9381 = vmatpush.bf16.msra.mxu1 %v13110_v18  ;;  %9442 = vmatpush.bf16.msrb.mxu2 %v13658_v21  ;;  %v13931_v18 = vld [vmem:[#allocation13 + $0x1088] sm:$0xf0]  ;;  %v14066_v21 = vor.u32 %v17187_v40, %v14065_v20  ;;  %v14614_v40 = vor.u32 %v17306_v9, %v14611_v10  ;;  %v11890_v0 = vor.u32 %v16643_v37, %v11889_v12  ;;  %v12849_v9 = vld [vmem:[#allocation13 + $0x788] sm:$0xf]  ;;  %v16882_v10 = vld [vmem:[#allocation13 + $0x80c] sm:$0xf0] }
 0x3de   :  { %v11891_v12 = vld [vmem:[#allocation13 + $0x98] sm:$0xf0]  ;;  %v13937_v37 = vld [vmem:[#allocation13 + $0x1008] sm:$0xf] }
 0x3df   :  { %9455 = vmatpush.bf16.msrb.mxu3 %v14746_v14  ;;  %9468 = vmatpush.bf16.msra.mxu0 %v15834_v53  ;;  %v12434_v14 = vor.u32 %v16779_v8, %v12433_v3  ;;  %v17136_v53 = vld [vmem:[#allocation13 + $0x1004] sm:$0xf]  ;;  %v16762_v3 = vld [vmem:[#allocation13 + $0x454] sm:$0xf]  ;;  %v12435_v8 = vld [vmem:[#allocation13 + $0x4d8] sm:$0xf0] }
 0x3e0   :  { %v13934_v23 = vor.u32 %v17136_v53, %v13931_v18  ;;  %v12438_v7 = vor.u32 %v16762_v3, %v12435_v8  ;;  %v12299_v53 = vld [vmem:[#allocation13 + $0x3c8] sm:$0xf0]  ;;  %v17154_v3 = vld [vmem:[#allocation13 + $0x108c] sm:$0xf0] }
 0x3e1   :  { %9382 = vmatpush.bf16.msra.mxu1 %v12974_v16  ;;  %9443 = vmatpush.bf16.msrb.mxu2 %v13522_v50  ;;  %v13795_v16 = vld [vmem:[#allocation13 + $0xf78] sm:$0xf0]  ;;  %v17374_v50 = vld [vmem:[#allocation13 + $0x1774] sm:$0xf]  ;;  %v12302_v24 = vor.u32 %v16728_v17, %v12299_v53  ;;  %v16848_v53 = vld [vmem:[#allocation13 + $0x6fc] sm:$0xf0] }
 0x3e3   :  { %9456 = vmatpush.bf16.msrb.mxu3 %v14610_v2  ;;  %9469 = vmatpush.bf16.msra.mxu0 %v15698_v26  ;;  %v15022_v2 = vor.u32 %v17408_v58, %v15019_v19  ;;  %v17102_v26 = vld [vmem:[#allocation13 + $0xef4] sm:$0xf]  ;;  %v16377_v19 = vld [vmem:[#allocation13 + $0x2320] sm:$0xf] }
 0x3e4   :  { %9383 = vmatmul.bf16.vlgmr.msra.gmra.mxu1 %v18372_v1  ;;  %v13798_v34 = vor.u32 %v17102_v26, %v13795_v16  ;;  %v12163_v26 = vld [vmem:[#allocation13 + $0x2b8] sm:$0xf0]  ;;  %v13254_v16 = vor.u32 %v16966_v28, %v13251_v22  ;;  %v17748_v28 = vld [vmem:[#allocation13 + $0x2324] sm:$0xf]  ;;  %v16379_v22 = vld [vmem:[#allocation13 + $0x23a8] sm:$0xf0] }
 0x3e5   :  { %9427 = vmatpush.bf16.msrb.mxu1 %v12842_v31  ;;  %9444 = vmatpush.bf16.msrb.mxu2 %v13386_v45  ;;  %v14883_v31 = vld [vmem:[#allocation13 + $0x17f8] sm:$0xf0]  ;;  %v12710_v45 = vor.u32 %v16830_v32, %v12707_v33  ;;  %v13115_v32 = vld [vmem:[#allocation13 + $0xa28] sm:$0xf0] }
 0x3e6   :  { %v14886_v38 = vor.u32 %v17374_v50, %v14883_v31  ;;  %v17680_v50 = vld [vmem:[#allocation13 + $0x2104] sm:$0xf] }
 0x3e7   :  { %9457 = vmatpush.bf16.msrb.mxu3 %v14474_v39  ;;  %9470 = vmatpush.bf16.msra.mxu0 %v15562_v41  ;;  %v17068_v39 = vld [vmem:[#allocation13 + $0xde4] sm:$0xf]  ;;  %v13659_v41 = vld [vmem:[#allocation13 + $0xe68] sm:$0xf0] }
 0x3e8   :  { %v13662_v54 = vor.u32 %v17068_v39, %v13659_v41  ;;  %v16660_v41 = vld [vmem:[#allocation13 + $0x124] sm:$0xf] }
 0x3e9   :  { %9428 = vmatpush.bf16.msrb.mxu1 %v12706_v46  ;;  %9445 = vmatpush.bf16.msrb.mxu2 %v13250_v61  ;;  %v17340_v46 = vld [vmem:[#allocation13 + $0x1664] sm:$0xf]  ;;  %v12026_v61 = vor.u32 %v16677_v49, %v12025_v48  ;;  %v15971_v48 = vld [vmem:[#allocation13 + $0x2078] sm:$0xf0]  ;;  %v16898_v49 = vld [vmem:[#allocation13 + $0x894] sm:$0xf] }
 0x3eb   :  { %9458 = vmatpush.bf16.msrb.mxu3 %v14338_v55  ;;  %9471 = vmatpush.bf16.msra.mxu0 %v15426_v56  ;;  %v6684_v55 = vunpack.c.l.b16 %v18416_v43  ;;  %v14750_v56 = vor.u32 %v17340_v46, %v14747_v47  ;;  %v13118_v46 = vor.u32 %v16932_v36, %v13115_v32  ;;  %v17646_v47 = vld [vmem:[#allocation13 + $0x1ff4] sm:$0xf]  ;;  %v16243_v32 = vld [vmem:[#allocation13 + $0x2298] sm:$0xf0] }
 0x3ec   :  { %v17714_v36 = vld [vmem:[#allocation13 + $0x2214] sm:$0xf] }
 0x3ed   :  { %9429 = vmatpush.bf16.msrb.mxu1 %v12570_v63  ;;  %9446 = vmatpush.bf16.msrb.mxu2 %v13114_v11  ;;  %v12574_v63 = vor.u32 %v16796_v51, %v12571_v52  ;;  %v7874_v20 = vpack.c.b16 %v6684_v55, %v6684_v55  ;;  %v17272_v11 = vld [vmem:[#allocation13 + $0x1444] sm:$0xf]  ;;  %v6685_v51 = vunpack.c.h.b16 %v18416_v43  ;;  %v18425_v52 = vld [vmem:[#allocation14] sm:$0xff]  ;;  %v15974_v43 = vor.u32 %v17646_v47, %v15971_v48  ;;  %v12441_v47 = vld [vmem:[#allocation13 + $0x458] sm:$0xf] }
 0x3ef   :  { %9459 = vmatpush.bf16.msrb.mxu3 %v14202_v5  ;;  %9472 = vmatpush.bf16.msra.mxu0 %v15290_v13  ;;  %v13526_v5 = vor.u32 %v17034_v57, %v13523_v60  ;;  %v17000_v13 = vld [vmem:[#allocation13 + $0xbc4] sm:$0xf]  ;;  %v9078_v18 = vsel %vm9064_vm10, %v7874_v20, 0  ;;  %v17170_v57 = vld [vmem:[#allocation13 + $0x1114] sm:$0xf] }
 0x3f0   :  { %v13390_v58 = vor.u32 %v17000_v13, %v13387_v62  ;;  %v14067_v60 = vld [vmem:[#allocation13 + $0x1198] sm:$0xf0]  ;;  %v17612_v13 = vld [vmem:[#allocation13 + $0x1ee4] sm:$0xf]  ;;  %v15835_v62 = vld [vmem:[#allocation13 + $0x1f68] sm:$0xf0] }
 0x3f1   :  { %9430 = vmatpush.bf16.msrb.mxu1 %v12434_v14  ;;  %9447 = vmatpush.bf16.msrb.mxu2 %v12978_v15  ;;  %v14475_v14 = vld [vmem:[#allocation13 + $0x14c8] sm:$0xf0]  ;;  %v16378_v15 = vor.u32 %v17765_v59, %v16377_v19  ;;  %v14070_v20 = vor.u32 %v17170_v57, %v14067_v60 }
 0x3f3   :  { %9460 = vmatpush.bf16.msrb.mxu3 %v14066_v21  ;;  %9473 = vmatpush.bf16.msra.mxu0 %v15154_v25  ;;  %v14478_v21 = vor.u32 %v17272_v11, %v14475_v14  ;;  %v17238_v25 = vld [vmem:[#allocation13 + $0x1334] sm:$0xf]  ;;  %v13938_v11 = vor.u32 %v17154_v3, %v13937_v37  ;;  %v12713_v14 = vld [vmem:[#allocation13 + $0x678] sm:$0xf]  ;;  %v17664_v37 = vld [vmem:[#allocation13 + $0x207c] sm:$0xf0] }
 0x3f4   :  { %9448 = vmatmul.bf16.vlgmr.msrb.gmra.mxu2 %v18372_v1 }
 0x3f5   :  { %9431 = vmatpush.bf16.msrb.mxu1 %v12298_v30  ;;  %9492 = vmatpush.bf16.msra.mxu2 %v12846_v42  ;;  %v16241_v30 = vld [vmem:[#allocation13 + $0x2210] sm:$0xf]  ;;  %v17731_v42 = vld [vmem:[#allocation13 + $0x2294] sm:$0xf0] }
 0x3f6   :  { %9461 = vmatmul.bf16.vlgmr.msrb.gmra.mxu3 %v18380_v4  ;;  %9474 = vmatmul.bf16.vlgmr.msra.gmra.mxu0 %v18382_v6  ;;  %v16242_v39 = vor.u32 %v17731_v42, %v16241_v30  ;;  %v16382_v30 = vor.u32 %v17748_v28, %v16379_v22  ;;  %v16814_v42 = vld [vmem:[#allocation13 + $0x5ec] sm:$0xf0]  ;;  %v13257_v28 = vld [vmem:[#allocation13 + $0xab8] sm:$0xf]  ;;  %v16984_v22 = vld [vmem:[#allocation13 + $0xb3c] sm:$0xf0] }
 0x3f7   :  { %9505 = vmatpush.bf16.msra.mxu3 %v13934_v23  ;;  %9518 = vmatpush.bf16.msrb.mxu0 %v15022_v2  ;;  %v14339_v23 = vld [vmem:[#allocation13 + $0x13b8] sm:$0xf0]  ;;  %v16694_v2 = vld [vmem:[#allocation13 + $0x234] sm:$0xf] }
 0x3f8   :  { %v14342_v31 = vor.u32 %v17238_v25, %v14339_v23  ;;  %v12166_v33 = vor.u32 %v16694_v2, %v12163_v26  ;;  %v17578_v25 = vld [vmem:[#allocation13 + $0x1dd4] sm:$0xf]  ;;  %v15699_v23 = vld [vmem:[#allocation13 + $0x1e58] sm:$0xf0]  ;;  %v12577_v26 = vld [vmem:[#allocation13 + $0x568] sm:$0xf] }
 0x3f9   :  { %9432 = vmatpush.bf16.msrb.mxu1 %v12162_v44  ;;  %9493 = vmatpush.bf16.msra.mxu2 %v12710_v45  ;;  %v12027_v44 = vld [vmem:[#allocation13 + $0x1a8] sm:$0xf0]  ;;  %v16110_v45 = vor.u32 %v17680_v50, %v16107_v29  ;;  %v13665_v50 = vld [vmem:[#allocation13 + $0xde8] sm:$0xf]  ;;  %v15702_v29 = vor.u32 %v17578_v25, %v15699_v23  ;;  %v3128_v25 = vperm.slane %v18425_v52, 1 }
 0x3fb   :  { %9506 = vmatpush.bf16.msra.mxu3 %v13798_v34  ;;  %9519 = vmatpush.bf16.msrb.mxu0 %v14886_v38  ;;  %v17204_v34 = vld [vmem:[#allocation13 + $0x1224] sm:$0xf]  ;;  %v14203_v38 = vld [vmem:[#allocation13 + $0x12a8] sm:$0xf0] }
 0x3fc   :  { %v14206_v55 = vor.u32 %v17204_v34, %v14203_v38  ;;  %v15563_v38 = vld [vmem:[#allocation13 + $0x1d48] sm:$0xf0] }
 0x3fd   :  { %9433 = vmatpush.bf16.msrb.mxu1 %v12026_v61  ;;  %9494 = vmatpush.bf16.msra.mxu2 %v12574_v63  ;;  %v12030_v61 = vor.u32 %v16660_v41, %v12027_v44  ;;  %v16626_v63 = vld [vmem:[#allocation13 + $0x14] sm:$0xf]  ;;  %v17698_v41 = vld [vmem:[#allocation13 + $0x218c] sm:$0xf0] }
 0x3ff   :  { %9507 = vmatpush.bf16.msra.mxu3 %v13662_v54  ;;  %9520 = vmatpush.bf16.msrb.mxu0 %v14750_v56  ;;  %v12979_v56 = vld [vmem:[#allocation13 + $0x918] sm:$0xf0] }
 0x400   :  { %v9176_v54 = vpop.f32.mrf.mxu1  ;;  %v12982_v8 = vor.u32 %v16898_v49, %v12979_v56  ;;  %v17052_v56 = vld [vmem:[#allocation13 + $0xd5c] sm:$0xf0] }
 0x401   :  { %9434 = vmatpush.bf16.msrb.mxu1 %v11890_v0  ;;  %9495 = vmatpush.bf16.msra.mxu2 %v12438_v7  ;;  %v3127_v0 = vperm.slane %v18425_v52, 0  ;;  %v11894_v7 = vor.u32 %v16626_v63, %v11891_v12  ;;  %v17510_v63 = vld [vmem:[#allocation13 + $0x1bb4] sm:$0xf]  ;;  %v15977_v12 = vld [vmem:[#allocation13 + $0x1ff8] sm:$0xf] }
 0x403   :  { %9508 = vmatpush.bf16.msra.mxu3 %v13526_v5  ;;  %9521 = vmatpush.bf16.msrb.mxu0 %v14614_v40  ;;  %v7875_v5 = vpack.c.b16 %v6685_v51, %v6685_v51  ;;  %v12850_v40 = vor.u32 %v16882_v10, %v12849_v9  ;;  %v16246_v51 = vor.u32 %v17714_v36, %v16243_v32  ;;  %v15427_v10 = vld [vmem:[#allocation13 + $0x1c38] sm:$0xf0]  ;;  %v15025_v32 = vld [vmem:[#allocation13 + $0x1888] sm:$0xf] }
 0x404   :  { %9435 = vmatmul.bf16.vlgmr.msrb.gmra.mxu1 %v18370_v35  ;;  %v13258_v36 = vor.u32 %v16984_v22, %v13257_v28  ;;  %v16831_v28 = vld [vmem:[#allocation13 + $0x67c] sm:$0xf]  ;;  %v12715_v22 = vld [vmem:[#allocation13 + $0x700] sm:$0xf0] }
 0x405   :  { %9484 = vmatpush.bf16.msra.mxu1 %v9078_v18  ;;  %9496 = vmatpush.bf16.msra.mxu2 %v12302_v24  ;;  %v13801_v18 = vld [vmem:[#allocation13 + $0xef8] sm:$0xf]  ;;  %v9081_v59 = vsel %vm9064_vm10, %v7875_v5, 0  ;;  %v12305_v5 = vld [vmem:[#allocation13 + $0x348] sm:$0xf] }
 0x406   :  { %v9189_v17 = vpop.f32.mrf.mxu2 }
 0x407   :  { %9509 = vmatpush.bf16.msra.mxu3 %v13390_v58  ;;  %9522 = vmatpush.bf16.msrb.mxu0 %v14478_v21  ;;  %v17120_v58 = vld [vmem:[#allocation13 + $0xf7c] sm:$0xf0]  ;;  %v9215_v19 = vpop.f32.mrf.mxu0  ;;  %v15838_v21 = vor.u32 %v17612_v13, %v15835_v62  ;;  %v13393_v13 = vld [vmem:[#allocation13 + $0xbc8] sm:$0xf]  ;;  %v17018_v62 = vld [vmem:[#allocation13 + $0xc4c] sm:$0xf0] }
 0x408   :  { %v9178_v24 = vpop.f32.mrf.mxu1  ;;  %v13802_v2 = vor.u32 %v17120_v58, %v13801_v18 }
 0x409   :  { %9485 = vmatpush.bf16.msra.mxu1 %v16378_v15  ;;  %9497 = vmatpush.bf16.msra.mxu2 %v12166_v33  ;;  %v12714_v15 = vor.u32 %v16848_v53, %v12713_v14  ;;  %v17544_v33 = vld [vmem:[#allocation13 + $0x1cc4] sm:$0xf]  ;;  %v15291_v14 = vld [vmem:[#allocation13 + $0x1b28] sm:$0xf0]  ;;  %v17630_v53 = vld [vmem:[#allocation13 + $0x1f6c] sm:$0xf0] }
 0x40a   :  { %v15566_v60 = vor.u32 %v17544_v33, %v15563_v38  ;;  %v18437_v24 = vld [vmem:[#allocation13 + $0x2438] sm:$0x77]  ;;  %v17426_v33 = vld [vmem:[#allocation13 + $0x190c] sm:$0xf0] }
 0x40b   :  { %9510 = vmatpush.bf16.msra.mxu3 %v13254_v16  ;;  %9523 = vmatpush.bf16.msrb.mxu0 %v14342_v31  ;;  %v9177_v16 = vadd.f32 %v9176_v54, %v3127_v0  ;;  %v17086_v31 = vld [vmem:[#allocation13 + $0xe6c] sm:$0xf0]  ;;  %v16780_v54 = vld [vmem:[#allocation13 + $0x4dc] sm:$0xf0]  ;;  %v15430_v0 = vor.u32 %v17510_v63, %v15427_v10  ;;  %v6686_v38 = vunpack.c.l.b16 %v18437_v24 }
 0x40c   :  { %v16644_v10 = vld [vmem:[#allocation13 + $0x9c] sm:$0xf0] }
 0x40d   :  { %9486 = vmatpush.bf16.msra.mxu1 %v16242_v39  ;;  %9498 = vmatpush.bf16.msra.mxu2 %v12030_v61  ;;  %v9190_v34 = vadd.f32 %v9189_v17, %v9177_v16  ;;  %v16113_v39 = vld [vmem:[#allocation13 + $0x2108] sm:$0xf]  ;;  %v9202_v44 = vpop.f32.mrf.mxu3  ;;  %v17442_v16 = vld [vmem:[#allocation13 + $0x1994] sm:$0xf]  ;;  %v7876_v63 = vpack.c.b16 %v6686_v38, %v6686_v38  ;;  %v15161_v38 = vld [vmem:[#allocation13 + $0x1998] sm:$0xf] }
 0x40e   :  { %v9191_v49 = vpop.f32.mrf.mxu2  ;;  %v16114_v61 = vor.u32 %v17698_v41, %v16113_v39  ;;  %v15841_v17 = vld [vmem:[#allocation13 + $0x1ee8] sm:$0xf]  ;;  %v16678_v39 = vld [vmem:[#allocation13 + $0x1ac] sm:$0xf0] }
 0x40f   :  { %9511 = vmatpush.bf16.msra.mxu3 %v13118_v46  ;;  %9524 = vmatpush.bf16.msrb.mxu0 %v14206_v55  ;;  %v13666_v46 = vor.u32 %v17086_v31, %v13665_v50  ;;  %v9203_v48 = vadd.f32 %v9202_v44, %v9190_v34  ;;  %v13529_v55 = vld [vmem:[#allocation13 + $0xcd8] sm:$0xf]  ;;  %v9217_v57 = vpop.f32.mrf.mxu0  ;;  %v17596_v50 = vld [vmem:[#allocation13 + $0x1e5c] sm:$0xf0]  ;;  %v12033_v34 = vld [vmem:[#allocation13 + $0x128] sm:$0xf] }
 0x410   :  { %v13121_v41 = vld [vmem:[#allocation13 + $0x9a8] sm:$0xf]  ;;  %v16950_v44 = vld [vmem:[#allocation13 + $0xa2c] sm:$0xf0]  ;;  %v14889_v57 = vld [vmem:[#allocation13 + $0x1778] sm:$0xf] }
 0x411   :  { %9531 = vmatpush.bf16.msrb.mxu1 %v16110_v45  ;;  %9499 = vmatpush.bf16.msra.mxu2 %v11894_v7  ;;  %v12578_v45 = vor.u32 %v16814_v42, %v12577_v26  ;;  %v9216_v9 = vadd.f32 %v9215_v19, %v9203_v48  ;;  %v9228_v3 = vpop.f32.mrf.mxu1  ;;  %v15978_v7 = vor.u32 %v17664_v37, %v15977_v12  ;;  %v15705_v42 = vld [vmem:[#allocation13 + $0x1dd8] sm:$0xf]  ;;  %v15569_v49 = vld [vmem:[#allocation13 + $0x1cc8] sm:$0xf]  ;;  %v16916_v37 = vld [vmem:[#allocation13 + $0x91c] sm:$0xf0] }
 0x412   :  { %v13394_v19 = vor.u32 %v17018_v62, %v13393_v13  ;;  %v15842_v26 = vor.u32 %v17630_v53, %v15841_v17  ;;  %v15026_v48 = vor.u32 %v17426_v33, %v15025_v32  ;;  %v12985_v12 = vld [vmem:[#allocation13 + $0x898] sm:$0xf]  ;;  %v17528_v62 = vld [vmem:[#allocation13 + $0x1c3c] sm:$0xf0]  ;;  %v16797_v33 = vld [vmem:[#allocation13 + $0x56c] sm:$0xf] }
 0x413   :  { %9512 = vmatpush.bf16.msra.mxu3 %v12982_v8  ;;  %9525 = vmatpush.bf16.msrb.mxu0 %v14070_v20  ;;  %v13530_v8 = vor.u32 %v17052_v56, %v13529_v55  ;;  %v9229_v20 = vadd.f32 %v9228_v3, %v9216_v9  ;;  %v12034_v55 = vor.u32 %v16678_v39, %v12033_v34  ;;  %v15433_v13 = vld [vmem:[#allocation13 + $0x1bb8] sm:$0xf]  ;;  %v12579_v34 = vld [vmem:[#allocation13 + $0x5f0] sm:$0xf0] }
 0x414   :  { %16499 = vmatmul.msk.bf16.vlgmr.msra.gmra.mxu1 %vm9060_vm11, %v18388_v27  ;;  %9500 = vmatmul.bf16.vlgmr.msra.gmra.mxu2 %v18370_v35  ;;  %v13122_v56 = vor.u32 %v16950_v44, %v13121_v41  ;;  %v17460_v44 = vld [vmem:[#allocation13 + $0x1a1c] sm:$0xf0] }
 0x415   :  { %9532 = vmatpush.bf16.msrb.mxu1 %v15974_v43  ;;  %9549 = vmatpush.bf16.msrb.mxu2 %v9081_v59  ;;  %v12442_v43 = vor.u32 %v16780_v54, %v12441_v47  ;;  %11377 = vst [vmem:[%s19046_s9] sm:$0xff] %v9229_v20  ;;  %v9204_v18 = vpop.f32.mrf.mxu3  ;;  %v12169_v59 = vld [vmem:[#allocation13 + $0x238] sm:$0xf]  ;;  %v12851_v20 = vld [vmem:[#allocation13 + $0x810] sm:$0xf0] }
 0x416   :  { %9513 = vmatmul.bf16.vlgmr.msra.gmra.mxu3 %v18372_v1  ;;  %9526 = vmatmul.bf16.vlgmr.msrb.gmra.mxu0 %v18380_v4  ;;  %v14753_v18 = vld [vmem:[#allocation13 + $0x1668] sm:$0xf] }
 0x417   :  { %9557 = vmatpush.bf16.msrb.mxu3 %v12850_v40  ;;  %9570 = vmatpush.bf16.msra.mxu0 %v13938_v11  ;;  %v16746_v40 = vld [vmem:[#allocation13 + $0x3cc] sm:$0xf0]  ;;  %v17476_v11 = vld [vmem:[#allocation13 + $0x1aa4] sm:$0xf]  ;;  %v9241_v23 = vpop.f32.mrf.mxu2 }
 0x418   :  { %v12306_v58 = vor.u32 %v16746_v40, %v12305_v5  ;;  %v9242_v47 = vadd.f32 %v9241_v23, %v3128_v25  ;;  %v16865_v5 = vld [vmem:[#allocation13 + $0x78c] sm:$0xf]  ;;  %v15297_v25 = vld [vmem:[#allocation13 + $0x1aa8] sm:$0xf]  ;;  %v17494_v23 = vld [vmem:[#allocation13 + $0x1b2c] sm:$0xf0] }
 0x419   :  { %9533 = vmatpush.bf16.msrb.mxu1 %v15838_v21  ;;  %9550 = vmatpush.bf16.msrb.mxu2 %v16382_v30  ;;  %v16712_v21 = vld [vmem:[#allocation13 + $0x2bc] sm:$0xf0]  ;;  %v15155_v30 = vld [vmem:[#allocation13 + $0x1a18] sm:$0xf0]  ;;  %v9230_v31 = vpop.f32.mrf.mxu1  ;;  %v12854_v53 = vor.u32 %v16865_v5, %v12851_v20  ;;  %v15298_v32 = vor.u32 %v17494_v23, %v15297_v25  ;;  %v14891_v5 = vld [vmem:[#allocation13 + $0x1800] sm:$0xf0] }
 0x41a   :  { %v16249_v31 = vld [vmem:[#allocation13 + $0x2218] sm:$0xf]  ;;  %v16695_v23 = vld [vmem:[#allocation13 + $0x23c] sm:$0xf] }
 0x41b   :  { %9558 = vmatpush.bf16.msrb.mxu3 %v12714_v15  ;;  %9571 = vmatpush.bf16.msra.mxu0 %v13802_v2  ;;  %v9267_v15 = vpop.f32.mrf.mxu0  ;;  %v15294_v2 = vor.u32 %v17476_v11, %v15291_v14  ;;  %v12986_v11 = vor.u32 %v16916_v37, %v12985_v12  ;;  %v9084_v14 = vsel %vm9064_vm10, %v7876_v63, 0  ;;  %v16763_v63 = vld [vmem:[#allocation13 + $0x45c] sm:$0xf]  ;;  %v15979_v37 = vld [vmem:[#allocation13 + $0x2080] sm:$0xf0] }
 0x41c   :  { %v17647_v12 = vld [vmem:[#allocation13 + $0x1ffc] sm:$0xf] }
 0x41d   :  { %9534 = vmatpush.bf16.msrb.mxu1 %v15702_v29  ;;  %9551 = vmatpush.bf16.msrb.mxu2 %v16246_v51  ;;  %v12170_v29 = vor.u32 %v16712_v21, %v12169_v59  ;;  %v17562_v51 = vld [vmem:[#allocation13 + $0x1d4c] sm:$0xf0]  ;;  %v9254_v54 = vpop.f32.mrf.mxu3  ;;  %v15434_v59 = vor.u32 %v17528_v62, %v15433_v13  ;;  %v17256_v13 = vld [vmem:[#allocation13 + $0x13bc] sm:$0xf0] }
 0x41e   :  { %v9255_v9 = vadd.f32 %v9254_v54, %v9242_v47  ;;  %v17766_v21 = vld [vmem:[#allocation13 + $0x23ac] sm:$0xf0] }
 0x41f   :  { %9559 = vmatpush.bf16.msrb.mxu3 %v12578_v45  ;;  %9572 = vmatpush.bf16.msra.mxu0 %v13666_v46  ;;  %v15158_v45 = vor.u32 %v17442_v16, %v15155_v30  ;;  %v15706_v46 = vor.u32 %v17596_v50, %v15705_v42  ;;  %v9243_v3 = vpop.f32.mrf.mxu2  ;;  %v14617_v16 = vld [vmem:[#allocation13 + $0x1558] sm:$0xf]  ;;  %v12718_v42 = vor.u32 %v16831_v28, %v12715_v22  ;;  %v17324_v50 = vld [vmem:[#allocation13 + $0x15dc] sm:$0xf0]  ;;  %v14209_v28 = vld [vmem:[#allocation13 + $0x1228] sm:$0xf] }
 0x420   :  { %v9268_v17 = vadd.f32 %v9267_v15, %v9255_v9  ;;  %v12443_v9 = vld [vmem:[#allocation13 + $0x4e0] sm:$0xf0]  ;;  %v17222_v22 = vld [vmem:[#allocation13 + $0x12ac] sm:$0xf0] }
 0x421   :  { %9535 = vmatpush.bf16.msrb.mxu1 %v15566_v60  ;;  %9596 = vmatpush.bf16.msra.mxu2 %v16114_v61  ;;  %v17392_v60 = vld [vmem:[#allocation13 + $0x17fc] sm:$0xf0]  ;;  %v11897_v61 = vld [vmem:[#allocation13 + $0x18] sm:$0xf]  ;;  %v12446_v20 = vor.u32 %v16763_v63, %v12443_v9 }
 0x422   :  { %v14890_v40 = vor.u32 %v17392_v60, %v14889_v57  ;;  %v17290_v57 = vld [vmem:[#allocation13 + $0x14cc] sm:$0xf0]  ;;  %v15162_v60 = vor.u32 %v17460_v44, %v15161_v38  ;;  %v6687_v38 = vunpack.c.h.b16 %v18437_v24 }
 0x423   :  { %9560 = vmatpush.bf16.msrb.mxu3 %v12442_v43  ;;  %9573 = vmatpush.bf16.msra.mxu0 %v13530_v8  ;;  %v9269_v43 = vpop.f32.mrf.mxu0  ;;  %v15570_v8 = vor.u32 %v17562_v51, %v15569_v49  ;;  %v17409_v49 = vld [vmem:[#allocation13 + $0x188c] sm:$0xf]  ;;  %v15027_v51 = vld [vmem:[#allocation13 + $0x1910] sm:$0xf0] }
 0x424   :  { %16500 = vmatmul.msk.bf16.vlgmr.msrb.gmra.mxu2 %vm9060_vm11, %v18388_v27  ;;  %v7877_v63 = vpack.c.b16 %v6687_v38, %v6687_v38  ;;  %v14075_v38 = vld [vmem:[#allocation13 + $0x11a0] sm:$0xf0] }
 0x425   :  { %9536 = vmatpush.bf16.msrb.mxu1 %v15430_v0  ;;  %9597 = vmatpush.bf16.msra.mxu2 %v15978_v7  ;;  %v9280_v0 = vpop.f32.mrf.mxu1  ;;  %v11898_v7 = vor.u32 %v16644_v10, %v11897_v61  ;;  %v15030_v10 = vor.u32 %v17409_v49, %v15027_v51  ;;  %v17545_v49 = vld [vmem:[#allocation13 + $0x1ccc] sm:$0xf]  ;;  %v15571_v51 = vld [vmem:[#allocation13 + $0x1d50] sm:$0xf0] }
 0x426   :  { %v9281_v30 = vadd.f32 %v9280_v0, %v9268_v17  ;;  %v15982_v0 = vor.u32 %v17647_v12, %v15979_v37  ;;  %v15574_v9 = vor.u32 %v17545_v49, %v15571_v51  ;;  %v16627_v12 = vld [vmem:[#allocation13 + $0x1c] sm:$0xf]  ;;  %v11899_v37 = vld [vmem:[#allocation13 + $0xa0] sm:$0xf0]  ;;  %v17699_v49 = vld [vmem:[#allocation13 + $0x2194] sm:$0xf0] }
 0x427   :  { %9561 = vmatpush.bf16.msrb.mxu3 %v12306_v58  ;;  %9574 = vmatpush.bf16.msra.mxu0 %v13394_v19  ;;  %v17358_v58 = vld [vmem:[#allocation13 + $0x16ec] sm:$0xf0]  ;;  %v16385_v19 = vld [vmem:[#allocation13 + $0x2328] sm:$0xf] }
 0x428   :  { %v16386_v15 = vor.u32 %v17766_v21, %v16385_v19  ;;  %v17341_v19 = vld [vmem:[#allocation13 + $0x166c] sm:$0xf]  ;;  %v13945_v51 = vld [vmem:[#allocation13 + $0x1010] sm:$0xf] }
 0x429   :  { %9537 = vmatpush.bf16.msrb.mxu1 %v15294_v2  ;;  %9598 = vmatpush.bf16.msra.mxu2 %v15842_v26  ;;  %v9256_v2 = vpop.f32.mrf.mxu3  ;;  %v14754_v26 = vor.u32 %v17358_v58, %v14753_v18  ;;  %v15843_v18 = vld [vmem:[#allocation13 + $0x1f70] sm:$0xf0] }
 0x42a   :  { %v12171_v2 = vld [vmem:[#allocation13 + $0x2c0] sm:$0xf0] }
 0x42b   :  { %9562 = vmatpush.bf16.msrb.mxu3 %v12170_v29  ;;  %9575 = vmatpush.bf16.msra.mxu0 %v13258_v36  ;;  %v17732_v29 = vld [vmem:[#allocation13 + $0x229c] sm:$0xf0]  ;;  %v9293_v36 = vpop.f32.mrf.mxu2  ;;  %v18447_v41 = vpop.f32.mrf.mxu0 }
 0x42c   :  { %v9294_v39 = vadd.f32 %v9293_v36, %v9281_v30  ;;  %v16250_v54 = vor.u32 %v17732_v29, %v16249_v31  ;;  %v15707_v30 = vld [vmem:[#allocation13 + $0x1e60] sm:$0xf0]  ;;  %v17307_v31 = vld [vmem:[#allocation13 + $0x155c] sm:$0xf]  ;;  %v12174_v36 = vor.u32 %v16695_v23, %v12171_v2  ;;  %v14211_v23 = vld [vmem:[#allocation13 + $0x12b0] sm:$0xf0] }
 0x42d   :  { %9538 = vmatpush.bf16.msrb.mxu1 %v15158_v45  ;;  %9599 = vmatpush.bf16.msra.mxu2 %v15706_v46  ;;  %v17681_v45 = vld [vmem:[#allocation13 + $0x210c] sm:$0xf]  ;;  %v16115_v46 = vld [vmem:[#allocation13 + $0x2190] sm:$0xf0]  ;;  %v9282_v47 = vpop.f32.mrf.mxu1  ;;  %v14619_v29 = vld [vmem:[#allocation13 + $0x15e0] sm:$0xf0] }
 0x42e   :  { %11378 = vst [vmem:[%s19046_s9 + $0x8] sm:$0xff] %v9294_v39  ;;  %v16118_v61 = vor.u32 %v17681_v45, %v16115_v46  ;;  %v13939_v45 = vld [vmem:[#allocation13 + $0x1090] sm:$0xf0]  ;;  %v16661_v46 = vld [vmem:[#allocation13 + $0x12c] sm:$0xf] }
 0x42f   :  { %9563 = vmatpush.bf16.msrb.mxu3 %v12034_v55  ;;  %9576 = vmatpush.bf16.msra.mxu0 %v13122_v56  ;;  %v12582_v55 = vor.u32 %v16797_v33, %v12579_v34  ;;  %v14481_v56 = vld [vmem:[#allocation13 + $0x1448] sm:$0xf]  ;;  %v17188_v33 = vld [vmem:[#allocation13 + $0x119c] sm:$0xf0]  ;;  %v17137_v34 = vld [vmem:[#allocation13 + $0x100c] sm:$0xf] }
 0x430   :  { %9539 = vmatmul.bf16.vlgmr.msrb.gmra.mxu1 %v18382_v6  ;;  %v14482_v43 = vor.u32 %v17290_v57, %v14481_v56  ;;  %v12035_v47 = vld [vmem:[#allocation13 + $0x1b0] sm:$0xf0]  ;;  %v17273_v56 = vld [vmem:[#allocation13 + $0x144c] sm:$0xf]  ;;  %v13942_v24 = vor.u32 %v17137_v34, %v13939_v45  ;;  %v17171_v34 = vld [vmem:[#allocation13 + $0x111c] sm:$0xf] }
 0x431   :  { %9583 = vmatpush.bf16.msra.mxu1 %v15026_v48  ;;  %9600 = vmatpush.bf16.msra.mxu2 %v15570_v8  ;;  %v14618_v48 = vor.u32 %v17324_v50, %v14617_v16  ;;  %v9306_v3 = vpop.f32.mrf.mxu3  ;;  %v17375_v8 = vld [vmem:[#allocation13 + $0x177c] sm:$0xf]  ;;  %v14210_v50 = vor.u32 %v17222_v22, %v14209_v28  ;;  %v14483_v57 = vld [vmem:[#allocation13 + $0x14d0] sm:$0xf0]  ;;  %v16121_v45 = vld [vmem:[#allocation13 + $0x2110] sm:$0xf] }
 0x432   :  { %v14894_v17 = vor.u32 %v17375_v8, %v14891_v5  ;;  %v17579_v16 = vld [vmem:[#allocation13 + $0x1ddc] sm:$0xf]  ;;  %v15435_v5 = vld [vmem:[#allocation13 + $0x1c40] sm:$0xf0]  ;;  %v16387_v28 = vld [vmem:[#allocation13 + $0x23b0] sm:$0xf0] }
 0x433   :  { %9564 = vmatpush.bf16.msrb.mxu3 %v11898_v7  ;;  %9577 = vmatpush.bf16.msra.mxu0 %v12986_v11  ;;  %v9295_v62 = vpop.f32.mrf.mxu2  ;;  %v16729_v7 = vld [vmem:[#allocation13 + $0x34c] sm:$0xf]  ;;  %v12307_v11 = vld [vmem:[#allocation13 + $0x3d0] sm:$0xf0]  ;;  %v15710_v44 = vor.u32 %v17579_v16, %v15707_v30  ;;  %v17511_v8 = vld [vmem:[#allocation13 + $0x1bbc] sm:$0xf] }
 0x434   :  { %v12310_v21 = vor.u32 %v16729_v7, %v12307_v11  ;;  %v11902_v7 = vor.u32 %v16627_v12, %v11899_v37  ;;  %v9087_v11 = vsel %vm9064_vm10, %v7877_v63, 0  ;;  %v13531_v16 = vld [vmem:[#allocation13 + $0xd60] sm:$0xf0]  ;;  %v17443_v30 = vld [vmem:[#allocation13 + $0x199c] sm:$0xf]  ;;  %v16122_v63 = vor.u32 %v17699_v49, %v16121_v45 }
 0x435   :  { %9584 = vmatpush.bf16.msra.mxu1 %v14890_v40  ;;  %9601 = vmatpush.bf16.msra.mxu2 %v15434_v59  ;;  %v14345_v40 = vld [vmem:[#allocation13 + $0x1338] sm:$0xf]  ;;  %v14755_v59 = vld [vmem:[#allocation13 + $0x16f0] sm:$0xf0]  ;;  %v17393_v12 = vld [vmem:[#allocation13 + $0x1804] sm:$0xf0] }
 0x436   :  { %9565 = vmatmul.bf16.vlgmr.msrb.gmra.mxu3 %v18370_v35  ;;  %9578 = vmatmul.bf16.vlgmr.msra.gmra.mxu0 %v18372_v1  ;;  %v14346_v58 = vor.u32 %v17256_v13, %v14345_v40  ;;  %v14347_v40 = vld [vmem:[#allocation13 + $0x13c0] sm:$0xf0]  ;;  %v15985_v37 = vld [vmem:[#allocation13 + $0x2000] sm:$0xf]  ;;  %v14489_v45 = vld [vmem:[#allocation13 + $0x1450] sm:$0xf] }
 0x437   :  { %9614 = vmatpush.bf16.msra.mxu3 %v9084_v14  ;;  %9622 = vmatpush.bf16.msrb.mxu0 %v12854_v53  ;;  %v9321_v14 = vpop.f32.mrf.mxu0  ;;  %v17613_v53 = vld [vmem:[#allocation13 + $0x1eec] sm:$0xf]  ;;  %v15577_v49 = vld [vmem:[#allocation13 + $0x1cd0] sm:$0xf] }
 0x438   :  { %v15846_v25 = vor.u32 %v17613_v53, %v15843_v18  ;;  %v15438_v53 = vor.u32 %v17511_v8, %v15435_v5  ;;  %v17069_v18 = vld [vmem:[#allocation13 + $0xdec] sm:$0xf]  ;;  %v17665_v8 = vld [vmem:[#allocation13 + $0x2084] sm:$0xf0]  ;;  %v13809_v5 = vld [vmem:[#allocation13 + $0xf00] sm:$0xf] }
 0x439   :  { %9585 = vmatpush.bf16.msra.mxu1 %v14754_v26  ;;  %9602 = vmatpush.bf16.msra.mxu2 %v15298_v32  ;;  %v14758_v26 = vor.u32 %v17341_v19, %v14755_v59  ;;  %v14073_v32 = vld [vmem:[#allocation13 + $0x1118] sm:$0xf]  ;;  %v17477_v19 = vld [vmem:[#allocation13 + $0x1aac] sm:$0xf]  ;;  %v15299_v59 = vld [vmem:[#allocation13 + $0x1b30] sm:$0xf0] }
 0x43b   :  { %9615 = vmatpush.bf16.msra.mxu3 %v16386_v15  ;;  %9623 = vmatpush.bf16.msrb.mxu0 %v12718_v42  ;;  %v3129_v15 = vperm.slane %v18425_v52, 2  ;;  %v9308_v42 = vpop.f32.mrf.mxu3  ;;  %v9345_v39 = vpop.f32.mrf.mxu2 }
 0x43c   :  { %v15302_v42 = vor.u32 %v17477_v19, %v15299_v59  ;;  %v17087_v19 = vld [vmem:[#allocation13 + $0xe74] sm:$0xf0]  ;;  %v13123_v59 = vld [vmem:[#allocation13 + $0xa30] sm:$0xf0] }
 0x43d   :  { %9586 = vmatpush.bf16.msra.mxu1 %v14618_v48  ;;  %9603 = vmatpush.bf16.msra.mxu2 %v15162_v60  ;;  %v14622_v48 = vor.u32 %v17307_v31, %v14619_v29  ;;  %v12038_v60 = vor.u32 %v16661_v46, %v12035_v47  ;;  %v15163_v31 = vld [vmem:[#allocation13 + $0x1a20] sm:$0xf0]  ;;  %v17715_v29 = vld [vmem:[#allocation13 + $0x221c] sm:$0xf] }
 0x43f   :  { %9616 = vmatpush.bf16.msra.mxu3 %v16250_v54  ;;  %9624 = vmatpush.bf16.msrb.mxu0 %v12582_v55  ;;  %v9307_v54 = vadd.f32 %v9306_v3, %v3129_v15  ;;  %v14074_v55 = vor.u32 %v17188_v33, %v14073_v32 }
 0x440   :  { %9604 = vmatmul.bf16.vlgmr.msra.gmra.mxu2 %v18382_v6 }
 0x441   :  { %9648 = vmatpush.bf16.msrb.mxu2 %v15030_v10  ;;  %9587 = vmatpush.bf16.msra.mxu1 %v14482_v43  ;;  %v13803_v10 = vld [vmem:[#allocation13 + $0xf80] sm:$0xf0]  ;;  %v14486_v43 = vor.u32 %v17273_v56, %v14483_v57  ;;  %v9320_v3 = vadd.f32 %v18447_v41, %v9307_v54  ;;  %v9332_v13 = vpop.f32.mrf.mxu1  ;;  %v17155_v54 = vld [vmem:[#allocation13 + $0x1094] sm:$0xf0]  ;;  %v17001_v57 = vld [vmem:[#allocation13 + $0xbcc] sm:$0xf] }
 0x443   :  { %9661 = vmatpush.bf16.msrb.mxu3 %v16118_v61  ;;  %9625 = vmatpush.bf16.msrb.mxu0 %v12446_v20  ;;  %v17103_v61 = vld [vmem:[#allocation13 + $0xefc] sm:$0xf]  ;;  %v9358_v62 = vpop.f32.mrf.mxu3  ;;  %v9333_v14 = vadd.f32 %v9332_v13, %v9320_v3  ;;  %v17121_v3 = vld [vmem:[#allocation13 + $0xf84] sm:$0xf0] }
 0x444   :  { %v17239_v20 = vld [vmem:[#allocation13 + $0x133c] sm:$0xf] }
 0x445   :  { %9649 = vmatpush.bf16.msrb.mxu2 %v14894_v17  ;;  %9588 = vmatpush.bf16.msra.mxu1 %v14346_v58  ;;  %v9347_v17 = vpop.f32.mrf.mxu2  ;;  %v13667_v58 = vld [vmem:[#allocation13 + $0xe70] sm:$0xf0]  ;;  %v14350_v41 = vor.u32 %v17239_v20, %v14347_v40  ;;  %v9346_v22 = vadd.f32 %v9345_v39, %v9333_v14  ;;  %v15033_v39 = vld [vmem:[#allocation13 + $0x1890] sm:$0xf]  ;;  %v16967_v20 = vld [vmem:[#allocation13 + $0xabc] sm:$0xf] }
 0x446   :  { %16501 = vmatmul.msk.bf16.vlgmr.msra.gmra.mxu3 %vm9060_vm11, %v18388_v27  ;;  %v13670_v2 = vor.u32 %v17069_v18, %v13667_v58  ;;  %v13259_v40 = vld [vmem:[#allocation13 + $0xb40] sm:$0xf0]  ;;  %v17359_v14 = vld [vmem:[#allocation13 + $0x16f4] sm:$0xf0]  ;;  %v15849_v17 = vld [vmem:[#allocation13 + $0x1ef0] sm:$0xf] }
 0x447   :  { %9662 = vmatpush.bf16.msrb.mxu3 %v15982_v0  ;;  %9626 = vmatpush.bf16.msrb.mxu0 %v12310_v21  ;;  %v13806_v0 = vor.u32 %v17103_v61, %v13803_v10  ;;  %v17749_v21 = vld [vmem:[#allocation13 + $0x232c] sm:$0xf]  ;;  %v9359_v15 = vadd.f32 %v9358_v62, %v9346_v22  ;;  %v18460_v32 = vpop.f32.mrf.mxu0  ;;  %v14897_v10 = vld [vmem:[#allocation13 + $0x1780] sm:$0xf]  ;;  %v17631_v18 = vld [vmem:[#allocation13 + $0x1f74] sm:$0xf0] }
 0x448   :  { %v14898_v62 = vor.u32 %v17393_v12, %v14897_v10  ;;  %v13673_v58 = vld [vmem:[#allocation13 + $0xdf0] sm:$0xf]  ;;  %v15441_v12 = vld [vmem:[#allocation13 + $0x1bc0] sm:$0xf] }
 0x449   :  { %9650 = vmatpush.bf16.msrb.mxu2 %v14758_v26  ;;  %9589 = vmatpush.bf16.msra.mxu1 %v14210_v50  ;;  %v17035_v26 = vld [vmem:[#allocation13 + $0xcdc] sm:$0xf]  ;;  %v16390_v50 = vor.u32 %v17749_v21, %v16387_v28  ;;  %11379 = vst [vmem:[%s19046_s9 + $0x10] sm:$0xff] %v9359_v15  ;;  %v9334_v46 = vpop.f32.mrf.mxu1  ;;  %v15850_v28 = vor.u32 %v17631_v18, %v15849_v17  ;;  %v17053_v15 = vld [vmem:[#allocation13 + $0xd64] sm:$0xf0] }
 0x44a   :  { %v13674_v22 = vor.u32 %v17087_v19, %v13673_v58  ;;  %v17291_v46 = vld [vmem:[#allocation13 + $0x14d4] sm:$0xf0]  ;;  %v15305_v58 = vld [vmem:[#allocation13 + $0x1ab0] sm:$0xf] }
 0x44b   :  { %9663 = vmatpush.bf16.msrb.mxu3 %v15846_v25  ;;  %9627 = vmatpush.bf16.msrb.mxu0 %v12174_v36  ;;  %v17205_v25 = vld [vmem:[#allocation13 + $0x122c] sm:$0xf]  ;;  %v16251_v36 = vld [vmem:[#allocation13 + $0x22a0] sm:$0xf0]  ;;  %v9360_v47 = vpop.f32.mrf.mxu3  ;;  %v17223_v17 = vld [vmem:[#allocation13 + $0x12b4] sm:$0xf0] }
 0x44c   :  { %v14214_v33 = vor.u32 %v17205_v25, %v14211_v23  ;;  %v16254_v56 = vor.u32 %v17715_v29, %v16251_v36  ;;  %v14625_v25 = vld [vmem:[#allocation13 + $0x1560] sm:$0xf]  ;;  %v17325_v23 = vld [vmem:[#allocation13 + $0x15e4] sm:$0xf0]  ;;  %v3130_v47 = vperm.slane %v18425_v52, 3 }
 0x44d   :  { %9651 = vmatpush.bf16.msrb.mxu2 %v14622_v48  ;;  %9590 = vmatpush.bf16.msra.mxu1 %v14074_v55  ;;  %v13534_v48 = vor.u32 %v17035_v26, %v13531_v16  ;;  %v15166_v55 = vor.u32 %v17443_v30, %v15163_v31  ;;  %v17597_v16 = vld [vmem:[#allocation13 + $0x1e64] sm:$0xf0]  ;;  %v13537_v30 = vld [vmem:[#allocation13 + $0xce0] sm:$0xf]  ;;  %v12987_v31 = vld [vmem:[#allocation13 + $0x920] sm:$0xf0]  ;;  %v14626_v36 = vor.u32 %v17325_v23, %v14625_v25 }
 0x44e   :  { %v9372_v52 = vadd.f32 %v18460_v32, %v3130_v47  ;;  %v17495_v19 = vld [vmem:[#allocation13 + $0x1b34] sm:$0xf0] }
 0x44f   :  { %9664 = vmatpush.bf16.msrb.mxu3 %v15710_v44  ;;  %9628 = vmatpush.bf16.msrb.mxu0 %v12038_v60  ;;  %v17427_v44 = vld [vmem:[#allocation13 + $0x1914] sm:$0xf0]  ;;  %v14078_v60 = vor.u32 %v17171_v34, %v14075_v38  ;;  %v9373_v13 = vpop.f32.mrf.mxu0 }
 0x450   :  { %9591 = vmatmul.bf16.vlgmr.msra.gmra.mxu1 %v18380_v4  ;;  %v15034_v61 = vor.u32 %v17427_v44, %v15033_v39  ;;  %v16883_v34 = vld [vmem:[#allocation13 + $0x814] sm:$0xf0]  ;;  %v13538_v44 = vor.u32 %v17053_v15, %v13537_v30  ;;  %v15306_v30 = vor.u32 %v17495_v19, %v15305_v58  ;;  %v17461_v15 = vld [vmem:[#allocation13 + $0x1a24] sm:$0xf0]  ;;  %v17036_v19 = vld [vmem:[#allocation13 + $0xce4] sm:$0xf] }
 0x451   :  { %9635 = vmatpush.bf16.msrb.mxu1 %v13942_v24  ;;  %9652 = vmatpush.bf16.msrb.mxu2 %v14486_v43  ;;  %v13395_v24 = vld [vmem:[#allocation13 + $0xc50] sm:$0xf0]  ;;  %v16747_v47 = vld [vmem:[#allocation13 + $0x3d4] sm:$0xf0] }
 0x452   :  { %v13398_v43 = vor.u32 %v17001_v57, %v13395_v24  ;;  %v14490_v57 = vor.u32 %v17291_v46, %v14489_v45  ;;  %v12721_v24 = vld [vmem:[#allocation13 + $0x680] sm:$0xf]  ;;  %v15035_v45 = vld [vmem:[#allocation13 + $0x1918] sm:$0xf0]  ;;  %v12313_v46 = vld [vmem:[#allocation13 + $0x350] sm:$0xf] }
 0x453   :  { %9665 = vmatpush.bf16.msrb.mxu3 %v15574_v9  ;;  %9629 = vmatpush.bf16.msrb.mxu0 %v11902_v7  ;;  %v13946_v9 = vor.u32 %v17155_v54, %v13945_v51  ;;  %v13810_v7 = vor.u32 %v17121_v3, %v13809_v5  ;;  %v17563_v51 = vld [vmem:[#allocation13 + $0x1d54] sm:$0xf0]  ;;  %v13265_v3 = vld [vmem:[#allocation13 + $0xac0] sm:$0xf] }
 0x455   :  { %9636 = vmatpush.bf16.msrb.mxu1 %v13806_v0  ;;  %9653 = vmatpush.bf16.msrb.mxu2 %v14350_v41  ;;  %v15986_v0 = vor.u32 %v17665_v8, %v15985_v37  ;;  %v16933_v41 = vld [vmem:[#allocation13 + $0x9ac] sm:$0xf]  ;;  %v17529_v37 = vld [vmem:[#allocation13 + $0x1c44] sm:$0xf0] }
 0x456   :  { %9630 = vmatmul.bf16.vlgmr.msrb.gmra.mxu0 %v18370_v35  ;;  %v13126_v26 = vor.u32 %v16933_v41, %v13123_v59  ;;  %v13129_v41 = vld [vmem:[#allocation13 + $0x9b0] sm:$0xf] }
 0x457   :  { %9666 = vmatpush.bf16.msrb.mxu3 %v15438_v53  ;;  %9679 = vmatpush.bf16.msra.mxu0 %v9087_v11  ;;  %v14761_v11 = vld [vmem:[#allocation13 + $0x1670] sm:$0xf]  ;;  %v13262_v53 = vor.u32 %v16967_v20, %v13259_v40  ;;  %v9397_v29 = vpop.f32.mrf.mxu2  ;;  %v18470_v38 = vpop.f32.mrf.mxu0  ;;  %v16985_v20 = vld [vmem:[#allocation13 + $0xb44] sm:$0xf0] }
 0x458   :  { %v14762_v21 = vor.u32 %v17359_v14, %v14761_v11  ;;  %v15442_v11 = vor.u32 %v17529_v37, %v15441_v12  ;;  %v14217_v14 = vld [vmem:[#allocation13 + $0x1230] sm:$0xf]  ;;  %v13266_v18 = vor.u32 %v16985_v20, %v13265_v3  ;;  %v16832_v12 = vld [vmem:[#allocation13 + $0x684] sm:$0xf]  ;;  %v12723_v37 = vld [vmem:[#allocation13 + $0x708] sm:$0xf0] }
 0x459   :  { %9637 = vmatpush.bf16.msrb.mxu1 %v13670_v2  ;;  %9654 = vmatpush.bf16.msrb.mxu2 %v14214_v33  ;;  %v15713_v2 = vld [vmem:[#allocation13 + $0x1de0] sm:$0xf]  ;;  %v12857_v33 = vld [vmem:[#allocation13 + $0x790] sm:$0xf]  ;;  %v14218_v23 = vor.u32 %v17223_v17, %v14217_v14  ;;  %v13675_v3 = vld [vmem:[#allocation13 + $0xe78] sm:$0xf0] }
 0x45a   :  { %v15714_v39 = vor.u32 %v17597_v16, %v15713_v2  ;;  %v12858_v54 = vor.u32 %v16883_v34, %v12857_v33  ;;  %v14081_v2 = vld [vmem:[#allocation13 + $0x1120] sm:$0xf]  ;;  %v17138_v33 = vld [vmem:[#allocation13 + $0x1014] sm:$0xf]  ;;  %v13947_v34 = vld [vmem:[#allocation13 + $0x1098] sm:$0xf0] }
 0x45b   :  { %9667 = vmatpush.bf16.msrb.mxu3 %v15302_v42  ;;  %9680 = vmatpush.bf16.msra.mxu0 %v16390_v50  ;;  %v18468_v42 = vpop.f32.mrf.mxu3  ;;  %v16899_v50 = vld [vmem:[#allocation13 + $0x89c] sm:$0xf]  ;;  %v15169_v16 = vld [vmem:[#allocation13 + $0x19a0] sm:$0xf]  ;;  %v16798_v14 = vld [vmem:[#allocation13 + $0x574] sm:$0xf] }
 0x45c   :  { %v18482_v20 = vld [vmem:[#allocation13 + $0x2440] sm:$0x77]  ;;  %v12587_v17 = vld [vmem:[#allocation13 + $0x5f8] sm:$0xf0] }
 0x45d   :  { %9638 = vmatpush.bf16.msrb.mxu1 %v13534_v48  ;;  %9655 = vmatpush.bf16.msrb.mxu2 %v14078_v60  ;;  %v12990_v48 = vor.u32 %v16899_v50, %v12987_v31  ;;  %v16849_v60 = vld [vmem:[#allocation13 + $0x704] sm:$0xf0]  ;;  %v12993_v50 = vld [vmem:[#allocation13 + $0x8a0] sm:$0xf] }
 0x45e   :  { %v12722_v5 = vor.u32 %v16849_v60, %v12721_v24  ;;  %v16917_v31 = vld [vmem:[#allocation13 + $0x924] sm:$0xf0]  ;;  %v13811_v24 = vld [vmem:[#allocation13 + $0xf88] sm:$0xf0]  ;;  %v12314_v60 = vor.u32 %v16747_v47, %v12313_v46  ;;  %v12315_v46 = vld [vmem:[#allocation13 + $0x3d8] sm:$0xf0] }
 0x45f   :  { %9668 = vmatpush.bf16.msrb.mxu3 %v15166_v55  ;;  %9681 = vmatpush.bf16.msra.mxu0 %v16254_v56  ;;  %v13401_v55 = vld [vmem:[#allocation13 + $0xbd0] sm:$0xf]  ;;  %v17019_v56 = vld [vmem:[#allocation13 + $0xc54] sm:$0xf0]  ;;  %v9399_v13 = vpop.f32.mrf.mxu2  ;;  %v9425_v32 = vpop.f32.mrf.mxu0 }
 0x460   :  { %9656 = vmatmul.bf16.vlgmr.msrb.gmra.mxu2 %v18380_v4  ;;  %v13402_v10 = vor.u32 %v17019_v56, %v13401_v55  ;;  %v12994_v55 = vor.u32 %v16917_v31, %v12993_v50  ;;  %v12041_v32 = vld [vmem:[#allocation13 + $0x130] sm:$0xf] }
 0x461   :  { %9700 = vmatpush.bf16.msra.mxu2 %v13946_v9  ;;  %9639 = vmatpush.bf16.msrb.mxu1 %v13398_v43  ;;  %v17257_v9 = vld [vmem:[#allocation13 + $0x13c4] sm:$0xf0]  ;;  %v9384_v43 = vpop.f32.mrf.mxu1 }
 0x462   :  { %9669 = vmatmul.bf16.vlgmr.msrb.gmra.mxu3 %v18382_v6  ;;  %v9385_v40 = vadd.f32 %v9384_v43, %v9372_v52  ;;  %v12177_v52 = vld [vmem:[#allocation13 + $0x240] sm:$0xf] }
 0x463   :  { %9713 = vmatpush.bf16.msra.mxu3 %v15034_v61  ;;  %9726 = vmatpush.bf16.msrb.mxu0 %v16122_v63  ;;  %v15578_v61 = vor.u32 %v17563_v51, %v15577_v49  ;;  %v14353_v63 = vld [vmem:[#allocation13 + $0x1340] sm:$0xf]  ;;  %v9412_v8 = vpop.f32.mrf.mxu3  ;;  %v16866_v49 = vld [vmem:[#allocation13 + $0x794] sm:$0xf]  ;;  %v12859_v51 = vld [vmem:[#allocation13 + $0x818] sm:$0xf0] }
 0x465   :  { %9701 = vmatpush.bf16.msra.mxu2 %v13810_v7  ;;  %9640 = vmatpush.bf16.msrb.mxu1 %v13262_v53  ;;  %v16815_v7 = vld [vmem:[#allocation13 + $0x5f4] sm:$0xf0]  ;;  %v9398_v53 = vadd.f32 %v9397_v29, %v9385_v40 }
 0x466   :  { %16502 = vmatmul.msk.bf16.vlgmr.msra.gmra.mxu0 %vm9060_vm11, %v18388_v27 }
 0x467   :  { %9714 = vmatpush.bf16.msra.mxu3 %v14898_v62  ;;  %9727 = vmatpush.bf16.msrb.mxu0 %v15986_v0  ;;  %v14354_v62 = vor.u32 %v17257_v9, %v14353_v63  ;;  %v12585_v0 = vld [vmem:[#allocation13 + $0x570] sm:$0xf]  ;;  %v9411_v25 = vadd.f32 %v18468_v42, %v9398_v53  ;;  %v17376_v63 = vld [vmem:[#allocation13 + $0x1784] sm:$0xf]  ;;  %v14899_v9 = vld [vmem:[#allocation13 + $0x1808] sm:$0xf0] }
 0x468   :  { %v12586_v59 = vor.u32 %v16815_v7, %v12585_v0  ;;  %v14902_v8 = vor.u32 %v17376_v63, %v14899_v9  ;;  %v17342_v0 = vld [vmem:[#allocation13 + $0x1674] sm:$0xf]  ;;  %v14763_v7 = vld [vmem:[#allocation13 + $0x16f8] sm:$0xf0]  ;;  %v16696_v9 = vld [vmem:[#allocation13 + $0x244] sm:$0xf] }
 0x469   :  { %9702 = vmatpush.bf16.msra.mxu2 %v13674_v22  ;;  %9641 = vmatpush.bf16.msrb.mxu1 %v13126_v26  ;;  %v16781_v22 = vld [vmem:[#allocation13 + $0x4e4] sm:$0xf0]  ;;  %v9424_v29 = vadd.f32 %v18470_v38, %v9411_v25  ;;  %v15170_v38 = vor.u32 %v17461_v15, %v15169_v16  ;;  %v14766_v58 = vor.u32 %v17342_v0, %v14763_v7  ;;  %v11905_v25 = vld [vmem:[#allocation13 + $0x20] sm:$0xf]  ;;  %v16934_v0 = vld [vmem:[#allocation13 + $0x9b4] sm:$0xf] }
 0x46a   :  { %v17189_v26 = vld [vmem:[#allocation13 + $0x11a4] sm:$0xf0]  ;;  %v13131_v7 = vld [vmem:[#allocation13 + $0xa38] sm:$0xf0] }
 0x46b   :  { %9715 = vmatpush.bf16.msra.mxu3 %v14762_v21  ;;  %9728 = vmatpush.bf16.msrb.mxu0 %v15850_v28  ;;  %v16951_v21 = vld [vmem:[#allocation13 + $0xa34] sm:$0xf0]  ;;  %v12449_v28 = vld [vmem:[#allocation13 + $0x460] sm:$0xf]  ;;  %11380 = vst [vmem:[%s19046_s9 + $0x18] sm:$0xff] %v9424_v29 }
 0x46c   :  { %v12450_v42 = vor.u32 %v16781_v22, %v12449_v28  ;;  %v17308_v28 = vld [vmem:[#allocation13 + $0x1564] sm:$0xf]  ;;  %v14627_v22 = vld [vmem:[#allocation13 + $0x15e8] sm:$0xf0]  ;;  %v17002_v29 = vld [vmem:[#allocation13 + $0xbd4] sm:$0xf] }
 0x46d   :  { %9703 = vmatpush.bf16.msra.mxu2 %v13538_v44  ;;  %9642 = vmatpush.bf16.msrb.mxu1 %v12990_v48  ;;  %v9386_v44 = vpop.f32.mrf.mxu1  ;;  %v14082_v48 = vor.u32 %v17189_v26, %v14081_v2  ;;  %v16764_v2 = vld [vmem:[#allocation13 + $0x464] sm:$0xf]  ;;  %v12451_v26 = vld [vmem:[#allocation13 + $0x4e8] sm:$0xf0]  ;;  %v14630_v31 = vor.u32 %v17308_v28, %v14627_v22  ;;  %v6689_v22 = vunpack.c.h.b16 %v18482_v20 }
 0x46e   :  { %v17274_v44 = vld [vmem:[#allocation13 + $0x1454] sm:$0xf]  ;;  %v16900_v28 = vld [vmem:[#allocation13 + $0x8a4] sm:$0xf] }
 0x46f   :  { %9716 = vmatpush.bf16.msra.mxu3 %v14626_v36  ;;  %9729 = vmatpush.bf16.msrb.mxu0 %v15714_v39  ;;  %v13130_v36 = vor.u32 %v16951_v21, %v13129_v41  ;;  %v17410_v39 = vld [vmem:[#allocation13 + $0x1894] sm:$0xf]  ;;  %v13539_v41 = vld [vmem:[#allocation13 + $0xd68] sm:$0xf0]  ;;  %v12590_v21 = vor.u32 %v16798_v14, %v12587_v17  ;;  %v14219_v14 = vld [vmem:[#allocation13 + $0x12b8] sm:$0xf0] }
 0x470   :  { %9643 = vmatmul.bf16.vlgmr.msrb.gmra.mxu1 %v18372_v1  ;;  %v15038_v56 = vor.u32 %v17410_v39, %v15035_v45  ;;  %v12454_v39 = vor.u32 %v16764_v2, %v12451_v26  ;;  %v16730_v45 = vld [vmem:[#allocation13 + $0x354] sm:$0xf]  ;;  %v17172_v2 = vld [vmem:[#allocation13 + $0x1124] sm:$0xf]  ;;  %v14083_v26 = vld [vmem:[#allocation13 + $0x11a8] sm:$0xf0] }
 0x471   :  { %9687 = vmatpush.bf16.msra.mxu1 %v12858_v54  ;;  %9704 = vmatpush.bf16.msra.mxu2 %v13402_v10  ;;  %v13950_v54 = vor.u32 %v17138_v33, %v13947_v34  ;;  %v16713_v10 = vld [vmem:[#allocation13 + $0x2c4] sm:$0xf0] }
 0x472   :  { %v12178_v13 = vor.u32 %v16713_v10, %v12177_v52  ;;  %v12179_v52 = vld [vmem:[#allocation13 + $0x2c8] sm:$0xf0] }
 0x473   :  { %9717 = vmatpush.bf16.msra.mxu3 %v14490_v57  ;;  %9730 = vmatpush.bf16.msrb.mxu0 %v15578_v61  ;;  %v17104_v57 = vld [vmem:[#allocation13 + $0xf04] sm:$0xf]  ;;  %v12862_v61 = vor.u32 %v16866_v49, %v12859_v51  ;;  %v18484_v40 = vpop.f32.mrf.mxu0  ;;  %v16393_v49 = vld [vmem:[#allocation13 + $0x2330] sm:$0xf]  ;;  %v17767_v51 = vld [vmem:[#allocation13 + $0x23b4] sm:$0xf0] }
 0x474   :  { %v13814_v43 = vor.u32 %v17104_v57, %v13811_v24  ;;  %v17240_v57 = vld [vmem:[#allocation13 + $0x1344] sm:$0xf]  ;;  %v14355_v24 = vld [vmem:[#allocation13 + $0x13c8] sm:$0xf0]  ;;  %v16394_v63 = vor.u32 %v17767_v51, %v16393_v49  ;;  %v15851_v49 = vld [vmem:[#allocation13 + $0x1f78] sm:$0xf0] }
 0x475   :  { %9688 = vmatpush.bf16.msra.mxu1 %v12722_v5  ;;  %9705 = vmatpush.bf16.msra.mxu2 %v13266_v18  ;;  %v17070_v5 = vld [vmem:[#allocation13 + $0xdf4] sm:$0xf]  ;;  %v6688_v18 = vunpack.c.l.b16 %v18482_v20 }
 0x476   :  { %v13678_v53 = vor.u32 %v17070_v5, %v13675_v3  ;;  %v17682_v5 = vld [vmem:[#allocation13 + $0x2114] sm:$0xf] }
 0x477   :  { %9718 = vmatpush.bf16.msra.mxu3 %v14354_v62  ;;  %9731 = vmatpush.bf16.msrb.mxu0 %v15442_v11  ;;  %v12726_v62 = vor.u32 %v16832_v12, %v12723_v37  ;;  %v16679_v11 = vld [vmem:[#allocation13 + $0x1b4] sm:$0xf0]  ;;  %v7878_v15 = vpack.c.b16 %v6688_v18, %v6688_v18  ;;  %v18492_v50 = vpop.f32.mrf.mxu2  ;;  %v16662_v18 = vld [vmem:[#allocation13 + $0x134] sm:$0xf] }
 0x479   :  { %9689 = vmatpush.bf16.msra.mxu1 %v12586_v59  ;;  %9706 = vmatpush.bf16.msra.mxu2 %v13130_v36  ;;  %v12042_v59 = vor.u32 %v16679_v11, %v12041_v32  ;;  %v18490_v16 = vpop.f32.mrf.mxu3  ;;  %v13403_v36 = vld [vmem:[#allocation13 + $0xc58] sm:$0xf0]  ;;  %v9090_v47 = vsel %vm9064_vm10, %v7878_v15, 0  ;;  %v12182_v32 = vor.u32 %v16696_v9, %v12179_v52  ;;  %v17206_v11 = vld [vmem:[#allocation13 + $0x1234] sm:$0xf] }
 0x47a   :  { %v16628_v15 = vld [vmem:[#allocation13 + $0x24] sm:$0xf]  ;;  %v16395_v9 = vld [vmem:[#allocation13 + $0x23b8] sm:$0xf0] }
 0x47b   :  { %9719 = vmatpush.bf16.msra.mxu3 %v14218_v23  ;;  %9732 = vmatpush.bf16.msrb.mxu0 %v15306_v30  ;;  %v16645_v23 = vld [vmem:[#allocation13 + $0xa4] sm:$0xf0]  ;;  %v13542_v30 = vor.u32 %v17036_v19, %v13539_v41  ;;  %v9477_v33 = vpop.f32.mrf.mxu0  ;;  %v13134_v41 = vor.u32 %v16934_v0, %v13131_v7  ;;  %v17580_v52 = vld [vmem:[#allocation13 + $0x1de4] sm:$0xf] }
 0x47c   :  { %v11906_v34 = vor.u32 %v16645_v23, %v11905_v25  ;;  %v14222_v25 = vor.u32 %v17206_v11, %v14219_v14  ;;  %v12995_v23 = vld [vmem:[#allocation13 + $0x928] sm:$0xf0]  ;;  %v17546_v14 = vld [vmem:[#allocation13 + $0x1cd4] sm:$0xf] }
 0x47d   :  { %9690 = vmatpush.bf16.msra.mxu1 %v12450_v42  ;;  %9707 = vmatpush.bf16.msra.mxu2 %v12994_v55  ;;  %v14491_v42 = vld [vmem:[#allocation13 + $0x14d8] sm:$0xf0]  ;;  %v13267_v55 = vld [vmem:[#allocation13 + $0xb48] sm:$0xf0] }
 0x47e   :  { %v11907_v33 = vld [vmem:[#allocation13 + $0xa8] sm:$0xf0] }
 0x47f   :  { %9720 = vmatpush.bf16.msra.mxu3 %v14082_v48  ;;  %9733 = vmatpush.bf16.msrb.mxu0 %v15170_v38  ;;  %v13406_v48 = vor.u32 %v17002_v29, %v13403_v36  ;;  %v14494_v38 = vor.u32 %v17274_v44, %v14491_v42  ;;  %v9451_v3 = vpop.f32.mrf.mxu2  ;;  %v16884_v29 = vld [vmem:[#allocation13 + $0x81c] sm:$0xf0]  ;;  %v12998_v42 = vor.u32 %v16900_v28, %v12995_v23  ;;  %v16259_v11 = vld [vmem:[#allocation13 + $0x22a8] sm:$0xf0]  ;;  %v13545_v28 = vld [vmem:[#allocation13 + $0xce8] sm:$0xf] }
 0x480   :  { %9708 = vmatmul.bf16.vlgmr.msra.gmra.mxu2 %v18372_v1  ;;  %v11910_v51 = vor.u32 %v16628_v15, %v11907_v33  ;;  %v16816_v3 = vld [vmem:[#allocation13 + $0x5fc] sm:$0xf0]  ;;  %v15993_v15 = vld [vmem:[#allocation13 + $0x2008] sm:$0xf] }
 0x481   :  { %9691 = vmatpush.bf16.msra.mxu1 %v12314_v60  ;;  %9752 = vmatpush.bf16.msrb.mxu2 %v12862_v61  ;;  %v18495_v60 = vld [vmem:[#allocation14] sm:$0xff]  ;;  %v9436_v10 = vpop.f32.mrf.mxu1  ;;  %v9464_v12 = vpop.f32.mrf.mxu3 }
 0x482   :  { %9721 = vmatmul.bf16.vlgmr.msra.gmra.mxu3 %v18380_v4  ;;  %9734 = vmatmul.bf16.vlgmr.msrb.gmra.mxu0 %v18382_v6  ;;  %v3131_v61 = vperm.slane %v18495_v60, 4 }
 0x483   :  { %9765 = vmatpush.bf16.msrb.mxu3 %v13950_v54  ;;  %9778 = vmatpush.bf16.msra.mxu0 %v15038_v56  ;;  %v16968_v54 = vld [vmem:[#allocation13 + $0xac4] sm:$0xf]  ;;  %v12318_v56 = vor.u32 %v16730_v45, %v12315_v46  ;;  %v7879_v45 = vpack.c.b16 %v6689_v22, %v6689_v22  ;;  %v14086_v46 = vor.u32 %v17172_v2, %v14083_v26  ;;  %v17054_v22 = vld [vmem:[#allocation13 + $0xd6c] sm:$0xf0] }
 0x484   :  { %v13270_v37 = vor.u32 %v16968_v54, %v13267_v55  ;;  %v9437_v17 = vadd.f32 %v9436_v10, %v3131_v61  ;;  %v12729_v54 = vld [vmem:[#allocation13 + $0x688] sm:$0xf]  ;;  %v16850_v55 = vld [vmem:[#allocation13 + $0x70c] sm:$0xf0]  ;;  %v15715_v10 = vld [vmem:[#allocation13 + $0x1e68] sm:$0xf0]  ;;  %v13546_v33 = vor.u32 %v17054_v22, %v13545_v28 }
 0x485   :  { %9692 = vmatpush.bf16.msra.mxu1 %v12178_v13  ;;  %9753 = vmatpush.bf16.msrb.mxu2 %v12726_v62  ;;  %v14358_v13 = vor.u32 %v17240_v57, %v14355_v24  ;;  %v16123_v62 = vld [vmem:[#allocation13 + $0x2198] sm:$0xf0]  ;;  %v17122_v57 = vld [vmem:[#allocation13 + $0xf8c] sm:$0xf0]  ;;  %v9093_v24 = vsel %vm9064_vm10, %v7879_v45, 0  ;;  %v12730_v12 = vor.u32 %v16850_v55, %v12729_v54  ;;  %v15718_v7 = vor.u32 %v17580_v52, %v15715_v10 }
 0x486   :  { %v16126_v19 = vor.u32 %v17682_v5, %v16123_v62  ;;  %v9450_v36 = vadd.f32 %v18492_v50, %v9437_v17  ;;  %v17088_v62 = vld [vmem:[#allocation13 + $0xe7c] sm:$0xf0]  ;;  %v17512_v26 = vld [vmem:[#allocation13 + $0x1bc4] sm:$0xf]  ;;  %v3132_v45 = vperm.slane %v18495_v60, 5 }
 0x487   :  { %9766 = vmatpush.bf16.msrb.mxu3 %v13814_v43  ;;  %9779 = vmatpush.bf16.msra.mxu0 %v14902_v8  ;;  %v16257_v43 = vld [vmem:[#allocation13 + $0x2220] sm:$0xf]  ;;  %v17733_v8 = vld [vmem:[#allocation13 + $0x22a4] sm:$0xf0] }
 0x488   :  { %v9463_v50 = vadd.f32 %v18490_v16, %v9450_v36  ;;  %v17632_v54 = vld [vmem:[#allocation13 + $0x1f7c] sm:$0xf0]  ;;  %v14905_v22 = vld [vmem:[#allocation13 + $0x1788] sm:$0xf] }
 0x489   :  { %9693 = vmatpush.bf16.msra.mxu1 %v12042_v59  ;;  %9754 = vmatpush.bf16.msrb.mxu2 %v12590_v21  ;;  %v17648_v59 = vld [vmem:[#allocation13 + $0x2004] sm:$0xf]  ;;  %v15987_v21 = vld [vmem:[#allocation13 + $0x2088] sm:$0xf0]  ;;  %v9438_v44 = vpop.f32.mrf.mxu1 }
 0x48a   :  { %v15990_v20 = vor.u32 %v17648_v59, %v15987_v21  ;;  %v16782_v59 = vld [vmem:[#allocation13 + $0x4ec] sm:$0xf0]  ;;  %v16748_v44 = vld [vmem:[#allocation13 + $0x3dc] sm:$0xf0] }
 0x48b   :  { %9767 = vmatpush.bf16.msrb.mxu3 %v13678_v53  ;;  %9780 = vmatpush.bf16.msra.mxu0 %v14766_v58  ;;  %v16258_v53 = vor.u32 %v17733_v8, %v16257_v43  ;;  %v12043_v58 = vld [vmem:[#allocation13 + $0x1b8] sm:$0xf0]  ;;  %v12593_v43 = vld [vmem:[#allocation13 + $0x578] sm:$0xf]  ;;  %v9476_v8 = vadd.f32 %v18484_v40, %v9463_v50 }
 0x48c   :  { %v16129_v40 = vld [vmem:[#allocation13 + $0x2118] sm:$0xf] }
 0x48d   :  { %9694 = vmatpush.bf16.msra.mxu1 %v11906_v34  ;;  %9755 = vmatpush.bf16.msrb.mxu2 %v12454_v39  ;;  %v13953_v34 = vld [vmem:[#allocation13 + $0x1018] sm:$0xf]  ;;  %v17156_v39 = vld [vmem:[#allocation13 + $0x109c] sm:$0xf0] }
 0x48f   :  { %9768 = vmatpush.bf16.msrb.mxu3 %v13542_v30  ;;  %9781 = vmatpush.bf16.msra.mxu0 %v14630_v31  ;;  %v12046_v30 = vor.u32 %v16662_v18, %v12043_v58  ;;  %v12865_v31 = vld [vmem:[#allocation13 + $0x798] sm:$0xf]  ;;  %v17700_v18 = vld [vmem:[#allocation13 + $0x219c] sm:$0xf0]  ;;  %v12594_v58 = vor.u32 %v16816_v3, %v12593_v43  ;;  %v15171_v43 = vld [vmem:[#allocation13 + $0x1a28] sm:$0xf0] }
 0x490   :  { %9695 = vmatmul.bf16.vlgmr.msra.gmra.mxu1 %v18370_v35  ;;  %v16130_v2 = vor.u32 %v17700_v18, %v16129_v40 }
 0x491   :  { %9744 = vmatpush.bf16.msrb.mxu1 %v9090_v47  ;;  %9756 = vmatpush.bf16.msrb.mxu2 %v12318_v56  ;;  %v12866_v47 = vor.u32 %v16884_v29, %v12865_v31  ;;  %v13817_v56 = vld [vmem:[#allocation13 + $0xf08] sm:$0xf]  ;;  %v9488_v0 = vpop.f32.mrf.mxu1  ;;  %v17666_v31 = vld [vmem:[#allocation13 + $0x208c] sm:$0xf0] }
 0x492   :  { %v9489_v17 = vadd.f32 %v9488_v0, %v9476_v8  ;;  %v15721_v8 = vld [vmem:[#allocation13 + $0x1de8] sm:$0xf]  ;;  %v15041_v0 = vld [vmem:[#allocation13 + $0x1898] sm:$0xf] }
 0x493   :  { %9769 = vmatpush.bf16.msrb.mxu3 %v13406_v48  ;;  %9782 = vmatpush.bf16.msra.mxu0 %v14494_v38  ;;  %v17614_v48 = vld [vmem:[#allocation13 + $0x1ef4] sm:$0xf]  ;;  %v13954_v38 = vor.u32 %v17156_v39, %v13953_v34  ;;  %v18503_v16 = vpop.f32.mrf.mxu0  ;;  %v12321_v34 = vld [vmem:[#allocation13 + $0x358] sm:$0xf] }
 0x494   :  { %v15854_v61 = vor.u32 %v17614_v48, %v15851_v49  ;;  %11381 = vst [vmem:[%s19046_s9 + $0x20] sm:$0xff] %v9489_v17  ;;  %v15994_v48 = vor.u32 %v17666_v31, %v15993_v15  ;;  %v17478_v49 = vld [vmem:[#allocation13 + $0x1ab4] sm:$0xf]  ;;  %v12322_v50 = vor.u32 %v16748_v44, %v12321_v34  ;;  %v13137_v17 = vld [vmem:[#allocation13 + $0x9b8] sm:$0xf] }
 0x495   :  { %9745 = vmatpush.bf16.msrb.mxu1 %v16394_v63  ;;  %9757 = vmatpush.bf16.msrb.mxu2 %v12182_v32  ;;  %v17750_v63 = vld [vmem:[#allocation13 + $0x2334] sm:$0xf]  ;;  %v17716_v32 = vld [vmem:[#allocation13 + $0x2224] sm:$0xf]  ;;  %v13001_v15 = vld [vmem:[#allocation13 + $0x8a8] sm:$0xf] }
 0x496   :  { %v16398_v5 = vor.u32 %v17750_v63, %v16395_v9  ;;  %v16262_v21 = vor.u32 %v17716_v32, %v16259_v11  ;;  %v18517_v63 = vld [vmem:[#allocation13 + $0x2448] sm:$0x77]  ;;  %v12049_v32 = vld [vmem:[#allocation13 + $0x138] sm:$0xf]  ;;  %v16918_v31 = vld [vmem:[#allocation13 + $0x92c] sm:$0xf0] }
 0x497   :  { %9770 = vmatpush.bf16.msrb.mxu3 %v13270_v37  ;;  %9783 = vmatpush.bf16.msra.mxu0 %v14358_v13  ;;  %v13818_v37 = vor.u32 %v17122_v57, %v13817_v56  ;;  %v13681_v13 = vld [vmem:[#allocation13 + $0xdf8] sm:$0xf]  ;;  %v9501_v29 = vpop.f32.mrf.mxu2  ;;  %v12185_v56 = vld [vmem:[#allocation13 + $0x248] sm:$0xf]  ;;  %v16714_v57 = vld [vmem:[#allocation13 + $0x2cc] sm:$0xf0]  ;;  %v6690_v11 = vunpack.c.l.b16 %v18517_v63 }
 0x498   :  { %v17530_v44 = vld [vmem:[#allocation13 + $0x1c4c] sm:$0xf0] }
 0x499   :  { %9746 = vmatpush.bf16.msrb.mxu1 %v16258_v53  ;;  %9758 = vmatpush.bf16.msrb.mxu2 %v12046_v30  ;;  %v15579_v53 = vld [vmem:[#allocation13 + $0x1d58] sm:$0xf0]  ;;  %v15443_v30 = vld [vmem:[#allocation13 + $0x1c48] sm:$0xf0] }
 0x49a   :  { %v15582_v23 = vor.u32 %v17546_v14, %v15579_v53  ;;  %v16680_v14 = vld [vmem:[#allocation13 + $0x1bc] sm:$0xf0] }
 0x49b   :  { %9771 = vmatpush.bf16.msrb.mxu3 %v13134_v41  ;;  %9784 = vmatpush.bf16.msra.mxu0 %v14222_v25  ;;  %v12457_v41 = vld [vmem:[#allocation13 + $0x468] sm:$0xf]  ;;  %v18514_v25 = vpop.f32.mrf.mxu3  ;;  %v9529_v39 = vpop.f32.mrf.mxu0  ;;  %v16952_v53 = vld [vmem:[#allocation13 + $0xa3c] sm:$0xf0] }
 0x49c   :  { %v12458_v36 = vor.u32 %v16782_v59, %v12457_v41  ;;  %v15585_v41 = vld [vmem:[#allocation13 + $0x1cd8] sm:$0xf]  ;;  %v17564_v59 = vld [vmem:[#allocation13 + $0x1d5c] sm:$0xf0]  ;;  %v13138_v28 = vor.u32 %v16952_v53, %v13137_v17  ;;  %v15449_v39 = vld [vmem:[#allocation13 + $0x1bc8] sm:$0xf] }
 0x49d   :  { %9791 = vmatpush.bf16.msra.mxu1 %v16126_v19  ;;  %9759 = vmatpush.bf16.msrb.mxu2 %v11910_v51  ;;  %v13682_v19 = vor.u32 %v17088_v62, %v13681_v13  ;;  %v15307_v51 = vld [vmem:[#allocation13 + $0x1b38] sm:$0xf0]  ;;  %v12186_v13 = vor.u32 %v16714_v57, %v12185_v56  ;;  %v12731_v56 = vld [vmem:[#allocation13 + $0x710] sm:$0xf0] }
 0x49e   :  { %v15310_v52 = vor.u32 %v17478_v49, %v15307_v51  ;;  %v14769_v51 = vld [vmem:[#allocation13 + $0x1678] sm:$0xf] }
 0x49f   :  { %9772 = vmatpush.bf16.msrb.mxu3 %v12998_v42  ;;  %9785 = vmatpush.bf16.msra.mxu0 %v14086_v46  ;;  %v17020_v42 = vld [vmem:[#allocation13 + $0xc5c] sm:$0xf0]  ;;  %v9490_v46 = vpop.f32.mrf.mxu1  ;;  %v9503_v3 = vpop.f32.mrf.mxu2 }
 0x4a0   :  { %16503 = vmatmul.msk.bf16.vlgmr.msrb.gmra.mxu1 %vm9060_vm11, %v18388_v27  ;;  %9760 = vmatmul.bf16.vlgmr.msrb.gmra.mxu2 %v18370_v35  ;;  %v13002_v46 = vor.u32 %v16918_v31, %v13001_v15 }
 0x4a1   :  { %9792 = vmatpush.bf16.msra.mxu1 %v15990_v20  ;;  %9809 = vmatpush.bf16.msra.mxu2 %v9093_v24  ;;  %v13409_v20 = vld [vmem:[#allocation13 + $0xbd8] sm:$0xf]  ;;  %v13273_v24 = vld [vmem:[#allocation13 + $0xac8] sm:$0xf] }
 0x4a2   :  { %9773 = vmatmul.bf16.vlgmr.msrb.gmra.mxu3 %v18372_v1  ;;  %9786 = vmatmul.bf16.vlgmr.msra.gmra.mxu0 %v18380_v4  ;;  %v13410_v55 = vor.u32 %v17020_v42, %v13409_v20 }
 0x4a3   :  { %9817 = vmatpush.bf16.msra.mxu3 %v12866_v47  ;;  %9830 = vmatpush.bf16.msrb.mxu0 %v13954_v38  ;;  %v15446_v47 = vor.u32 %v17512_v26, %v15443_v30  ;;  %v15857_v38 = vld [vmem:[#allocation13 + $0x1ef8] sm:$0xf]  ;;  %v9516_v9 = vpop.f32.mrf.mxu3  ;;  %v7880_v26 = vpack.c.b16 %v6690_v11, %v6690_v11  ;;  %v16646_v30 = vld [vmem:[#allocation13 + $0xac] sm:$0xf0]  ;;  %v16131_v11 = vld [vmem:[#allocation13 + $0x21a0] sm:$0xf0] }
 0x4a4   :  { %v15858_v10 = vor.u32 %v17632_v54, %v15857_v38  ;;  %v17360_v38 = vld [vmem:[#allocation13 + $0x16fc] sm:$0xf0]  ;;  %v16401_v54 = vld [vmem:[#allocation13 + $0x2338] sm:$0xf] }
 0x4a5   :  { %9793 = vmatpush.bf16.msra.mxu1 %v15854_v61  ;;  %9810 = vmatpush.bf16.msra.mxu2 %v16398_v5  ;;  %v16986_v61 = vld [vmem:[#allocation13 + $0xb4c] sm:$0xf0]  ;;  %v14770_v9 = vor.u32 %v17360_v38, %v14769_v51  ;;  %v14771_v51 = vld [vmem:[#allocation13 + $0x1700] sm:$0xf0] }
 0x4a6   :  { %v17598_v5 = vld [vmem:[#allocation13 + $0x1e6c] sm:$0xf0]  ;;  %v13274_v62 = vor.u32 %v16986_v61, %v13273_v24  ;;  %v15313_v24 = vld [vmem:[#allocation13 + $0x1ab8] sm:$0xf]  ;;  %v17496_v61 = vld [vmem:[#allocation13 + $0x1b3c] sm:$0xf0] }
 0x4a7   :  { %9818 = vmatpush.bf16.msra.mxu3 %v12730_v12  ;;  %9831 = vmatpush.bf16.msrb.mxu0 %v13818_v37  ;;  %v17444_v12 = vld [vmem:[#allocation13 + $0x19a4] sm:$0xf]  ;;  %v9502_v37 = vadd.f32 %v9501_v29, %v3132_v45  ;;  %v15722_v18 = vor.u32 %v17598_v5, %v15721_v8  ;;  %v16867_v29 = vld [vmem:[#allocation13 + $0x79c] sm:$0xf]  ;;  %v9553_v42 = vpop.f32.mrf.mxu2  ;;  %v17734_v8 = vld [vmem:[#allocation13 + $0x22ac] sm:$0xf0]  ;;  %v15314_v3 = vor.u32 %v17496_v61, %v15313_v24 }
 0x4a8   :  { %v15174_v40 = vor.u32 %v17444_v12, %v15171_v43  ;;  %v16265_v43 = vld [vmem:[#allocation13 + $0x2228] sm:$0xf]  ;;  %v17581_v24 = vld [vmem:[#allocation13 + $0x1dec] sm:$0xf]  ;;  %v15723_v61 = vld [vmem:[#allocation13 + $0x1e70] sm:$0xf0] }
 0x4a9   :  { %9794 = vmatpush.bf16.msra.mxu1 %v15718_v7  ;;  %9811 = vmatpush.bf16.msra.mxu2 %v16262_v21  ;;  %v17428_v7 = vld [vmem:[#allocation13 + $0x191c] sm:$0xf0]  ;;  %v12050_v21 = vor.u32 %v16680_v14, %v12049_v32  ;;  %v17683_v32 = vld [vmem:[#allocation13 + $0x211c] sm:$0xf] }
 0x4ab   :  { %9819 = vmatpush.bf16.msra.mxu3 %v12594_v58  ;;  %9832 = vmatpush.bf16.msrb.mxu0 %v13682_v19  ;;  %v9515_v58 = vadd.f32 %v18514_v25, %v9502_v37  ;;  %v15042_v19 = vor.u32 %v17428_v7, %v15041_v0  ;;  %v15586_v25 = vor.u32 %v17564_v59, %v15585_v41  ;;  %v15177_v0 = vld [vmem:[#allocation13 + $0x19a8] sm:$0xf]  ;;  %v17462_v7 = vld [vmem:[#allocation13 + $0x1a2c] sm:$0xf0]  ;;  %v14497_v41 = vld [vmem:[#allocation13 + $0x1458] sm:$0xf] }
 0x4ac   :  { %v17292_v59 = vld [vmem:[#allocation13 + $0x14dc] sm:$0xf0] }
 0x4ad   :  { %9795 = vmatpush.bf16.msra.mxu1 %v15582_v23  ;;  %9856 = vmatpush.bf16.msrb.mxu2 %v16130_v2  ;;  %v17394_v23 = vld [vmem:[#allocation13 + $0x180c] sm:$0xf0]  ;;  %v11913_v2 = vld [vmem:[#allocation13 + $0x28] sm:$0xf]  ;;  %v9540_v20 = vpop.f32.mrf.mxu1  ;;  %v14498_v31 = vor.u32 %v17292_v59, %v14497_v41 }
 0x4ae   :  { %v14906_v34 = vor.u32 %v17394_v23, %v14905_v22  ;;  %v11914_v45 = vor.u32 %v16646_v30, %v11913_v2  ;;  %v16765_v22 = vld [vmem:[#allocation13 + $0x46c] sm:$0xf]  ;;  %v12459_v23 = vld [vmem:[#allocation13 + $0x4f0] sm:$0xf0] }
 0x4af   :  { %9820 = vmatpush.bf16.msra.mxu3 %v12458_v36  ;;  %9833 = vmatpush.bf16.msrb.mxu0 %v13546_v33  ;;  %v12867_v36 = vld [vmem:[#allocation13 + $0x820] sm:$0xf0]  ;;  %v9528_v33 = vadd.f32 %v18503_v16, %v9515_v58  ;;  %v15450_v16 = vor.u32 %v17530_v44, %v15449_v39  ;;  %v9555_v17 = vpop.f32.mrf.mxu2  ;;  %v16266_v58 = vor.u32 %v17734_v8, %v16265_v43  ;;  %v15995_v30 = vld [vmem:[#allocation13 + $0x2090] sm:$0xf0]  ;;  %v14089_v8 = vld [vmem:[#allocation13 + $0x1128] sm:$0xf] }
 0x4b0   :  { %16504 = vmatmul.msk.bf16.vlgmr.msra.gmra.mxu2 %vm9060_vm11, %v18388_v27  ;;  %v12870_v49 = vor.u32 %v16867_v29, %v12867_v36  ;;  %v14907_v29 = vld [vmem:[#allocation13 + $0x1810] sm:$0xf0]  ;;  %v12462_v36 = vor.u32 %v16765_v22, %v12459_v23 }
 0x4b1   :  { %9796 = vmatpush.bf16.msra.mxu1 %v15446_v47  ;;  %9857 = vmatpush.bf16.msrb.mxu2 %v15994_v48  ;;  %v9096_v47 = vsel %vm9064_vm10, %v7880_v26, 0  ;;  %v9541_v48 = vadd.f32 %v9540_v20, %v9528_v33  ;;  %v17649_v26 = vld [vmem:[#allocation13 + $0x200c] sm:$0xf]  ;;  %v14361_v33 = vld [vmem:[#allocation13 + $0x1348] sm:$0xf] }
 0x4b2   :  { %v15998_v44 = vor.u32 %v17649_v26, %v15995_v30  ;;  %v16731_v20 = vld [vmem:[#allocation13 + $0x35c] sm:$0xf]  ;;  %v13819_v23 = vld [vmem:[#allocation13 + $0xf90] sm:$0xf0] }
 0x4b3   :  { %9821 = vmatpush.bf16.msra.mxu3 %v12322_v50  ;;  %9834 = vmatpush.bf16.msrb.mxu0 %v13410_v55  ;;  %v17768_v50 = vld [vmem:[#allocation13 + $0x23bc] sm:$0xf0]  ;;  %v16833_v55 = vld [vmem:[#allocation13 + $0x68c] sm:$0xf]  ;;  %v9554_v57 = vadd.f32 %v9553_v42, %v9541_v48  ;;  %v18529_v5 = vpop.f32.mrf.mxu0  ;;  %v12323_v42 = vld [vmem:[#allocation13 + $0x3e0] sm:$0xf0] }
 0x4b4   :  { %v16402_v12 = vor.u32 %v17768_v50, %v16401_v54  ;;  %v12734_v37 = vor.u32 %v16833_v55, %v12731_v56  ;;  %v12326_v38 = vor.u32 %v16731_v20, %v12323_v42  ;;  %v14225_v54 = vld [vmem:[#allocation13 + $0x1238] sm:$0xf]  ;;  %v16697_v55 = vld [vmem:[#allocation13 + $0x24c] sm:$0xf]  ;;  %v12187_v56 = vld [vmem:[#allocation13 + $0x2d0] sm:$0xf0] }
 0x4b5   :  { %9797 = vmatpush.bf16.msra.mxu1 %v15310_v52  ;;  %9858 = vmatpush.bf16.msrb.mxu2 %v15858_v10  ;;  %v14633_v52 = vld [vmem:[#allocation13 + $0x1568] sm:$0xf]  ;;  %v17326_v10 = vld [vmem:[#allocation13 + $0x15ec] sm:$0xf0]  ;;  %11382 = vst [vmem:[%s19046_s9 + $0x28] sm:$0xff] %v9554_v57  ;;  %v9542_v14 = vpop.f32.mrf.mxu1  ;;  %v12190_v43 = vor.u32 %v16697_v55, %v12187_v56 }
 0x4b6   :  { %v14634_v53 = vor.u32 %v17326_v10, %v14633_v52  ;;  %v12051_v14 = vld [vmem:[#allocation13 + $0x1c0] sm:$0xf0]  ;;  %v11915_v26 = vld [vmem:[#allocation13 + $0xb0] sm:$0xf0] }
 0x4b7   :  { %9822 = vmatpush.bf16.msra.mxu3 %v12186_v13  ;;  %9835 = vmatpush.bf16.msrb.mxu0 %v13274_v62  ;;  %v16799_v13 = vld [vmem:[#allocation13 + $0x57c] sm:$0xf]  ;;  %v12595_v62 = vld [vmem:[#allocation13 + $0x600] sm:$0xf0] }
 0x4b9   :  { %9798 = vmatpush.bf16.msra.mxu1 %v15174_v40  ;;  %9859 = vmatpush.bf16.msrb.mxu2 %v15722_v18  ;;  %v17411_v40 = vld [vmem:[#allocation13 + $0x189c] sm:$0xf]  ;;  %v15043_v18 = vld [vmem:[#allocation13 + $0x1920] sm:$0xf0]  ;;  %v18533_v15 = vpop.f32.mrf.mxu3 }
 0x4ba   :  { %v15046_v2 = vor.u32 %v17411_v40, %v15043_v18  ;;  %v15587_v40 = vld [vmem:[#allocation13 + $0x1d60] sm:$0xf0] }
 0x4bb   :  { %9823 = vmatpush.bf16.msra.mxu3 %v12050_v21  ;;  %9836 = vmatpush.bf16.msrb.mxu0 %v13138_v28  ;;  %v15178_v21 = vor.u32 %v17462_v7, %v15177_v0  ;;  %v16134_v28 = vor.u32 %v17683_v32, %v16131_v11  ;;  %v9581_v39 = vpop.f32.mrf.mxu0  ;;  %v15726_v7 = vor.u32 %v17581_v24, %v15723_v61  ;;  %v13955_v32 = vld [vmem:[#allocation13 + $0x10a0] sm:$0xf0]  ;;  %v16663_v11 = vld [vmem:[#allocation13 + $0x13c] sm:$0xf]  ;;  %v13547_v24 = vld [vmem:[#allocation13 + $0xd70] sm:$0xf0] }
 0x4bc   :  { %9799 = vmatmul.bf16.vlgmr.msra.gmra.mxu1 %v18382_v6  ;;  %v12054_v59 = vor.u32 %v16663_v11, %v12051_v14  ;;  %v17445_v61 = vld [vmem:[#allocation13 + $0x19ac] sm:$0xf]  ;;  %v16137_v11 = vld [vmem:[#allocation13 + $0x2120] sm:$0xf]  ;;  %v17701_v14 = vld [vmem:[#allocation13 + $0x21a4] sm:$0xf0] }
 0x4bd   :  { %9843 = vmatpush.bf16.msrb.mxu1 %v15042_v19  ;;  %9860 = vmatpush.bf16.msrb.mxu2 %v15586_v25  ;;  %v12598_v19 = vor.u32 %v16799_v13, %v12595_v62  ;;  %v17377_v25 = vld [vmem:[#allocation13 + $0x178c] sm:$0xf]  ;;  %v17139_v13 = vld [vmem:[#allocation13 + $0x101c] sm:$0xf]  ;;  %v6691_v62 = vunpack.c.h.b16 %v18517_v63 }
 0x4be   :  { %v13958_v63 = vor.u32 %v17139_v13, %v13955_v32  ;;  %v17173_v13 = vld [vmem:[#allocation13 + $0x112c] sm:$0xf]  ;;  %v17429_v32 = vld [vmem:[#allocation13 + $0x1924] sm:$0xf0] }
 0x4bf   :  { %9824 = vmatpush.bf16.msra.mxu3 %v11914_v45  ;;  %9837 = vmatpush.bf16.msrb.mxu0 %v13002_v46  ;;  %v14910_v45 = vor.u32 %v17377_v25, %v14907_v29  ;;  %v17615_v46 = vld [vmem:[#allocation13 + $0x1efc] sm:$0xf]  ;;  %v15451_v25 = vld [vmem:[#allocation13 + $0x1c50] sm:$0xf0] }
 0x4c1   :  { %9844 = vmatpush.bf16.msrb.mxu1 %v14906_v34  ;;  %9861 = vmatpush.bf16.msrb.mxu2 %v15450_v16  ;;  %v17258_v34 = vld [vmem:[#allocation13 + $0x13cc] sm:$0xf0]  ;;  %v17224_v16 = vld [vmem:[#allocation13 + $0x12bc] sm:$0xf0]  ;;  %v9568_v52 = vpop.f32.mrf.mxu3 }
 0x4c2   :  { %9825 = vmatmul.bf16.vlgmr.msra.gmra.mxu3 %v18370_v35  ;;  %9838 = vmatmul.bf16.vlgmr.msrb.gmra.mxu0 %v18372_v1  ;;  %v14362_v48 = vor.u32 %v17258_v34, %v14361_v33  ;;  %v14226_v10 = vor.u32 %v17224_v16, %v14225_v54  ;;  %v14363_v33 = vld [vmem:[#allocation13 + $0x13d0] sm:$0xf0]  ;;  %v17751_v54 = vld [vmem:[#allocation13 + $0x233c] sm:$0xf]  ;;  %v16403_v16 = vld [vmem:[#allocation13 + $0x23c0] sm:$0xf0] }
 0x4c3   :  { %9874 = vmatpush.bf16.msrb.mxu3 %v9096_v47  ;;  %9882 = vmatpush.bf16.msra.mxu0 %v12870_v49  ;;  %v15859_v47 = vld [vmem:[#allocation13 + $0x1f80] sm:$0xf0]  ;;  %v17343_v49 = vld [vmem:[#allocation13 + $0x167c] sm:$0xf]  ;;  %v9605_v0 = vpop.f32.mrf.mxu2  ;;  %v16406_v52 = vor.u32 %v17751_v54, %v16403_v16 }
 0x4c4   :  { %v15862_v50 = vor.u32 %v17615_v46, %v15859_v47  ;;  %v14774_v57 = vor.u32 %v17343_v49, %v14771_v51  ;;  %v17071_v46 = vld [vmem:[#allocation13 + $0xdfc] sm:$0xf]  ;;  %v13683_v47 = vld [vmem:[#allocation13 + $0xe80] sm:$0xf0] }
 0x4c5   :  { %9845 = vmatpush.bf16.msrb.mxu1 %v14770_v9  ;;  %9862 = vmatpush.bf16.msrb.mxu2 %v15314_v3  ;;  %v3133_v9 = vperm.slane %v18495_v60, 6  ;;  %v17190_v3 = vld [vmem:[#allocation13 + $0x11ac] sm:$0xf0]  ;;  %v13686_v56 = vor.u32 %v17071_v46, %v13683_v47  ;;  %v17633_v47 = vld [vmem:[#allocation13 + $0x1f84] sm:$0xf0] }
 0x4c6   :  { %v14090_v18 = vor.u32 %v17190_v3, %v14089_v8 }
 0x4c7   :  { %9875 = vmatpush.bf16.msrb.mxu3 %v16402_v12  ;;  %9883 = vmatpush.bf16.msra.mxu0 %v12734_v37  ;;  %v17309_v12 = vld [vmem:[#allocation13 + $0x156c] sm:$0xf]  ;;  %v14635_v37 = vld [vmem:[#allocation13 + $0x15f0] sm:$0xf0]  ;;  %v9567_v41 = vadd.f32 %v18533_v15, %v3133_v9 }
 0x4c8   :  { %v14638_v17 = vor.u32 %v17309_v12, %v14635_v37  ;;  %v17717_v12 = vld [vmem:[#allocation13 + $0x222c] sm:$0xf]  ;;  %v16267_v37 = vld [vmem:[#allocation13 + $0x22b0] sm:$0xf0] }
 0x4c9   :  { %9846 = vmatpush.bf16.msrb.mxu1 %v14634_v53  ;;  %9863 = vmatpush.bf16.msrb.mxu2 %v15178_v21  ;;  %v17547_v53 = vld [vmem:[#allocation13 + $0x1cdc] sm:$0xf]  ;;  %v17105_v21 = vld [vmem:[#allocation13 + $0xf0c] sm:$0xf]  ;;  %v9618_v29 = vpop.f32.mrf.mxu3  ;;  %v9580_v15 = vadd.f32 %v18529_v5, %v9567_v41 }
 0x4ca   :  { %v15590_v22 = vor.u32 %v17547_v53, %v15587_v40  ;;  %v13822_v34 = vor.u32 %v17105_v21, %v13819_v23  ;;  %v17207_v5 = vld [vmem:[#allocation13 + $0x123c] sm:$0xf]  ;;  %v13961_v53 = vld [vmem:[#allocation13 + $0x1020] sm:$0xf]  ;;  %v17157_v40 = vld [vmem:[#allocation13 + $0x10a4] sm:$0xf0] }
 0x4cb   :  { %9876 = vmatpush.bf16.msrb.mxu3 %v16266_v58  ;;  %9884 = vmatpush.bf16.msra.mxu0 %v12598_v19  ;;  %v17275_v58 = vld [vmem:[#allocation13 + $0x145c] sm:$0xf]  ;;  %v14499_v19 = vld [vmem:[#allocation13 + $0x14e0] sm:$0xf0]  ;;  %v9607_v42 = vpop.f32.mrf.mxu2  ;;  %v14913_v23 = vld [vmem:[#allocation13 + $0x1790] sm:$0xf] }
 0x4cc   :  { %9864 = vmatmul.bf16.vlgmr.msrb.gmra.mxu2 %v18382_v6  ;;  %v14502_v30 = vor.u32 %v17275_v58, %v14499_v19  ;;  %v16270_v19 = vor.u32 %v17717_v12, %v16267_v37  ;;  %v17003_v41 = vld [vmem:[#allocation13 + $0xbdc] sm:$0xf]  ;;  %v17361_v42 = vld [vmem:[#allocation13 + $0x1704] sm:$0xf0]  ;;  %v13003_v12 = vld [vmem:[#allocation13 + $0x930] sm:$0xf0] }
 0x4cd   :  { %9908 = vmatpush.bf16.msra.mxu2 %v15046_v2  ;;  %9847 = vmatpush.bf16.msrb.mxu1 %v14498_v31  ;;  %v16629_v2 = vld [vmem:[#allocation13 + $0x2c] sm:$0xf]  ;;  %v9592_v20 = vpop.f32.mrf.mxu1 }
 0x4ce   :  { %v17513_v31 = vld [vmem:[#allocation13 + $0x1bcc] sm:$0xf]  ;;  %v11918_v39 = vor.u32 %v16629_v2, %v11915_v26  ;;  %v9593_v49 = vadd.f32 %v9592_v20, %v9580_v15  ;;  %v17395_v2 = vld [vmem:[#allocation13 + $0x1814] sm:$0xf0]  ;;  %v16001_v26 = vld [vmem:[#allocation13 + $0x2010] sm:$0xf] }
 0x4cf   :  { %9921 = vmatpush.bf16.msra.mxu3 %v16134_v28  ;;  %9885 = vmatpush.bf16.msra.mxu0 %v12462_v36  ;;  %v7881_v28 = vpack.c.b16 %v6691_v62, %v6691_v62  ;;  %v17241_v36 = vld [vmem:[#allocation13 + $0x134c] sm:$0xf]  ;;  %v14091_v62 = vld [vmem:[#allocation13 + $0x11b0] sm:$0xf0]  ;;  %v14777_v20 = vld [vmem:[#allocation13 + $0x1680] sm:$0xf] }
 0x4d0   :  { %v14366_v51 = vor.u32 %v17241_v36, %v14363_v33  ;;  %v9606_v55 = vadd.f32 %v9605_v0, %v9593_v49  ;;  %v15049_v0 = vld [vmem:[#allocation13 + $0x18a0] sm:$0xf]  ;;  %v16969_v36 = vld [vmem:[#allocation13 + $0xacc] sm:$0xf]  ;;  %v13275_v33 = vld [vmem:[#allocation13 + $0xb50] sm:$0xf0]  ;;  %v14778_v54 = vor.u32 %v17361_v42, %v14777_v20 }
 0x4d1   :  { %9909 = vmatpush.bf16.msra.mxu2 %v14910_v45  ;;  %9848 = vmatpush.bf16.msrb.mxu1 %v14362_v48  ;;  %v15454_v45 = vor.u32 %v17513_v31, %v15451_v25  ;;  %v17479_v48 = vld [vmem:[#allocation13 + $0x1abc] sm:$0xf]  ;;  %v15050_v21 = vor.u32 %v17429_v32, %v15049_v0  ;;  %v17667_v31 = vld [vmem:[#allocation13 + $0x2094] sm:$0xf0]  ;;  %v13825_v25 = vld [vmem:[#allocation13 + $0xf10] sm:$0xf]  ;;  %v13278_v46 = vor.u32 %v16969_v36, %v13275_v33 }
 0x4d2   :  { %16505 = vmatmul.msk.bf16.vlgmr.msrb.gmra.mxu3 %vm9060_vm11, %v18388_v27  ;;  %v17089_v49 = vld [vmem:[#allocation13 + $0xe84] sm:$0xf0]  ;;  %v14505_v32 = vld [vmem:[#allocation13 + $0x1460] sm:$0xf] }
 0x4d3   :  { %9922 = vmatpush.bf16.msra.mxu3 %v15998_v44  ;;  %9886 = vmatpush.bf16.msra.mxu0 %v12326_v38  ;;  %v9099_v44 = vsel %vm9064_vm10, %v7881_v28, 0  ;;  %v15315_v38 = vld [vmem:[#allocation13 + $0x1b40] sm:$0xf0]  ;;  %v18544_v8 = vpop.f32.mrf.mxu0  ;;  %v16138_v28 = vor.u32 %v17701_v14, %v16137_v11  ;;  %v17293_v11 = vld [vmem:[#allocation13 + $0x14e4] sm:$0xf0] }
 0x4d4   :  { %v15318_v9 = vor.u32 %v17479_v48, %v15315_v38  ;;  %v13689_v48 = vld [vmem:[#allocation13 + $0xe00] sm:$0xf]  ;;  %v13139_v38 = vld [vmem:[#allocation13 + $0xa40] sm:$0xf0] }
 0x4d5   :  { %9910 = vmatpush.bf16.msra.mxu2 %v14774_v57  ;;  %9849 = vmatpush.bf16.msrb.mxu1 %v14226_v10  ;;  %v17037_v57 = vld [vmem:[#allocation13 + $0xcec] sm:$0xf]  ;;  %v15179_v10 = vld [vmem:[#allocation13 + $0x1a30] sm:$0xf0] }
 0x4d6   :  { %v15182_v58 = vor.u32 %v17445_v61, %v15179_v10  ;;  %v13553_v61 = vld [vmem:[#allocation13 + $0xcf0] sm:$0xf]  ;;  %v16901_v10 = vld [vmem:[#allocation13 + $0x8ac] sm:$0xf] }
 0x4d7   :  { %9923 = vmatpush.bf16.msra.mxu3 %v15862_v50  ;;  %9887 = vmatpush.bf16.msra.mxu0 %v12190_v43  ;;  %v14227_v50 = vld [vmem:[#allocation13 + $0x12c0] sm:$0xf0]  ;;  %v9619_v43 = vadd.f32 %v9618_v29, %v9606_v55  ;;  %v17123_v29 = vld [vmem:[#allocation13 + $0xf94] sm:$0xf0]  ;;  %v13006_v14 = vor.u32 %v16901_v10, %v13003_v12  ;;  %v13009_v10 = vld [vmem:[#allocation13 + $0x8b0] sm:$0xf] }
 0x4d8   :  { %v14230_v3 = vor.u32 %v17207_v5, %v14227_v50  ;;  %v13690_v5 = vor.u32 %v17089_v49, %v13689_v48  ;;  %v14641_v50 = vld [vmem:[#allocation13 + $0x1570] sm:$0xf]  ;;  %v17327_v55 = vld [vmem:[#allocation13 + $0x15f4] sm:$0xf0]  ;;  %v17497_v48 = vld [vmem:[#allocation13 + $0x1b44] sm:$0xf0] }
 0x4d9   :  { %9911 = vmatpush.bf16.msra.mxu2 %v14638_v17  ;;  %9850 = vmatpush.bf16.msrb.mxu1 %v14090_v18  ;;  %11383 = vst [vmem:[%s19046_s9 + $0x30] sm:$0xff] %v9619_v43  ;;  %v13550_v17 = vor.u32 %v17037_v57, %v13547_v24  ;;  %v9594_v18 = vpop.f32.mrf.mxu1  ;;  %v17599_v24 = vld [vmem:[#allocation13 + $0x1e74] sm:$0xf0]  ;;  %v14642_v43 = vor.u32 %v17327_v55, %v14641_v50  ;;  %v14097_v55 = vld [vmem:[#allocation13 + $0x1130] sm:$0xf] }
 0x4da   :  { %v16783_v50 = vld [vmem:[#allocation13 + $0x4f4] sm:$0xf0] }
 0x4db   :  { %9924 = vmatpush.bf16.msra.mxu3 %v15726_v7  ;;  %9888 = vmatpush.bf16.msra.mxu0 %v12054_v59  ;;  %v9620_v7 = vpop.f32.mrf.mxu3  ;;  %v14094_v59 = vor.u32 %v17173_v13, %v14091_v62  ;;  %v9633_v15 = vpop.f32.mrf.mxu0  ;;  %v16885_v13 = vld [vmem:[#allocation13 + $0x824] sm:$0xf0] }
 0x4dc   :  { %9851 = vmatmul.bf16.vlgmr.msrb.gmra.mxu1 %v18380_v4 }
 0x4dd   :  { %9895 = vmatpush.bf16.msra.mxu1 %v13958_v63  ;;  %9912 = vmatpush.bf16.msra.mxu2 %v14502_v30  ;;  %v13411_v63 = vld [vmem:[#allocation13 + $0xc60] sm:$0xf0] }
 0x4de   :  { %v13414_v30 = vor.u32 %v17003_v41, %v13411_v63  ;;  %v14506_v41 = vor.u32 %v17293_v11, %v14505_v32  ;;  %v12737_v63 = vld [vmem:[#allocation13 + $0x690] sm:$0xf]  ;;  %v15051_v32 = vld [vmem:[#allocation13 + $0x1928] sm:$0xf0]  ;;  %v12329_v11 = vld [vmem:[#allocation13 + $0x360] sm:$0xf] }
 0x4df   :  { %9925 = vmatpush.bf16.msra.mxu3 %v15590_v22  ;;  %9889 = vmatpush.bf16.msra.mxu0 %v11918_v39  ;;  %v13962_v22 = vor.u32 %v17157_v40, %v13961_v53  ;;  %v16002_v39 = vor.u32 %v17667_v31, %v16001_v26  ;;  %v17565_v53 = vld [vmem:[#allocation13 + $0x1d64] sm:$0xf0]  ;;  %v3134_v40 = vperm.slane %v18495_v60, 7  ;;  %v17531_v26 = vld [vmem:[#allocation13 + $0x1c54] sm:$0xf0] }
 0x4e1   :  { %9896 = vmatpush.bf16.msra.mxu1 %v13822_v34  ;;  %9913 = vmatpush.bf16.msra.mxu2 %v14366_v51  ;;  %v14914_v34 = vor.u32 %v17395_v2, %v14913_v23  ;;  %v16935_v51 = vld [vmem:[#allocation13 + $0x9bc] sm:$0xf]  ;;  %v15457_v2 = vld [vmem:[#allocation13 + $0x1bd0] sm:$0xf] }
 0x4e2   :  { %9890 = vmatmul.bf16.vlgmr.msra.gmra.mxu0 %v18370_v35  ;;  %v13142_v57 = vor.u32 %v16935_v51, %v13139_v38  ;;  %v15458_v42 = vor.u32 %v17531_v26, %v15457_v2  ;;  %v13145_v38 = vld [vmem:[#allocation13 + $0x9c0] sm:$0xf]  ;;  %v16715_v2 = vld [vmem:[#allocation13 + $0x2d4] sm:$0xf0]  ;;  %v16834_v26 = vld [vmem:[#allocation13 + $0x694] sm:$0xf] }
 0x4e3   :  { %9926 = vmatpush.bf16.msra.mxu3 %v15454_v45  ;;  %9939 = vmatpush.bf16.msrb.mxu0 %v9099_v44  ;;  %v13826_v44 = vor.u32 %v17123_v29, %v13825_v25  ;;  %v15865_v45 = vld [vmem:[#allocation13 + $0x1f00] sm:$0xf]  ;;  %v9657_v37 = vpop.f32.mrf.mxu2  ;;  %v18554_v62 = vpop.f32.mrf.mxu0  ;;  %v13281_v25 = vld [vmem:[#allocation13 + $0xad0] sm:$0xf]  ;;  %v16987_v29 = vld [vmem:[#allocation13 + $0xb54] sm:$0xf0] }
 0x4e4   :  { %v15866_v16 = vor.u32 %v17633_v47, %v15865_v45  ;;  %v14233_v45 = vld [vmem:[#allocation13 + $0x1240] sm:$0xf] }
 0x4e5   :  { %9897 = vmatpush.bf16.msra.mxu1 %v13686_v56  ;;  %9914 = vmatpush.bf16.msra.mxu2 %v14230_v3  ;;  %v15729_v56 = vld [vmem:[#allocation13 + $0x1df0] sm:$0xf]  ;;  %v12873_v3 = vld [vmem:[#allocation13 + $0x7a0] sm:$0xf] }
 0x4e6   :  { %v15730_v0 = vor.u32 %v17599_v24, %v15729_v56  ;;  %v12874_v18 = vor.u32 %v16885_v13, %v12873_v3  ;;  %v15321_v47 = vld [vmem:[#allocation13 + $0x1ac0] sm:$0xf]  ;;  %v17191_v56 = vld [vmem:[#allocation13 + $0x11b4] sm:$0xf0]  ;;  %v13963_v3 = vld [vmem:[#allocation13 + $0x10a8] sm:$0xf0] }
 0x4e7   :  { %9927 = vmatpush.bf16.msra.mxu3 %v15318_v9  ;;  %9940 = vmatpush.bf16.msrb.mxu0 %v16406_v52  ;;  %v17055_v9 = vld [vmem:[#allocation13 + $0xd74] sm:$0xf0]  ;;  %v18552_v52 = vpop.f32.mrf.mxu3  ;;  %v15322_v24 = vor.u32 %v17497_v48, %v15321_v47 }
 0x4e8   :  { %v13554_v7 = vor.u32 %v17055_v9, %v13553_v61  ;;  %v15185_v61 = vld [vmem:[#allocation13 + $0x19b0] sm:$0xf]  ;;  %v17463_v9 = vld [vmem:[#allocation13 + $0x1a34] sm:$0xf0] }
 0x4e9   :  { %9898 = vmatpush.bf16.msra.mxu1 %v13550_v17  ;;  %9915 = vmatpush.bf16.msra.mxu2 %v14094_v59  ;;  %v15593_v17 = vld [vmem:[#allocation13 + $0x1ce0] sm:$0xf]  ;;  %v16851_v59 = vld [vmem:[#allocation13 + $0x714] sm:$0xf0] }
 0x4ea   :  { %v12738_v31 = vor.u32 %v16851_v59, %v12737_v63  ;;  %v13827_v63 = vld [vmem:[#allocation13 + $0xf98] sm:$0xf0] }
 0x4eb   :  { %9928 = vmatpush.bf16.msra.mxu3 %v15182_v58  ;;  %9941 = vmatpush.bf16.msrb.mxu0 %v16270_v19  ;;  %v13417_v58 = vld [vmem:[#allocation13 + $0xbe0] sm:$0xf]  ;;  %v17021_v19 = vld [vmem:[#allocation13 + $0xc64] sm:$0xf0]  ;;  %v9659_v33 = vpop.f32.mrf.mxu2  ;;  %v9685_v20 = vpop.f32.mrf.mxu0 }
 0x4ec   :  { %9916 = vmatmul.bf16.vlgmr.msra.gmra.mxu2 %v18380_v4  ;;  %v13418_v23 = vor.u32 %v17021_v19, %v13417_v58  ;;  %v12057_v20 = vld [vmem:[#allocation13 + $0x140] sm:$0xf] }
 0x4ed   :  { %9960 = vmatpush.bf16.msrb.mxu2 %v13962_v22  ;;  %9899 = vmatpush.bf16.msra.mxu1 %v13414_v30  ;;  %v17259_v22 = vld [vmem:[#allocation13 + $0x13d4] sm:$0xf0]  ;;  %v9632_v30 = vadd.f32 %v18544_v8, %v3134_v40  ;;  %v9644_v36 = vpop.f32.mrf.mxu1  ;;  %v13282_v8 = vor.u32 %v16987_v29, %v13281_v25  ;;  %v12875_v40 = vld [vmem:[#allocation13 + $0x828] sm:$0xf0]  ;;  %v17072_v25 = vld [vmem:[#allocation13 + $0xe04] sm:$0xf] }
 0x4ee   :  { %9929 = vmatmul.bf16.vlgmr.msra.gmra.mxu3 %v18382_v6  ;;  %v13691_v29 = vld [vmem:[#allocation13 + $0xe88] sm:$0xf0] }
 0x4ef   :  { %9973 = vmatpush.bf16.msrb.mxu3 %v15050_v21  ;;  %9986 = vmatpush.bf16.msra.mxu0 %v16138_v28  ;;  %v15594_v21 = vor.u32 %v17565_v53, %v15593_v17  ;;  %v14369_v28 = vld [vmem:[#allocation13 + $0x1350] sm:$0xf]  ;;  %v9672_v60 = vpop.f32.mrf.mxu3  ;;  %v16749_v17 = vld [vmem:[#allocation13 + $0x3e4] sm:$0xf0]  ;;  %v16868_v53 = vld [vmem:[#allocation13 + $0x7a4] sm:$0xf] }
 0x4f0   :  { %v14370_v15 = vor.u32 %v17259_v22, %v14369_v28  ;;  %v12330_v59 = vor.u32 %v16749_v17, %v12329_v11  ;;  %v17378_v28 = vld [vmem:[#allocation13 + $0x1794] sm:$0xf]  ;;  %v14915_v22 = vld [vmem:[#allocation13 + $0x1818] sm:$0xf0]  ;;  %v16732_v11 = vld [vmem:[#allocation13 + $0x364] sm:$0xf] }
 0x4f1   :  { %9961 = vmatpush.bf16.msrb.mxu2 %v13826_v44  ;;  %9900 = vmatpush.bf16.msra.mxu1 %v13278_v46  ;;  %v9645_v44 = vadd.f32 %v9644_v36, %v9632_v30  ;;  %v17225_v46 = vld [vmem:[#allocation13 + $0x12c4] sm:$0xf0]  ;;  %v12739_v30 = vld [vmem:[#allocation13 + $0x718] sm:$0xf0]  ;;  %v18566_v36 = vld [vmem:[#allocation13 + $0x2450] sm:$0x77] }
 0x4f2   :  { %16506 = vmatmul.msk.bf16.vlgmr.msrb.gmra.mxu0 %vm9060_vm11, %v18388_v27  ;;  %v6692_v47 = vunpack.c.l.b16 %v18566_v36  ;;  %v18579_v17 = vld [vmem:[#allocation14 + $0x8] sm:$0xff] }
 0x4f3   :  { %9974 = vmatpush.bf16.msrb.mxu3 %v14914_v34  ;;  %9987 = vmatpush.bf16.msra.mxu0 %v16002_v39  ;;  %v12601_v34 = vld [vmem:[#allocation13 + $0x580] sm:$0xf]  ;;  %v16817_v39 = vld [vmem:[#allocation13 + $0x604] sm:$0xf0]  ;;  %v9658_v49 = vadd.f32 %v9657_v37, %v9645_v44  ;;  %v16919_v37 = vld [vmem:[#allocation13 + $0x934] sm:$0xf0] }
 0x4f4   :  { %v12602_v51 = vor.u32 %v16817_v39, %v12601_v34  ;;  %v12742_v34 = vor.u32 %v16834_v26, %v12739_v30  ;;  %v17344_v39 = vld [vmem:[#allocation13 + $0x1684] sm:$0xf]  ;;  %v14779_v44 = vld [vmem:[#allocation13 + $0x1708] sm:$0xf0] }
 0x4f5   :  { %9962 = vmatpush.bf16.msrb.mxu2 %v13690_v5  ;;  %9901 = vmatpush.bf16.msra.mxu1 %v13142_v57  ;;  %v14234_v5 = vor.u32 %v17225_v46, %v14233_v45  ;;  %v9671_v57 = vadd.f32 %v18552_v52, %v9658_v49  ;;  %v14098_v52 = vor.u32 %v17191_v56, %v14097_v55  ;;  %v16800_v45 = vld [vmem:[#allocation13 + $0x584] sm:$0xf]  ;;  %v12603_v46 = vld [vmem:[#allocation13 + $0x608] sm:$0xf0]  ;;  %v17038_v49 = vld [vmem:[#allocation13 + $0xcf4] sm:$0xf] }
 0x4f6   :  { %v14782_v48 = vor.u32 %v17344_v39, %v14779_v44  ;;  %v16647_v55 = vld [vmem:[#allocation13 + $0xb4] sm:$0xf0]  ;;  %v16766_v56 = vld [vmem:[#allocation13 + $0x474] sm:$0xf]  ;;  %v16936_v39 = vld [vmem:[#allocation13 + $0x9c4] sm:$0xf] }
 0x4f7   :  { %9975 = vmatpush.bf16.msrb.mxu3 %v14778_v54  ;;  %9988 = vmatpush.bf16.msra.mxu0 %v15866_v16  ;;  %v16953_v54 = vld [vmem:[#allocation13 + $0xa44] sm:$0xf0]  ;;  %v12465_v16 = vld [vmem:[#allocation13 + $0x470] sm:$0xf]  ;;  %v9684_v13 = vadd.f32 %v18554_v62, %v9671_v57  ;;  %v13010_v62 = vor.u32 %v16919_v37, %v13009_v10  ;;  %v12467_v57 = vld [vmem:[#allocation13 + $0x4f8] sm:$0xf0] }
 0x4f8   :  { %v13146_v12 = vor.u32 %v16953_v54, %v13145_v38  ;;  %v12606_v54 = vor.u32 %v16800_v45, %v12603_v46  ;;  %v17004_v37 = vld [vmem:[#allocation13 + $0xbe4] sm:$0xf]  ;;  %v13147_v44 = vld [vmem:[#allocation13 + $0xa48] sm:$0xf0] }
 0x4f9   :  { %9963 = vmatpush.bf16.msrb.mxu2 %v13554_v7  ;;  %9902 = vmatpush.bf16.msra.mxu1 %v13006_v14  ;;  %v17412_v7 = vld [vmem:[#allocation13 + $0x18a4] sm:$0xf]  ;;  %v9646_v14 = vpop.f32.mrf.mxu1  ;;  %11384 = vst [vmem:[%s19046_s9 + $0x38] sm:$0xff] %v9684_v13  ;;  %v14235_v45 = vld [vmem:[#allocation13 + $0x12c8] sm:$0xf0] }
 0x4fa   :  { %v15054_v19 = vor.u32 %v17412_v7, %v15051_v32  ;;  %v17276_v7 = vld [vmem:[#allocation13 + $0x1464] sm:$0xf]  ;;  %v14507_v32 = vld [vmem:[#allocation13 + $0x14e8] sm:$0xf0] }
 0x4fb   :  { %9976 = vmatpush.bf16.msrb.mxu3 %v14642_v43  ;;  %9989 = vmatpush.bf16.msra.mxu0 %v15730_v0  ;;  %v17140_v43 = vld [vmem:[#allocation13 + $0x1024] sm:$0xf]  ;;  %v12466_v0 = vor.u32 %v16783_v50, %v12465_v16  ;;  %v17310_v16 = vld [vmem:[#allocation13 + $0x1574] sm:$0xf]  ;;  %v11921_v50 = vld [vmem:[#allocation13 + $0x30] sm:$0xf] }
 0x4fc   :  { %9903 = vmatmul.bf16.vlgmr.msra.gmra.mxu1 %v18372_v1  ;;  %v13966_v58 = vor.u32 %v17140_v43, %v13963_v3  ;;  %v13419_v43 = vld [vmem:[#allocation13 + $0xc68] sm:$0xf0]  ;;  %v11922_v13 = vor.u32 %v16647_v55, %v11921_v50  ;;  %v13011_v55 = vld [vmem:[#allocation13 + $0x938] sm:$0xf0] }
 0x4fd   :  { %9947 = vmatpush.bf16.msrb.mxu1 %v12874_v18  ;;  %9964 = vmatpush.bf16.msrb.mxu2 %v13418_v23  ;;  %v15186_v18 = vor.u32 %v17463_v9, %v15185_v61  ;;  %v12193_v23 = vld [vmem:[#allocation13 + $0x250] sm:$0xf]  ;;  %v7882_v9 = vpack.c.b16 %v6692_v47, %v6692_v47  ;;  %v12331_v14 = vld [vmem:[#allocation13 + $0x3e8] sm:$0xf0]  ;;  %v16664_v47 = vld [vmem:[#allocation13 + $0x144] sm:$0xf] }
 0x4ff   :  { %9977 = vmatpush.bf16.msrb.mxu3 %v14506_v41  ;;  %9990 = vmatpush.bf16.msra.mxu0 %v15594_v21  ;;  %v17106_v41 = vld [vmem:[#allocation13 + $0xf14] sm:$0xf]  ;;  %v12878_v21 = vor.u32 %v16868_v53, %v12875_v40  ;;  %v18568_v33 = vpop.f32.mrf.mxu0  ;;  %v13422_v53 = vor.u32 %v17004_v37, %v13419_v43  ;;  %v16409_v40 = vld [vmem:[#allocation13 + $0x2340] sm:$0xf]  ;;  %v16886_v37 = vld [vmem:[#allocation13 + $0x82c] sm:$0xf0] }
 0x500   :  { %v13830_v60 = vor.u32 %v17106_v41, %v13827_v63  ;;  %v12334_v41 = vor.u32 %v16732_v11, %v12331_v14  ;;  %v17242_v63 = vld [vmem:[#allocation13 + $0x1354] sm:$0xf] }
 0x501   :  { %9948 = vmatpush.bf16.msrb.mxu1 %v12738_v31  ;;  %9965 = vmatpush.bf16.msrb.mxu2 %v13282_v8  ;;  %v14918_v31 = vor.u32 %v17378_v28, %v14915_v22  ;;  %v13694_v8 = vor.u32 %v17072_v25, %v13691_v29  ;;  %v16698_v22 = vld [vmem:[#allocation13 + $0x254] sm:$0xf]  ;;  %v17684_v25 = vld [vmem:[#allocation13 + $0x2124] sm:$0xf] }
 0x503   :  { %9978 = vmatpush.bf16.msrb.mxu3 %v14370_v15  ;;  %9991 = vmatpush.bf16.msra.mxu0 %v15458_v42  ;;  %v12194_v15 = vor.u32 %v16715_v2, %v12193_v23  ;;  %v16681_v42 = vld [vmem:[#allocation13 + $0x1c4] sm:$0xf0]  ;;  %v18576_v10 = vpop.f32.mrf.mxu2  ;;  %v12195_v23 = vld [vmem:[#allocation13 + $0x2d8] sm:$0xf0] }
 0x504   :  { %v12058_v38 = vor.u32 %v16681_v42, %v12057_v20  ;;  %v12198_v20 = vor.u32 %v16698_v22, %v12195_v23  ;;  %v17208_v42 = vld [vmem:[#allocation13 + $0x1244] sm:$0xf]  ;;  %v16411_v22 = vld [vmem:[#allocation13 + $0x23c8] sm:$0xf0]  ;;  %v17582_v23 = vld [vmem:[#allocation13 + $0x1df4] sm:$0xf] }
 0x505   :  { %9949 = vmatpush.bf16.msrb.mxu1 %v12602_v51  ;;  %9966 = vmatpush.bf16.msrb.mxu2 %v13146_v12  ;;  %v13555_v51 = vld [vmem:[#allocation13 + $0xd78] sm:$0xf0]  ;;  %v14238_v50 = vor.u32 %v17208_v42, %v14235_v45  ;;  %v17548_v45 = vld [vmem:[#allocation13 + $0x1ce4] sm:$0xf] }
 0x506   :  { %v13558_v61 = vor.u32 %v17038_v49, %v13555_v51  ;;  %v13150_v51 = vor.u32 %v16936_v39, %v13147_v44  ;;  %v16275_v42 = vld [vmem:[#allocation13 + $0x22b8] sm:$0xf0] }
 0x507   :  { %9979 = vmatpush.bf16.msrb.mxu3 %v14234_v5  ;;  %9992 = vmatpush.bf16.msra.mxu0 %v15322_v24  ;;  %v14643_v5 = vld [vmem:[#allocation13 + $0x15f8] sm:$0xf0]  ;;  %v18574_v24 = vpop.f32.mrf.mxu3  ;;  %v9737_v3 = vpop.f32.mrf.mxu0 }
 0x508   :  { %v14646_v12 = vor.u32 %v17310_v16, %v14643_v5  ;;  %v16902_v16 = vld [vmem:[#allocation13 + $0x8b4] sm:$0xf]  ;;  %v6693_v5 = vunpack.c.h.b16 %v18566_v36  ;;  %v11923_v3 = vld [vmem:[#allocation13 + $0xb8] sm:$0xf0] }
 0x509   :  { %9950 = vmatpush.bf16.msrb.mxu1 %v12466_v0  ;;  %9967 = vmatpush.bf16.msrb.mxu2 %v13010_v62  ;;  %v12470_v0 = vor.u32 %v16766_v56, %v12467_v57  ;;  %v16970_v62 = vld [vmem:[#allocation13 + $0xad4] sm:$0xf]  ;;  %v14099_v57 = vld [vmem:[#allocation13 + $0x11b8] sm:$0xf0] }
 0x50a   :  { %v17174_v56 = vld [vmem:[#allocation13 + $0x1134] sm:$0xf]  ;;  %v7883_v11 = vpack.c.b16 %v6693_v5, %v6693_v5  ;;  %v17056_v5 = vld [vmem:[#allocation13 + $0xd7c] sm:$0xf0] }
 0x50b   :  { %9980 = vmatpush.bf16.msrb.mxu3 %v14098_v52  ;;  %9993 = vmatpush.bf16.msra.mxu0 %v15186_v18  ;;  %v9102_v52 = vsel %vm9064_vm10, %v7882_v9, 0  ;;  %v17769_v18 = vld [vmem:[#allocation13 + $0x23c4] sm:$0xf0]  ;;  %v9711_v29 = vpop.f32.mrf.mxu2  ;;  %v16630_v9 = vld [vmem:[#allocation13 + $0x34] sm:$0xf]  ;;  %v14102_v14 = vor.u32 %v17174_v56, %v14099_v57 }
 0x50c   :  { %9968 = vmatmul.bf16.vlgmr.msrb.gmra.mxu2 %v18372_v1  ;;  %v16410_v28 = vor.u32 %v17769_v18, %v16409_v40  ;;  %v15867_v40 = vld [vmem:[#allocation13 + $0x1f88] sm:$0xf0]  ;;  %v11926_v18 = vor.u32 %v16630_v9, %v11923_v3  ;;  %v16818_v29 = vld [vmem:[#allocation13 + $0x60c] sm:$0xf0]  ;;  %v17514_v57 = vld [vmem:[#allocation13 + $0x1bd4] sm:$0xf] }
 0x50d   :  { %9951 = vmatpush.bf16.msrb.mxu1 %v12330_v59  ;;  %10012 = vmatpush.bf16.msra.mxu2 %v12878_v21  ;;  %v14371_v59 = vld [vmem:[#allocation13 + $0x13d8] sm:$0xf0]  ;;  %v3135_v21 = vperm.slane %v18579_v17, 0  ;;  %v9696_v2 = vpop.f32.mrf.mxu1  ;;  %v16009_v9 = vld [vmem:[#allocation13 + $0x2018] sm:$0xf] }
 0x50e   :  { %9981 = vmatmul.bf16.vlgmr.msrb.gmra.mxu3 %v18380_v4  ;;  %9994 = vmatmul.bf16.vlgmr.msra.gmra.mxu0 %v18382_v6 }
 0x50f   :  { %10025 = vmatpush.bf16.msra.mxu3 %v13966_v58  ;;  %10038 = vmatpush.bf16.msrb.mxu0 %v15054_v19  ;;  %v14510_v58 = vor.u32 %v17276_v7, %v14507_v32  ;;  %v13283_v19 = vld [vmem:[#allocation13 + $0xb58] sm:$0xf0]  ;;  %v9724_v26 = vpop.f32.mrf.mxu3  ;;  %v9697_v46 = vadd.f32 %v9696_v2, %v3135_v21  ;;  %v13014_v32 = vor.u32 %v16902_v16, %v13011_v55  ;;  %v13561_v16 = vld [vmem:[#allocation13 + $0xcf8] sm:$0xf] }
 0x510   :  { %v13286_v30 = vor.u32 %v16970_v62, %v13283_v19  ;;  %v12745_v62 = vld [vmem:[#allocation13 + $0x698] sm:$0xf]  ;;  %v16852_v19 = vld [vmem:[#allocation13 + $0x71c] sm:$0xf0]  ;;  %v15731_v2 = vld [vmem:[#allocation13 + $0x1e78] sm:$0xf0]  ;;  %v13562_v3 = vor.u32 %v17056_v5, %v13561_v16 }
 0x511   :  { %9952 = vmatpush.bf16.msrb.mxu1 %v12194_v15  ;;  %10013 = vmatpush.bf16.msra.mxu2 %v12742_v34  ;;  %v14374_v15 = vor.u32 %v17242_v63, %v14371_v59  ;;  %v16139_v34 = vld [vmem:[#allocation13 + $0x21a8] sm:$0xf0]  ;;  %v9710_v43 = vadd.f32 %v18576_v10, %v9697_v46  ;;  %v17124_v63 = vld [vmem:[#allocation13 + $0xf9c] sm:$0xf0]  ;;  %v9105_v59 = vsel %vm9064_vm10, %v7883_v11, 0  ;;  %v12746_v26 = vor.u32 %v16852_v19, %v12745_v62 }
 0x512   :  { %v16142_v49 = vor.u32 %v17684_v25, %v16139_v34  ;;  %v17090_v34 = vld [vmem:[#allocation13 + $0xe8c] sm:$0xf0]  ;;  %v15734_v44 = vor.u32 %v17582_v23, %v15731_v2  ;;  %v3136_v11 = vperm.slane %v18579_v17, 1  ;;  %v14921_v5 = vld [vmem:[#allocation13 + $0x1798] sm:$0xf] }
 0x513   :  { %10026 = vmatpush.bf16.msra.mxu3 %v13830_v60  ;;  %10039 = vmatpush.bf16.msrb.mxu0 %v14918_v31  ;;  %v16273_v60 = vld [vmem:[#allocation13 + $0x2230] sm:$0xf]  ;;  %v17735_v31 = vld [vmem:[#allocation13 + $0x22b4] sm:$0xf0]  ;;  %v9723_v10 = vadd.f32 %v18574_v24, %v9710_v43 }
 0x514   :  { %v17634_v62 = vld [vmem:[#allocation13 + $0x1f8c] sm:$0xf0] }
 0x515   :  { %9953 = vmatpush.bf16.msrb.mxu1 %v12058_v38  ;;  %10014 = vmatpush.bf16.msra.mxu2 %v12606_v54  ;;  %v17650_v38 = vld [vmem:[#allocation13 + $0x2014] sm:$0xf]  ;;  %v16003_v54 = vld [vmem:[#allocation13 + $0x2098] sm:$0xf0]  ;;  %v9698_v7 = vpop.f32.mrf.mxu1 }
 0x516   :  { %v16006_v36 = vor.u32 %v17650_v38, %v16003_v54  ;;  %v16784_v38 = vld [vmem:[#allocation13 + $0x4fc] sm:$0xf0]  ;;  %v16750_v7 = vld [vmem:[#allocation13 + $0x3ec] sm:$0xf0] }
 0x517   :  { %10027 = vmatpush.bf16.msra.mxu3 %v13694_v8  ;;  %10040 = vmatpush.bf16.msrb.mxu0 %v14782_v48  ;;  %v16274_v8 = vor.u32 %v17735_v31, %v16273_v60  ;;  %v12059_v48 = vld [vmem:[#allocation13 + $0x1c8] sm:$0xf0]  ;;  %v12609_v60 = vld [vmem:[#allocation13 + $0x588] sm:$0xf]  ;;  %v9736_v31 = vadd.f32 %v18568_v33, %v9723_v10 }
 0x518   :  { %v16145_v33 = vld [vmem:[#allocation13 + $0x2128] sm:$0xf] }
 0x519   :  { %9954 = vmatpush.bf16.msrb.mxu1 %v11922_v13  ;;  %10015 = vmatpush.bf16.msra.mxu2 %v12470_v0  ;;  %v13969_v13 = vld [vmem:[#allocation13 + $0x1028] sm:$0xf]  ;;  %v17158_v0 = vld [vmem:[#allocation13 + $0x10ac] sm:$0xf0] }
 0x51b   :  { %10028 = vmatpush.bf16.msra.mxu3 %v13558_v61  ;;  %10041 = vmatpush.bf16.msrb.mxu0 %v14646_v12  ;;  %v12062_v61 = vor.u32 %v16664_v47, %v12059_v48  ;;  %v12881_v12 = vld [vmem:[#allocation13 + $0x7a8] sm:$0xf]  ;;  %v17702_v47 = vld [vmem:[#allocation13 + $0x21ac] sm:$0xf0]  ;;  %v12610_v48 = vor.u32 %v16818_v29, %v12609_v60  ;;  %v15187_v60 = vld [vmem:[#allocation13 + $0x1a38] sm:$0xf0] }
 0x51c   :  { %9955 = vmatmul.bf16.vlgmr.msrb.gmra.mxu1 %v18370_v35  ;;  %v16146_v56 = vor.u32 %v17702_v47, %v16145_v33 }
 0x51d   :  { %10004 = vmatpush.bf16.msra.mxu1 %v9102_v52  ;;  %10016 = vmatpush.bf16.msra.mxu2 %v12334_v41  ;;  %v12882_v52 = vor.u32 %v16886_v37, %v12881_v12  ;;  %v13833_v41 = vld [vmem:[#allocation13 + $0xf18] sm:$0xf]  ;;  %v9748_v39 = vpop.f32.mrf.mxu1  ;;  %v17668_v12 = vld [vmem:[#allocation13 + $0x209c] sm:$0xf0] }
 0x51e   :  { %v9749_v46 = vadd.f32 %v9748_v39, %v9736_v31  ;;  %v15737_v31 = vld [vmem:[#allocation13 + $0x1df8] sm:$0xf]  ;;  %v15057_v39 = vld [vmem:[#allocation13 + $0x18a8] sm:$0xf] }
 0x51f   :  { %10029 = vmatpush.bf16.msra.mxu3 %v13422_v53  ;;  %10042 = vmatpush.bf16.msrb.mxu0 %v14510_v58  ;;  %v17616_v53 = vld [vmem:[#allocation13 + $0x1f04] sm:$0xf]  ;;  %v13970_v58 = vor.u32 %v17158_v0, %v13969_v13  ;;  %v18587_v24 = vpop.f32.mrf.mxu0  ;;  %v12337_v13 = vld [vmem:[#allocation13 + $0x368] sm:$0xf] }
 0x520   :  { %v15870_v21 = vor.u32 %v17616_v53, %v15867_v40  ;;  %11385 = vst [vmem:[%s19046_s9 + $0x40] sm:$0xff] %v9749_v46  ;;  %v16010_v53 = vor.u32 %v17668_v12, %v16009_v9  ;;  %v17480_v40 = vld [vmem:[#allocation13 + $0x1ac4] sm:$0xf]  ;;  %v12338_v10 = vor.u32 %v16750_v7, %v12337_v13  ;;  %v13153_v46 = vld [vmem:[#allocation13 + $0x9c8] sm:$0xf] }
 0x521   :  { %10005 = vmatpush.bf16.msra.mxu1 %v16410_v28  ;;  %10017 = vmatpush.bf16.msra.mxu2 %v12198_v20  ;;  %v17752_v28 = vld [vmem:[#allocation13 + $0x2344] sm:$0xf]  ;;  %v17718_v20 = vld [vmem:[#allocation13 + $0x2234] sm:$0xf]  ;;  %v13017_v9 = vld [vmem:[#allocation13 + $0x8b8] sm:$0xf] }
 0x522   :  { %v16414_v25 = vor.u32 %v17752_v28, %v16411_v22  ;;  %v16278_v54 = vor.u32 %v17718_v20, %v16275_v42  ;;  %v18601_v28 = vld [vmem:[#allocation13 + $0x2458] sm:$0x77]  ;;  %v12065_v20 = vld [vmem:[#allocation13 + $0x148] sm:$0xf]  ;;  %v16920_v12 = vld [vmem:[#allocation13 + $0x93c] sm:$0xf0] }
 0x523   :  { %10030 = vmatpush.bf16.msra.mxu3 %v13286_v30  ;;  %10043 = vmatpush.bf16.msrb.mxu0 %v14374_v15  ;;  %v13834_v30 = vor.u32 %v17124_v63, %v13833_v41  ;;  %v13697_v15 = vld [vmem:[#allocation13 + $0xe08] sm:$0xf]  ;;  %v9761_v37 = vpop.f32.mrf.mxu2  ;;  %v12201_v41 = vld [vmem:[#allocation13 + $0x258] sm:$0xf]  ;;  %v16716_v63 = vld [vmem:[#allocation13 + $0x2dc] sm:$0xf0]  ;;  %v6694_v42 = vunpack.c.l.b16 %v18601_v28 }
 0x524   :  { %v17532_v7 = vld [vmem:[#allocation13 + $0x1c5c] sm:$0xf0] }
 0x525   :  { %10006 = vmatpush.bf16.msra.mxu1 %v16274_v8  ;;  %10018 = vmatpush.bf16.msra.mxu2 %v12062_v61  ;;  %v15595_v8 = vld [vmem:[#allocation13 + $0x1d68] sm:$0xf0]  ;;  %v15459_v61 = vld [vmem:[#allocation13 + $0x1c58] sm:$0xf0] }
 0x526   :  { %v15598_v55 = vor.u32 %v17548_v45, %v15595_v8  ;;  %v16682_v45 = vld [vmem:[#allocation13 + $0x1cc] sm:$0xf0] }
 0x527   :  { %10031 = vmatpush.bf16.msra.mxu3 %v13150_v51  ;;  %10044 = vmatpush.bf16.msrb.mxu0 %v14238_v50  ;;  %v12473_v51 = vld [vmem:[#allocation13 + $0x478] sm:$0xf]  ;;  %v18598_v50 = vpop.f32.mrf.mxu3  ;;  %v9789_v0 = vpop.f32.mrf.mxu0  ;;  %v16954_v8 = vld [vmem:[#allocation13 + $0xa4c] sm:$0xf0] }
 0x528   :  { %v12474_v43 = vor.u32 %v16784_v38, %v12473_v51  ;;  %v15601_v51 = vld [vmem:[#allocation13 + $0x1ce8] sm:$0xf]  ;;  %v17566_v38 = vld [vmem:[#allocation13 + $0x1d6c] sm:$0xf0]  ;;  %v13154_v16 = vor.u32 %v16954_v8, %v13153_v46  ;;  %v15465_v0 = vld [vmem:[#allocation13 + $0x1bd8] sm:$0xf] }
 0x529   :  { %10051 = vmatpush.bf16.msrb.mxu1 %v16142_v49  ;;  %10019 = vmatpush.bf16.msra.mxu2 %v11926_v18  ;;  %v13698_v49 = vor.u32 %v17090_v34, %v13697_v15  ;;  %v15323_v18 = vld [vmem:[#allocation13 + $0x1b48] sm:$0xf0]  ;;  %v12202_v15 = vor.u32 %v16716_v63, %v12201_v41  ;;  %v12747_v41 = vld [vmem:[#allocation13 + $0x720] sm:$0xf0] }
 0x52a   :  { %v15326_v23 = vor.u32 %v17480_v40, %v15323_v18  ;;  %v14785_v18 = vld [vmem:[#allocation13 + $0x1688] sm:$0xf] }
 0x52b   :  { %10032 = vmatpush.bf16.msra.mxu3 %v13014_v32  ;;  %10045 = vmatpush.bf16.msrb.mxu0 %v14102_v14  ;;  %v17022_v32 = vld [vmem:[#allocation13 + $0xc6c] sm:$0xf0]  ;;  %v9750_v14 = vpop.f32.mrf.mxu1  ;;  %v9763_v29 = vpop.f32.mrf.mxu2 }
 0x52c   :  { %16507 = vmatmul.msk.bf16.vlgmr.msra.gmra.mxu1 %vm9060_vm11, %v18388_v27  ;;  %10020 = vmatmul.bf16.vlgmr.msra.gmra.mxu2 %v18370_v35  ;;  %v13018_v14 = vor.u32 %v16920_v12, %v13017_v9 }
 0x52d   :  { %10052 = vmatpush.bf16.msrb.mxu1 %v16006_v36  ;;  %10069 = vmatpush.bf16.msrb.mxu2 %v9105_v59  ;;  %v13425_v36 = vld [vmem:[#allocation13 + $0xbe8] sm:$0xf]  ;;  %v13289_v59 = vld [vmem:[#allocation13 + $0xad8] sm:$0xf] }
 0x52e   :  { %10033 = vmatmul.bf16.vlgmr.msra.gmra.mxu3 %v18372_v1  ;;  %10046 = vmatmul.bf16.vlgmr.msrb.gmra.mxu0 %v18380_v4  ;;  %v13426_v19 = vor.u32 %v17022_v32, %v13425_v36 }
 0x52f   :  { %10077 = vmatpush.bf16.msrb.mxu3 %v12882_v52  ;;  %10090 = vmatpush.bf16.msra.mxu0 %v13970_v58  ;;  %v15462_v52 = vor.u32 %v17514_v57, %v15459_v61  ;;  %v15873_v58 = vld [vmem:[#allocation13 + $0x1f08] sm:$0xf]  ;;  %v9776_v22 = vpop.f32.mrf.mxu3  ;;  %v7884_v57 = vpack.c.b16 %v6694_v42, %v6694_v42  ;;  %v16648_v61 = vld [vmem:[#allocation13 + $0xbc] sm:$0xf0]  ;;  %v16147_v42 = vld [vmem:[#allocation13 + $0x21b0] sm:$0xf0] }
 0x530   :  { %v15874_v2 = vor.u32 %v17634_v62, %v15873_v58  ;;  %v17362_v58 = vld [vmem:[#allocation13 + $0x170c] sm:$0xf0]  ;;  %v16417_v62 = vld [vmem:[#allocation13 + $0x2348] sm:$0xf] }
 0x531   :  { %10053 = vmatpush.bf16.msrb.mxu1 %v15870_v21  ;;  %10070 = vmatpush.bf16.msrb.mxu2 %v16414_v25  ;;  %v16988_v21 = vld [vmem:[#allocation13 + $0xb5c] sm:$0xf0]  ;;  %v14786_v22 = vor.u32 %v17362_v58, %v14785_v18  ;;  %v14787_v18 = vld [vmem:[#allocation13 + $0x1710] sm:$0xf0] }
 0x532   :  { %v17600_v25 = vld [vmem:[#allocation13 + $0x1e7c] sm:$0xf0]  ;;  %v13290_v34 = vor.u32 %v16988_v21, %v13289_v59  ;;  %v15329_v59 = vld [vmem:[#allocation13 + $0x1ac8] sm:$0xf]  ;;  %v17498_v21 = vld [vmem:[#allocation13 + $0x1b4c] sm:$0xf0] }
 0x533   :  { %10078 = vmatpush.bf16.msrb.mxu3 %v12746_v26  ;;  %10091 = vmatpush.bf16.msra.mxu0 %v13834_v30  ;;  %v17446_v26 = vld [vmem:[#allocation13 + $0x19b4] sm:$0xf]  ;;  %v9762_v30 = vadd.f32 %v9761_v37, %v3136_v11  ;;  %v15738_v47 = vor.u32 %v17600_v25, %v15737_v31  ;;  %v16869_v37 = vld [vmem:[#allocation13 + $0x7ac] sm:$0xf]  ;;  %v9813_v32 = vpop.f32.mrf.mxu2  ;;  %v17736_v31 = vld [vmem:[#allocation13 + $0x22bc] sm:$0xf0]  ;;  %v15330_v29 = vor.u32 %v17498_v21, %v15329_v59 }
 0x534   :  { %v15190_v33 = vor.u32 %v17446_v26, %v15187_v60  ;;  %v16281_v60 = vld [vmem:[#allocation13 + $0x2238] sm:$0xf]  ;;  %v17583_v59 = vld [vmem:[#allocation13 + $0x1dfc] sm:$0xf]  ;;  %v15739_v21 = vld [vmem:[#allocation13 + $0x1e80] sm:$0xf0] }
 0x535   :  { %10054 = vmatpush.bf16.msrb.mxu1 %v15734_v44  ;;  %10071 = vmatpush.bf16.msrb.mxu2 %v16278_v54  ;;  %v17430_v44 = vld [vmem:[#allocation13 + $0x192c] sm:$0xf0]  ;;  %v12066_v54 = vor.u32 %v16682_v45, %v12065_v20  ;;  %v17685_v20 = vld [vmem:[#allocation13 + $0x212c] sm:$0xf] }
 0x537   :  { %10079 = vmatpush.bf16.msrb.mxu3 %v12610_v48  ;;  %10092 = vmatpush.bf16.msra.mxu0 %v13698_v49  ;;  %v9775_v48 = vadd.f32 %v18598_v50, %v9762_v30  ;;  %v15058_v49 = vor.u32 %v17430_v44, %v15057_v39  ;;  %v15602_v50 = vor.u32 %v17566_v38, %v15601_v51  ;;  %v15193_v39 = vld [vmem:[#allocation13 + $0x19b8] sm:$0xf]  ;;  %v17464_v44 = vld [vmem:[#allocation13 + $0x1a3c] sm:$0xf0]  ;;  %v14513_v51 = vld [vmem:[#allocation13 + $0x1468] sm:$0xf] }
 0x538   :  { %v17294_v38 = vld [vmem:[#allocation13 + $0x14ec] sm:$0xf0] }
 0x539   :  { %10055 = vmatpush.bf16.msrb.mxu1 %v15598_v55  ;;  %10116 = vmatpush.bf16.msra.mxu2 %v16146_v56  ;;  %v17396_v55 = vld [vmem:[#allocation13 + $0x181c] sm:$0xf0]  ;;  %v11929_v56 = vld [vmem:[#allocation13 + $0x38] sm:$0xf]  ;;  %v9800_v36 = vpop.f32.mrf.mxu1  ;;  %v14514_v12 = vor.u32 %v17294_v38, %v14513_v51 }
 0x53a   :  { %v14922_v13 = vor.u32 %v17396_v55, %v14921_v5  ;;  %v11930_v11 = vor.u32 %v16648_v61, %v11929_v56  ;;  %v16767_v5 = vld [vmem:[#allocation13 + $0x47c] sm:$0xf]  ;;  %v12475_v55 = vld [vmem:[#allocation13 + $0x500] sm:$0xf0] }
 0x53b   :  { %10080 = vmatpush.bf16.msrb.mxu3 %v12474_v43  ;;  %10093 = vmatpush.bf16.msra.mxu0 %v13562_v3  ;;  %v12883_v43 = vld [vmem:[#allocation13 + $0x830] sm:$0xf0]  ;;  %v9788_v3 = vadd.f32 %v18587_v24, %v9775_v48  ;;  %v15466_v24 = vor.u32 %v17532_v7, %v15465_v0  ;;  %v9815_v46 = vpop.f32.mrf.mxu2  ;;  %v16282_v48 = vor.u32 %v17736_v31, %v16281_v60  ;;  %v16011_v61 = vld [vmem:[#allocation13 + $0x20a0] sm:$0xf0]  ;;  %v14105_v31 = vld [vmem:[#allocation13 + $0x1138] sm:$0xf] }
 0x53c   :  { %16508 = vmatmul.msk.bf16.vlgmr.msrb.gmra.mxu2 %vm9060_vm11, %v18388_v27  ;;  %v12886_v40 = vor.u32 %v16869_v37, %v12883_v43  ;;  %v14923_v37 = vld [vmem:[#allocation13 + $0x1820] sm:$0xf0]  ;;  %v12478_v43 = vor.u32 %v16767_v5, %v12475_v55 }
 0x53d   :  { %10056 = vmatpush.bf16.msrb.mxu1 %v15462_v52  ;;  %10117 = vmatpush.bf16.msra.mxu2 %v16010_v53  ;;  %v9108_v52 = vsel %vm9064_vm10, %v7884_v57, 0  ;;  %v9801_v53 = vadd.f32 %v9800_v36, %v9788_v3  ;;  %v17651_v57 = vld [vmem:[#allocation13 + $0x201c] sm:$0xf]  ;;  %v14377_v3 = vld [vmem:[#allocation13 + $0x1358] sm:$0xf] }
 0x53e   :  { %v16014_v7 = vor.u32 %v17651_v57, %v16011_v61  ;;  %v16733_v36 = vld [vmem:[#allocation13 + $0x36c] sm:$0xf]  ;;  %v13835_v55 = vld [vmem:[#allocation13 + $0xfa0] sm:$0xf0] }
 0x53f   :  { %10081 = vmatpush.bf16.msrb.mxu3 %v12338_v10  ;;  %10094 = vmatpush.bf16.msra.mxu0 %v13426_v19  ;;  %v17770_v10 = vld [vmem:[#allocation13 + $0x23cc] sm:$0xf0]  ;;  %v16835_v19 = vld [vmem:[#allocation13 + $0x69c] sm:$0xf]  ;;  %v9814_v63 = vadd.f32 %v9813_v32, %v9801_v53  ;;  %v18613_v25 = vpop.f32.mrf.mxu0  ;;  %v12339_v32 = vld [vmem:[#allocation13 + $0x3f0] sm:$0xf0] }
 0x540   :  { %v16418_v26 = vor.u32 %v17770_v10, %v16417_v62  ;;  %v12750_v30 = vor.u32 %v16835_v19, %v12747_v41  ;;  %v12342_v58 = vor.u32 %v16733_v36, %v12339_v32  ;;  %v14241_v62 = vld [vmem:[#allocation13 + $0x1248] sm:$0xf]  ;;  %v16699_v19 = vld [vmem:[#allocation13 + $0x25c] sm:$0xf]  ;;  %v12203_v41 = vld [vmem:[#allocation13 + $0x2e0] sm:$0xf0] }
 0x541   :  { %10057 = vmatpush.bf16.msrb.mxu1 %v15326_v23  ;;  %10118 = vmatpush.bf16.msra.mxu2 %v15874_v2  ;;  %v14649_v23 = vld [vmem:[#allocation13 + $0x1578] sm:$0xf]  ;;  %v17328_v2 = vld [vmem:[#allocation13 + $0x15fc] sm:$0xf0]  ;;  %11386 = vst [vmem:[%s19046_s9 + $0x48] sm:$0xff] %v9814_v63  ;;  %v9802_v45 = vpop.f32.mrf.mxu1  ;;  %v12206_v60 = vor.u32 %v16699_v19, %v12203_v41 }
 0x542   :  { %v14650_v8 = vor.u32 %v17328_v2, %v14649_v23  ;;  %v12067_v45 = vld [vmem:[#allocation13 + $0x1d0] sm:$0xf0]  ;;  %v11931_v57 = vld [vmem:[#allocation13 + $0xc0] sm:$0xf0] }
 0x543   :  { %10082 = vmatpush.bf16.msrb.mxu3 %v12202_v15  ;;  %10095 = vmatpush.bf16.msra.mxu0 %v13290_v34  ;;  %v16801_v15 = vld [vmem:[#allocation13 + $0x58c] sm:$0xf]  ;;  %v12611_v34 = vld [vmem:[#allocation13 + $0x610] sm:$0xf0] }
 0x545   :  { %10058 = vmatpush.bf16.msrb.mxu1 %v15190_v33  ;;  %10119 = vmatpush.bf16.msra.mxu2 %v15738_v47  ;;  %v17413_v33 = vld [vmem:[#allocation13 + $0x18ac] sm:$0xf]  ;;  %v15059_v47 = vld [vmem:[#allocation13 + $0x1930] sm:$0xf0]  ;;  %v18617_v9 = vpop.f32.mrf.mxu3 }
 0x546   :  { %v15062_v56 = vor.u32 %v17413_v33, %v15059_v47  ;;  %v15603_v33 = vld [vmem:[#allocation13 + $0x1d70] sm:$0xf0] }
 0x547   :  { %10083 = vmatpush.bf16.msrb.mxu3 %v12066_v54  ;;  %10096 = vmatpush.bf16.msra.mxu0 %v13154_v16  ;;  %v15194_v54 = vor.u32 %v17464_v44, %v15193_v39  ;;  %v16150_v16 = vor.u32 %v17685_v20, %v16147_v42  ;;  %v9841_v0 = vpop.f32.mrf.mxu0  ;;  %v15742_v44 = vor.u32 %v17583_v59, %v15739_v21  ;;  %v13971_v20 = vld [vmem:[#allocation13 + $0x10b0] sm:$0xf0]  ;;  %v16665_v42 = vld [vmem:[#allocation13 + $0x14c] sm:$0xf]  ;;  %v13563_v59 = vld [vmem:[#allocation13 + $0xd80] sm:$0xf0] }
 0x548   :  { %10059 = vmatmul.bf16.vlgmr.msrb.gmra.mxu1 %v18382_v6  ;;  %v12070_v38 = vor.u32 %v16665_v42, %v12067_v45  ;;  %v17447_v21 = vld [vmem:[#allocation13 + $0x19bc] sm:$0xf]  ;;  %v16153_v42 = vld [vmem:[#allocation13 + $0x2130] sm:$0xf]  ;;  %v17703_v45 = vld [vmem:[#allocation13 + $0x21b4] sm:$0xf0] }
 0x549   :  { %10103 = vmatpush.bf16.msra.mxu1 %v15058_v49  ;;  %10120 = vmatpush.bf16.msra.mxu2 %v15602_v50  ;;  %v12614_v49 = vor.u32 %v16801_v15, %v12611_v34  ;;  %v17379_v50 = vld [vmem:[#allocation13 + $0x179c] sm:$0xf]  ;;  %v17141_v15 = vld [vmem:[#allocation13 + $0x102c] sm:$0xf]  ;;  %v6695_v34 = vunpack.c.h.b16 %v18601_v28 }
 0x54a   :  { %v13974_v28 = vor.u32 %v17141_v15, %v13971_v20  ;;  %v17175_v15 = vld [vmem:[#allocation13 + $0x113c] sm:$0xf]  ;;  %v17431_v20 = vld [vmem:[#allocation13 + $0x1934] sm:$0xf0] }
 0x54b   :  { %10084 = vmatpush.bf16.msrb.mxu3 %v11930_v11  ;;  %10097 = vmatpush.bf16.msra.mxu0 %v13018_v14  ;;  %v14926_v11 = vor.u32 %v17379_v50, %v14923_v37  ;;  %v17617_v14 = vld [vmem:[#allocation13 + $0x1f0c] sm:$0xf]  ;;  %v15467_v50 = vld [vmem:[#allocation13 + $0x1c60] sm:$0xf0] }
 0x54d   :  { %10104 = vmatpush.bf16.msra.mxu1 %v14922_v13  ;;  %10121 = vmatpush.bf16.msra.mxu2 %v15466_v24  ;;  %v17260_v13 = vld [vmem:[#allocation13 + $0x13dc] sm:$0xf0]  ;;  %v17226_v24 = vld [vmem:[#allocation13 + $0x12cc] sm:$0xf0]  ;;  %v9828_v23 = vpop.f32.mrf.mxu3 }
 0x54e   :  { %10085 = vmatmul.bf16.vlgmr.msrb.gmra.mxu3 %v18370_v35  ;;  %10098 = vmatmul.bf16.vlgmr.msra.gmra.mxu0 %v18372_v1  ;;  %v14378_v53 = vor.u32 %v17260_v13, %v14377_v3  ;;  %v14242_v2 = vor.u32 %v17226_v24, %v14241_v62  ;;  %v14379_v3 = vld [vmem:[#allocation13 + $0x13e0] sm:$0xf0]  ;;  %v17753_v62 = vld [vmem:[#allocation13 + $0x234c] sm:$0xf]  ;;  %v16419_v24 = vld [vmem:[#allocation13 + $0x23d0] sm:$0xf0] }
 0x54f   :  { %10134 = vmatpush.bf16.msra.mxu3 %v9108_v52  ;;  %10142 = vmatpush.bf16.msrb.mxu0 %v12886_v40  ;;  %v15875_v52 = vld [vmem:[#allocation13 + $0x1f90] sm:$0xf0]  ;;  %v17345_v40 = vld [vmem:[#allocation13 + $0x168c] sm:$0xf]  ;;  %v9865_v39 = vpop.f32.mrf.mxu2  ;;  %v16422_v23 = vor.u32 %v17753_v62, %v16419_v24 }
 0x550   :  { %v15878_v10 = vor.u32 %v17617_v14, %v15875_v52  ;;  %v14790_v63 = vor.u32 %v17345_v40, %v14787_v18  ;;  %v17073_v14 = vld [vmem:[#allocation13 + $0xe0c] sm:$0xf]  ;;  %v13699_v52 = vld [vmem:[#allocation13 + $0xe90] sm:$0xf0] }
 0x551   :  { %10105 = vmatpush.bf16.msra.mxu1 %v14786_v22  ;;  %10122 = vmatpush.bf16.msra.mxu2 %v15330_v29  ;;  %v3137_v22 = vperm.slane %v18579_v17, 2  ;;  %v17192_v29 = vld [vmem:[#allocation13 + $0x11bc] sm:$0xf0]  ;;  %v13702_v41 = vor.u32 %v17073_v14, %v13699_v52  ;;  %v17635_v52 = vld [vmem:[#allocation13 + $0x1f94] sm:$0xf0] }
 0x552   :  { %v14106_v47 = vor.u32 %v17192_v29, %v14105_v31 }
 0x553   :  { %10135 = vmatpush.bf16.msra.mxu3 %v16418_v26  ;;  %10143 = vmatpush.bf16.msrb.mxu0 %v12750_v30  ;;  %v17311_v26 = vld [vmem:[#allocation13 + $0x157c] sm:$0xf]  ;;  %v14651_v30 = vld [vmem:[#allocation13 + $0x1600] sm:$0xf0]  ;;  %v9827_v51 = vadd.f32 %v18617_v9, %v3137_v22 }
 0x554   :  { %v14654_v46 = vor.u32 %v17311_v26, %v14651_v30  ;;  %v17719_v26 = vld [vmem:[#allocation13 + $0x223c] sm:$0xf]  ;;  %v16283_v30 = vld [vmem:[#allocation13 + $0x22c0] sm:$0xf0] }
 0x555   :  { %10106 = vmatpush.bf16.msra.mxu1 %v14650_v8  ;;  %10123 = vmatpush.bf16.msra.mxu2 %v15194_v54  ;;  %v17549_v8 = vld [vmem:[#allocation13 + $0x1cec] sm:$0xf]  ;;  %v17107_v54 = vld [vmem:[#allocation13 + $0xf1c] sm:$0xf]  ;;  %v9878_v37 = vpop.f32.mrf.mxu3  ;;  %v9840_v9 = vadd.f32 %v18613_v25, %v9827_v51 }
 0x556   :  { %v15606_v5 = vor.u32 %v17549_v8, %v15603_v33  ;;  %v13838_v13 = vor.u32 %v17107_v54, %v13835_v55  ;;  %v17209_v25 = vld [vmem:[#allocation13 + $0x124c] sm:$0xf]  ;;  %v13977_v8 = vld [vmem:[#allocation13 + $0x1030] sm:$0xf]  ;;  %v17159_v33 = vld [vmem:[#allocation13 + $0x10b4] sm:$0xf0] }
 0x557   :  { %10136 = vmatpush.bf16.msra.mxu3 %v16282_v48  ;;  %10144 = vmatpush.bf16.msrb.mxu0 %v12614_v49  ;;  %v17277_v48 = vld [vmem:[#allocation13 + $0x146c] sm:$0xf]  ;;  %v14515_v49 = vld [vmem:[#allocation13 + $0x14f0] sm:$0xf0]  ;;  %v9867_v32 = vpop.f32.mrf.mxu2  ;;  %v14929_v55 = vld [vmem:[#allocation13 + $0x17a0] sm:$0xf] }
 0x558   :  { %10124 = vmatmul.bf16.vlgmr.msra.gmra.mxu2 %v18382_v6  ;;  %v14518_v61 = vor.u32 %v17277_v48, %v14515_v49  ;;  %v16286_v49 = vor.u32 %v17719_v26, %v16283_v30  ;;  %v17005_v51 = vld [vmem:[#allocation13 + $0xbec] sm:$0xf]  ;;  %v17363_v32 = vld [vmem:[#allocation13 + $0x1714] sm:$0xf0]  ;;  %v13019_v26 = vld [vmem:[#allocation13 + $0x940] sm:$0xf0] }
 0x559   :  { %10168 = vmatpush.bf16.msrb.mxu2 %v15062_v56  ;;  %10107 = vmatpush.bf16.msra.mxu1 %v14514_v12  ;;  %v16631_v56 = vld [vmem:[#allocation13 + $0x3c] sm:$0xf]  ;;  %v9852_v36 = vpop.f32.mrf.mxu1 }
 0x55a   :  { %v17515_v12 = vld [vmem:[#allocation13 + $0x1bdc] sm:$0xf]  ;;  %v11934_v0 = vor.u32 %v16631_v56, %v11931_v57  ;;  %v9853_v40 = vadd.f32 %v9852_v36, %v9840_v9  ;;  %v17397_v56 = vld [vmem:[#allocation13 + $0x1824] sm:$0xf0]  ;;  %v16017_v57 = vld [vmem:[#allocation13 + $0x2020] sm:$0xf] }
 0x55b   :  { %10181 = vmatpush.bf16.msrb.mxu3 %v16150_v16  ;;  %10145 = vmatpush.bf16.msrb.mxu0 %v12478_v43  ;;  %v7885_v16 = vpack.c.b16 %v6695_v34, %v6695_v34  ;;  %v17243_v43 = vld [vmem:[#allocation13 + $0x135c] sm:$0xf]  ;;  %v14107_v34 = vld [vmem:[#allocation13 + $0x11c0] sm:$0xf0]  ;;  %v14793_v36 = vld [vmem:[#allocation13 + $0x1690] sm:$0xf] }
 0x55c   :  { %v14382_v18 = vor.u32 %v17243_v43, %v14379_v3  ;;  %v9866_v19 = vadd.f32 %v9865_v39, %v9853_v40  ;;  %v15065_v39 = vld [vmem:[#allocation13 + $0x18b0] sm:$0xf]  ;;  %v16971_v43 = vld [vmem:[#allocation13 + $0xadc] sm:$0xf]  ;;  %v13291_v3 = vld [vmem:[#allocation13 + $0xb60] sm:$0xf0]  ;;  %v14794_v62 = vor.u32 %v17363_v32, %v14793_v36 }
 0x55d   :  { %10169 = vmatpush.bf16.msrb.mxu2 %v14926_v11  ;;  %10108 = vmatpush.bf16.msra.mxu1 %v14378_v53  ;;  %v15470_v11 = vor.u32 %v17515_v12, %v15467_v50  ;;  %v17481_v53 = vld [vmem:[#allocation13 + $0x1acc] sm:$0xf]  ;;  %v15066_v54 = vor.u32 %v17431_v20, %v15065_v39  ;;  %v17669_v12 = vld [vmem:[#allocation13 + $0x20a4] sm:$0xf0]  ;;  %v13841_v50 = vld [vmem:[#allocation13 + $0xf20] sm:$0xf]  ;;  %v13294_v14 = vor.u32 %v16971_v43, %v13291_v3 }
 0x55e   :  { %16509 = vmatmul.msk.bf16.vlgmr.msra.gmra.mxu3 %vm9060_vm11, %v18388_v27  ;;  %v17091_v40 = vld [vmem:[#allocation13 + $0xe94] sm:$0xf0]  ;;  %v14521_v20 = vld [vmem:[#allocation13 + $0x1470] sm:$0xf] }
 0x55f   :  { %10182 = vmatpush.bf16.msrb.mxu3 %v16014_v7  ;;  %10146 = vmatpush.bf16.msrb.mxu0 %v12342_v58  ;;  %v9111_v7 = vsel %vm9064_vm10, %v7885_v16, 0  ;;  %v15331_v58 = vld [vmem:[#allocation13 + $0x1b50] sm:$0xf0]  ;;  %v18628_v31 = vpop.f32.mrf.mxu0  ;;  %v16154_v16 = vor.u32 %v17703_v45, %v16153_v42  ;;  %v17295_v42 = vld [vmem:[#allocation13 + $0x14f4] sm:$0xf0] }
 0x560   :  { %v15334_v22 = vor.u32 %v17481_v53, %v15331_v58  ;;  %v13705_v53 = vld [vmem:[#allocation13 + $0xe10] sm:$0xf]  ;;  %v13155_v58 = vld [vmem:[#allocation13 + $0xa50] sm:$0xf0] }
 0x561   :  { %10170 = vmatpush.bf16.msrb.mxu2 %v14790_v63  ;;  %10109 = vmatpush.bf16.msra.mxu1 %v14242_v2  ;;  %v17039_v63 = vld [vmem:[#allocation13 + $0xcfc] sm:$0xf]  ;;  %v15195_v2 = vld [vmem:[#allocation13 + $0x1a40] sm:$0xf0] }
 0x562   :  { %v15198_v48 = vor.u32 %v17447_v21, %v15195_v2  ;;  %v13569_v21 = vld [vmem:[#allocation13 + $0xd00] sm:$0xf]  ;;  %v16903_v2 = vld [vmem:[#allocation13 + $0x8bc] sm:$0xf] }
 0x563   :  { %10183 = vmatpush.bf16.msrb.mxu3 %v15878_v10  ;;  %10147 = vmatpush.bf16.msrb.mxu0 %v12206_v60  ;;  %v14243_v10 = vld [vmem:[#allocation13 + $0x12d0] sm:$0xf0]  ;;  %v9879_v60 = vadd.f32 %v9878_v37, %v9866_v19  ;;  %v17125_v37 = vld [vmem:[#allocation13 + $0xfa4] sm:$0xf0]  ;;  %v13022_v45 = vor.u32 %v16903_v2, %v13019_v26  ;;  %v13025_v2 = vld [vmem:[#allocation13 + $0x8c0] sm:$0xf] }
 0x564   :  { %v14246_v29 = vor.u32 %v17209_v25, %v14243_v10  ;;  %v13706_v25 = vor.u32 %v17091_v40, %v13705_v53  ;;  %v14657_v10 = vld [vmem:[#allocation13 + $0x1580] sm:$0xf]  ;;  %v17329_v19 = vld [vmem:[#allocation13 + $0x1604] sm:$0xf0]  ;;  %v17499_v53 = vld [vmem:[#allocation13 + $0x1b54] sm:$0xf0] }
 0x565   :  { %10171 = vmatpush.bf16.msrb.mxu2 %v14654_v46  ;;  %10110 = vmatpush.bf16.msra.mxu1 %v14106_v47  ;;  %11387 = vst [vmem:[%s19046_s9 + $0x50] sm:$0xff] %v9879_v60  ;;  %v13566_v46 = vor.u32 %v17039_v63, %v13563_v59  ;;  %v9854_v47 = vpop.f32.mrf.mxu1  ;;  %v17601_v59 = vld [vmem:[#allocation13 + $0x1e84] sm:$0xf0]  ;;  %v14658_v60 = vor.u32 %v17329_v19, %v14657_v10  ;;  %v14113_v19 = vld [vmem:[#allocation13 + $0x1140] sm:$0xf] }
 0x566   :  { %v16785_v10 = vld [vmem:[#allocation13 + $0x504] sm:$0xf0] }
 0x567   :  { %10184 = vmatpush.bf16.msrb.mxu3 %v15742_v44  ;;  %10148 = vmatpush.bf16.msrb.mxu0 %v12070_v38  ;;  %v9880_v44 = vpop.f32.mrf.mxu3  ;;  %v14110_v38 = vor.u32 %v17175_v15, %v14107_v34  ;;  %v9893_v9 = vpop.f32.mrf.mxu0  ;;  %v16887_v15 = vld [vmem:[#allocation13 + $0x834] sm:$0xf0] }
 0x568   :  { %10111 = vmatmul.bf16.vlgmr.msra.gmra.mxu1 %v18380_v4 }
 0x569   :  { %10155 = vmatpush.bf16.msrb.mxu1 %v13974_v28  ;;  %10172 = vmatpush.bf16.msrb.mxu2 %v14518_v61  ;;  %v13427_v28 = vld [vmem:[#allocation13 + $0xc70] sm:$0xf0] }
 0x56a   :  { %v13430_v61 = vor.u32 %v17005_v51, %v13427_v28  ;;  %v14522_v51 = vor.u32 %v17295_v42, %v14521_v20  ;;  %v12753_v28 = vld [vmem:[#allocation13 + $0x6a0] sm:$0xf]  ;;  %v15067_v20 = vld [vmem:[#allocation13 + $0x1938] sm:$0xf0]  ;;  %v12345_v42 = vld [vmem:[#allocation13 + $0x370] sm:$0xf] }
 0x56b   :  { %10185 = vmatpush.bf16.msrb.mxu3 %v15606_v5  ;;  %10149 = vmatpush.bf16.msrb.mxu0 %v11934_v0  ;;  %v13978_v5 = vor.u32 %v17159_v33, %v13977_v8  ;;  %v16018_v0 = vor.u32 %v17669_v12, %v16017_v57  ;;  %v17567_v8 = vld [vmem:[#allocation13 + $0x1d74] sm:$0xf0]  ;;  %v3138_v33 = vperm.slane %v18579_v17, 3  ;;  %v17533_v57 = vld [vmem:[#allocation13 + $0x1c64] sm:$0xf0] }
 0x56d   :  { %10156 = vmatpush.bf16.msrb.mxu1 %v13838_v13  ;;  %10173 = vmatpush.bf16.msrb.mxu2 %v14382_v18  ;;  %v14930_v13 = vor.u32 %v17397_v56, %v14929_v55  ;;  %v16937_v18 = vld [vmem:[#allocation13 + $0x9cc] sm:$0xf]  ;;  %v15473_v56 = vld [vmem:[#allocation13 + $0x1be0] sm:$0xf] }
 0x56e   :  { %10150 = vmatmul.bf16.vlgmr.msrb.gmra.mxu0 %v18370_v35  ;;  %v13158_v63 = vor.u32 %v16937_v18, %v13155_v58  ;;  %v15474_v32 = vor.u32 %v17533_v57, %v15473_v56  ;;  %v13161_v58 = vld [vmem:[#allocation13 + $0x9d0] sm:$0xf]  ;;  %v16717_v56 = vld [vmem:[#allocation13 + $0x2e4] sm:$0xf0]  ;;  %v16836_v57 = vld [vmem:[#allocation13 + $0x6a4] sm:$0xf] }
 0x56f   :  { %10186 = vmatpush.bf16.msrb.mxu3 %v15470_v11  ;;  %10199 = vmatpush.bf16.msra.mxu0 %v9111_v7  ;;  %v13842_v7 = vor.u32 %v17125_v37, %v13841_v50  ;;  %v15881_v11 = vld [vmem:[#allocation13 + $0x1f10] sm:$0xf]  ;;  %v9917_v30 = vpop.f32.mrf.mxu2  ;;  %v18638_v34 = vpop.f32.mrf.mxu0  ;;  %v13297_v50 = vld [vmem:[#allocation13 + $0xae0] sm:$0xf]  ;;  %v16989_v37 = vld [vmem:[#allocation13 + $0xb64] sm:$0xf0] }
 0x570   :  { %v15882_v24 = vor.u32 %v17635_v52, %v15881_v11  ;;  %v14249_v11 = vld [vmem:[#allocation13 + $0x1250] sm:$0xf] }
 0x571   :  { %10157 = vmatpush.bf16.msrb.mxu1 %v13702_v41  ;;  %10174 = vmatpush.bf16.msrb.mxu2 %v14246_v29  ;;  %v15745_v41 = vld [vmem:[#allocation13 + $0x1e00] sm:$0xf]  ;;  %v12889_v29 = vld [vmem:[#allocation13 + $0x7b0] sm:$0xf] }
 0x572   :  { %v15746_v39 = vor.u32 %v17601_v59, %v15745_v41  ;;  %v12890_v47 = vor.u32 %v16887_v15, %v12889_v29  ;;  %v15337_v52 = vld [vmem:[#allocation13 + $0x1ad0] sm:$0xf]  ;;  %v17193_v41 = vld [vmem:[#allocation13 + $0x11c4] sm:$0xf0]  ;;  %v13979_v29 = vld [vmem:[#allocation13 + $0x10b8] sm:$0xf0] }
 0x573   :  { %10187 = vmatpush.bf16.msrb.mxu3 %v15334_v22  ;;  %10200 = vmatpush.bf16.msra.mxu0 %v16422_v23  ;;  %v17057_v22 = vld [vmem:[#allocation13 + $0xd84] sm:$0xf0]  ;;  %v18636_v23 = vpop.f32.mrf.mxu3  ;;  %v15338_v59 = vor.u32 %v17499_v53, %v15337_v52 }
 0x574   :  { %v13570_v44 = vor.u32 %v17057_v22, %v13569_v21  ;;  %v15201_v21 = vld [vmem:[#allocation13 + $0x19c0] sm:$0xf]  ;;  %v17465_v22 = vld [vmem:[#allocation13 + $0x1a44] sm:$0xf0] }
 0x575   :  { %10158 = vmatpush.bf16.msrb.mxu1 %v13566_v46  ;;  %10175 = vmatpush.bf16.msrb.mxu2 %v14110_v38  ;;  %v15609_v46 = vld [vmem:[#allocation13 + $0x1cf0] sm:$0xf]  ;;  %v16853_v38 = vld [vmem:[#allocation13 + $0x724] sm:$0xf0] }
 0x576   :  { %v12754_v12 = vor.u32 %v16853_v38, %v12753_v28  ;;  %v13843_v28 = vld [vmem:[#allocation13 + $0xfa8] sm:$0xf0] }
 0x577   :  { %10188 = vmatpush.bf16.msrb.mxu3 %v15198_v48  ;;  %10201 = vmatpush.bf16.msra.mxu0 %v16286_v49  ;;  %v13433_v48 = vld [vmem:[#allocation13 + $0xbf0] sm:$0xf]  ;;  %v17023_v49 = vld [vmem:[#allocation13 + $0xc74] sm:$0xf0]  ;;  %v9919_v3 = vpop.f32.mrf.mxu2  ;;  %v9945_v36 = vpop.f32.mrf.mxu0 }
 0x578   :  { %10176 = vmatmul.bf16.vlgmr.msrb.gmra.mxu2 %v18380_v4  ;;  %v13434_v55 = vor.u32 %v17023_v49, %v13433_v48  ;;  %v12073_v36 = vld [vmem:[#allocation13 + $0x150] sm:$0xf] }
 0x579   :  { %10220 = vmatpush.bf16.msra.mxu2 %v13978_v5  ;;  %10159 = vmatpush.bf16.msrb.mxu1 %v13430_v61  ;;  %v17261_v5 = vld [vmem:[#allocation13 + $0x13e4] sm:$0xf0]  ;;  %v9892_v61 = vadd.f32 %v18628_v31, %v3138_v33  ;;  %v9904_v43 = vpop.f32.mrf.mxu1  ;;  %v13298_v31 = vor.u32 %v16989_v37, %v13297_v50  ;;  %v12891_v33 = vld [vmem:[#allocation13 + $0x838] sm:$0xf0]  ;;  %v17074_v50 = vld [vmem:[#allocation13 + $0xe14] sm:$0xf] }
 0x57a   :  { %10189 = vmatmul.bf16.vlgmr.msrb.gmra.mxu3 %v18382_v6  ;;  %v13707_v37 = vld [vmem:[#allocation13 + $0xe98] sm:$0xf0] }
 0x57b   :  { %10233 = vmatpush.bf16.msra.mxu3 %v15066_v54  ;;  %10246 = vmatpush.bf16.msrb.mxu0 %v16154_v16  ;;  %v15610_v54 = vor.u32 %v17567_v8, %v15609_v46  ;;  %v14385_v16 = vld [vmem:[#allocation13 + $0x1360] sm:$0xf]  ;;  %v9932_v17 = vpop.f32.mrf.mxu3  ;;  %v16751_v46 = vld [vmem:[#allocation13 + $0x3f4] sm:$0xf0]  ;;  %v16870_v8 = vld [vmem:[#allocation13 + $0x7b4] sm:$0xf] }
 0x57c   :  { %v14386_v9 = vor.u32 %v17261_v5, %v14385_v16  ;;  %v12346_v38 = vor.u32 %v16751_v46, %v12345_v42  ;;  %v17380_v16 = vld [vmem:[#allocation13 + $0x17a4] sm:$0xf]  ;;  %v14931_v5 = vld [vmem:[#allocation13 + $0x1828] sm:$0xf0]  ;;  %v16734_v42 = vld [vmem:[#allocation13 + $0x374] sm:$0xf] }
 0x57d   :  { %10221 = vmatpush.bf16.msra.mxu2 %v13842_v7  ;;  %10160 = vmatpush.bf16.msrb.mxu1 %v13294_v14  ;;  %v9905_v7 = vadd.f32 %v9904_v43, %v9892_v61  ;;  %v17227_v14 = vld [vmem:[#allocation13 + $0x12d4] sm:$0xf0]  ;;  %v12755_v61 = vld [vmem:[#allocation13 + $0x728] sm:$0xf0]  ;;  %v18650_v43 = vld [vmem:[#allocation13 + $0x2460] sm:$0x77] }
 0x57e   :  { %16510 = vmatmul.msk.bf16.vlgmr.msra.gmra.mxu0 %vm9060_vm11, %v18388_v27  ;;  %v6696_v52 = vunpack.c.l.b16 %v18650_v43 }
 0x57f   :  { %10234 = vmatpush.bf16.msra.mxu3 %v14930_v13  ;;  %10247 = vmatpush.bf16.msrb.mxu0 %v16018_v0  ;;  %v12617_v13 = vld [vmem:[#allocation13 + $0x590] sm:$0xf]  ;;  %v16819_v0 = vld [vmem:[#allocation13 + $0x614] sm:$0xf0]  ;;  %v9918_v40 = vadd.f32 %v9917_v30, %v9905_v7  ;;  %v16921_v30 = vld [vmem:[#allocation13 + $0x944] sm:$0xf0] }
 0x580   :  { %v12618_v18 = vor.u32 %v16819_v0, %v12617_v13  ;;  %v12758_v13 = vor.u32 %v16836_v57, %v12755_v61  ;;  %v17346_v0 = vld [vmem:[#allocation13 + $0x1694] sm:$0xf]  ;;  %v14795_v7 = vld [vmem:[#allocation13 + $0x1718] sm:$0xf0] }
 0x581   :  { %10222 = vmatpush.bf16.msra.mxu2 %v13706_v25  ;;  %10161 = vmatpush.bf16.msrb.mxu1 %v13158_v63  ;;  %v14250_v25 = vor.u32 %v17227_v14, %v14249_v11  ;;  %v9931_v63 = vadd.f32 %v18636_v23, %v9918_v40  ;;  %v14114_v23 = vor.u32 %v17193_v41, %v14113_v19  ;;  %v16802_v11 = vld [vmem:[#allocation13 + $0x594] sm:$0xf]  ;;  %v12619_v14 = vld [vmem:[#allocation13 + $0x618] sm:$0xf0]  ;;  %v17040_v40 = vld [vmem:[#allocation13 + $0xd04] sm:$0xf] }
 0x582   :  { %v14798_v53 = vor.u32 %v17346_v0, %v14795_v7  ;;  %v16649_v19 = vld [vmem:[#allocation13 + $0xc4] sm:$0xf0]  ;;  %v16768_v41 = vld [vmem:[#allocation13 + $0x484] sm:$0xf]  ;;  %v16938_v0 = vld [vmem:[#allocation13 + $0x9d4] sm:$0xf] }
 0x583   :  { %10235 = vmatpush.bf16.msra.mxu3 %v14794_v62  ;;  %10248 = vmatpush.bf16.msrb.mxu0 %v15882_v24  ;;  %v16955_v62 = vld [vmem:[#allocation13 + $0xa54] sm:$0xf0]  ;;  %v12481_v24 = vld [vmem:[#allocation13 + $0x480] sm:$0xf]  ;;  %v9944_v15 = vadd.f32 %v18638_v34, %v9931_v63  ;;  %v13026_v34 = vor.u32 %v16921_v30, %v13025_v2  ;;  %v12483_v63 = vld [vmem:[#allocation13 + $0x508] sm:$0xf0] }
 0x584   :  { %v13162_v26 = vor.u32 %v16955_v62, %v13161_v58  ;;  %v12622_v62 = vor.u32 %v16802_v11, %v12619_v14  ;;  %v17006_v30 = vld [vmem:[#allocation13 + $0xbf4] sm:$0xf]  ;;  %v13163_v7 = vld [vmem:[#allocation13 + $0xa58] sm:$0xf0] }
 0x585   :  { %10223 = vmatpush.bf16.msra.mxu2 %v13570_v44  ;;  %10162 = vmatpush.bf16.msrb.mxu1 %v13022_v45  ;;  %v17414_v44 = vld [vmem:[#allocation13 + $0x18b4] sm:$0xf]  ;;  %v9906_v45 = vpop.f32.mrf.mxu1  ;;  %11388 = vst [vmem:[%s19046_s9 + $0x58] sm:$0xff] %v9944_v15  ;;  %v14251_v11 = vld [vmem:[#allocation13 + $0x12d8] sm:$0xf0] }
 0x586   :  { %v15070_v49 = vor.u32 %v17414_v44, %v15067_v20  ;;  %v17278_v44 = vld [vmem:[#allocation13 + $0x1474] sm:$0xf]  ;;  %v14523_v20 = vld [vmem:[#allocation13 + $0x14f8] sm:$0xf0] }
 0x587   :  { %10236 = vmatpush.bf16.msra.mxu3 %v14658_v60  ;;  %10249 = vmatpush.bf16.msrb.mxu0 %v15746_v39  ;;  %v17142_v60 = vld [vmem:[#allocation13 + $0x1034] sm:$0xf]  ;;  %v12482_v39 = vor.u32 %v16785_v10, %v12481_v24  ;;  %v17312_v24 = vld [vmem:[#allocation13 + $0x1584] sm:$0xf]  ;;  %v11937_v10 = vld [vmem:[#allocation13 + $0x40] sm:$0xf] }
 0x588   :  { %10163 = vmatmul.bf16.vlgmr.msrb.gmra.mxu1 %v18372_v1  ;;  %v13982_v48 = vor.u32 %v17142_v60, %v13979_v29  ;;  %v13435_v60 = vld [vmem:[#allocation13 + $0xc78] sm:$0xf0]  ;;  %v11938_v15 = vor.u32 %v16649_v19, %v11937_v10  ;;  %v13027_v19 = vld [vmem:[#allocation13 + $0x948] sm:$0xf0] }
 0x589   :  { %10207 = vmatpush.bf16.msra.mxu1 %v12890_v47  ;;  %10224 = vmatpush.bf16.msra.mxu2 %v13434_v55  ;;  %v15202_v47 = vor.u32 %v17465_v22, %v15201_v21  ;;  %v12209_v55 = vld [vmem:[#allocation13 + $0x260] sm:$0xf]  ;;  %v7886_v22 = vpack.c.b16 %v6696_v52, %v6696_v52  ;;  %v12347_v45 = vld [vmem:[#allocation13 + $0x3f8] sm:$0xf0]  ;;  %v13438_v46 = vor.u32 %v17006_v30, %v13435_v60  ;;  %v16666_v52 = vld [vmem:[#allocation13 + $0x154] sm:$0xf] }
 0x58a   :  { %v16888_v30 = vld [vmem:[#allocation13 + $0x83c] sm:$0xf0] }
 0x58b   :  { %10237 = vmatpush.bf16.msra.mxu3 %v14522_v51  ;;  %10250 = vmatpush.bf16.msrb.mxu0 %v15610_v54  ;;  %v17108_v51 = vld [vmem:[#allocation13 + $0xf24] sm:$0xf]  ;;  %v12894_v54 = vor.u32 %v16870_v8, %v12891_v33  ;;  %v18652_v3 = vpop.f32.mrf.mxu0  ;;  %v16425_v8 = vld [vmem:[#allocation13 + $0x2350] sm:$0xf]  ;;  %v17771_v33 = vld [vmem:[#allocation13 + $0x23d4] sm:$0xf0] }
 0x58c   :  { %v13846_v17 = vor.u32 %v17108_v51, %v13843_v28  ;;  %v17244_v51 = vld [vmem:[#allocation13 + $0x1364] sm:$0xf]  ;;  %v14387_v28 = vld [vmem:[#allocation13 + $0x13e8] sm:$0xf0] }
 0x58d   :  { %10208 = vmatpush.bf16.msra.mxu1 %v12754_v12  ;;  %10225 = vmatpush.bf16.msra.mxu2 %v13298_v31  ;;  %v14934_v12 = vor.u32 %v17380_v16, %v14931_v5  ;;  %v13710_v31 = vor.u32 %v17074_v50, %v13707_v37  ;;  %v16426_v16 = vor.u32 %v17771_v33, %v16425_v8  ;;  %v16700_v5 = vld [vmem:[#allocation13 + $0x264] sm:$0xf]  ;;  %v17686_v50 = vld [vmem:[#allocation13 + $0x2134] sm:$0xf]  ;;  %v15883_v8 = vld [vmem:[#allocation13 + $0x1f98] sm:$0xf0] }
 0x58f   :  { %10238 = vmatpush.bf16.msra.mxu3 %v14386_v9  ;;  %10251 = vmatpush.bf16.msrb.mxu0 %v15474_v32  ;;  %v12210_v9 = vor.u32 %v16717_v56, %v12209_v55  ;;  %v16683_v32 = vld [vmem:[#allocation13 + $0x1d4] sm:$0xf0]  ;;  %v18660_v2 = vpop.f32.mrf.mxu2  ;;  %v12211_v55 = vld [vmem:[#allocation13 + $0x2e8] sm:$0xf0] }
 0x590   :  { %v12074_v58 = vor.u32 %v16683_v32, %v12073_v36  ;;  %v12214_v36 = vor.u32 %v16700_v5, %v12211_v55  ;;  %v17210_v32 = vld [vmem:[#allocation13 + $0x1254] sm:$0xf]  ;;  %v16427_v5 = vld [vmem:[#allocation13 + $0x23d8] sm:$0xf0]  ;;  %v17584_v55 = vld [vmem:[#allocation13 + $0x1e04] sm:$0xf] }
 0x591   :  { %10209 = vmatpush.bf16.msra.mxu1 %v12618_v18  ;;  %10226 = vmatpush.bf16.msra.mxu2 %v13162_v26  ;;  %v13571_v18 = vld [vmem:[#allocation13 + $0xd88] sm:$0xf0]  ;;  %v14254_v10 = vor.u32 %v17210_v32, %v14251_v11  ;;  %v17550_v11 = vld [vmem:[#allocation13 + $0x1cf4] sm:$0xf] }
 0x592   :  { %v13574_v21 = vor.u32 %v17040_v40, %v13571_v18  ;;  %v13166_v18 = vor.u32 %v16938_v0, %v13163_v7  ;;  %v16291_v32 = vld [vmem:[#allocation13 + $0x22c8] sm:$0xf0] }
 0x593   :  { %10239 = vmatpush.bf16.msra.mxu3 %v14250_v25  ;;  %10252 = vmatpush.bf16.msrb.mxu0 %v15338_v59  ;;  %v14659_v25 = vld [vmem:[#allocation13 + $0x1608] sm:$0xf0]  ;;  %v18658_v59 = vpop.f32.mrf.mxu3  ;;  %v9997_v29 = vpop.f32.mrf.mxu0 }
 0x594   :  { %v14662_v26 = vor.u32 %v17312_v24, %v14659_v25  ;;  %v16904_v24 = vld [vmem:[#allocation13 + $0x8c4] sm:$0xf]  ;;  %v6697_v25 = vunpack.c.h.b16 %v18650_v43  ;;  %v11939_v29 = vld [vmem:[#allocation13 + $0xc8] sm:$0xf0] }
 0x595   :  { %10210 = vmatpush.bf16.msra.mxu1 %v12482_v39  ;;  %10227 = vmatpush.bf16.msra.mxu2 %v13026_v34  ;;  %v12486_v39 = vor.u32 %v16768_v41, %v12483_v63  ;;  %v13299_v34 = vld [vmem:[#allocation13 + $0xb68] sm:$0xf0]  ;;  %v17176_v41 = vld [vmem:[#allocation13 + $0x1144] sm:$0xf] }
 0x596   :  { %v14115_v63 = vld [vmem:[#allocation13 + $0x11c8] sm:$0xf0] }
 0x597   :  { %10240 = vmatpush.bf16.msra.mxu3 %v14114_v23  ;;  %10253 = vmatpush.bf16.msrb.mxu0 %v15202_v47  ;;  %v9114_v23 = vsel %vm9064_vm10, %v7886_v22, 0  ;;  %v14526_v47 = vor.u32 %v17278_v44, %v14523_v20  ;;  %v9971_v37 = vpop.f32.mrf.mxu2  ;;  %v16632_v22 = vld [vmem:[#allocation13 + $0x44] sm:$0xf]  ;;  %v13030_v20 = vor.u32 %v16904_v24, %v13027_v19  ;;  %v13577_v24 = vld [vmem:[#allocation13 + $0xd08] sm:$0xf] }
 0x598   :  { %10228 = vmatmul.bf16.vlgmr.msra.gmra.mxu2 %v18372_v1  ;;  %v11942_v33 = vor.u32 %v16632_v22, %v11939_v29  ;;  %v16820_v37 = vld [vmem:[#allocation13 + $0x61c] sm:$0xf0]  ;;  %v16025_v22 = vld [vmem:[#allocation13 + $0x2028] sm:$0xf] }
 0x599   :  { %10211 = vmatpush.bf16.msra.mxu1 %v12346_v38  ;;  %10272 = vmatpush.bf16.msrb.mxu2 %v12894_v54  ;;  %v18663_v38 = vld [vmem:[#allocation14 + $0x8] sm:$0xff]  ;;  %v9956_v56 = vpop.f32.mrf.mxu1 }
 0x59a   :  { %10241 = vmatmul.bf16.vlgmr.msra.gmra.mxu3 %v18380_v4  ;;  %10254 = vmatmul.bf16.vlgmr.msrb.gmra.mxu0 %v18382_v6  ;;  %v3139_v54 = vperm.slane %v18663_v38, 4 }
 0x59b   :  { %10285 = vmatpush.bf16.msrb.mxu3 %v13982_v48  ;;  %10298 = vmatpush.bf16.msra.mxu0 %v15070_v49  ;;  %v16972_v48 = vld [vmem:[#allocation13 + $0xae4] sm:$0xf]  ;;  %v12350_v49 = vor.u32 %v16734_v42, %v12347_v45  ;;  %v9984_v57 = vpop.f32.mrf.mxu3  ;;  %v7887_v42 = vpack.c.b16 %v6697_v25, %v6697_v25  ;;  %v14118_v45 = vor.u32 %v17176_v41, %v14115_v63  ;;  %v17058_v25 = vld [vmem:[#allocation13 + $0xd8c] sm:$0xf0] }
 0x59c   :  { %v13302_v61 = vor.u32 %v16972_v48, %v13299_v34  ;;  %v9957_v14 = vadd.f32 %v9956_v56, %v3139_v54  ;;  %v12761_v48 = vld [vmem:[#allocation13 + $0x6a8] sm:$0xf]  ;;  %v16854_v34 = vld [vmem:[#allocation13 + $0x72c] sm:$0xf0]  ;;  %v15747_v56 = vld [vmem:[#allocation13 + $0x1e88] sm:$0xf0]  ;;  %v13578_v29 = vor.u32 %v17058_v25, %v13577_v24 }
 0x59d   :  { %10212 = vmatpush.bf16.msra.mxu1 %v12210_v9  ;;  %10273 = vmatpush.bf16.msrb.mxu2 %v12758_v13  ;;  %v14390_v9 = vor.u32 %v17244_v51, %v14387_v28  ;;  %v16155_v13 = vld [vmem:[#allocation13 + $0x21b8] sm:$0xf0]  ;;  %v17126_v51 = vld [vmem:[#allocation13 + $0xfac] sm:$0xf0]  ;;  %v9117_v28 = vsel %vm9064_vm10, %v7887_v42, 0  ;;  %v12762_v57 = vor.u32 %v16854_v34, %v12761_v48  ;;  %v15750_v7 = vor.u32 %v17584_v55, %v15747_v56 }
 0x59e   :  { %v16158_v40 = vor.u32 %v17686_v50, %v16155_v13  ;;  %v9970_v60 = vadd.f32 %v18660_v2, %v9957_v14  ;;  %v17092_v13 = vld [vmem:[#allocation13 + $0xe9c] sm:$0xf0]  ;;  %v17516_v63 = vld [vmem:[#allocation13 + $0x1be4] sm:$0xf]  ;;  %v3140_v42 = vperm.slane %v18663_v38, 5 }
 0x59f   :  { %10286 = vmatpush.bf16.msrb.mxu3 %v13846_v17  ;;  %10299 = vmatpush.bf16.msra.mxu0 %v14934_v12  ;;  %v16289_v17 = vld [vmem:[#allocation13 + $0x2240] sm:$0xf]  ;;  %v17737_v12 = vld [vmem:[#allocation13 + $0x22c4] sm:$0xf0] }
 0x5a0   :  { %v9983_v2 = vadd.f32 %v18658_v59, %v9970_v60  ;;  %v17636_v48 = vld [vmem:[#allocation13 + $0x1f9c] sm:$0xf0]  ;;  %v14937_v25 = vld [vmem:[#allocation13 + $0x17a8] sm:$0xf] }
 0x5a1   :  { %10213 = vmatpush.bf16.msra.mxu1 %v12074_v58  ;;  %10274 = vmatpush.bf16.msrb.mxu2 %v12622_v62  ;;  %v17652_v58 = vld [vmem:[#allocation13 + $0x2024] sm:$0xf]  ;;  %v16019_v62 = vld [vmem:[#allocation13 + $0x20a8] sm:$0xf0]  ;;  %v9958_v44 = vpop.f32.mrf.mxu1 }
 0x5a2   :  { %v16022_v43 = vor.u32 %v17652_v58, %v16019_v62  ;;  %v16786_v58 = vld [vmem:[#allocation13 + $0x50c] sm:$0xf0]  ;;  %v16752_v44 = vld [vmem:[#allocation13 + $0x3fc] sm:$0xf0] }
 0x5a3   :  { %10287 = vmatpush.bf16.msrb.mxu3 %v13710_v31  ;;  %10300 = vmatpush.bf16.msra.mxu0 %v14798_v53  ;;  %v16290_v31 = vor.u32 %v17737_v12, %v16289_v17  ;;  %v12075_v53 = vld [vmem:[#allocation13 + $0x1d8] sm:$0xf0]  ;;  %v12625_v17 = vld [vmem:[#allocation13 + $0x598] sm:$0xf]  ;;  %v9996_v12 = vadd.f32 %v18652_v3, %v9983_v2 }
 0x5a4   :  { %v16161_v3 = vld [vmem:[#allocation13 + $0x2138] sm:$0xf] }
 0x5a5   :  { %10214 = vmatpush.bf16.msra.mxu1 %v11938_v15  ;;  %10275 = vmatpush.bf16.msrb.mxu2 %v12486_v39  ;;  %v13985_v15 = vld [vmem:[#allocation13 + $0x1038] sm:$0xf]  ;;  %v17160_v39 = vld [vmem:[#allocation13 + $0x10bc] sm:$0xf0] }
 0x5a7   :  { %10288 = vmatpush.bf16.msrb.mxu3 %v13574_v21  ;;  %10301 = vmatpush.bf16.msra.mxu0 %v14662_v26  ;;  %v12078_v21 = vor.u32 %v16666_v52, %v12075_v53  ;;  %v12897_v26 = vld [vmem:[#allocation13 + $0x7b8] sm:$0xf]  ;;  %v17704_v52 = vld [vmem:[#allocation13 + $0x21bc] sm:$0xf0]  ;;  %v12626_v53 = vor.u32 %v16820_v37, %v12625_v17  ;;  %v15203_v17 = vld [vmem:[#allocation13 + $0x1a48] sm:$0xf0] }
 0x5a8   :  { %10215 = vmatmul.bf16.vlgmr.msra.gmra.mxu1 %v18370_v35  ;;  %v16162_v41 = vor.u32 %v17704_v52, %v16161_v3 }
 0x5a9   :  { %10264 = vmatpush.bf16.msrb.mxu1 %v9114_v23  ;;  %10276 = vmatpush.bf16.msrb.mxu2 %v12350_v49  ;;  %v12898_v23 = vor.u32 %v16888_v30, %v12897_v26  ;;  %v13849_v49 = vld [vmem:[#allocation13 + $0xf28] sm:$0xf]  ;;  %v10008_v0 = vpop.f32.mrf.mxu1  ;;  %v17670_v26 = vld [vmem:[#allocation13 + $0x20ac] sm:$0xf0] }
 0x5aa   :  { %v10009_v14 = vadd.f32 %v10008_v0, %v9996_v12  ;;  %v15753_v12 = vld [vmem:[#allocation13 + $0x1e08] sm:$0xf]  ;;  %v15073_v0 = vld [vmem:[#allocation13 + $0x18b8] sm:$0xf] }
 0x5ab   :  { %10289 = vmatpush.bf16.msrb.mxu3 %v13438_v46  ;;  %10302 = vmatpush.bf16.msra.mxu0 %v14526_v47  ;;  %v17618_v46 = vld [vmem:[#allocation13 + $0x1f14] sm:$0xf]  ;;  %v13986_v47 = vor.u32 %v17160_v39, %v13985_v15  ;;  %v18671_v59 = vpop.f32.mrf.mxu0  ;;  %v12353_v15 = vld [vmem:[#allocation13 + $0x378] sm:$0xf] }
 0x5ac   :  { %v15886_v54 = vor.u32 %v17618_v46, %v15883_v8  ;;  %11389 = vst [vmem:[%s19046_s9 + $0x60] sm:$0xff] %v10009_v14  ;;  %v16026_v46 = vor.u32 %v17670_v26, %v16025_v22  ;;  %v17482_v8 = vld [vmem:[#allocation13 + $0x1ad4] sm:$0xf]  ;;  %v12354_v2 = vor.u32 %v16752_v44, %v12353_v15  ;;  %v13169_v14 = vld [vmem:[#allocation13 + $0x9d8] sm:$0xf] }
 0x5ad   :  { %10265 = vmatpush.bf16.msrb.mxu1 %v16426_v16  ;;  %10277 = vmatpush.bf16.msrb.mxu2 %v12214_v36  ;;  %v17754_v16 = vld [vmem:[#allocation13 + $0x2354] sm:$0xf]  ;;  %v17720_v36 = vld [vmem:[#allocation13 + $0x2244] sm:$0xf]  ;;  %v13033_v22 = vld [vmem:[#allocation13 + $0x8c8] sm:$0xf] }
 0x5ae   :  { %v16430_v50 = vor.u32 %v17754_v16, %v16427_v5  ;;  %v16294_v62 = vor.u32 %v17720_v36, %v16291_v32  ;;  %v18685_v16 = vld [vmem:[#allocation13 + $0x2468] sm:$0x77]  ;;  %v12081_v36 = vld [vmem:[#allocation13 + $0x158] sm:$0xf]  ;;  %v16922_v26 = vld [vmem:[#allocation13 + $0x94c] sm:$0xf0] }
 0x5af   :  { %10290 = vmatpush.bf16.msrb.mxu3 %v13302_v61  ;;  %10303 = vmatpush.bf16.msra.mxu0 %v14390_v9  ;;  %v13850_v61 = vor.u32 %v17126_v51, %v13849_v49  ;;  %v13713_v9 = vld [vmem:[#allocation13 + $0xe18] sm:$0xf]  ;;  %v10021_v30 = vpop.f32.mrf.mxu2  ;;  %v12217_v49 = vld [vmem:[#allocation13 + $0x268] sm:$0xf]  ;;  %v16718_v51 = vld [vmem:[#allocation13 + $0x2ec] sm:$0xf0]  ;;  %v6698_v32 = vunpack.c.l.b16 %v18685_v16 }
 0x5b0   :  { %v17534_v44 = vld [vmem:[#allocation13 + $0x1c6c] sm:$0xf0] }
 0x5b1   :  { %10266 = vmatpush.bf16.msrb.mxu1 %v16290_v31  ;;  %10278 = vmatpush.bf16.msrb.mxu2 %v12078_v21  ;;  %v15611_v31 = vld [vmem:[#allocation13 + $0x1d78] sm:$0xf0]  ;;  %v15475_v21 = vld [vmem:[#allocation13 + $0x1c68] sm:$0xf0] }
 0x5b2   :  { %v15614_v19 = vor.u32 %v17550_v11, %v15611_v31  ;;  %v16684_v11 = vld [vmem:[#allocation13 + $0x1dc] sm:$0xf0] }
 0x5b3   :  { %10291 = vmatpush.bf16.msrb.mxu3 %v13166_v18  ;;  %10304 = vmatpush.bf16.msra.mxu0 %v14254_v10  ;;  %v12489_v18 = vld [vmem:[#allocation13 + $0x488] sm:$0xf]  ;;  %v18682_v10 = vpop.f32.mrf.mxu3  ;;  %v10049_v39 = vpop.f32.mrf.mxu0  ;;  %v16956_v31 = vld [vmem:[#allocation13 + $0xa5c] sm:$0xf0] }
 0x5b4   :  { %v12490_v60 = vor.u32 %v16786_v58, %v12489_v18  ;;  %v15617_v18 = vld [vmem:[#allocation13 + $0x1cf8] sm:$0xf]  ;;  %v17568_v58 = vld [vmem:[#allocation13 + $0x1d7c] sm:$0xf0]  ;;  %v13170_v24 = vor.u32 %v16956_v31, %v13169_v14  ;;  %v15481_v39 = vld [vmem:[#allocation13 + $0x1be8] sm:$0xf] }
 0x5b5   :  { %10311 = vmatpush.bf16.msra.mxu1 %v16158_v40  ;;  %10279 = vmatpush.bf16.msrb.mxu2 %v11942_v33  ;;  %v13714_v40 = vor.u32 %v17092_v13, %v13713_v9  ;;  %v15339_v33 = vld [vmem:[#allocation13 + $0x1b58] sm:$0xf0]  ;;  %v12218_v9 = vor.u32 %v16718_v51, %v12217_v49  ;;  %v12763_v49 = vld [vmem:[#allocation13 + $0x730] sm:$0xf0] }
 0x5b6   :  { %v15342_v55 = vor.u32 %v17482_v8, %v15339_v33  ;;  %v14801_v33 = vld [vmem:[#allocation13 + $0x1698] sm:$0xf] }
 0x5b7   :  { %10292 = vmatpush.bf16.msrb.mxu3 %v13030_v20  ;;  %10305 = vmatpush.bf16.msra.mxu0 %v14118_v45  ;;  %v17024_v20 = vld [vmem:[#allocation13 + $0xc7c] sm:$0xf0]  ;;  %v10010_v45 = vpop.f32.mrf.mxu1  ;;  %v10023_v37 = vpop.f32.mrf.mxu2 }
 0x5b8   :  { %16511 = vmatmul.msk.bf16.vlgmr.msrb.gmra.mxu1 %vm9060_vm11, %v18388_v27  ;;  %10280 = vmatmul.bf16.vlgmr.msrb.gmra.mxu2 %v18370_v35  ;;  %v13034_v45 = vor.u32 %v16922_v26, %v13033_v22 }
 0x5b9   :  { %10312 = vmatpush.bf16.msra.mxu1 %v16022_v43  ;;  %10329 = vmatpush.bf16.msra.mxu2 %v9117_v28  ;;  %v13441_v43 = vld [vmem:[#allocation13 + $0xbf8] sm:$0xf]  ;;  %v13305_v28 = vld [vmem:[#allocation13 + $0xae8] sm:$0xf] }
 0x5ba   :  { %10293 = vmatmul.bf16.vlgmr.msrb.gmra.mxu3 %v18372_v1  ;;  %10306 = vmatmul.bf16.vlgmr.msra.gmra.mxu0 %v18380_v4  ;;  %v13442_v34 = vor.u32 %v17024_v20, %v13441_v43 }
 0x5bb   :  { %10337 = vmatpush.bf16.msra.mxu3 %v12898_v23  ;;  %10350 = vmatpush.bf16.msrb.mxu0 %v13986_v47  ;;  %v15478_v23 = vor.u32 %v17516_v63, %v15475_v21  ;;  %v15889_v47 = vld [vmem:[#allocation13 + $0x1f18] sm:$0xf]  ;;  %v10036_v5 = vpop.f32.mrf.mxu3  ;;  %v7888_v63 = vpack.c.b16 %v6698_v32, %v6698_v32  ;;  %v16650_v21 = vld [vmem:[#allocation13 + $0xcc] sm:$0xf0]  ;;  %v16163_v32 = vld [vmem:[#allocation13 + $0x21c0] sm:$0xf0] }
 0x5bc   :  { %v15890_v56 = vor.u32 %v17636_v48, %v15889_v47  ;;  %v17364_v47 = vld [vmem:[#allocation13 + $0x171c] sm:$0xf0]  ;;  %v16433_v48 = vld [vmem:[#allocation13 + $0x2358] sm:$0xf] }
 0x5bd   :  { %10313 = vmatpush.bf16.msra.mxu1 %v15886_v54  ;;  %10330 = vmatpush.bf16.msra.mxu2 %v16430_v50  ;;  %v16990_v54 = vld [vmem:[#allocation13 + $0xb6c] sm:$0xf0]  ;;  %v14802_v5 = vor.u32 %v17364_v47, %v14801_v33  ;;  %v14803_v33 = vld [vmem:[#allocation13 + $0x1720] sm:$0xf0] }
 0x5be   :  { %v17602_v50 = vld [vmem:[#allocation13 + $0x1e8c] sm:$0xf0]  ;;  %v13306_v13 = vor.u32 %v16990_v54, %v13305_v28  ;;  %v15345_v28 = vld [vmem:[#allocation13 + $0x1ad8] sm:$0xf]  ;;  %v17500_v54 = vld [vmem:[#allocation13 + $0x1b5c] sm:$0xf0] }
 0x5bf   :  { %10338 = vmatpush.bf16.msra.mxu3 %v12762_v57  ;;  %10351 = vmatpush.bf16.msrb.mxu0 %v13850_v61  ;;  %v17448_v57 = vld [vmem:[#allocation13 + $0x19c4] sm:$0xf]  ;;  %v10022_v61 = vadd.f32 %v10021_v30, %v3140_v42  ;;  %v15754_v52 = vor.u32 %v17602_v50, %v15753_v12  ;;  %v16871_v30 = vld [vmem:[#allocation13 + $0x7bc] sm:$0xf]  ;;  %v10073_v20 = vpop.f32.mrf.mxu2  ;;  %v17738_v12 = vld [vmem:[#allocation13 + $0x22cc] sm:$0xf0]  ;;  %v15346_v37 = vor.u32 %v17500_v54, %v15345_v28 }
 0x5c0   :  { %v15206_v3 = vor.u32 %v17448_v57, %v15203_v17  ;;  %v16297_v17 = vld [vmem:[#allocation13 + $0x2248] sm:$0xf]  ;;  %v17585_v28 = vld [vmem:[#allocation13 + $0x1e0c] sm:$0xf]  ;;  %v15755_v54 = vld [vmem:[#allocation13 + $0x1e90] sm:$0xf0] }
 0x5c1   :  { %10314 = vmatpush.bf16.msra.mxu1 %v15750_v7  ;;  %10331 = vmatpush.bf16.msra.mxu2 %v16294_v62  ;;  %v17432_v7 = vld [vmem:[#allocation13 + $0x193c] sm:$0xf0]  ;;  %v12082_v62 = vor.u32 %v16684_v11, %v12081_v36  ;;  %v17687_v36 = vld [vmem:[#allocation13 + $0x213c] sm:$0xf] }
 0x5c3   :  { %10339 = vmatpush.bf16.msra.mxu3 %v12626_v53  ;;  %10352 = vmatpush.bf16.msrb.mxu0 %v13714_v40  ;;  %v10035_v53 = vadd.f32 %v18682_v10, %v10022_v61  ;;  %v15074_v40 = vor.u32 %v17432_v7, %v15073_v0  ;;  %v15618_v10 = vor.u32 %v17568_v58, %v15617_v18  ;;  %v15209_v0 = vld [vmem:[#allocation13 + $0x19c8] sm:$0xf]  ;;  %v17466_v7 = vld [vmem:[#allocation13 + $0x1a4c] sm:$0xf0]  ;;  %v14529_v18 = vld [vmem:[#allocation13 + $0x1478] sm:$0xf] }
 0x5c4   :  { %v17296_v58 = vld [vmem:[#allocation13 + $0x14fc] sm:$0xf0] }
 0x5c5   :  { %10315 = vmatpush.bf16.msra.mxu1 %v15614_v19  ;;  %10376 = vmatpush.bf16.msrb.mxu2 %v16162_v41  ;;  %v17398_v19 = vld [vmem:[#allocation13 + $0x182c] sm:$0xf0]  ;;  %v11945_v41 = vld [vmem:[#allocation13 + $0x48] sm:$0xf]  ;;  %v10060_v43 = vpop.f32.mrf.mxu1  ;;  %v14530_v26 = vor.u32 %v17296_v58, %v14529_v18 }
 0x5c6   :  { %v14938_v15 = vor.u32 %v17398_v19, %v14937_v25  ;;  %v11946_v42 = vor.u32 %v16650_v21, %v11945_v41  ;;  %v16769_v25 = vld [vmem:[#allocation13 + $0x48c] sm:$0xf]  ;;  %v12491_v19 = vld [vmem:[#allocation13 + $0x510] sm:$0xf0] }
 0x5c7   :  { %10340 = vmatpush.bf16.msra.mxu3 %v12490_v60  ;;  %10353 = vmatpush.bf16.msrb.mxu0 %v13578_v29  ;;  %v12899_v60 = vld [vmem:[#allocation13 + $0x840] sm:$0xf0]  ;;  %v10048_v29 = vadd.f32 %v18671_v59, %v10035_v53  ;;  %v15482_v59 = vor.u32 %v17534_v44, %v15481_v39  ;;  %v10075_v14 = vpop.f32.mrf.mxu2  ;;  %v16298_v53 = vor.u32 %v17738_v12, %v16297_v17  ;;  %v16027_v21 = vld [vmem:[#allocation13 + $0x20b0] sm:$0xf0]  ;;  %v14121_v12 = vld [vmem:[#allocation13 + $0x1148] sm:$0xf] }
 0x5c8   :  { %16512 = vmatmul.msk.bf16.vlgmr.msra.gmra.mxu2 %vm9060_vm11, %v18388_v27  ;;  %v12902_v8 = vor.u32 %v16871_v30, %v12899_v60  ;;  %v14939_v30 = vld [vmem:[#allocation13 + $0x1830] sm:$0xf0]  ;;  %v12494_v60 = vor.u32 %v16769_v25, %v12491_v19 }
 0x5c9   :  { %10316 = vmatpush.bf16.msra.mxu1 %v15478_v23  ;;  %10377 = vmatpush.bf16.msrb.mxu2 %v16026_v46  ;;  %v9120_v23 = vsel %vm9064_vm10, %v7888_v63, 0  ;;  %v10061_v46 = vadd.f32 %v10060_v43, %v10048_v29  ;;  %v17653_v63 = vld [vmem:[#allocation13 + $0x202c] sm:$0xf]  ;;  %v14393_v29 = vld [vmem:[#allocation13 + $0x1368] sm:$0xf] }
 0x5ca   :  { %v16030_v44 = vor.u32 %v17653_v63, %v16027_v21  ;;  %v16735_v43 = vld [vmem:[#allocation13 + $0x37c] sm:$0xf]  ;;  %v13851_v19 = vld [vmem:[#allocation13 + $0xfb0] sm:$0xf0] }
 0x5cb   :  { %10341 = vmatpush.bf16.msra.mxu3 %v12354_v2  ;;  %10354 = vmatpush.bf16.msrb.mxu0 %v13442_v34  ;;  %v17772_v2 = vld [vmem:[#allocation13 + $0x23dc] sm:$0xf0]  ;;  %v16837_v34 = vld [vmem:[#allocation13 + $0x6ac] sm:$0xf]  ;;  %v10074_v51 = vadd.f32 %v10073_v20, %v10061_v46  ;;  %v18697_v50 = vpop.f32.mrf.mxu0  ;;  %v12355_v20 = vld [vmem:[#allocation13 + $0x400] sm:$0xf0] }
 0x5cc   :  { %v16434_v57 = vor.u32 %v17772_v2, %v16433_v48  ;;  %v12766_v61 = vor.u32 %v16837_v34, %v12763_v49  ;;  %v12358_v47 = vor.u32 %v16735_v43, %v12355_v20  ;;  %v14257_v48 = vld [vmem:[#allocation13 + $0x1258] sm:$0xf]  ;;  %v16701_v34 = vld [vmem:[#allocation13 + $0x26c] sm:$0xf]  ;;  %v12219_v49 = vld [vmem:[#allocation13 + $0x2f0] sm:$0xf0] }
 0x5cd   :  { %10317 = vmatpush.bf16.msra.mxu1 %v15342_v55  ;;  %10378 = vmatpush.bf16.msrb.mxu2 %v15890_v56  ;;  %v14665_v55 = vld [vmem:[#allocation13 + $0x1588] sm:$0xf]  ;;  %v17330_v56 = vld [vmem:[#allocation13 + $0x160c] sm:$0xf0]  ;;  %11390 = vst [vmem:[%s19046_s9 + $0x68] sm:$0xff] %v10074_v51  ;;  %v10062_v11 = vpop.f32.mrf.mxu1  ;;  %v12222_v17 = vor.u32 %v16701_v34, %v12219_v49 }
 0x5ce   :  { %v14666_v31 = vor.u32 %v17330_v56, %v14665_v55  ;;  %v12083_v11 = vld [vmem:[#allocation13 + $0x1e0] sm:$0xf0]  ;;  %v11947_v63 = vld [vmem:[#allocation13 + $0xd0] sm:$0xf0] }
 0x5cf   :  { %10342 = vmatpush.bf16.msra.mxu3 %v12218_v9  ;;  %10355 = vmatpush.bf16.msrb.mxu0 %v13306_v13  ;;  %v16803_v9 = vld [vmem:[#allocation13 + $0x59c] sm:$0xf]  ;;  %v12627_v13 = vld [vmem:[#allocation13 + $0x620] sm:$0xf0] }
 0x5d1   :  { %10318 = vmatpush.bf16.msra.mxu1 %v15206_v3  ;;  %10379 = vmatpush.bf16.msrb.mxu2 %v15754_v52  ;;  %v17415_v3 = vld [vmem:[#allocation13 + $0x18bc] sm:$0xf]  ;;  %v15075_v52 = vld [vmem:[#allocation13 + $0x1940] sm:$0xf0]  ;;  %v18701_v22 = vpop.f32.mrf.mxu3 }
 0x5d2   :  { %v15078_v41 = vor.u32 %v17415_v3, %v15075_v52  ;;  %v15619_v3 = vld [vmem:[#allocation13 + $0x1d80] sm:$0xf0] }
 0x5d3   :  { %10343 = vmatpush.bf16.msra.mxu3 %v12082_v62  ;;  %10356 = vmatpush.bf16.msrb.mxu0 %v13170_v24  ;;  %v15210_v62 = vor.u32 %v17466_v7, %v15209_v0  ;;  %v16166_v24 = vor.u32 %v17687_v36, %v16163_v32  ;;  %v10101_v39 = vpop.f32.mrf.mxu0  ;;  %v15758_v7 = vor.u32 %v17585_v28, %v15755_v54  ;;  %v13987_v36 = vld [vmem:[#allocation13 + $0x10c0] sm:$0xf0]  ;;  %v16667_v32 = vld [vmem:[#allocation13 + $0x15c] sm:$0xf]  ;;  %v13579_v28 = vld [vmem:[#allocation13 + $0xd90] sm:$0xf0] }
 0x5d4   :  { %10319 = vmatmul.bf16.vlgmr.msra.gmra.mxu1 %v18382_v6  ;;  %v12086_v58 = vor.u32 %v16667_v32, %v12083_v11  ;;  %v17449_v54 = vld [vmem:[#allocation13 + $0x19cc] sm:$0xf]  ;;  %v16169_v32 = vld [vmem:[#allocation13 + $0x2140] sm:$0xf]  ;;  %v17705_v11 = vld [vmem:[#allocation13 + $0x21c4] sm:$0xf0] }
 0x5d5   :  { %10363 = vmatpush.bf16.msrb.mxu1 %v15074_v40  ;;  %10380 = vmatpush.bf16.msrb.mxu2 %v15618_v10  ;;  %v12630_v40 = vor.u32 %v16803_v9, %v12627_v13  ;;  %v17381_v10 = vld [vmem:[#allocation13 + $0x17ac] sm:$0xf]  ;;  %v17143_v9 = vld [vmem:[#allocation13 + $0x103c] sm:$0xf]  ;;  %v6699_v13 = vunpack.c.h.b16 %v18685_v16 }
 0x5d6   :  { %v13990_v16 = vor.u32 %v17143_v9, %v13987_v36  ;;  %v17177_v9 = vld [vmem:[#allocation13 + $0x114c] sm:$0xf]  ;;  %v17433_v36 = vld [vmem:[#allocation13 + $0x1944] sm:$0xf0] }
 0x5d7   :  { %10344 = vmatpush.bf16.msra.mxu3 %v11946_v42  ;;  %10357 = vmatpush.bf16.msrb.mxu0 %v13034_v45  ;;  %v14942_v42 = vor.u32 %v17381_v10, %v14939_v30  ;;  %v17619_v45 = vld [vmem:[#allocation13 + $0x1f1c] sm:$0xf]  ;;  %v15483_v10 = vld [vmem:[#allocation13 + $0x1c70] sm:$0xf0] }
 0x5d9   :  { %10364 = vmatpush.bf16.msrb.mxu1 %v14938_v15  ;;  %10381 = vmatpush.bf16.msrb.mxu2 %v15482_v59  ;;  %v17262_v15 = vld [vmem:[#allocation13 + $0x13ec] sm:$0xf0]  ;;  %v17228_v59 = vld [vmem:[#allocation13 + $0x12dc] sm:$0xf0]  ;;  %v10088_v55 = vpop.f32.mrf.mxu3 }
 0x5da   :  { %10345 = vmatmul.bf16.vlgmr.msra.gmra.mxu3 %v18370_v35  ;;  %10358 = vmatmul.bf16.vlgmr.msrb.gmra.mxu0 %v18372_v1  ;;  %v14394_v46 = vor.u32 %v17262_v15, %v14393_v29  ;;  %v14258_v56 = vor.u32 %v17228_v59, %v14257_v48  ;;  %v14395_v29 = vld [vmem:[#allocation13 + $0x13f0] sm:$0xf0]  ;;  %v17755_v48 = vld [vmem:[#allocation13 + $0x235c] sm:$0xf]  ;;  %v16435_v59 = vld [vmem:[#allocation13 + $0x23e0] sm:$0xf0] }
 0x5db   :  { %10394 = vmatpush.bf16.msrb.mxu3 %v9120_v23  ;;  %10402 = vmatpush.bf16.msra.mxu0 %v12902_v8  ;;  %v15891_v23 = vld [vmem:[#allocation13 + $0x1fa0] sm:$0xf0]  ;;  %v17347_v8 = vld [vmem:[#allocation13 + $0x169c] sm:$0xf]  ;;  %v10125_v0 = vpop.f32.mrf.mxu2  ;;  %v16438_v55 = vor.u32 %v17755_v48, %v16435_v59 }
 0x5dc   :  { %v15894_v2 = vor.u32 %v17619_v45, %v15891_v23  ;;  %v14806_v51 = vor.u32 %v17347_v8, %v14803_v33  ;;  %v17075_v45 = vld [vmem:[#allocation13 + $0xe1c] sm:$0xf]  ;;  %v13715_v23 = vld [vmem:[#allocation13 + $0xea0] sm:$0xf0] }
 0x5dd   :  { %10365 = vmatpush.bf16.msrb.mxu1 %v14802_v5  ;;  %10382 = vmatpush.bf16.msrb.mxu2 %v15346_v37  ;;  %v3141_v5 = vperm.slane %v18663_v38, 6  ;;  %v17194_v37 = vld [vmem:[#allocation13 + $0x11cc] sm:$0xf0]  ;;  %v13718_v49 = vor.u32 %v17075_v45, %v13715_v23  ;;  %v17637_v23 = vld [vmem:[#allocation13 + $0x1fa4] sm:$0xf0] }
 0x5de   :  { %v14122_v52 = vor.u32 %v17194_v37, %v14121_v12 }
 0x5df   :  { %10395 = vmatpush.bf16.msrb.mxu3 %v16434_v57  ;;  %10403 = vmatpush.bf16.msra.mxu0 %v12766_v61  ;;  %v17313_v57 = vld [vmem:[#allocation13 + $0x158c] sm:$0xf]  ;;  %v14667_v61 = vld [vmem:[#allocation13 + $0x1610] sm:$0xf0]  ;;  %v10087_v18 = vadd.f32 %v18701_v22, %v3141_v5 }
 0x5e0   :  { %v14670_v14 = vor.u32 %v17313_v57, %v14667_v61  ;;  %v17721_v57 = vld [vmem:[#allocation13 + $0x224c] sm:$0xf]  ;;  %v16299_v61 = vld [vmem:[#allocation13 + $0x22d0] sm:$0xf0] }
 0x5e1   :  { %10366 = vmatpush.bf16.msrb.mxu1 %v14666_v31  ;;  %10383 = vmatpush.bf16.msrb.mxu2 %v15210_v62  ;;  %v17551_v31 = vld [vmem:[#allocation13 + $0x1cfc] sm:$0xf]  ;;  %v17109_v62 = vld [vmem:[#allocation13 + $0xf2c] sm:$0xf]  ;;  %v10138_v30 = vpop.f32.mrf.mxu3  ;;  %v10100_v22 = vadd.f32 %v18697_v50, %v10087_v18 }
 0x5e2   :  { %v15622_v25 = vor.u32 %v17551_v31, %v15619_v3  ;;  %v13854_v15 = vor.u32 %v17109_v62, %v13851_v19  ;;  %v17211_v50 = vld [vmem:[#allocation13 + $0x125c] sm:$0xf]  ;;  %v13993_v31 = vld [vmem:[#allocation13 + $0x1040] sm:$0xf]  ;;  %v17161_v3 = vld [vmem:[#allocation13 + $0x10c4] sm:$0xf0] }
 0x5e3   :  { %10396 = vmatpush.bf16.msrb.mxu3 %v16298_v53  ;;  %10404 = vmatpush.bf16.msra.mxu0 %v12630_v40  ;;  %v17279_v53 = vld [vmem:[#allocation13 + $0x147c] sm:$0xf]  ;;  %v14531_v40 = vld [vmem:[#allocation13 + $0x1500] sm:$0xf0]  ;;  %v10127_v20 = vpop.f32.mrf.mxu2  ;;  %v14945_v19 = vld [vmem:[#allocation13 + $0x17b0] sm:$0xf] }
 0x5e4   :  { %10384 = vmatmul.bf16.vlgmr.msrb.gmra.mxu2 %v18382_v6  ;;  %v14534_v21 = vor.u32 %v17279_v53, %v14531_v40  ;;  %v16302_v40 = vor.u32 %v17721_v57, %v16299_v61  ;;  %v17007_v18 = vld [vmem:[#allocation13 + $0xbfc] sm:$0xf]  ;;  %v17365_v20 = vld [vmem:[#allocation13 + $0x1724] sm:$0xf0]  ;;  %v13035_v57 = vld [vmem:[#allocation13 + $0x950] sm:$0xf0] }
 0x5e5   :  { %10428 = vmatpush.bf16.msra.mxu2 %v15078_v41  ;;  %10367 = vmatpush.bf16.msrb.mxu1 %v14530_v26  ;;  %v16633_v41 = vld [vmem:[#allocation13 + $0x4c] sm:$0xf]  ;;  %v10112_v43 = vpop.f32.mrf.mxu1 }
 0x5e6   :  { %v17517_v26 = vld [vmem:[#allocation13 + $0x1bec] sm:$0xf]  ;;  %v11950_v39 = vor.u32 %v16633_v41, %v11947_v63  ;;  %v10113_v8 = vadd.f32 %v10112_v43, %v10100_v22  ;;  %v17399_v41 = vld [vmem:[#allocation13 + $0x1834] sm:$0xf0]  ;;  %v16033_v63 = vld [vmem:[#allocation13 + $0x2030] sm:$0xf] }
 0x5e7   :  { %10441 = vmatpush.bf16.msra.mxu3 %v16166_v24  ;;  %10405 = vmatpush.bf16.msra.mxu0 %v12494_v60  ;;  %v7889_v24 = vpack.c.b16 %v6699_v13, %v6699_v13  ;;  %v17245_v60 = vld [vmem:[#allocation13 + $0x136c] sm:$0xf]  ;;  %v14123_v13 = vld [vmem:[#allocation13 + $0x11d0] sm:$0xf0]  ;;  %v14809_v43 = vld [vmem:[#allocation13 + $0x16a0] sm:$0xf] }
 0x5e8   :  { %v14398_v33 = vor.u32 %v17245_v60, %v14395_v29  ;;  %v10126_v34 = vadd.f32 %v10125_v0, %v10113_v8  ;;  %v15081_v0 = vld [vmem:[#allocation13 + $0x18c0] sm:$0xf]  ;;  %v16973_v60 = vld [vmem:[#allocation13 + $0xaec] sm:$0xf]  ;;  %v13307_v29 = vld [vmem:[#allocation13 + $0xb70] sm:$0xf0]  ;;  %v14810_v48 = vor.u32 %v17365_v20, %v14809_v43 }
 0x5e9   :  { %10429 = vmatpush.bf16.msra.mxu2 %v14942_v42  ;;  %10368 = vmatpush.bf16.msrb.mxu1 %v14394_v46  ;;  %v15486_v42 = vor.u32 %v17517_v26, %v15483_v10  ;;  %v17483_v46 = vld [vmem:[#allocation13 + $0x1adc] sm:$0xf]  ;;  %v15082_v62 = vor.u32 %v17433_v36, %v15081_v0  ;;  %v17671_v26 = vld [vmem:[#allocation13 + $0x20b4] sm:$0xf0]  ;;  %v13857_v10 = vld [vmem:[#allocation13 + $0xf30] sm:$0xf]  ;;  %v13310_v45 = vor.u32 %v16973_v60, %v13307_v29 }
 0x5ea   :  { %16513 = vmatmul.msk.bf16.vlgmr.msrb.gmra.mxu3 %vm9060_vm11, %v18388_v27  ;;  %v17093_v8 = vld [vmem:[#allocation13 + $0xea4] sm:$0xf0]  ;;  %v14537_v36 = vld [vmem:[#allocation13 + $0x1480] sm:$0xf] }
 0x5eb   :  { %10442 = vmatpush.bf16.msra.mxu3 %v16030_v44  ;;  %10406 = vmatpush.bf16.msra.mxu0 %v12358_v47  ;;  %v9123_v44 = vsel %vm9064_vm10, %v7889_v24, 0  ;;  %v15347_v47 = vld [vmem:[#allocation13 + $0x1b60] sm:$0xf0]  ;;  %v18712_v12 = vpop.f32.mrf.mxu0  ;;  %v16170_v24 = vor.u32 %v17705_v11, %v16169_v32  ;;  %v17297_v32 = vld [vmem:[#allocation13 + $0x1504] sm:$0xf0] }
 0x5ec   :  { %v15350_v5 = vor.u32 %v17483_v46, %v15347_v47  ;;  %v13721_v46 = vld [vmem:[#allocation13 + $0xe20] sm:$0xf]  ;;  %v13171_v47 = vld [vmem:[#allocation13 + $0xa60] sm:$0xf0] }
 0x5ed   :  { %10430 = vmatpush.bf16.msra.mxu2 %v14806_v51  ;;  %10369 = vmatpush.bf16.msrb.mxu1 %v14258_v56  ;;  %v17041_v51 = vld [vmem:[#allocation13 + $0xd0c] sm:$0xf]  ;;  %v15211_v56 = vld [vmem:[#allocation13 + $0x1a50] sm:$0xf0] }
 0x5ee   :  { %v15214_v53 = vor.u32 %v17449_v54, %v15211_v56  ;;  %v13585_v54 = vld [vmem:[#allocation13 + $0xd10] sm:$0xf]  ;;  %v16905_v56 = vld [vmem:[#allocation13 + $0x8cc] sm:$0xf] }
 0x5ef   :  { %10443 = vmatpush.bf16.msra.mxu3 %v15894_v2  ;;  %10407 = vmatpush.bf16.msra.mxu0 %v12222_v17  ;;  %v14259_v2 = vld [vmem:[#allocation13 + $0x12e0] sm:$0xf0]  ;;  %v10139_v17 = vadd.f32 %v10138_v30, %v10126_v34  ;;  %v17127_v30 = vld [vmem:[#allocation13 + $0xfb4] sm:$0xf0]  ;;  %v13038_v11 = vor.u32 %v16905_v56, %v13035_v57  ;;  %v13041_v56 = vld [vmem:[#allocation13 + $0x8d0] sm:$0xf] }
 0x5f0   :  { %v14262_v37 = vor.u32 %v17211_v50, %v14259_v2  ;;  %v13722_v50 = vor.u32 %v17093_v8, %v13721_v46  ;;  %v14673_v2 = vld [vmem:[#allocation13 + $0x1590] sm:$0xf]  ;;  %v17331_v34 = vld [vmem:[#allocation13 + $0x1614] sm:$0xf0]  ;;  %v17501_v46 = vld [vmem:[#allocation13 + $0x1b64] sm:$0xf0] }
 0x5f1   :  { %10431 = vmatpush.bf16.msra.mxu2 %v14670_v14  ;;  %10370 = vmatpush.bf16.msrb.mxu1 %v14122_v52  ;;  %11391 = vst [vmem:[%s19046_s9 + $0x70] sm:$0xff] %v10139_v17  ;;  %v13582_v14 = vor.u32 %v17041_v51, %v13579_v28  ;;  %v10114_v52 = vpop.f32.mrf.mxu1  ;;  %v17603_v28 = vld [vmem:[#allocation13 + $0x1e94] sm:$0xf0]  ;;  %v14674_v17 = vor.u32 %v17331_v34, %v14673_v2  ;;  %v14129_v34 = vld [vmem:[#allocation13 + $0x1150] sm:$0xf] }
 0x5f2   :  { %v16787_v2 = vld [vmem:[#allocation13 + $0x514] sm:$0xf0] }
 0x5f3   :  { %10444 = vmatpush.bf16.msra.mxu3 %v15758_v7  ;;  %10408 = vmatpush.bf16.msra.mxu0 %v12086_v58  ;;  %v10140_v7 = vpop.f32.mrf.mxu3  ;;  %v14126_v58 = vor.u32 %v17177_v9, %v14123_v13  ;;  %v10153_v22 = vpop.f32.mrf.mxu0  ;;  %v16889_v9 = vld [vmem:[#allocation13 + $0x844] sm:$0xf0] }
 0x5f4   :  { %10371 = vmatmul.bf16.vlgmr.msrb.gmra.mxu1 %v18380_v4 }
 0x5f5   :  { %10415 = vmatpush.bf16.msra.mxu1 %v13990_v16  ;;  %10432 = vmatpush.bf16.msra.mxu2 %v14534_v21  ;;  %v13443_v16 = vld [vmem:[#allocation13 + $0xc80] sm:$0xf0] }
 0x5f6   :  { %v13446_v21 = vor.u32 %v17007_v18, %v13443_v16  ;;  %v14538_v18 = vor.u32 %v17297_v32, %v14537_v36  ;;  %v12769_v16 = vld [vmem:[#allocation13 + $0x6b0] sm:$0xf]  ;;  %v15083_v36 = vld [vmem:[#allocation13 + $0x1948] sm:$0xf0]  ;;  %v12361_v32 = vld [vmem:[#allocation13 + $0x380] sm:$0xf] }
 0x5f7   :  { %10445 = vmatpush.bf16.msra.mxu3 %v15622_v25  ;;  %10409 = vmatpush.bf16.msra.mxu0 %v11950_v39  ;;  %v13994_v25 = vor.u32 %v17161_v3, %v13993_v31  ;;  %v16034_v39 = vor.u32 %v17671_v26, %v16033_v63  ;;  %v17569_v31 = vld [vmem:[#allocation13 + $0x1d84] sm:$0xf0]  ;;  %v3142_v3 = vperm.slane %v18663_v38, 7  ;;  %v17535_v63 = vld [vmem:[#allocation13 + $0x1c74] sm:$0xf0] }
 0x5f9   :  { %10416 = vmatpush.bf16.msra.mxu1 %v13854_v15  ;;  %10433 = vmatpush.bf16.msra.mxu2 %v14398_v33  ;;  %v14946_v15 = vor.u32 %v17399_v41, %v14945_v19  ;;  %v16939_v33 = vld [vmem:[#allocation13 + $0x9dc] sm:$0xf]  ;;  %v15489_v41 = vld [vmem:[#allocation13 + $0x1bf0] sm:$0xf] }
 0x5fa   :  { %10410 = vmatmul.bf16.vlgmr.msra.gmra.mxu0 %v18370_v35  ;;  %v13174_v51 = vor.u32 %v16939_v33, %v13171_v47  ;;  %v15490_v20 = vor.u32 %v17535_v63, %v15489_v41  ;;  %v13177_v47 = vld [vmem:[#allocation13 + $0x9e0] sm:$0xf]  ;;  %v16719_v41 = vld [vmem:[#allocation13 + $0x2f4] sm:$0xf0]  ;;  %v16838_v63 = vld [vmem:[#allocation13 + $0x6b4] sm:$0xf] }
 0x5fb   :  { %10446 = vmatpush.bf16.msra.mxu3 %v15486_v42  ;;  %10459 = vmatpush.bf16.msrb.mxu0 %v9123_v44  ;;  %v13858_v44 = vor.u32 %v17127_v30, %v13857_v10  ;;  %v15897_v42 = vld [vmem:[#allocation13 + $0x1f20] sm:$0xf]  ;;  %v10177_v61 = vpop.f32.mrf.mxu2  ;;  %v18722_v13 = vpop.f32.mrf.mxu0  ;;  %v13313_v10 = vld [vmem:[#allocation13 + $0xaf0] sm:$0xf]  ;;  %v16991_v30 = vld [vmem:[#allocation13 + $0xb74] sm:$0xf0] }
 0x5fc   :  { %v15898_v59 = vor.u32 %v17637_v23, %v15897_v42  ;;  %v14265_v42 = vld [vmem:[#allocation13 + $0x1260] sm:$0xf] }
 0x5fd   :  { %10417 = vmatpush.bf16.msra.mxu1 %v13718_v49  ;;  %10434 = vmatpush.bf16.msra.mxu2 %v14262_v37  ;;  %v15761_v49 = vld [vmem:[#allocation13 + $0x1e10] sm:$0xf]  ;;  %v12905_v37 = vld [vmem:[#allocation13 + $0x7c0] sm:$0xf] }
 0x5fe   :  { %v15762_v0 = vor.u32 %v17603_v28, %v15761_v49  ;;  %v12906_v52 = vor.u32 %v16889_v9, %v12905_v37  ;;  %v15353_v23 = vld [vmem:[#allocation13 + $0x1ae0] sm:$0xf]  ;;  %v17195_v49 = vld [vmem:[#allocation13 + $0x11d4] sm:$0xf0]  ;;  %v13995_v37 = vld [vmem:[#allocation13 + $0x10c8] sm:$0xf0] }
 0x5ff   :  { %10447 = vmatpush.bf16.msra.mxu3 %v15350_v5  ;;  %10460 = vmatpush.bf16.msrb.mxu0 %v16438_v55  ;;  %v17059_v5 = vld [vmem:[#allocation13 + $0xd94] sm:$0xf0]  ;;  %v18720_v55 = vpop.f32.mrf.mxu3  ;;  %v15354_v28 = vor.u32 %v17501_v46, %v15353_v23 }
 0x600   :  { %v13586_v7 = vor.u32 %v17059_v5, %v13585_v54  ;;  %v15217_v54 = vld [vmem:[#allocation13 + $0x19d0] sm:$0xf]  ;;  %v17467_v5 = vld [vmem:[#allocation13 + $0x1a54] sm:$0xf0] }
 0x601   :  { %10418 = vmatpush.bf16.msra.mxu1 %v13582_v14  ;;  %10435 = vmatpush.bf16.msra.mxu2 %v14126_v58  ;;  %v15625_v14 = vld [vmem:[#allocation13 + $0x1d00] sm:$0xf]  ;;  %v16855_v58 = vld [vmem:[#allocation13 + $0x734] sm:$0xf0] }
 0x602   :  { %v12770_v26 = vor.u32 %v16855_v58, %v12769_v16  ;;  %v13859_v16 = vld [vmem:[#allocation13 + $0xfb8] sm:$0xf0] }
 0x603   :  { %10448 = vmatpush.bf16.msra.mxu3 %v15214_v53  ;;  %10461 = vmatpush.bf16.msrb.mxu0 %v16302_v40  ;;  %v13449_v53 = vld [vmem:[#allocation13 + $0xc00] sm:$0xf]  ;;  %v17025_v40 = vld [vmem:[#allocation13 + $0xc84] sm:$0xf0]  ;;  %v10179_v29 = vpop.f32.mrf.mxu2  ;;  %v10205_v43 = vpop.f32.mrf.mxu0 }
 0x604   :  { %10436 = vmatmul.bf16.vlgmr.msra.gmra.mxu2 %v18380_v4  ;;  %v13450_v19 = vor.u32 %v17025_v40, %v13449_v53  ;;  %v12089_v43 = vld [vmem:[#allocation13 + $0x160] sm:$0xf] }
 0x605   :  { %10480 = vmatpush.bf16.msrb.mxu2 %v13994_v25  ;;  %10419 = vmatpush.bf16.msra.mxu1 %v13446_v21  ;;  %v17263_v25 = vld [vmem:[#allocation13 + $0x13f4] sm:$0xf0]  ;;  %v10152_v21 = vadd.f32 %v18712_v12, %v3142_v3  ;;  %v10164_v60 = vpop.f32.mrf.mxu1  ;;  %v13314_v12 = vor.u32 %v16991_v30, %v13313_v10  ;;  %v12907_v3 = vld [vmem:[#allocation13 + $0x848] sm:$0xf0]  ;;  %v17076_v10 = vld [vmem:[#allocation13 + $0xe24] sm:$0xf] }
 0x606   :  { %10449 = vmatmul.bf16.vlgmr.msra.gmra.mxu3 %v18382_v6  ;;  %v13723_v30 = vld [vmem:[#allocation13 + $0xea8] sm:$0xf0] }
 0x607   :  { %10493 = vmatpush.bf16.msrb.mxu3 %v15082_v62  ;;  %10506 = vmatpush.bf16.msra.mxu0 %v16170_v24  ;;  %v15626_v62 = vor.u32 %v17569_v31, %v15625_v14  ;;  %v14401_v24 = vld [vmem:[#allocation13 + $0x1370] sm:$0xf]  ;;  %v10192_v38 = vpop.f32.mrf.mxu3  ;;  %v16753_v14 = vld [vmem:[#allocation13 + $0x404] sm:$0xf0]  ;;  %v16872_v31 = vld [vmem:[#allocation13 + $0x7c4] sm:$0xf] }
 0x608   :  { %v14402_v22 = vor.u32 %v17263_v25, %v14401_v24  ;;  %v12362_v58 = vor.u32 %v16753_v14, %v12361_v32  ;;  %v17382_v24 = vld [vmem:[#allocation13 + $0x17b4] sm:$0xf]  ;;  %v14947_v25 = vld [vmem:[#allocation13 + $0x1838] sm:$0xf0]  ;;  %v16736_v32 = vld [vmem:[#allocation13 + $0x384] sm:$0xf] }
 0x609   :  { %10481 = vmatpush.bf16.msrb.mxu2 %v13858_v44  ;;  %10420 = vmatpush.bf16.msra.mxu1 %v13310_v45  ;;  %v10165_v44 = vadd.f32 %v10164_v60, %v10152_v21  ;;  %v17229_v45 = vld [vmem:[#allocation13 + $0x12e4] sm:$0xf0]  ;;  %v12771_v21 = vld [vmem:[#allocation13 + $0x738] sm:$0xf0]  ;;  %v18734_v60 = vld [vmem:[#allocation13 + $0x2470] sm:$0x77] }
 0x60a   :  { %16514 = vmatmul.msk.bf16.vlgmr.msrb.gmra.mxu0 %vm9060_vm11, %v18388_v27  ;;  %v6700_v23 = vunpack.c.l.b16 %v18734_v60  ;;  %v18747_v14 = vld [vmem:[#allocation14 + $0x10] sm:$0xff] }
 0x60b   :  { %10494 = vmatpush.bf16.msrb.mxu3 %v14946_v15  ;;  %10507 = vmatpush.bf16.msra.mxu0 %v16034_v39  ;;  %v12633_v15 = vld [vmem:[#allocation13 + $0x5a0] sm:$0xf]  ;;  %v16821_v39 = vld [vmem:[#allocation13 + $0x624] sm:$0xf0]  ;;  %v10178_v8 = vadd.f32 %v10177_v61, %v10165_v44  ;;  %v16923_v61 = vld [vmem:[#allocation13 + $0x954] sm:$0xf0] }
 0x60c   :  { %v12634_v33 = vor.u32 %v16821_v39, %v12633_v15  ;;  %v12774_v15 = vor.u32 %v16838_v63, %v12771_v21  ;;  %v17348_v39 = vld [vmem:[#allocation13 + $0x16a4] sm:$0xf]  ;;  %v14811_v44 = vld [vmem:[#allocation13 + $0x1728] sm:$0xf0] }
 0x60d   :  { %10482 = vmatpush.bf16.msrb.mxu2 %v13722_v50  ;;  %10421 = vmatpush.bf16.msra.mxu1 %v13174_v51  ;;  %v14266_v50 = vor.u32 %v17229_v45, %v14265_v42  ;;  %v10191_v51 = vadd.f32 %v18720_v55, %v10178_v8  ;;  %v14130_v55 = vor.u32 %v17195_v49, %v14129_v34  ;;  %v16804_v42 = vld [vmem:[#allocation13 + $0x5a4] sm:$0xf]  ;;  %v12635_v45 = vld [vmem:[#allocation13 + $0x628] sm:$0xf0]  ;;  %v17042_v8 = vld [vmem:[#allocation13 + $0xd14] sm:$0xf] }
 0x60e   :  { %v14814_v46 = vor.u32 %v17348_v39, %v14811_v44  ;;  %v16651_v34 = vld [vmem:[#allocation13 + $0xd4] sm:$0xf0]  ;;  %v16770_v49 = vld [vmem:[#allocation13 + $0x494] sm:$0xf]  ;;  %v16940_v39 = vld [vmem:[#allocation13 + $0x9e4] sm:$0xf] }
 0x60f   :  { %10495 = vmatpush.bf16.msrb.mxu3 %v14810_v48  ;;  %10508 = vmatpush.bf16.msra.mxu0 %v15898_v59  ;;  %v16957_v48 = vld [vmem:[#allocation13 + $0xa64] sm:$0xf0]  ;;  %v12497_v59 = vld [vmem:[#allocation13 + $0x490] sm:$0xf]  ;;  %v10204_v9 = vadd.f32 %v18722_v13, %v10191_v51  ;;  %v13042_v13 = vor.u32 %v16923_v61, %v13041_v56  ;;  %v12499_v51 = vld [vmem:[#allocation13 + $0x518] sm:$0xf0] }
 0x610   :  { %v13178_v57 = vor.u32 %v16957_v48, %v13177_v47  ;;  %v12638_v48 = vor.u32 %v16804_v42, %v12635_v45  ;;  %v17008_v61 = vld [vmem:[#allocation13 + $0xc04] sm:$0xf]  ;;  %v13179_v44 = vld [vmem:[#allocation13 + $0xa68] sm:$0xf0] }
 0x611   :  { %10483 = vmatpush.bf16.msrb.mxu2 %v13586_v7  ;;  %10422 = vmatpush.bf16.msra.mxu1 %v13038_v11  ;;  %v17416_v7 = vld [vmem:[#allocation13 + $0x18c4] sm:$0xf]  ;;  %v10166_v11 = vpop.f32.mrf.mxu1  ;;  %11392 = vst [vmem:[%s19046_s9 + $0x78] sm:$0xff] %v10204_v9  ;;  %v14267_v42 = vld [vmem:[#allocation13 + $0x12e8] sm:$0xf0] }
 0x612   :  { %v15086_v40 = vor.u32 %v17416_v7, %v15083_v36  ;;  %v17280_v7 = vld [vmem:[#allocation13 + $0x1484] sm:$0xf]  ;;  %v14539_v36 = vld [vmem:[#allocation13 + $0x1508] sm:$0xf0] }
 0x613   :  { %10496 = vmatpush.bf16.msrb.mxu3 %v14674_v17  ;;  %10509 = vmatpush.bf16.msra.mxu0 %v15762_v0  ;;  %v17144_v17 = vld [vmem:[#allocation13 + $0x1044] sm:$0xf]  ;;  %v12498_v0 = vor.u32 %v16787_v2, %v12497_v59  ;;  %v17314_v59 = vld [vmem:[#allocation13 + $0x1594] sm:$0xf]  ;;  %v11953_v2 = vld [vmem:[#allocation13 + $0x50] sm:$0xf] }
 0x614   :  { %10423 = vmatmul.bf16.vlgmr.msra.gmra.mxu1 %v18372_v1  ;;  %v13998_v53 = vor.u32 %v17144_v17, %v13995_v37  ;;  %v13451_v17 = vld [vmem:[#allocation13 + $0xc88] sm:$0xf0]  ;;  %v11954_v9 = vor.u32 %v16651_v34, %v11953_v2  ;;  %v13043_v34 = vld [vmem:[#allocation13 + $0x958] sm:$0xf0] }
 0x615   :  { %10467 = vmatpush.bf16.msrb.mxu1 %v12906_v52  ;;  %10484 = vmatpush.bf16.msrb.mxu2 %v13450_v19  ;;  %v15218_v52 = vor.u32 %v17467_v5, %v15217_v54  ;;  %v12225_v19 = vld [vmem:[#allocation13 + $0x270] sm:$0xf]  ;;  %v7890_v5 = vpack.c.b16 %v6700_v23, %v6700_v23  ;;  %v12363_v11 = vld [vmem:[#allocation13 + $0x408] sm:$0xf0]  ;;  %v16668_v23 = vld [vmem:[#allocation13 + $0x164] sm:$0xf] }
 0x617   :  { %10497 = vmatpush.bf16.msrb.mxu3 %v14538_v18  ;;  %10510 = vmatpush.bf16.msra.mxu0 %v15626_v62  ;;  %v17110_v18 = vld [vmem:[#allocation13 + $0xf34] sm:$0xf]  ;;  %v12910_v62 = vor.u32 %v16872_v31, %v12907_v3  ;;  %v18736_v29 = vpop.f32.mrf.mxu0  ;;  %v13454_v31 = vor.u32 %v17008_v61, %v13451_v17  ;;  %v16441_v3 = vld [vmem:[#allocation13 + $0x2360] sm:$0xf]  ;;  %v16890_v61 = vld [vmem:[#allocation13 + $0x84c] sm:$0xf0] }
 0x618   :  { %v13862_v38 = vor.u32 %v17110_v18, %v13859_v16  ;;  %v12366_v18 = vor.u32 %v16736_v32, %v12363_v11  ;;  %v17246_v16 = vld [vmem:[#allocation13 + $0x1374] sm:$0xf] }
 0x619   :  { %10468 = vmatpush.bf16.msrb.mxu1 %v12770_v26  ;;  %10485 = vmatpush.bf16.msrb.mxu2 %v13314_v12  ;;  %v14950_v26 = vor.u32 %v17382_v24, %v14947_v25  ;;  %v13726_v12 = vor.u32 %v17076_v10, %v13723_v30  ;;  %v16702_v25 = vld [vmem:[#allocation13 + $0x274] sm:$0xf]  ;;  %v17688_v10 = vld [vmem:[#allocation13 + $0x2144] sm:$0xf] }
 0x61b   :  { %10498 = vmatpush.bf16.msrb.mxu3 %v14402_v22  ;;  %10511 = vmatpush.bf16.msra.mxu0 %v15490_v20  ;;  %v12226_v22 = vor.u32 %v16719_v41, %v12225_v19  ;;  %v16685_v20 = vld [vmem:[#allocation13 + $0x1e4] sm:$0xf0]  ;;  %v18744_v56 = vpop.f32.mrf.mxu2  ;;  %v12227_v19 = vld [vmem:[#allocation13 + $0x2f8] sm:$0xf0] }
 0x61c   :  { %v12090_v47 = vor.u32 %v16685_v20, %v12089_v43  ;;  %v12230_v43 = vor.u32 %v16702_v25, %v12227_v19  ;;  %v17212_v20 = vld [vmem:[#allocation13 + $0x1264] sm:$0xf]  ;;  %v16443_v25 = vld [vmem:[#allocation13 + $0x23e8] sm:$0xf0]  ;;  %v17586_v19 = vld [vmem:[#allocation13 + $0x1e14] sm:$0xf] }
 0x61d   :  { %10469 = vmatpush.bf16.msrb.mxu1 %v12634_v33  ;;  %10486 = vmatpush.bf16.msrb.mxu2 %v13178_v57  ;;  %v13587_v33 = vld [vmem:[#allocation13 + $0xd98] sm:$0xf0]  ;;  %v14270_v2 = vor.u32 %v17212_v20, %v14267_v42  ;;  %v17552_v42 = vld [vmem:[#allocation13 + $0x1d04] sm:$0xf] }
 0x61e   :  { %v13590_v54 = vor.u32 %v17042_v8, %v13587_v33  ;;  %v13182_v33 = vor.u32 %v16940_v39, %v13179_v44  ;;  %v16307_v20 = vld [vmem:[#allocation13 + $0x22d8] sm:$0xf0] }
 0x61f   :  { %10499 = vmatpush.bf16.msrb.mxu3 %v14266_v50  ;;  %10512 = vmatpush.bf16.msra.mxu0 %v15354_v28  ;;  %v14675_v50 = vld [vmem:[#allocation13 + $0x1618] sm:$0xf0]  ;;  %v18742_v28 = vpop.f32.mrf.mxu3  ;;  %v10257_v37 = vpop.f32.mrf.mxu0 }
 0x620   :  { %v14678_v57 = vor.u32 %v17314_v59, %v14675_v50  ;;  %v16906_v59 = vld [vmem:[#allocation13 + $0x8d4] sm:$0xf]  ;;  %v6701_v50 = vunpack.c.h.b16 %v18734_v60  ;;  %v11955_v37 = vld [vmem:[#allocation13 + $0xd8] sm:$0xf0] }
 0x621   :  { %10470 = vmatpush.bf16.msrb.mxu1 %v12498_v0  ;;  %10487 = vmatpush.bf16.msrb.mxu2 %v13042_v13  ;;  %v12502_v0 = vor.u32 %v16770_v49, %v12499_v51  ;;  %v16974_v13 = vld [vmem:[#allocation13 + $0xaf4] sm:$0xf]  ;;  %v14131_v51 = vld [vmem:[#allocation13 + $0x11d8] sm:$0xf0] }
 0x622   :  { %v17178_v49 = vld [vmem:[#allocation13 + $0x1154] sm:$0xf]  ;;  %v7891_v32 = vpack.c.b16 %v6701_v50, %v6701_v50  ;;  %v17060_v50 = vld [vmem:[#allocation13 + $0xd9c] sm:$0xf0] }
 0x623   :  { %10500 = vmatpush.bf16.msrb.mxu3 %v14130_v55  ;;  %10513 = vmatpush.bf16.msra.mxu0 %v15218_v52  ;;  %v9126_v55 = vsel %vm9064_vm10, %v7890_v5, 0  ;;  %v17773_v52 = vld [vmem:[#allocation13 + $0x23e4] sm:$0xf0]  ;;  %v10231_v30 = vpop.f32.mrf.mxu2  ;;  %v16634_v5 = vld [vmem:[#allocation13 + $0x54] sm:$0xf]  ;;  %v14134_v11 = vor.u32 %v17178_v49, %v14131_v51 }
 0x624   :  { %10488 = vmatmul.bf16.vlgmr.msrb.gmra.mxu2 %v18372_v1  ;;  %v16442_v24 = vor.u32 %v17773_v52, %v16441_v3  ;;  %v15899_v3 = vld [vmem:[#allocation13 + $0x1fa8] sm:$0xf0]  ;;  %v11958_v52 = vor.u32 %v16634_v5, %v11955_v37  ;;  %v16822_v30 = vld [vmem:[#allocation13 + $0x62c] sm:$0xf0]  ;;  %v17518_v51 = vld [vmem:[#allocation13 + $0x1bf4] sm:$0xf] }
 0x625   :  { %10471 = vmatpush.bf16.msrb.mxu1 %v12362_v58  ;;  %10532 = vmatpush.bf16.msra.mxu2 %v12910_v62  ;;  %v14403_v58 = vld [vmem:[#allocation13 + $0x13f8] sm:$0xf0]  ;;  %v3143_v62 = vperm.slane %v18747_v14, 0  ;;  %v10216_v41 = vpop.f32.mrf.mxu1  ;;  %v16041_v5 = vld [vmem:[#allocation13 + $0x2038] sm:$0xf] }
 0x626   :  { %10501 = vmatmul.bf16.vlgmr.msrb.gmra.mxu3 %v18380_v4  ;;  %10514 = vmatmul.bf16.vlgmr.msra.gmra.mxu0 %v18382_v6 }
 0x627   :  { %10545 = vmatpush.bf16.msra.mxu3 %v13998_v53  ;;  %10558 = vmatpush.bf16.msrb.mxu0 %v15086_v40  ;;  %v14542_v53 = vor.u32 %v17280_v7, %v14539_v36  ;;  %v13315_v40 = vld [vmem:[#allocation13 + $0xb78] sm:$0xf0]  ;;  %v10244_v63 = vpop.f32.mrf.mxu3  ;;  %v10217_v45 = vadd.f32 %v10216_v41, %v3143_v62  ;;  %v13046_v36 = vor.u32 %v16906_v59, %v13043_v34  ;;  %v13593_v59 = vld [vmem:[#allocation13 + $0xd18] sm:$0xf] }
 0x628   :  { %v13318_v21 = vor.u32 %v16974_v13, %v13315_v40  ;;  %v12777_v13 = vld [vmem:[#allocation13 + $0x6b8] sm:$0xf]  ;;  %v16856_v40 = vld [vmem:[#allocation13 + $0x73c] sm:$0xf0]  ;;  %v15763_v41 = vld [vmem:[#allocation13 + $0x1e98] sm:$0xf0]  ;;  %v13594_v37 = vor.u32 %v17060_v50, %v13593_v59 }
 0x629   :  { %10472 = vmatpush.bf16.msrb.mxu1 %v12226_v22  ;;  %10533 = vmatpush.bf16.msra.mxu2 %v12774_v15  ;;  %v14406_v22 = vor.u32 %v17246_v16, %v14403_v58  ;;  %v16171_v15 = vld [vmem:[#allocation13 + $0x21c8] sm:$0xf0]  ;;  %v10230_v17 = vadd.f32 %v18744_v56, %v10217_v45  ;;  %v17128_v16 = vld [vmem:[#allocation13 + $0xfbc] sm:$0xf0]  ;;  %v9129_v58 = vsel %vm9064_vm10, %v7891_v32, 0  ;;  %v12778_v63 = vor.u32 %v16856_v40, %v12777_v13 }
 0x62a   :  { %v16174_v8 = vor.u32 %v17688_v10, %v16171_v15  ;;  %v17094_v15 = vld [vmem:[#allocation13 + $0xeac] sm:$0xf0]  ;;  %v15766_v44 = vor.u32 %v17586_v19, %v15763_v41  ;;  %v3144_v32 = vperm.slane %v18747_v14, 1  ;;  %v14953_v50 = vld [vmem:[#allocation13 + $0x17b8] sm:$0xf] }
 0x62b   :  { %10546 = vmatpush.bf16.msra.mxu3 %v13862_v38  ;;  %10559 = vmatpush.bf16.msrb.mxu0 %v14950_v26  ;;  %v16305_v38 = vld [vmem:[#allocation13 + $0x2250] sm:$0xf]  ;;  %v17739_v26 = vld [vmem:[#allocation13 + $0x22d4] sm:$0xf0]  ;;  %v10243_v56 = vadd.f32 %v18742_v28, %v10230_v17 }
 0x62c   :  { %v17638_v13 = vld [vmem:[#allocation13 + $0x1fac] sm:$0xf0] }
 0x62d   :  { %10473 = vmatpush.bf16.msrb.mxu1 %v12090_v47  ;;  %10534 = vmatpush.bf16.msra.mxu2 %v12638_v48  ;;  %v17654_v47 = vld [vmem:[#allocation13 + $0x2034] sm:$0xf]  ;;  %v16035_v48 = vld [vmem:[#allocation13 + $0x20b8] sm:$0xf0]  ;;  %v10218_v7 = vpop.f32.mrf.mxu1 }
 0x62e   :  { %v16038_v60 = vor.u32 %v17654_v47, %v16035_v48  ;;  %v16788_v47 = vld [vmem:[#allocation13 + $0x51c] sm:$0xf0]  ;;  %v16754_v7 = vld [vmem:[#allocation13 + $0x40c] sm:$0xf0] }
 0x62f   :  { %10547 = vmatpush.bf16.msra.mxu3 %v13726_v12  ;;  %10560 = vmatpush.bf16.msrb.mxu0 %v14814_v46  ;;  %v16306_v12 = vor.u32 %v17739_v26, %v16305_v38  ;;  %v12091_v46 = vld [vmem:[#allocation13 + $0x1e8] sm:$0xf0]  ;;  %v12641_v38 = vld [vmem:[#allocation13 + $0x5a8] sm:$0xf]  ;;  %v10256_v26 = vadd.f32 %v18736_v29, %v10243_v56 }
 0x630   :  { %v16177_v29 = vld [vmem:[#allocation13 + $0x2148] sm:$0xf] }
 0x631   :  { %10474 = vmatpush.bf16.msrb.mxu1 %v11954_v9  ;;  %10535 = vmatpush.bf16.msra.mxu2 %v12502_v0  ;;  %v14001_v9 = vld [vmem:[#allocation13 + $0x1048] sm:$0xf]  ;;  %v17162_v0 = vld [vmem:[#allocation13 + $0x10cc] sm:$0xf0] }
 0x633   :  { %10548 = vmatpush.bf16.msra.mxu3 %v13590_v54  ;;  %10561 = vmatpush.bf16.msrb.mxu0 %v14678_v57  ;;  %v12094_v54 = vor.u32 %v16668_v23, %v12091_v46  ;;  %v12913_v57 = vld [vmem:[#allocation13 + $0x7c8] sm:$0xf]  ;;  %v17706_v23 = vld [vmem:[#allocation13 + $0x21cc] sm:$0xf0]  ;;  %v12642_v46 = vor.u32 %v16822_v30, %v12641_v38  ;;  %v15219_v38 = vld [vmem:[#allocation13 + $0x1a58] sm:$0xf0] }
 0x634   :  { %10475 = vmatmul.bf16.vlgmr.msrb.gmra.mxu1 %v18370_v35  ;;  %v16178_v49 = vor.u32 %v17706_v23, %v16177_v29 }
 0x635   :  { %10524 = vmatpush.bf16.msra.mxu1 %v9126_v55  ;;  %10536 = vmatpush.bf16.msra.mxu2 %v12366_v18  ;;  %v12914_v55 = vor.u32 %v16890_v61, %v12913_v57  ;;  %v13865_v18 = vld [vmem:[#allocation13 + $0xf38] sm:$0xf]  ;;  %v10268_v39 = vpop.f32.mrf.mxu1  ;;  %v17672_v57 = vld [vmem:[#allocation13 + $0x20bc] sm:$0xf0] }
 0x636   :  { %v10269_v45 = vadd.f32 %v10268_v39, %v10256_v26  ;;  %v15769_v26 = vld [vmem:[#allocation13 + $0x1e18] sm:$0xf]  ;;  %v15089_v39 = vld [vmem:[#allocation13 + $0x18c8] sm:$0xf] }
 0x637   :  { %10549 = vmatpush.bf16.msra.mxu3 %v13454_v31  ;;  %10562 = vmatpush.bf16.msrb.mxu0 %v14542_v53  ;;  %v17620_v31 = vld [vmem:[#allocation13 + $0x1f24] sm:$0xf]  ;;  %v14002_v53 = vor.u32 %v17162_v0, %v14001_v9  ;;  %v18755_v28 = vpop.f32.mrf.mxu0  ;;  %v12369_v9 = vld [vmem:[#allocation13 + $0x388] sm:$0xf] }
 0x638   :  { %v15902_v62 = vor.u32 %v17620_v31, %v15899_v3  ;;  %11393 = vst [vmem:[%s19046_s9 + $0x80] sm:$0xff] %v10269_v45  ;;  %v16042_v31 = vor.u32 %v17672_v57, %v16041_v5  ;;  %v17484_v3 = vld [vmem:[#allocation13 + $0x1ae4] sm:$0xf]  ;;  %v12370_v56 = vor.u32 %v16754_v7, %v12369_v9  ;;  %v13185_v45 = vld [vmem:[#allocation13 + $0x9e8] sm:$0xf] }
 0x639   :  { %10525 = vmatpush.bf16.msra.mxu1 %v16442_v24  ;;  %10537 = vmatpush.bf16.msra.mxu2 %v12230_v43  ;;  %v17756_v24 = vld [vmem:[#allocation13 + $0x2364] sm:$0xf]  ;;  %v17722_v43 = vld [vmem:[#allocation13 + $0x2254] sm:$0xf]  ;;  %v13049_v5 = vld [vmem:[#allocation13 + $0x8d8] sm:$0xf] }
 0x63a   :  { %v16446_v10 = vor.u32 %v17756_v24, %v16443_v25  ;;  %v16310_v48 = vor.u32 %v17722_v43, %v16307_v20  ;;  %v18769_v24 = vld [vmem:[#allocation13 + $0x2478] sm:$0x77]  ;;  %v12097_v43 = vld [vmem:[#allocation13 + $0x168] sm:$0xf]  ;;  %v16924_v57 = vld [vmem:[#allocation13 + $0x95c] sm:$0xf0] }
 0x63b   :  { %10550 = vmatpush.bf16.msra.mxu3 %v13318_v21  ;;  %10563 = vmatpush.bf16.msrb.mxu0 %v14406_v22  ;;  %v13866_v21 = vor.u32 %v17128_v16, %v13865_v18  ;;  %v13729_v22 = vld [vmem:[#allocation13 + $0xe28] sm:$0xf]  ;;  %v10281_v61 = vpop.f32.mrf.mxu2  ;;  %v12233_v18 = vld [vmem:[#allocation13 + $0x278] sm:$0xf]  ;;  %v16720_v16 = vld [vmem:[#allocation13 + $0x2fc] sm:$0xf0]  ;;  %v6702_v20 = vunpack.c.l.b16 %v18769_v24 }
 0x63c   :  { %v17536_v7 = vld [vmem:[#allocation13 + $0x1c7c] sm:$0xf0] }
 0x63d   :  { %10526 = vmatpush.bf16.msra.mxu1 %v16306_v12  ;;  %10538 = vmatpush.bf16.msra.mxu2 %v12094_v54  ;;  %v15627_v12 = vld [vmem:[#allocation13 + $0x1d88] sm:$0xf0]  ;;  %v15491_v54 = vld [vmem:[#allocation13 + $0x1c78] sm:$0xf0] }
 0x63e   :  { %v15630_v34 = vor.u32 %v17552_v42, %v15627_v12  ;;  %v16686_v42 = vld [vmem:[#allocation13 + $0x1ec] sm:$0xf0] }
 0x63f   :  { %10551 = vmatpush.bf16.msra.mxu3 %v13182_v33  ;;  %10564 = vmatpush.bf16.msrb.mxu0 %v14270_v2  ;;  %v12505_v33 = vld [vmem:[#allocation13 + $0x498] sm:$0xf]  ;;  %v18766_v2 = vpop.f32.mrf.mxu3  ;;  %v10309_v0 = vpop.f32.mrf.mxu0  ;;  %v16958_v12 = vld [vmem:[#allocation13 + $0xa6c] sm:$0xf0] }
 0x640   :  { %v12506_v17 = vor.u32 %v16788_v47, %v12505_v33  ;;  %v15633_v33 = vld [vmem:[#allocation13 + $0x1d08] sm:$0xf]  ;;  %v17570_v47 = vld [vmem:[#allocation13 + $0x1d8c] sm:$0xf0]  ;;  %v13186_v59 = vor.u32 %v16958_v12, %v13185_v45  ;;  %v15497_v0 = vld [vmem:[#allocation13 + $0x1bf8] sm:$0xf] }
 0x641   :  { %10571 = vmatpush.bf16.msrb.mxu1 %v16174_v8  ;;  %10539 = vmatpush.bf16.msra.mxu2 %v11958_v52  ;;  %v13730_v8 = vor.u32 %v17094_v15, %v13729_v22  ;;  %v15355_v52 = vld [vmem:[#allocation13 + $0x1b68] sm:$0xf0]  ;;  %v12234_v22 = vor.u32 %v16720_v16, %v12233_v18  ;;  %v12779_v18 = vld [vmem:[#allocation13 + $0x740] sm:$0xf0] }
 0x642   :  { %v15358_v19 = vor.u32 %v17484_v3, %v15355_v52  ;;  %v14817_v52 = vld [vmem:[#allocation13 + $0x16a8] sm:$0xf] }
 0x643   :  { %10552 = vmatpush.bf16.msra.mxu3 %v13046_v36  ;;  %10565 = vmatpush.bf16.msrb.mxu0 %v14134_v11  ;;  %v17026_v36 = vld [vmem:[#allocation13 + $0xc8c] sm:$0xf0]  ;;  %v10270_v11 = vpop.f32.mrf.mxu1  ;;  %v10283_v30 = vpop.f32.mrf.mxu2 }
 0x644   :  { %16515 = vmatmul.msk.bf16.vlgmr.msra.gmra.mxu1 %vm9060_vm11, %v18388_v27  ;;  %10540 = vmatmul.bf16.vlgmr.msra.gmra.mxu2 %v18370_v35  ;;  %v13050_v11 = vor.u32 %v16924_v57, %v13049_v5 }
 0x645   :  { %10572 = vmatpush.bf16.msrb.mxu1 %v16038_v60  ;;  %10589 = vmatpush.bf16.msrb.mxu2 %v9129_v58  ;;  %v13457_v60 = vld [vmem:[#allocation13 + $0xc08] sm:$0xf]  ;;  %v13321_v58 = vld [vmem:[#allocation13 + $0xaf8] sm:$0xf] }
 0x646   :  { %10553 = vmatmul.bf16.vlgmr.msra.gmra.mxu3 %v18372_v1  ;;  %10566 = vmatmul.bf16.vlgmr.msrb.gmra.mxu0 %v18380_v4  ;;  %v13458_v40 = vor.u32 %v17026_v36, %v13457_v60 }
 0x647   :  { %10597 = vmatpush.bf16.msrb.mxu3 %v12914_v55  ;;  %10610 = vmatpush.bf16.msra.mxu0 %v14002_v53  ;;  %v15494_v55 = vor.u32 %v17518_v51, %v15491_v54  ;;  %v15905_v53 = vld [vmem:[#allocation13 + $0x1f28] sm:$0xf]  ;;  %v10296_v25 = vpop.f32.mrf.mxu3  ;;  %v7892_v51 = vpack.c.b16 %v6702_v20, %v6702_v20  ;;  %v16652_v54 = vld [vmem:[#allocation13 + $0xdc] sm:$0xf0]  ;;  %v16179_v20 = vld [vmem:[#allocation13 + $0x21d0] sm:$0xf0] }
 0x648   :  { %v15906_v41 = vor.u32 %v17638_v13, %v15905_v53  ;;  %v17366_v53 = vld [vmem:[#allocation13 + $0x172c] sm:$0xf0]  ;;  %v16449_v13 = vld [vmem:[#allocation13 + $0x2368] sm:$0xf] }
 0x649   :  { %10573 = vmatpush.bf16.msrb.mxu1 %v15902_v62  ;;  %10590 = vmatpush.bf16.msrb.mxu2 %v16446_v10  ;;  %v16992_v62 = vld [vmem:[#allocation13 + $0xb7c] sm:$0xf0]  ;;  %v14818_v25 = vor.u32 %v17366_v53, %v14817_v52  ;;  %v14819_v52 = vld [vmem:[#allocation13 + $0x1730] sm:$0xf0] }
 0x64a   :  { %v17604_v10 = vld [vmem:[#allocation13 + $0x1e9c] sm:$0xf0]  ;;  %v13322_v15 = vor.u32 %v16992_v62, %v13321_v58  ;;  %v15361_v58 = vld [vmem:[#allocation13 + $0x1ae8] sm:$0xf]  ;;  %v17502_v62 = vld [vmem:[#allocation13 + $0x1b6c] sm:$0xf0] }
 0x64b   :  { %10598 = vmatpush.bf16.msrb.mxu3 %v12778_v63  ;;  %10611 = vmatpush.bf16.msra.mxu0 %v13866_v21  ;;  %v17450_v63 = vld [vmem:[#allocation13 + $0x19d4] sm:$0xf]  ;;  %v10282_v21 = vadd.f32 %v10281_v61, %v3144_v32  ;;  %v15770_v23 = vor.u32 %v17604_v10, %v15769_v26  ;;  %v16873_v61 = vld [vmem:[#allocation13 + $0x7cc] sm:$0xf]  ;;  %v10333_v36 = vpop.f32.mrf.mxu2  ;;  %v17740_v26 = vld [vmem:[#allocation13 + $0x22dc] sm:$0xf0]  ;;  %v15362_v30 = vor.u32 %v17502_v62, %v15361_v58 }
 0x64c   :  { %v15222_v29 = vor.u32 %v17450_v63, %v15219_v38  ;;  %v16313_v38 = vld [vmem:[#allocation13 + $0x2258] sm:$0xf]  ;;  %v17587_v58 = vld [vmem:[#allocation13 + $0x1e1c] sm:$0xf]  ;;  %v15771_v62 = vld [vmem:[#allocation13 + $0x1ea0] sm:$0xf0] }
 0x64d   :  { %10574 = vmatpush.bf16.msrb.mxu1 %v15766_v44  ;;  %10591 = vmatpush.bf16.msrb.mxu2 %v16310_v48  ;;  %v17434_v44 = vld [vmem:[#allocation13 + $0x194c] sm:$0xf0]  ;;  %v12098_v48 = vor.u32 %v16686_v42, %v12097_v43  ;;  %v17689_v43 = vld [vmem:[#allocation13 + $0x214c] sm:$0xf] }
 0x64f   :  { %10599 = vmatpush.bf16.msrb.mxu3 %v12642_v46  ;;  %10612 = vmatpush.bf16.msra.mxu0 %v13730_v8  ;;  %v10295_v46 = vadd.f32 %v18766_v2, %v10282_v21  ;;  %v15090_v8 = vor.u32 %v17434_v44, %v15089_v39  ;;  %v15634_v2 = vor.u32 %v17570_v47, %v15633_v33  ;;  %v15225_v39 = vld [vmem:[#allocation13 + $0x19d8] sm:$0xf]  ;;  %v17468_v44 = vld [vmem:[#allocation13 + $0x1a5c] sm:$0xf0]  ;;  %v14545_v33 = vld [vmem:[#allocation13 + $0x1488] sm:$0xf] }
 0x650   :  { %v17298_v47 = vld [vmem:[#allocation13 + $0x150c] sm:$0xf0] }
 0x651   :  { %10575 = vmatpush.bf16.msrb.mxu1 %v15630_v34  ;;  %10636 = vmatpush.bf16.msra.mxu2 %v16178_v49  ;;  %v17400_v34 = vld [vmem:[#allocation13 + $0x183c] sm:$0xf0]  ;;  %v11961_v49 = vld [vmem:[#allocation13 + $0x58] sm:$0xf]  ;;  %v10320_v60 = vpop.f32.mrf.mxu1  ;;  %v14546_v57 = vor.u32 %v17298_v47, %v14545_v33 }
 0x652   :  { %v14954_v9 = vor.u32 %v17400_v34, %v14953_v50  ;;  %v11962_v32 = vor.u32 %v16652_v54, %v11961_v49  ;;  %v16771_v50 = vld [vmem:[#allocation13 + $0x49c] sm:$0xf]  ;;  %v12507_v34 = vld [vmem:[#allocation13 + $0x520] sm:$0xf0] }
 0x653   :  { %10600 = vmatpush.bf16.msrb.mxu3 %v12506_v17  ;;  %10613 = vmatpush.bf16.msra.mxu0 %v13594_v37  ;;  %v12915_v17 = vld [vmem:[#allocation13 + $0x850] sm:$0xf0]  ;;  %v10308_v37 = vadd.f32 %v18755_v28, %v10295_v46  ;;  %v15498_v28 = vor.u32 %v17536_v7, %v15497_v0  ;;  %v10335_v45 = vpop.f32.mrf.mxu2  ;;  %v16314_v46 = vor.u32 %v17740_v26, %v16313_v38  ;;  %v16043_v54 = vld [vmem:[#allocation13 + $0x20c0] sm:$0xf0]  ;;  %v14137_v26 = vld [vmem:[#allocation13 + $0x1158] sm:$0xf] }
 0x654   :  { %16516 = vmatmul.msk.bf16.vlgmr.msrb.gmra.mxu2 %vm9060_vm11, %v18388_v27  ;;  %v12918_v3 = vor.u32 %v16873_v61, %v12915_v17  ;;  %v14955_v61 = vld [vmem:[#allocation13 + $0x1840] sm:$0xf0]  ;;  %v12510_v17 = vor.u32 %v16771_v50, %v12507_v34 }
 0x655   :  { %10576 = vmatpush.bf16.msrb.mxu1 %v15494_v55  ;;  %10637 = vmatpush.bf16.msra.mxu2 %v16042_v31  ;;  %v9132_v55 = vsel %vm9064_vm10, %v7892_v51, 0  ;;  %v10321_v31 = vadd.f32 %v10320_v60, %v10308_v37  ;;  %v17655_v51 = vld [vmem:[#allocation13 + $0x203c] sm:$0xf]  ;;  %v14409_v37 = vld [vmem:[#allocation13 + $0x1378] sm:$0xf] }
 0x656   :  { %v16046_v7 = vor.u32 %v17655_v51, %v16043_v54  ;;  %v16737_v60 = vld [vmem:[#allocation13 + $0x38c] sm:$0xf]  ;;  %v13867_v34 = vld [vmem:[#allocation13 + $0xfc0] sm:$0xf0] }
 0x657   :  { %10601 = vmatpush.bf16.msrb.mxu3 %v12370_v56  ;;  %10614 = vmatpush.bf16.msra.mxu0 %v13458_v40  ;;  %v17774_v56 = vld [vmem:[#allocation13 + $0x23ec] sm:$0xf0]  ;;  %v16839_v40 = vld [vmem:[#allocation13 + $0x6bc] sm:$0xf]  ;;  %v10334_v16 = vadd.f32 %v10333_v36, %v10321_v31  ;;  %v18781_v10 = vpop.f32.mrf.mxu0  ;;  %v12371_v36 = vld [vmem:[#allocation13 + $0x410] sm:$0xf0] }
 0x658   :  { %v16450_v63 = vor.u32 %v17774_v56, %v16449_v13  ;;  %v12782_v21 = vor.u32 %v16839_v40, %v12779_v18  ;;  %v12374_v53 = vor.u32 %v16737_v60, %v12371_v36  ;;  %v14273_v13 = vld [vmem:[#allocation13 + $0x1268] sm:$0xf]  ;;  %v16703_v40 = vld [vmem:[#allocation13 + $0x27c] sm:$0xf]  ;;  %v12235_v18 = vld [vmem:[#allocation13 + $0x300] sm:$0xf0] }
 0x659   :  { %10577 = vmatpush.bf16.msrb.mxu1 %v15358_v19  ;;  %10638 = vmatpush.bf16.msra.mxu2 %v15906_v41  ;;  %v14681_v19 = vld [vmem:[#allocation13 + $0x1598] sm:$0xf]  ;;  %v17332_v41 = vld [vmem:[#allocation13 + $0x161c] sm:$0xf0]  ;;  %11394 = vst [vmem:[%s19046_s9 + $0x88] sm:$0xff] %v10334_v16  ;;  %v10322_v42 = vpop.f32.mrf.mxu1  ;;  %v12238_v38 = vor.u32 %v16703_v40, %v12235_v18 }
 0x65a   :  { %v14682_v12 = vor.u32 %v17332_v41, %v14681_v19  ;;  %v12099_v42 = vld [vmem:[#allocation13 + $0x1f0] sm:$0xf0]  ;;  %v11963_v51 = vld [vmem:[#allocation13 + $0xe0] sm:$0xf0] }
 0x65b   :  { %10602 = vmatpush.bf16.msrb.mxu3 %v12234_v22  ;;  %10615 = vmatpush.bf16.msra.mxu0 %v13322_v15  ;;  %v16805_v22 = vld [vmem:[#allocation13 + $0x5ac] sm:$0xf]  ;;  %v12643_v15 = vld [vmem:[#allocation13 + $0x630] sm:$0xf0] }
 0x65d   :  { %10578 = vmatpush.bf16.msrb.mxu1 %v15222_v29  ;;  %10639 = vmatpush.bf16.msra.mxu2 %v15770_v23  ;;  %v17417_v29 = vld [vmem:[#allocation13 + $0x18cc] sm:$0xf]  ;;  %v15091_v23 = vld [vmem:[#allocation13 + $0x1950] sm:$0xf0]  ;;  %v18785_v5 = vpop.f32.mrf.mxu3 }
 0x65e   :  { %v15094_v49 = vor.u32 %v17417_v29, %v15091_v23  ;;  %v15635_v29 = vld [vmem:[#allocation13 + $0x1d90] sm:$0xf0] }
 0x65f   :  { %10603 = vmatpush.bf16.msrb.mxu3 %v12098_v48  ;;  %10616 = vmatpush.bf16.msra.mxu0 %v13186_v59  ;;  %v15226_v48 = vor.u32 %v17468_v44, %v15225_v39  ;;  %v16182_v59 = vor.u32 %v17689_v43, %v16179_v20  ;;  %v10361_v0 = vpop.f32.mrf.mxu0  ;;  %v15774_v44 = vor.u32 %v17587_v58, %v15771_v62  ;;  %v14003_v43 = vld [vmem:[#allocation13 + $0x10d0] sm:$0xf0]  ;;  %v16669_v20 = vld [vmem:[#allocation13 + $0x16c] sm:$0xf]  ;;  %v13595_v58 = vld [vmem:[#allocation13 + $0xda0] sm:$0xf0] }
 0x660   :  { %10579 = vmatmul.bf16.vlgmr.msrb.gmra.mxu1 %v18382_v6  ;;  %v12102_v47 = vor.u32 %v16669_v20, %v12099_v42  ;;  %v17451_v62 = vld [vmem:[#allocation13 + $0x19dc] sm:$0xf]  ;;  %v16185_v20 = vld [vmem:[#allocation13 + $0x2150] sm:$0xf]  ;;  %v17707_v42 = vld [vmem:[#allocation13 + $0x21d4] sm:$0xf0] }
 0x661   :  { %10623 = vmatpush.bf16.msra.mxu1 %v15090_v8  ;;  %10640 = vmatpush.bf16.msra.mxu2 %v15634_v2  ;;  %v12646_v8 = vor.u32 %v16805_v22, %v12643_v15  ;;  %v17383_v2 = vld [vmem:[#allocation13 + $0x17bc] sm:$0xf]  ;;  %v17145_v22 = vld [vmem:[#allocation13 + $0x104c] sm:$0xf]  ;;  %v6703_v15 = vunpack.c.h.b16 %v18769_v24 }
 0x662   :  { %v14006_v24 = vor.u32 %v17145_v22, %v14003_v43  ;;  %v17179_v22 = vld [vmem:[#allocation13 + $0x115c] sm:$0xf]  ;;  %v17435_v43 = vld [vmem:[#allocation13 + $0x1954] sm:$0xf0] }
 0x663   :  { %10604 = vmatpush.bf16.msrb.mxu3 %v11962_v32  ;;  %10617 = vmatpush.bf16.msra.mxu0 %v13050_v11  ;;  %v14958_v32 = vor.u32 %v17383_v2, %v14955_v61  ;;  %v17621_v11 = vld [vmem:[#allocation13 + $0x1f2c] sm:$0xf]  ;;  %v15499_v2 = vld [vmem:[#allocation13 + $0x1c80] sm:$0xf0] }
 0x665   :  { %10624 = vmatpush.bf16.msra.mxu1 %v14954_v9  ;;  %10641 = vmatpush.bf16.msra.mxu2 %v15498_v28  ;;  %v17264_v9 = vld [vmem:[#allocation13 + $0x13fc] sm:$0xf0]  ;;  %v17230_v28 = vld [vmem:[#allocation13 + $0x12ec] sm:$0xf0]  ;;  %v10348_v19 = vpop.f32.mrf.mxu3 }
 0x666   :  { %10605 = vmatmul.bf16.vlgmr.msrb.gmra.mxu3 %v18370_v35  ;;  %10618 = vmatmul.bf16.vlgmr.msra.gmra.mxu0 %v18372_v1  ;;  %v14410_v31 = vor.u32 %v17264_v9, %v14409_v37  ;;  %v14274_v41 = vor.u32 %v17230_v28, %v14273_v13  ;;  %v14411_v37 = vld [vmem:[#allocation13 + $0x1400] sm:$0xf0]  ;;  %v17757_v13 = vld [vmem:[#allocation13 + $0x236c] sm:$0xf]  ;;  %v16451_v28 = vld [vmem:[#allocation13 + $0x23f0] sm:$0xf0] }
 0x667   :  { %10654 = vmatpush.bf16.msra.mxu3 %v9132_v55  ;;  %10662 = vmatpush.bf16.msrb.mxu0 %v12918_v3  ;;  %v15907_v55 = vld [vmem:[#allocation13 + $0x1fb0] sm:$0xf0]  ;;  %v17349_v3 = vld [vmem:[#allocation13 + $0x16ac] sm:$0xf]  ;;  %v10385_v39 = vpop.f32.mrf.mxu2  ;;  %v16454_v19 = vor.u32 %v17757_v13, %v16451_v28 }
 0x668   :  { %v15910_v56 = vor.u32 %v17621_v11, %v15907_v55  ;;  %v14822_v16 = vor.u32 %v17349_v3, %v14819_v52  ;;  %v17077_v11 = vld [vmem:[#allocation13 + $0xe2c] sm:$0xf]  ;;  %v13731_v55 = vld [vmem:[#allocation13 + $0xeb0] sm:$0xf0] }
 0x669   :  { %10625 = vmatpush.bf16.msra.mxu1 %v14818_v25  ;;  %10642 = vmatpush.bf16.msra.mxu2 %v15362_v30  ;;  %v3145_v25 = vperm.slane %v18747_v14, 2  ;;  %v17196_v30 = vld [vmem:[#allocation13 + $0x11dc] sm:$0xf0]  ;;  %v13734_v18 = vor.u32 %v17077_v11, %v13731_v55  ;;  %v17639_v55 = vld [vmem:[#allocation13 + $0x1fb4] sm:$0xf0] }
 0x66a   :  { %v14138_v23 = vor.u32 %v17196_v30, %v14137_v26 }
 0x66b   :  { %10655 = vmatpush.bf16.msra.mxu3 %v16450_v63  ;;  %10663 = vmatpush.bf16.msrb.mxu0 %v12782_v21  ;;  %v17315_v63 = vld [vmem:[#allocation13 + $0x159c] sm:$0xf]  ;;  %v14683_v21 = vld [vmem:[#allocation13 + $0x1620] sm:$0xf0]  ;;  %v10347_v33 = vadd.f32 %v18785_v5, %v3145_v25 }
 0x66c   :  { %v14686_v45 = vor.u32 %v17315_v63, %v14683_v21  ;;  %v17723_v63 = vld [vmem:[#allocation13 + $0x225c] sm:$0xf]  ;;  %v16315_v21 = vld [vmem:[#allocation13 + $0x22e0] sm:$0xf0] }
 0x66d   :  { %10626 = vmatpush.bf16.msra.mxu1 %v14682_v12  ;;  %10643 = vmatpush.bf16.msra.mxu2 %v15226_v48  ;;  %v17553_v12 = vld [vmem:[#allocation13 + $0x1d0c] sm:$0xf]  ;;  %v17111_v48 = vld [vmem:[#allocation13 + $0xf3c] sm:$0xf]  ;;  %v10398_v61 = vpop.f32.mrf.mxu3  ;;  %v10360_v5 = vadd.f32 %v18781_v10, %v10347_v33 }
 0x66e   :  { %v15638_v50 = vor.u32 %v17553_v12, %v15635_v29  ;;  %v13870_v9 = vor.u32 %v17111_v48, %v13867_v34  ;;  %v17213_v10 = vld [vmem:[#allocation13 + $0x126c] sm:$0xf]  ;;  %v14009_v12 = vld [vmem:[#allocation13 + $0x1050] sm:$0xf]  ;;  %v17163_v29 = vld [vmem:[#allocation13 + $0x10d4] sm:$0xf0] }
 0x66f   :  { %10656 = vmatpush.bf16.msra.mxu3 %v16314_v46  ;;  %10664 = vmatpush.bf16.msrb.mxu0 %v12646_v8  ;;  %v17281_v46 = vld [vmem:[#allocation13 + $0x148c] sm:$0xf]  ;;  %v14547_v8 = vld [vmem:[#allocation13 + $0x1510] sm:$0xf0]  ;;  %v10387_v36 = vpop.f32.mrf.mxu2  ;;  %v14961_v34 = vld [vmem:[#allocation13 + $0x17c0] sm:$0xf] }
 0x670   :  { %10644 = vmatmul.bf16.vlgmr.msra.gmra.mxu2 %v18382_v6  ;;  %v14550_v54 = vor.u32 %v17281_v46, %v14547_v8  ;;  %v16318_v8 = vor.u32 %v17723_v63, %v16315_v21  ;;  %v17009_v33 = vld [vmem:[#allocation13 + $0xc0c] sm:$0xf]  ;;  %v17367_v36 = vld [vmem:[#allocation13 + $0x1734] sm:$0xf0]  ;;  %v13051_v63 = vld [vmem:[#allocation13 + $0x960] sm:$0xf0] }
 0x671   :  { %10688 = vmatpush.bf16.msrb.mxu2 %v15094_v49  ;;  %10627 = vmatpush.bf16.msra.mxu1 %v14546_v57  ;;  %v16635_v49 = vld [vmem:[#allocation13 + $0x5c] sm:$0xf]  ;;  %v10372_v60 = vpop.f32.mrf.mxu1 }
 0x672   :  { %v17519_v57 = vld [vmem:[#allocation13 + $0x1bfc] sm:$0xf]  ;;  %v11966_v0 = vor.u32 %v16635_v49, %v11963_v51  ;;  %v10373_v3 = vadd.f32 %v10372_v60, %v10360_v5  ;;  %v17401_v49 = vld [vmem:[#allocation13 + $0x1844] sm:$0xf0]  ;;  %v16049_v51 = vld [vmem:[#allocation13 + $0x2040] sm:$0xf] }
 0x673   :  { %10701 = vmatpush.bf16.msrb.mxu3 %v16182_v59  ;;  %10665 = vmatpush.bf16.msrb.mxu0 %v12510_v17  ;;  %v7893_v59 = vpack.c.b16 %v6703_v15, %v6703_v15  ;;  %v17247_v17 = vld [vmem:[#allocation13 + $0x137c] sm:$0xf]  ;;  %v14139_v15 = vld [vmem:[#allocation13 + $0x11e0] sm:$0xf0]  ;;  %v14825_v60 = vld [vmem:[#allocation13 + $0x16b0] sm:$0xf] }
 0x674   :  { %v14414_v52 = vor.u32 %v17247_v17, %v14411_v37  ;;  %v10386_v40 = vadd.f32 %v10385_v39, %v10373_v3  ;;  %v15097_v39 = vld [vmem:[#allocation13 + $0x18d0] sm:$0xf]  ;;  %v16975_v17 = vld [vmem:[#allocation13 + $0xafc] sm:$0xf]  ;;  %v13323_v37 = vld [vmem:[#allocation13 + $0xb80] sm:$0xf0]  ;;  %v14826_v13 = vor.u32 %v17367_v36, %v14825_v60 }
 0x675   :  { %10689 = vmatpush.bf16.msrb.mxu2 %v14958_v32  ;;  %10628 = vmatpush.bf16.msra.mxu1 %v14410_v31  ;;  %v15502_v32 = vor.u32 %v17519_v57, %v15499_v2  ;;  %v17485_v31 = vld [vmem:[#allocation13 + $0x1aec] sm:$0xf]  ;;  %v15098_v48 = vor.u32 %v17435_v43, %v15097_v39  ;;  %v17673_v57 = vld [vmem:[#allocation13 + $0x20c4] sm:$0xf0]  ;;  %v13873_v2 = vld [vmem:[#allocation13 + $0xf40] sm:$0xf]  ;;  %v13326_v11 = vor.u32 %v16975_v17, %v13323_v37 }
 0x676   :  { %16517 = vmatmul.msk.bf16.vlgmr.msra.gmra.mxu3 %vm9060_vm11, %v18388_v27  ;;  %v17095_v3 = vld [vmem:[#allocation13 + $0xeb4] sm:$0xf0]  ;;  %v14553_v43 = vld [vmem:[#allocation13 + $0x1490] sm:$0xf] }
 0x677   :  { %10702 = vmatpush.bf16.msrb.mxu3 %v16046_v7  ;;  %10666 = vmatpush.bf16.msrb.mxu0 %v12374_v53  ;;  %v9135_v7 = vsel %vm9064_vm10, %v7893_v59, 0  ;;  %v15363_v53 = vld [vmem:[#allocation13 + $0x1b70] sm:$0xf0]  ;;  %v18796_v26 = vpop.f32.mrf.mxu0  ;;  %v16186_v59 = vor.u32 %v17707_v42, %v16185_v20  ;;  %v17299_v20 = vld [vmem:[#allocation13 + $0x1514] sm:$0xf0] }
 0x678   :  { %v15366_v25 = vor.u32 %v17485_v31, %v15363_v53  ;;  %v13737_v31 = vld [vmem:[#allocation13 + $0xe30] sm:$0xf]  ;;  %v13187_v53 = vld [vmem:[#allocation13 + $0xa70] sm:$0xf0] }
 0x679   :  { %10690 = vmatpush.bf16.msrb.mxu2 %v14822_v16  ;;  %10629 = vmatpush.bf16.msra.mxu1 %v14274_v41  ;;  %v17043_v16 = vld [vmem:[#allocation13 + $0xd1c] sm:$0xf]  ;;  %v15227_v41 = vld [vmem:[#allocation13 + $0x1a60] sm:$0xf0] }
 0x67a   :  { %v15230_v46 = vor.u32 %v17451_v62, %v15227_v41  ;;  %v13601_v62 = vld [vmem:[#allocation13 + $0xd20] sm:$0xf]  ;;  %v16907_v41 = vld [vmem:[#allocation13 + $0x8dc] sm:$0xf] }
 0x67b   :  { %10703 = vmatpush.bf16.msrb.mxu3 %v15910_v56  ;;  %10667 = vmatpush.bf16.msrb.mxu0 %v12238_v38  ;;  %v14275_v56 = vld [vmem:[#allocation13 + $0x12f0] sm:$0xf0]  ;;  %v10399_v38 = vadd.f32 %v10398_v61, %v10386_v40  ;;  %v17129_v61 = vld [vmem:[#allocation13 + $0xfc4] sm:$0xf0]  ;;  %v13054_v42 = vor.u32 %v16907_v41, %v13051_v63  ;;  %v13057_v41 = vld [vmem:[#allocation13 + $0x8e0] sm:$0xf] }
 0x67c   :  { %v14278_v30 = vor.u32 %v17213_v10, %v14275_v56  ;;  %v13738_v10 = vor.u32 %v17095_v3, %v13737_v31  ;;  %v14689_v56 = vld [vmem:[#allocation13 + $0x15a0] sm:$0xf]  ;;  %v17333_v40 = vld [vmem:[#allocation13 + $0x1624] sm:$0xf0]  ;;  %v17503_v31 = vld [vmem:[#allocation13 + $0x1b74] sm:$0xf0] }
 0x67d   :  { %10691 = vmatpush.bf16.msrb.mxu2 %v14686_v45  ;;  %10630 = vmatpush.bf16.msra.mxu1 %v14138_v23  ;;  %11395 = vst [vmem:[%s19046_s9 + $0x90] sm:$0xff] %v10399_v38  ;;  %v13598_v45 = vor.u32 %v17043_v16, %v13595_v58  ;;  %v10374_v23 = vpop.f32.mrf.mxu1  ;;  %v17605_v58 = vld [vmem:[#allocation13 + $0x1ea4] sm:$0xf0]  ;;  %v14690_v38 = vor.u32 %v17333_v40, %v14689_v56  ;;  %v14145_v40 = vld [vmem:[#allocation13 + $0x1160] sm:$0xf] }
 0x67e   :  { %v16789_v56 = vld [vmem:[#allocation13 + $0x524] sm:$0xf0] }
 0x67f   :  { %10704 = vmatpush.bf16.msrb.mxu3 %v15774_v44  ;;  %10668 = vmatpush.bf16.msrb.mxu0 %v12102_v47  ;;  %v10400_v44 = vpop.f32.mrf.mxu3  ;;  %v14142_v47 = vor.u32 %v17179_v22, %v14139_v15  ;;  %v10413_v5 = vpop.f32.mrf.mxu0  ;;  %v16891_v22 = vld [vmem:[#allocation13 + $0x854] sm:$0xf0] }
 0x680   :  { %10631 = vmatmul.bf16.vlgmr.msra.gmra.mxu1 %v18380_v4 }
 0x681   :  { %10675 = vmatpush.bf16.msrb.mxu1 %v14006_v24  ;;  %10692 = vmatpush.bf16.msrb.mxu2 %v14550_v54  ;;  %v13459_v24 = vld [vmem:[#allocation13 + $0xc90] sm:$0xf0] }
 0x682   :  { %v13462_v54 = vor.u32 %v17009_v33, %v13459_v24  ;;  %v14554_v33 = vor.u32 %v17299_v20, %v14553_v43  ;;  %v12785_v24 = vld [vmem:[#allocation13 + $0x6c0] sm:$0xf]  ;;  %v15099_v43 = vld [vmem:[#allocation13 + $0x1958] sm:$0xf0]  ;;  %v12377_v20 = vld [vmem:[#allocation13 + $0x390] sm:$0xf] }
 0x683   :  { %10705 = vmatpush.bf16.msrb.mxu3 %v15638_v50  ;;  %10669 = vmatpush.bf16.msrb.mxu0 %v11966_v0  ;;  %v14010_v50 = vor.u32 %v17163_v29, %v14009_v12  ;;  %v16050_v0 = vor.u32 %v17673_v57, %v16049_v51  ;;  %v17571_v12 = vld [vmem:[#allocation13 + $0x1d94] sm:$0xf0]  ;;  %v3146_v29 = vperm.slane %v18747_v14, 3  ;;  %v17537_v51 = vld [vmem:[#allocation13 + $0x1c84] sm:$0xf0] }
 0x685   :  { %10676 = vmatpush.bf16.msrb.mxu1 %v13870_v9  ;;  %10693 = vmatpush.bf16.msrb.mxu2 %v14414_v52  ;;  %v14962_v9 = vor.u32 %v17401_v49, %v14961_v34  ;;  %v16941_v52 = vld [vmem:[#allocation13 + $0x9ec] sm:$0xf]  ;;  %v15505_v49 = vld [vmem:[#allocation13 + $0x1c00] sm:$0xf] }
 0x686   :  { %10670 = vmatmul.bf16.vlgmr.msrb.gmra.mxu0 %v18370_v35  ;;  %v13190_v16 = vor.u32 %v16941_v52, %v13187_v53  ;;  %v15506_v36 = vor.u32 %v17537_v51, %v15505_v49  ;;  %v13193_v53 = vld [vmem:[#allocation13 + $0x9f0] sm:$0xf]  ;;  %v16721_v49 = vld [vmem:[#allocation13 + $0x304] sm:$0xf0]  ;;  %v16840_v51 = vld [vmem:[#allocation13 + $0x6c4] sm:$0xf] }
 0x687   :  { %10706 = vmatpush.bf16.msrb.mxu3 %v15502_v32  ;;  %10719 = vmatpush.bf16.msra.mxu0 %v9135_v7  ;;  %v13874_v7 = vor.u32 %v17129_v61, %v13873_v2  ;;  %v15913_v32 = vld [vmem:[#allocation13 + $0x1f30] sm:$0xf]  ;;  %v10437_v21 = vpop.f32.mrf.mxu2  ;;  %v18806_v15 = vpop.f32.mrf.mxu0  ;;  %v13329_v2 = vld [vmem:[#allocation13 + $0xb00] sm:$0xf]  ;;  %v16993_v61 = vld [vmem:[#allocation13 + $0xb84] sm:$0xf0] }
 0x688   :  { %v15914_v28 = vor.u32 %v17639_v55, %v15913_v32  ;;  %v14281_v32 = vld [vmem:[#allocation13 + $0x1270] sm:$0xf] }
 0x689   :  { %10677 = vmatpush.bf16.msrb.mxu1 %v13734_v18  ;;  %10694 = vmatpush.bf16.msrb.mxu2 %v14278_v30  ;;  %v15777_v18 = vld [vmem:[#allocation13 + $0x1e20] sm:$0xf]  ;;  %v12921_v30 = vld [vmem:[#allocation13 + $0x7d0] sm:$0xf] }
 0x68a   :  { %v15778_v39 = vor.u32 %v17605_v58, %v15777_v18  ;;  %v12922_v23 = vor.u32 %v16891_v22, %v12921_v30  ;;  %v15369_v55 = vld [vmem:[#allocation13 + $0x1af0] sm:$0xf]  ;;  %v17197_v18 = vld [vmem:[#allocation13 + $0x11e4] sm:$0xf0]  ;;  %v14011_v30 = vld [vmem:[#allocation13 + $0x10d8] sm:$0xf0] }
 0x68b   :  { %10707 = vmatpush.bf16.msrb.mxu3 %v15366_v25  ;;  %10720 = vmatpush.bf16.msra.mxu0 %v16454_v19  ;;  %v17061_v25 = vld [vmem:[#allocation13 + $0xda4] sm:$0xf0]  ;;  %v18804_v19 = vpop.f32.mrf.mxu3  ;;  %v15370_v58 = vor.u32 %v17503_v31, %v15369_v55 }
 0x68c   :  { %v13602_v44 = vor.u32 %v17061_v25, %v13601_v62  ;;  %v15233_v62 = vld [vmem:[#allocation13 + $0x19e0] sm:$0xf]  ;;  %v17469_v25 = vld [vmem:[#allocation13 + $0x1a64] sm:$0xf0] }
 0x68d   :  { %10678 = vmatpush.bf16.msrb.mxu1 %v13598_v45  ;;  %10695 = vmatpush.bf16.msrb.mxu2 %v14142_v47  ;;  %v15641_v45 = vld [vmem:[#allocation13 + $0x1d10] sm:$0xf]  ;;  %v16857_v47 = vld [vmem:[#allocation13 + $0x744] sm:$0xf0] }
 0x68e   :  { %v12786_v57 = vor.u32 %v16857_v47, %v12785_v24  ;;  %v13875_v24 = vld [vmem:[#allocation13 + $0xfc8] sm:$0xf0] }
 0x68f   :  { %10708 = vmatpush.bf16.msrb.mxu3 %v15230_v46  ;;  %10721 = vmatpush.bf16.msra.mxu0 %v16318_v8  ;;  %v13465_v46 = vld [vmem:[#allocation13 + $0xc10] sm:$0xf]  ;;  %v17027_v8 = vld [vmem:[#allocation13 + $0xc94] sm:$0xf0]  ;;  %v10439_v37 = vpop.f32.mrf.mxu2  ;;  %v10465_v60 = vpop.f32.mrf.mxu0 }
 0x690   :  { %10696 = vmatmul.bf16.vlgmr.msrb.gmra.mxu2 %v18380_v4  ;;  %v13466_v34 = vor.u32 %v17027_v8, %v13465_v46  ;;  %v12105_v60 = vld [vmem:[#allocation13 + $0x170] sm:$0xf] }
 0x691   :  { %10740 = vmatpush.bf16.msra.mxu2 %v14010_v50  ;;  %10679 = vmatpush.bf16.msrb.mxu1 %v13462_v54  ;;  %v17265_v50 = vld [vmem:[#allocation13 + $0x1404] sm:$0xf0]  ;;  %v10412_v54 = vadd.f32 %v18796_v26, %v3146_v29  ;;  %v10424_v17 = vpop.f32.mrf.mxu1  ;;  %v13330_v26 = vor.u32 %v16993_v61, %v13329_v2  ;;  %v12923_v29 = vld [vmem:[#allocation13 + $0x858] sm:$0xf0]  ;;  %v17078_v2 = vld [vmem:[#allocation13 + $0xe34] sm:$0xf] }
 0x692   :  { %10709 = vmatmul.bf16.vlgmr.msrb.gmra.mxu3 %v18382_v6  ;;  %v13739_v61 = vld [vmem:[#allocation13 + $0xeb8] sm:$0xf0] }
 0x693   :  { %10753 = vmatpush.bf16.msra.mxu3 %v15098_v48  ;;  %10766 = vmatpush.bf16.msrb.mxu0 %v16186_v59  ;;  %v15642_v48 = vor.u32 %v17571_v12, %v15641_v45  ;;  %v14417_v59 = vld [vmem:[#allocation13 + $0x1380] sm:$0xf]  ;;  %v10452_v14 = vpop.f32.mrf.mxu3  ;;  %v16755_v45 = vld [vmem:[#allocation13 + $0x414] sm:$0xf0]  ;;  %v16874_v12 = vld [vmem:[#allocation13 + $0x7d4] sm:$0xf] }
 0x694   :  { %v14418_v5 = vor.u32 %v17265_v50, %v14417_v59  ;;  %v12378_v47 = vor.u32 %v16755_v45, %v12377_v20  ;;  %v17384_v59 = vld [vmem:[#allocation13 + $0x17c4] sm:$0xf]  ;;  %v14963_v50 = vld [vmem:[#allocation13 + $0x1848] sm:$0xf0]  ;;  %v16738_v20 = vld [vmem:[#allocation13 + $0x394] sm:$0xf] }
 0x695   :  { %10741 = vmatpush.bf16.msra.mxu2 %v13874_v7  ;;  %10680 = vmatpush.bf16.msrb.mxu1 %v13326_v11  ;;  %v10425_v7 = vadd.f32 %v10424_v17, %v10412_v54  ;;  %v17231_v11 = vld [vmem:[#allocation13 + $0x12f4] sm:$0xf0]  ;;  %v12787_v54 = vld [vmem:[#allocation13 + $0x748] sm:$0xf0]  ;;  %v18818_v17 = vld [vmem:[#allocation13 + $0x2480] sm:$0x77] }
 0x696   :  { %16518 = vmatmul.msk.bf16.vlgmr.msra.gmra.mxu0 %vm9060_vm11, %v18388_v27  ;;  %v6704_v55 = vunpack.c.l.b16 %v18818_v17 }
 0x697   :  { %10754 = vmatpush.bf16.msra.mxu3 %v14962_v9  ;;  %10767 = vmatpush.bf16.msrb.mxu0 %v16050_v0  ;;  %v12649_v9 = vld [vmem:[#allocation13 + $0x5b0] sm:$0xf]  ;;  %v16823_v0 = vld [vmem:[#allocation13 + $0x634] sm:$0xf0]  ;;  %v10438_v3 = vadd.f32 %v10437_v21, %v10425_v7  ;;  %v16925_v21 = vld [vmem:[#allocation13 + $0x964] sm:$0xf0] }
 0x698   :  { %v12650_v52 = vor.u32 %v16823_v0, %v12649_v9  ;;  %v12790_v9 = vor.u32 %v16840_v51, %v12787_v54  ;;  %v17350_v0 = vld [vmem:[#allocation13 + $0x16b4] sm:$0xf]  ;;  %v14827_v7 = vld [vmem:[#allocation13 + $0x1738] sm:$0xf0] }
 0x699   :  { %10742 = vmatpush.bf16.msra.mxu2 %v13738_v10  ;;  %10681 = vmatpush.bf16.msrb.mxu1 %v13190_v16  ;;  %v14282_v10 = vor.u32 %v17231_v11, %v14281_v32  ;;  %v10451_v16 = vadd.f32 %v18804_v19, %v10438_v3  ;;  %v14146_v19 = vor.u32 %v17197_v18, %v14145_v40  ;;  %v16806_v32 = vld [vmem:[#allocation13 + $0x5b4] sm:$0xf]  ;;  %v12651_v11 = vld [vmem:[#allocation13 + $0x638] sm:$0xf0]  ;;  %v17044_v3 = vld [vmem:[#allocation13 + $0xd24] sm:$0xf] }
 0x69a   :  { %v14830_v31 = vor.u32 %v17350_v0, %v14827_v7  ;;  %v16653_v40 = vld [vmem:[#allocation13 + $0xe4] sm:$0xf0]  ;;  %v16772_v18 = vld [vmem:[#allocation13 + $0x4a4] sm:$0xf]  ;;  %v16942_v0 = vld [vmem:[#allocation13 + $0x9f4] sm:$0xf] }
 0x69b   :  { %10755 = vmatpush.bf16.msra.mxu3 %v14826_v13  ;;  %10768 = vmatpush.bf16.msrb.mxu0 %v15914_v28  ;;  %v16959_v13 = vld [vmem:[#allocation13 + $0xa74] sm:$0xf0]  ;;  %v12513_v28 = vld [vmem:[#allocation13 + $0x4a0] sm:$0xf]  ;;  %v10464_v22 = vadd.f32 %v18806_v15, %v10451_v16  ;;  %v13058_v15 = vor.u32 %v16925_v21, %v13057_v41  ;;  %v12515_v16 = vld [vmem:[#allocation13 + $0x528] sm:$0xf0] }
 0x69c   :  { %v13194_v63 = vor.u32 %v16959_v13, %v13193_v53  ;;  %v12654_v13 = vor.u32 %v16806_v32, %v12651_v11  ;;  %v17010_v21 = vld [vmem:[#allocation13 + $0xc14] sm:$0xf]  ;;  %v13195_v7 = vld [vmem:[#allocation13 + $0xa78] sm:$0xf0] }
 0x69d   :  { %10743 = vmatpush.bf16.msra.mxu2 %v13602_v44  ;;  %10682 = vmatpush.bf16.msrb.mxu1 %v13054_v42  ;;  %v17418_v44 = vld [vmem:[#allocation13 + $0x18d4] sm:$0xf]  ;;  %v10426_v42 = vpop.f32.mrf.mxu1  ;;  %11396 = vst [vmem:[%s19046_s9 + $0x98] sm:$0xff] %v10464_v22  ;;  %v14283_v32 = vld [vmem:[#allocation13 + $0x12f8] sm:$0xf0] }
 0x69e   :  { %v15102_v8 = vor.u32 %v17418_v44, %v15099_v43  ;;  %v17282_v44 = vld [vmem:[#allocation13 + $0x1494] sm:$0xf]  ;;  %v14555_v43 = vld [vmem:[#allocation13 + $0x1518] sm:$0xf0] }
 0x69f   :  { %10756 = vmatpush.bf16.msra.mxu3 %v14690_v38  ;;  %10769 = vmatpush.bf16.msrb.mxu0 %v15778_v39  ;;  %v17146_v38 = vld [vmem:[#allocation13 + $0x1054] sm:$0xf]  ;;  %v12514_v39 = vor.u32 %v16789_v56, %v12513_v28  ;;  %v17316_v28 = vld [vmem:[#allocation13 + $0x15a4] sm:$0xf]  ;;  %v11969_v56 = vld [vmem:[#allocation13 + $0x60] sm:$0xf] }
 0x6a0   :  { %10683 = vmatmul.bf16.vlgmr.msrb.gmra.mxu1 %v18372_v1  ;;  %v14014_v46 = vor.u32 %v17146_v38, %v14011_v30  ;;  %v13467_v38 = vld [vmem:[#allocation13 + $0xc98] sm:$0xf0]  ;;  %v11970_v22 = vor.u32 %v16653_v40, %v11969_v56  ;;  %v13059_v40 = vld [vmem:[#allocation13 + $0x968] sm:$0xf0] }
 0x6a1   :  { %10727 = vmatpush.bf16.msra.mxu1 %v12922_v23  ;;  %10744 = vmatpush.bf16.msra.mxu2 %v13466_v34  ;;  %v15234_v23 = vor.u32 %v17469_v25, %v15233_v62  ;;  %v12241_v34 = vld [vmem:[#allocation13 + $0x280] sm:$0xf]  ;;  %v7894_v25 = vpack.c.b16 %v6704_v55, %v6704_v55  ;;  %v12379_v42 = vld [vmem:[#allocation13 + $0x418] sm:$0xf0]  ;;  %v13470_v45 = vor.u32 %v17010_v21, %v13467_v38  ;;  %v16670_v55 = vld [vmem:[#allocation13 + $0x174] sm:$0xf] }
 0x6a2   :  { %v16892_v21 = vld [vmem:[#allocation13 + $0x85c] sm:$0xf0] }
 0x6a3   :  { %10757 = vmatpush.bf16.msra.mxu3 %v14554_v33  ;;  %10770 = vmatpush.bf16.msrb.mxu0 %v15642_v48  ;;  %v17112_v33 = vld [vmem:[#allocation13 + $0xf44] sm:$0xf]  ;;  %v12926_v48 = vor.u32 %v16874_v12, %v12923_v29  ;;  %v18820_v37 = vpop.f32.mrf.mxu0  ;;  %v16457_v12 = vld [vmem:[#allocation13 + $0x2370] sm:$0xf]  ;;  %v17775_v29 = vld [vmem:[#allocation13 + $0x23f4] sm:$0xf0] }
 0x6a4   :  { %v13878_v14 = vor.u32 %v17112_v33, %v13875_v24  ;;  %v17248_v33 = vld [vmem:[#allocation13 + $0x1384] sm:$0xf]  ;;  %v14419_v24 = vld [vmem:[#allocation13 + $0x1408] sm:$0xf0] }
 0x6a5   :  { %10728 = vmatpush.bf16.msra.mxu1 %v12786_v57  ;;  %10745 = vmatpush.bf16.msra.mxu2 %v13330_v26  ;;  %v14966_v57 = vor.u32 %v17384_v59, %v14963_v50  ;;  %v13742_v26 = vor.u32 %v17078_v2, %v13739_v61  ;;  %v16458_v59 = vor.u32 %v17775_v29, %v16457_v12  ;;  %v16704_v50 = vld [vmem:[#allocation13 + $0x284] sm:$0xf]  ;;  %v17690_v2 = vld [vmem:[#allocation13 + $0x2154] sm:$0xf]  ;;  %v15915_v12 = vld [vmem:[#allocation13 + $0x1fb8] sm:$0xf0] }
 0x6a7   :  { %10758 = vmatpush.bf16.msra.mxu3 %v14418_v5  ;;  %10771 = vmatpush.bf16.msrb.mxu0 %v15506_v36  ;;  %v12242_v5 = vor.u32 %v16721_v49, %v12241_v34  ;;  %v16687_v36 = vld [vmem:[#allocation13 + $0x1f4] sm:$0xf0]  ;;  %v18828_v41 = vpop.f32.mrf.mxu2  ;;  %v12243_v34 = vld [vmem:[#allocation13 + $0x308] sm:$0xf0] }
 0x6a8   :  { %v12106_v53 = vor.u32 %v16687_v36, %v12105_v60  ;;  %v12246_v60 = vor.u32 %v16704_v50, %v12243_v34  ;;  %v17214_v36 = vld [vmem:[#allocation13 + $0x1274] sm:$0xf]  ;;  %v16459_v50 = vld [vmem:[#allocation13 + $0x23f8] sm:$0xf0]  ;;  %v17588_v34 = vld [vmem:[#allocation13 + $0x1e24] sm:$0xf] }
 0x6a9   :  { %10729 = vmatpush.bf16.msra.mxu1 %v12650_v52  ;;  %10746 = vmatpush.bf16.msra.mxu2 %v13194_v63  ;;  %v13603_v52 = vld [vmem:[#allocation13 + $0xda8] sm:$0xf0]  ;;  %v14286_v56 = vor.u32 %v17214_v36, %v14283_v32  ;;  %v17554_v32 = vld [vmem:[#allocation13 + $0x1d14] sm:$0xf] }
 0x6aa   :  { %v13606_v62 = vor.u32 %v17044_v3, %v13603_v52  ;;  %v13198_v52 = vor.u32 %v16942_v0, %v13195_v7  ;;  %v16323_v36 = vld [vmem:[#allocation13 + $0x22e8] sm:$0xf0] }
 0x6ab   :  { %10759 = vmatpush.bf16.msra.mxu3 %v14282_v10  ;;  %10772 = vmatpush.bf16.msrb.mxu0 %v15370_v58  ;;  %v14691_v10 = vld [vmem:[#allocation13 + $0x1628] sm:$0xf0]  ;;  %v18826_v58 = vpop.f32.mrf.mxu3  ;;  %v10517_v30 = vpop.f32.mrf.mxu0 }
 0x6ac   :  { %v14694_v63 = vor.u32 %v17316_v28, %v14691_v10  ;;  %v16908_v28 = vld [vmem:[#allocation13 + $0x8e4] sm:$0xf]  ;;  %v6705_v10 = vunpack.c.h.b16 %v18818_v17  ;;  %v11971_v30 = vld [vmem:[#allocation13 + $0xe8] sm:$0xf0] }
 0x6ad   :  { %10730 = vmatpush.bf16.msra.mxu1 %v12514_v39  ;;  %10747 = vmatpush.bf16.msra.mxu2 %v13058_v15  ;;  %v12518_v39 = vor.u32 %v16772_v18, %v12515_v16  ;;  %v13331_v15 = vld [vmem:[#allocation13 + $0xb88] sm:$0xf0]  ;;  %v17180_v18 = vld [vmem:[#allocation13 + $0x1164] sm:$0xf] }
 0x6ae   :  { %v14147_v16 = vld [vmem:[#allocation13 + $0x11e8] sm:$0xf0] }
 0x6af   :  { %10760 = vmatpush.bf16.msra.mxu3 %v14146_v19  ;;  %10773 = vmatpush.bf16.msrb.mxu0 %v15234_v23  ;;  %v9138_v19 = vsel %vm9064_vm10, %v7894_v25, 0  ;;  %v14558_v23 = vor.u32 %v17282_v44, %v14555_v43  ;;  %v10491_v61 = vpop.f32.mrf.mxu2  ;;  %v16636_v25 = vld [vmem:[#allocation13 + $0x64] sm:$0xf]  ;;  %v13062_v43 = vor.u32 %v16908_v28, %v13059_v40  ;;  %v13609_v28 = vld [vmem:[#allocation13 + $0xd28] sm:$0xf] }
 0x6b0   :  { %10748 = vmatmul.bf16.vlgmr.msra.gmra.mxu2 %v18372_v1  ;;  %v11974_v29 = vor.u32 %v16636_v25, %v11971_v30  ;;  %v16824_v61 = vld [vmem:[#allocation13 + $0x63c] sm:$0xf0]  ;;  %v16057_v25 = vld [vmem:[#allocation13 + $0x2048] sm:$0xf] }
 0x6b1   :  { %10731 = vmatpush.bf16.msra.mxu1 %v12378_v47  ;;  %10792 = vmatpush.bf16.msrb.mxu2 %v12926_v48  ;;  %v18831_v47 = vld [vmem:[#allocation14 + $0x10] sm:$0xff]  ;;  %v10476_v49 = vpop.f32.mrf.mxu1 }
 0x6b2   :  { %10761 = vmatmul.bf16.vlgmr.msra.gmra.mxu3 %v18380_v4  ;;  %10774 = vmatmul.bf16.vlgmr.msrb.gmra.mxu0 %v18382_v6  ;;  %v3147_v48 = vperm.slane %v18831_v47, 4 }
 0x6b3   :  { %10805 = vmatpush.bf16.msrb.mxu3 %v14014_v46  ;;  %10818 = vmatpush.bf16.msra.mxu0 %v15102_v8  ;;  %v16976_v46 = vld [vmem:[#allocation13 + $0xb04] sm:$0xf]  ;;  %v12382_v8 = vor.u32 %v16738_v20, %v12379_v42  ;;  %v10504_v51 = vpop.f32.mrf.mxu3  ;;  %v7895_v20 = vpack.c.b16 %v6705_v10, %v6705_v10  ;;  %v14150_v42 = vor.u32 %v17180_v18, %v14147_v16  ;;  %v17062_v10 = vld [vmem:[#allocation13 + $0xdac] sm:$0xf0] }
 0x6b4   :  { %v13334_v54 = vor.u32 %v16976_v46, %v13331_v15  ;;  %v10477_v11 = vadd.f32 %v10476_v49, %v3147_v48  ;;  %v12793_v46 = vld [vmem:[#allocation13 + $0x6c8] sm:$0xf]  ;;  %v16858_v15 = vld [vmem:[#allocation13 + $0x74c] sm:$0xf0]  ;;  %v15779_v49 = vld [vmem:[#allocation13 + $0x1ea8] sm:$0xf0]  ;;  %v13610_v30 = vor.u32 %v17062_v10, %v13609_v28 }
 0x6b5   :  { %10732 = vmatpush.bf16.msra.mxu1 %v12242_v5  ;;  %10793 = vmatpush.bf16.msrb.mxu2 %v12790_v9  ;;  %v14422_v5 = vor.u32 %v17248_v33, %v14419_v24  ;;  %v16187_v9 = vld [vmem:[#allocation13 + $0x21d8] sm:$0xf0]  ;;  %v17130_v33 = vld [vmem:[#allocation13 + $0xfcc] sm:$0xf0]  ;;  %v9141_v24 = vsel %vm9064_vm10, %v7895_v20, 0  ;;  %v12794_v51 = vor.u32 %v16858_v15, %v12793_v46  ;;  %v15782_v7 = vor.u32 %v17588_v34, %v15779_v49 }
 0x6b6   :  { %v16190_v3 = vor.u32 %v17690_v2, %v16187_v9  ;;  %v10490_v38 = vadd.f32 %v18828_v41, %v10477_v11  ;;  %v17096_v9 = vld [vmem:[#allocation13 + $0xebc] sm:$0xf0]  ;;  %v17520_v16 = vld [vmem:[#allocation13 + $0x1c04] sm:$0xf]  ;;  %v3148_v20 = vperm.slane %v18831_v47, 5 }
 0x6b7   :  { %10806 = vmatpush.bf16.msrb.mxu3 %v13878_v14  ;;  %10819 = vmatpush.bf16.msra.mxu0 %v14966_v57  ;;  %v16321_v14 = vld [vmem:[#allocation13 + $0x2260] sm:$0xf]  ;;  %v17741_v57 = vld [vmem:[#allocation13 + $0x22e4] sm:$0xf0] }
 0x6b8   :  { %v10503_v41 = vadd.f32 %v18826_v58, %v10490_v38  ;;  %v17640_v46 = vld [vmem:[#allocation13 + $0x1fbc] sm:$0xf0]  ;;  %v14969_v10 = vld [vmem:[#allocation13 + $0x17c8] sm:$0xf] }
 0x6b9   :  { %10733 = vmatpush.bf16.msra.mxu1 %v12106_v53  ;;  %10794 = vmatpush.bf16.msrb.mxu2 %v12654_v13  ;;  %v17656_v53 = vld [vmem:[#allocation13 + $0x2044] sm:$0xf]  ;;  %v16051_v13 = vld [vmem:[#allocation13 + $0x20c8] sm:$0xf0]  ;;  %v10478_v44 = vpop.f32.mrf.mxu1 }
 0x6ba   :  { %v16054_v17 = vor.u32 %v17656_v53, %v16051_v13  ;;  %v16790_v53 = vld [vmem:[#allocation13 + $0x52c] sm:$0xf0]  ;;  %v16756_v44 = vld [vmem:[#allocation13 + $0x41c] sm:$0xf0] }
 0x6bb   :  { %10807 = vmatpush.bf16.msrb.mxu3 %v13742_v26  ;;  %10820 = vmatpush.bf16.msra.mxu0 %v14830_v31  ;;  %v16322_v26 = vor.u32 %v17741_v57, %v16321_v14  ;;  %v12107_v31 = vld [vmem:[#allocation13 + $0x1f8] sm:$0xf0]  ;;  %v12657_v14 = vld [vmem:[#allocation13 + $0x5b8] sm:$0xf]  ;;  %v10516_v57 = vadd.f32 %v18820_v37, %v10503_v41 }
 0x6bc   :  { %v16193_v37 = vld [vmem:[#allocation13 + $0x2158] sm:$0xf] }
 0x6bd   :  { %10734 = vmatpush.bf16.msra.mxu1 %v11970_v22  ;;  %10795 = vmatpush.bf16.msrb.mxu2 %v12518_v39  ;;  %v14017_v22 = vld [vmem:[#allocation13 + $0x1058] sm:$0xf]  ;;  %v17164_v39 = vld [vmem:[#allocation13 + $0x10dc] sm:$0xf0] }
 0x6bf   :  { %10808 = vmatpush.bf16.msrb.mxu3 %v13606_v62  ;;  %10821 = vmatpush.bf16.msra.mxu0 %v14694_v63  ;;  %v12110_v62 = vor.u32 %v16670_v55, %v12107_v31  ;;  %v12929_v63 = vld [vmem:[#allocation13 + $0x7d8] sm:$0xf]  ;;  %v17708_v55 = vld [vmem:[#allocation13 + $0x21dc] sm:$0xf0]  ;;  %v12658_v31 = vor.u32 %v16824_v61, %v12657_v14  ;;  %v15235_v14 = vld [vmem:[#allocation13 + $0x1a68] sm:$0xf0] }
 0x6c0   :  { %10735 = vmatmul.bf16.vlgmr.msra.gmra.mxu1 %v18370_v35  ;;  %v16194_v18 = vor.u32 %v17708_v55, %v16193_v37 }
 0x6c1   :  { %10784 = vmatpush.bf16.msrb.mxu1 %v9138_v19  ;;  %10796 = vmatpush.bf16.msrb.mxu2 %v12382_v8  ;;  %v12930_v19 = vor.u32 %v16892_v21, %v12929_v63  ;;  %v13881_v8 = vld [vmem:[#allocation13 + $0xf48] sm:$0xf]  ;;  %v10528_v0 = vpop.f32.mrf.mxu1  ;;  %v17674_v63 = vld [vmem:[#allocation13 + $0x20cc] sm:$0xf0] }
 0x6c2   :  { %v10529_v11 = vadd.f32 %v10528_v0, %v10516_v57  ;;  %v15785_v57 = vld [vmem:[#allocation13 + $0x1e28] sm:$0xf]  ;;  %v15105_v0 = vld [vmem:[#allocation13 + $0x18d8] sm:$0xf] }
 0x6c3   :  { %10809 = vmatpush.bf16.msrb.mxu3 %v13470_v45  ;;  %10822 = vmatpush.bf16.msra.mxu0 %v14558_v23  ;;  %v17622_v45 = vld [vmem:[#allocation13 + $0x1f34] sm:$0xf]  ;;  %v14018_v23 = vor.u32 %v17164_v39, %v14017_v22  ;;  %v18839_v58 = vpop.f32.mrf.mxu0  ;;  %v12385_v22 = vld [vmem:[#allocation13 + $0x398] sm:$0xf] }
 0x6c4   :  { %v15918_v48 = vor.u32 %v17622_v45, %v15915_v12  ;;  %11397 = vst [vmem:[%s19046_s9 + $0xa0] sm:$0xff] %v10529_v11  ;;  %v16058_v45 = vor.u32 %v17674_v63, %v16057_v25  ;;  %v17486_v12 = vld [vmem:[#allocation13 + $0x1af4] sm:$0xf]  ;;  %v12386_v41 = vor.u32 %v16756_v44, %v12385_v22  ;;  %v13201_v11 = vld [vmem:[#allocation13 + $0x9f8] sm:$0xf] }
 0x6c5   :  { %10785 = vmatpush.bf16.msrb.mxu1 %v16458_v59  ;;  %10797 = vmatpush.bf16.msrb.mxu2 %v12246_v60  ;;  %v17758_v59 = vld [vmem:[#allocation13 + $0x2374] sm:$0xf]  ;;  %v17724_v60 = vld [vmem:[#allocation13 + $0x2264] sm:$0xf]  ;;  %v13065_v25 = vld [vmem:[#allocation13 + $0x8e8] sm:$0xf] }
 0x6c6   :  { %v16462_v2 = vor.u32 %v17758_v59, %v16459_v50  ;;  %v16326_v13 = vor.u32 %v17724_v60, %v16323_v36  ;;  %v18853_v59 = vld [vmem:[#allocation13 + $0x2488] sm:$0x77]  ;;  %v12113_v60 = vld [vmem:[#allocation13 + $0x178] sm:$0xf]  ;;  %v16926_v63 = vld [vmem:[#allocation13 + $0x96c] sm:$0xf0] }
 0x6c7   :  { %10810 = vmatpush.bf16.msrb.mxu3 %v13334_v54  ;;  %10823 = vmatpush.bf16.msra.mxu0 %v14422_v5  ;;  %v13882_v54 = vor.u32 %v17130_v33, %v13881_v8  ;;  %v13745_v5 = vld [vmem:[#allocation13 + $0xe38] sm:$0xf]  ;;  %v10541_v21 = vpop.f32.mrf.mxu2  ;;  %v12249_v8 = vld [vmem:[#allocation13 + $0x288] sm:$0xf]  ;;  %v16722_v33 = vld [vmem:[#allocation13 + $0x30c] sm:$0xf0]  ;;  %v6706_v36 = vunpack.c.l.b16 %v18853_v59 }
 0x6c8   :  { %v17538_v44 = vld [vmem:[#allocation13 + $0x1c8c] sm:$0xf0] }
 0x6c9   :  { %10786 = vmatpush.bf16.msrb.mxu1 %v16322_v26  ;;  %10798 = vmatpush.bf16.msrb.mxu2 %v12110_v62  ;;  %v15643_v26 = vld [vmem:[#allocation13 + $0x1d98] sm:$0xf0]  ;;  %v15507_v62 = vld [vmem:[#allocation13 + $0x1c88] sm:$0xf0] }
 0x6ca   :  { %v15646_v40 = vor.u32 %v17554_v32, %v15643_v26  ;;  %v16688_v32 = vld [vmem:[#allocation13 + $0x1fc] sm:$0xf0] }
 0x6cb   :  { %10811 = vmatpush.bf16.msrb.mxu3 %v13198_v52  ;;  %10824 = vmatpush.bf16.msra.mxu0 %v14286_v56  ;;  %v12521_v52 = vld [vmem:[#allocation13 + $0x4a8] sm:$0xf]  ;;  %v18850_v56 = vpop.f32.mrf.mxu3  ;;  %v10569_v39 = vpop.f32.mrf.mxu0  ;;  %v16960_v26 = vld [vmem:[#allocation13 + $0xa7c] sm:$0xf0] }
 0x6cc   :  { %v12522_v38 = vor.u32 %v16790_v53, %v12521_v52  ;;  %v15649_v52 = vld [vmem:[#allocation13 + $0x1d18] sm:$0xf]  ;;  %v17572_v53 = vld [vmem:[#allocation13 + $0x1d9c] sm:$0xf0]  ;;  %v13202_v28 = vor.u32 %v16960_v26, %v13201_v11  ;;  %v15513_v39 = vld [vmem:[#allocation13 + $0x1c08] sm:$0xf] }
 0x6cd   :  { %10831 = vmatpush.bf16.msra.mxu1 %v16190_v3  ;;  %10799 = vmatpush.bf16.msrb.mxu2 %v11974_v29  ;;  %v13746_v3 = vor.u32 %v17096_v9, %v13745_v5  ;;  %v15371_v29 = vld [vmem:[#allocation13 + $0x1b78] sm:$0xf0]  ;;  %v12250_v5 = vor.u32 %v16722_v33, %v12249_v8  ;;  %v12795_v8 = vld [vmem:[#allocation13 + $0x750] sm:$0xf0] }
 0x6ce   :  { %v15374_v34 = vor.u32 %v17486_v12, %v15371_v29  ;;  %v14833_v29 = vld [vmem:[#allocation13 + $0x16b8] sm:$0xf] }
 0x6cf   :  { %10812 = vmatpush.bf16.msrb.mxu3 %v13062_v43  ;;  %10825 = vmatpush.bf16.msra.mxu0 %v14150_v42  ;;  %v17028_v43 = vld [vmem:[#allocation13 + $0xc9c] sm:$0xf0]  ;;  %v10530_v42 = vpop.f32.mrf.mxu1  ;;  %v10543_v61 = vpop.f32.mrf.mxu2 }
 0x6d0   :  { %16519 = vmatmul.msk.bf16.vlgmr.msrb.gmra.mxu1 %vm9060_vm11, %v18388_v27  ;;  %10800 = vmatmul.bf16.vlgmr.msrb.gmra.mxu2 %v18370_v35  ;;  %v13066_v42 = vor.u32 %v16926_v63, %v13065_v25 }
 0x6d1   :  { %10832 = vmatpush.bf16.msra.mxu1 %v16054_v17  ;;  %10849 = vmatpush.bf16.msra.mxu2 %v9141_v24  ;;  %v13473_v17 = vld [vmem:[#allocation13 + $0xc18] sm:$0xf]  ;;  %v13337_v24 = vld [vmem:[#allocation13 + $0xb08] sm:$0xf] }
 0x6d2   :  { %10813 = vmatmul.bf16.vlgmr.msrb.gmra.mxu3 %v18372_v1  ;;  %10826 = vmatmul.bf16.vlgmr.msra.gmra.mxu0 %v18380_v4  ;;  %v13474_v15 = vor.u32 %v17028_v43, %v13473_v17 }
 0x6d3   :  { %10857 = vmatpush.bf16.msra.mxu3 %v12930_v19  ;;  %10870 = vmatpush.bf16.msrb.mxu0 %v14018_v23  ;;  %v15510_v19 = vor.u32 %v17520_v16, %v15507_v62  ;;  %v15921_v23 = vld [vmem:[#allocation13 + $0x1f38] sm:$0xf]  ;;  %v10556_v50 = vpop.f32.mrf.mxu3  ;;  %v7896_v16 = vpack.c.b16 %v6706_v36, %v6706_v36  ;;  %v16654_v62 = vld [vmem:[#allocation13 + $0xec] sm:$0xf0]  ;;  %v16195_v36 = vld [vmem:[#allocation13 + $0x21e0] sm:$0xf0] }
 0x6d4   :  { %v15922_v49 = vor.u32 %v17640_v46, %v15921_v23  ;;  %v17368_v23 = vld [vmem:[#allocation13 + $0x173c] sm:$0xf0]  ;;  %v16465_v46 = vld [vmem:[#allocation13 + $0x2378] sm:$0xf] }
 0x6d5   :  { %10833 = vmatpush.bf16.msra.mxu1 %v15918_v48  ;;  %10850 = vmatpush.bf16.msra.mxu2 %v16462_v2  ;;  %v16994_v48 = vld [vmem:[#allocation13 + $0xb8c] sm:$0xf0]  ;;  %v14834_v50 = vor.u32 %v17368_v23, %v14833_v29  ;;  %v14835_v29 = vld [vmem:[#allocation13 + $0x1740] sm:$0xf0] }
 0x6d6   :  { %v17606_v2 = vld [vmem:[#allocation13 + $0x1eac] sm:$0xf0]  ;;  %v13338_v9 = vor.u32 %v16994_v48, %v13337_v24  ;;  %v15377_v24 = vld [vmem:[#allocation13 + $0x1af8] sm:$0xf]  ;;  %v17504_v48 = vld [vmem:[#allocation13 + $0x1b7c] sm:$0xf0] }
 0x6d7   :  { %10858 = vmatpush.bf16.msra.mxu3 %v12794_v51  ;;  %10871 = vmatpush.bf16.msrb.mxu0 %v13882_v54  ;;  %v17452_v51 = vld [vmem:[#allocation13 + $0x19e4] sm:$0xf]  ;;  %v10542_v54 = vadd.f32 %v10541_v21, %v3148_v20  ;;  %v15786_v55 = vor.u32 %v17606_v2, %v15785_v57  ;;  %v16875_v21 = vld [vmem:[#allocation13 + $0x7dc] sm:$0xf]  ;;  %v10593_v43 = vpop.f32.mrf.mxu2  ;;  %v17742_v57 = vld [vmem:[#allocation13 + $0x22ec] sm:$0xf0]  ;;  %v15378_v61 = vor.u32 %v17504_v48, %v15377_v24 }
 0x6d8   :  { %v15238_v37 = vor.u32 %v17452_v51, %v15235_v14  ;;  %v16329_v14 = vld [vmem:[#allocation13 + $0x2268] sm:$0xf]  ;;  %v17589_v24 = vld [vmem:[#allocation13 + $0x1e2c] sm:$0xf]  ;;  %v15787_v48 = vld [vmem:[#allocation13 + $0x1eb0] sm:$0xf0] }
 0x6d9   :  { %10834 = vmatpush.bf16.msra.mxu1 %v15782_v7  ;;  %10851 = vmatpush.bf16.msra.mxu2 %v16326_v13  ;;  %v17436_v7 = vld [vmem:[#allocation13 + $0x195c] sm:$0xf0]  ;;  %v12114_v13 = vor.u32 %v16688_v32, %v12113_v60  ;;  %v17691_v60 = vld [vmem:[#allocation13 + $0x215c] sm:$0xf] }
 0x6db   :  { %10859 = vmatpush.bf16.msra.mxu3 %v12658_v31  ;;  %10872 = vmatpush.bf16.msrb.mxu0 %v13746_v3  ;;  %v10555_v31 = vadd.f32 %v18850_v56, %v10542_v54  ;;  %v15106_v3 = vor.u32 %v17436_v7, %v15105_v0  ;;  %v15650_v56 = vor.u32 %v17572_v53, %v15649_v52  ;;  %v15241_v0 = vld [vmem:[#allocation13 + $0x19e8] sm:$0xf]  ;;  %v17470_v7 = vld [vmem:[#allocation13 + $0x1a6c] sm:$0xf0]  ;;  %v14561_v52 = vld [vmem:[#allocation13 + $0x1498] sm:$0xf] }
 0x6dc   :  { %v17300_v53 = vld [vmem:[#allocation13 + $0x151c] sm:$0xf0] }
 0x6dd   :  { %10835 = vmatpush.bf16.msra.mxu1 %v15646_v40  ;;  %10896 = vmatpush.bf16.msrb.mxu2 %v16194_v18  ;;  %v17402_v40 = vld [vmem:[#allocation13 + $0x184c] sm:$0xf0]  ;;  %v11977_v18 = vld [vmem:[#allocation13 + $0x68] sm:$0xf]  ;;  %v10580_v17 = vpop.f32.mrf.mxu1  ;;  %v14562_v63 = vor.u32 %v17300_v53, %v14561_v52 }
 0x6de   :  { %v14970_v22 = vor.u32 %v17402_v40, %v14969_v10  ;;  %v11978_v20 = vor.u32 %v16654_v62, %v11977_v18  ;;  %v16773_v10 = vld [vmem:[#allocation13 + $0x4ac] sm:$0xf]  ;;  %v12523_v40 = vld [vmem:[#allocation13 + $0x530] sm:$0xf0] }
 0x6df   :  { %10860 = vmatpush.bf16.msra.mxu3 %v12522_v38  ;;  %10873 = vmatpush.bf16.msrb.mxu0 %v13610_v30  ;;  %v12931_v38 = vld [vmem:[#allocation13 + $0x860] sm:$0xf0]  ;;  %v10568_v30 = vadd.f32 %v18839_v58, %v10555_v31  ;;  %v15514_v58 = vor.u32 %v17538_v44, %v15513_v39  ;;  %v10595_v11 = vpop.f32.mrf.mxu2  ;;  %v16330_v31 = vor.u32 %v17742_v57, %v16329_v14  ;;  %v16059_v62 = vld [vmem:[#allocation13 + $0x20d0] sm:$0xf0]  ;;  %v14153_v57 = vld [vmem:[#allocation13 + $0x1168] sm:$0xf] }
 0x6e0   :  { %16520 = vmatmul.msk.bf16.vlgmr.msra.gmra.mxu2 %vm9060_vm11, %v18388_v27  ;;  %v12934_v12 = vor.u32 %v16875_v21, %v12931_v38  ;;  %v14971_v21 = vld [vmem:[#allocation13 + $0x1850] sm:$0xf0]  ;;  %v12526_v38 = vor.u32 %v16773_v10, %v12523_v40 }
 0x6e1   :  { %10836 = vmatpush.bf16.msra.mxu1 %v15510_v19  ;;  %10897 = vmatpush.bf16.msrb.mxu2 %v16058_v45  ;;  %v9144_v19 = vsel %vm9064_vm10, %v7896_v16, 0  ;;  %v10581_v45 = vadd.f32 %v10580_v17, %v10568_v30  ;;  %v17657_v16 = vld [vmem:[#allocation13 + $0x204c] sm:$0xf]  ;;  %v14425_v30 = vld [vmem:[#allocation13 + $0x1388] sm:$0xf] }
 0x6e2   :  { %v16062_v44 = vor.u32 %v17657_v16, %v16059_v62  ;;  %v16739_v17 = vld [vmem:[#allocation13 + $0x39c] sm:$0xf]  ;;  %v13883_v40 = vld [vmem:[#allocation13 + $0xfd0] sm:$0xf0] }
 0x6e3   :  { %10861 = vmatpush.bf16.msra.mxu3 %v12386_v41  ;;  %10874 = vmatpush.bf16.msrb.mxu0 %v13474_v15  ;;  %v17776_v41 = vld [vmem:[#allocation13 + $0x23fc] sm:$0xf0]  ;;  %v16841_v15 = vld [vmem:[#allocation13 + $0x6cc] sm:$0xf]  ;;  %v10594_v33 = vadd.f32 %v10593_v43, %v10581_v45  ;;  %v18865_v2 = vpop.f32.mrf.mxu0  ;;  %v12387_v43 = vld [vmem:[#allocation13 + $0x420] sm:$0xf0] }
 0x6e4   :  { %v16466_v51 = vor.u32 %v17776_v41, %v16465_v46  ;;  %v12798_v54 = vor.u32 %v16841_v15, %v12795_v8  ;;  %v12390_v23 = vor.u32 %v16739_v17, %v12387_v43  ;;  %v14289_v46 = vld [vmem:[#allocation13 + $0x1278] sm:$0xf]  ;;  %v16705_v15 = vld [vmem:[#allocation13 + $0x28c] sm:$0xf]  ;;  %v12251_v8 = vld [vmem:[#allocation13 + $0x310] sm:$0xf0] }
 0x6e5   :  { %10837 = vmatpush.bf16.msra.mxu1 %v15374_v34  ;;  %10898 = vmatpush.bf16.msrb.mxu2 %v15922_v49  ;;  %v14697_v34 = vld [vmem:[#allocation13 + $0x15a8] sm:$0xf]  ;;  %v17334_v49 = vld [vmem:[#allocation13 + $0x162c] sm:$0xf0]  ;;  %11398 = vst [vmem:[%s19046_s9 + $0xa8] sm:$0xff] %v10594_v33  ;;  %v10582_v32 = vpop.f32.mrf.mxu1  ;;  %v12254_v14 = vor.u32 %v16705_v15, %v12251_v8 }
 0x6e6   :  { %v14698_v26 = vor.u32 %v17334_v49, %v14697_v34  ;;  %v12115_v32 = vld [vmem:[#allocation13 + $0x200] sm:$0xf0]  ;;  %v11979_v16 = vld [vmem:[#allocation13 + $0xf0] sm:$0xf0] }
 0x6e7   :  { %10862 = vmatpush.bf16.msra.mxu3 %v12250_v5  ;;  %10875 = vmatpush.bf16.msrb.mxu0 %v13338_v9  ;;  %v16807_v5 = vld [vmem:[#allocation13 + $0x5bc] sm:$0xf]  ;;  %v12659_v9 = vld [vmem:[#allocation13 + $0x640] sm:$0xf0] }
 0x6e9   :  { %10838 = vmatpush.bf16.msra.mxu1 %v15238_v37  ;;  %10899 = vmatpush.bf16.msrb.mxu2 %v15786_v55  ;;  %v17419_v37 = vld [vmem:[#allocation13 + $0x18dc] sm:$0xf]  ;;  %v15107_v55 = vld [vmem:[#allocation13 + $0x1960] sm:$0xf0]  ;;  %v18869_v25 = vpop.f32.mrf.mxu3 }
 0x6ea   :  { %v15110_v18 = vor.u32 %v17419_v37, %v15107_v55  ;;  %v15651_v37 = vld [vmem:[#allocation13 + $0x1da0] sm:$0xf0] }
 0x6eb   :  { %10863 = vmatpush.bf16.msra.mxu3 %v12114_v13  ;;  %10876 = vmatpush.bf16.msrb.mxu0 %v13202_v28  ;;  %v15242_v13 = vor.u32 %v17470_v7, %v15241_v0  ;;  %v16198_v28 = vor.u32 %v17691_v60, %v16195_v36  ;;  %v10621_v39 = vpop.f32.mrf.mxu0  ;;  %v15790_v7 = vor.u32 %v17589_v24, %v15787_v48  ;;  %v14019_v60 = vld [vmem:[#allocation13 + $0x10e0] sm:$0xf0]  ;;  %v16671_v36 = vld [vmem:[#allocation13 + $0x17c] sm:$0xf]  ;;  %v13611_v24 = vld [vmem:[#allocation13 + $0xdb0] sm:$0xf0] }
 0x6ec   :  { %10839 = vmatmul.bf16.vlgmr.msra.gmra.mxu1 %v18382_v6  ;;  %v12118_v53 = vor.u32 %v16671_v36, %v12115_v32  ;;  %v17453_v48 = vld [vmem:[#allocation13 + $0x19ec] sm:$0xf]  ;;  %v16201_v36 = vld [vmem:[#allocation13 + $0x2160] sm:$0xf]  ;;  %v17709_v32 = vld [vmem:[#allocation13 + $0x21e4] sm:$0xf0] }
 0x6ed   :  { %10883 = vmatpush.bf16.msrb.mxu1 %v15106_v3  ;;  %10900 = vmatpush.bf16.msrb.mxu2 %v15650_v56  ;;  %v12662_v3 = vor.u32 %v16807_v5, %v12659_v9  ;;  %v17385_v56 = vld [vmem:[#allocation13 + $0x17cc] sm:$0xf]  ;;  %v17147_v5 = vld [vmem:[#allocation13 + $0x105c] sm:$0xf]  ;;  %v6707_v9 = vunpack.c.h.b16 %v18853_v59 }
 0x6ee   :  { %v14022_v59 = vor.u32 %v17147_v5, %v14019_v60  ;;  %v17181_v5 = vld [vmem:[#allocation13 + $0x116c] sm:$0xf]  ;;  %v17437_v60 = vld [vmem:[#allocation13 + $0x1964] sm:$0xf0] }
 0x6ef   :  { %10864 = vmatpush.bf16.msra.mxu3 %v11978_v20  ;;  %10877 = vmatpush.bf16.msrb.mxu0 %v13066_v42  ;;  %v14974_v20 = vor.u32 %v17385_v56, %v14971_v21  ;;  %v17623_v42 = vld [vmem:[#allocation13 + $0x1f3c] sm:$0xf]  ;;  %v15515_v56 = vld [vmem:[#allocation13 + $0x1c90] sm:$0xf0] }
 0x6f1   :  { %10884 = vmatpush.bf16.msrb.mxu1 %v14970_v22  ;;  %10901 = vmatpush.bf16.msrb.mxu2 %v15514_v58  ;;  %v17266_v22 = vld [vmem:[#allocation13 + $0x140c] sm:$0xf0]  ;;  %v17232_v58 = vld [vmem:[#allocation13 + $0x12fc] sm:$0xf0]  ;;  %v10608_v34 = vpop.f32.mrf.mxu3 }
 0x6f2   :  { %10865 = vmatmul.bf16.vlgmr.msra.gmra.mxu3 %v18370_v35  ;;  %10878 = vmatmul.bf16.vlgmr.msrb.gmra.mxu0 %v18372_v1  ;;  %v14426_v45 = vor.u32 %v17266_v22, %v14425_v30  ;;  %v14290_v49 = vor.u32 %v17232_v58, %v14289_v46  ;;  %v14427_v30 = vld [vmem:[#allocation13 + $0x1410] sm:$0xf0]  ;;  %v17759_v46 = vld [vmem:[#allocation13 + $0x237c] sm:$0xf]  ;;  %v16467_v58 = vld [vmem:[#allocation13 + $0x2400] sm:$0xf0] }
 0x6f3   :  { %10914 = vmatpush.bf16.msrb.mxu3 %v9144_v19  ;;  %10922 = vmatpush.bf16.msra.mxu0 %v12934_v12  ;;  %v15923_v19 = vld [vmem:[#allocation13 + $0x1fc0] sm:$0xf0]  ;;  %v17351_v12 = vld [vmem:[#allocation13 + $0x16bc] sm:$0xf]  ;;  %v10645_v0 = vpop.f32.mrf.mxu2  ;;  %v16470_v34 = vor.u32 %v17759_v46, %v16467_v58 }
 0x6f4   :  { %v15926_v41 = vor.u32 %v17623_v42, %v15923_v19  ;;  %v14838_v33 = vor.u32 %v17351_v12, %v14835_v29  ;;  %v17079_v42 = vld [vmem:[#allocation13 + $0xe3c] sm:$0xf]  ;;  %v13747_v19 = vld [vmem:[#allocation13 + $0xec0] sm:$0xf0] }
 0x6f5   :  { %10885 = vmatpush.bf16.msrb.mxu1 %v14834_v50  ;;  %10902 = vmatpush.bf16.msrb.mxu2 %v15378_v61  ;;  %v3149_v50 = vperm.slane %v18831_v47, 6  ;;  %v17198_v61 = vld [vmem:[#allocation13 + $0x11ec] sm:$0xf0]  ;;  %v13750_v8 = vor.u32 %v17079_v42, %v13747_v19  ;;  %v17641_v19 = vld [vmem:[#allocation13 + $0x1fc4] sm:$0xf0] }
 0x6f6   :  { %v14154_v55 = vor.u32 %v17198_v61, %v14153_v57 }
 0x6f7   :  { %10915 = vmatpush.bf16.msrb.mxu3 %v16466_v51  ;;  %10923 = vmatpush.bf16.msra.mxu0 %v12798_v54  ;;  %v17317_v51 = vld [vmem:[#allocation13 + $0x15ac] sm:$0xf]  ;;  %v14699_v54 = vld [vmem:[#allocation13 + $0x1630] sm:$0xf0]  ;;  %v10607_v52 = vadd.f32 %v18869_v25, %v3149_v50 }
 0x6f8   :  { %v14702_v11 = vor.u32 %v17317_v51, %v14699_v54  ;;  %v17725_v51 = vld [vmem:[#allocation13 + $0x226c] sm:$0xf]  ;;  %v16331_v54 = vld [vmem:[#allocation13 + $0x22f0] sm:$0xf0] }
 0x6f9   :  { %10886 = vmatpush.bf16.msrb.mxu1 %v14698_v26  ;;  %10903 = vmatpush.bf16.msrb.mxu2 %v15242_v13  ;;  %v17555_v26 = vld [vmem:[#allocation13 + $0x1d1c] sm:$0xf]  ;;  %v17113_v13 = vld [vmem:[#allocation13 + $0xf4c] sm:$0xf]  ;;  %v10658_v21 = vpop.f32.mrf.mxu3  ;;  %v10620_v25 = vadd.f32 %v18865_v2, %v10607_v52 }
 0x6fa   :  { %v15654_v10 = vor.u32 %v17555_v26, %v15651_v37  ;;  %v13886_v22 = vor.u32 %v17113_v13, %v13883_v40  ;;  %v17215_v2 = vld [vmem:[#allocation13 + $0x127c] sm:$0xf]  ;;  %v14025_v26 = vld [vmem:[#allocation13 + $0x1060] sm:$0xf]  ;;  %v17165_v37 = vld [vmem:[#allocation13 + $0x10e4] sm:$0xf0] }
 0x6fb   :  { %10916 = vmatpush.bf16.msrb.mxu3 %v16330_v31  ;;  %10924 = vmatpush.bf16.msra.mxu0 %v12662_v3  ;;  %v17283_v31 = vld [vmem:[#allocation13 + $0x149c] sm:$0xf]  ;;  %v14563_v3 = vld [vmem:[#allocation13 + $0x1520] sm:$0xf0]  ;;  %v10647_v43 = vpop.f32.mrf.mxu2  ;;  %v14977_v40 = vld [vmem:[#allocation13 + $0x17d0] sm:$0xf] }
 0x6fc   :  { %10904 = vmatmul.bf16.vlgmr.msrb.gmra.mxu2 %v18382_v6  ;;  %v14566_v62 = vor.u32 %v17283_v31, %v14563_v3  ;;  %v16334_v3 = vor.u32 %v17725_v51, %v16331_v54  ;;  %v17011_v52 = vld [vmem:[#allocation13 + $0xc1c] sm:$0xf]  ;;  %v17369_v43 = vld [vmem:[#allocation13 + $0x1744] sm:$0xf0]  ;;  %v13067_v51 = vld [vmem:[#allocation13 + $0x970] sm:$0xf0] }
 0x6fd   :  { %10948 = vmatpush.bf16.msra.mxu2 %v15110_v18  ;;  %10887 = vmatpush.bf16.msrb.mxu1 %v14562_v63  ;;  %v16637_v18 = vld [vmem:[#allocation13 + $0x6c] sm:$0xf]  ;;  %v10632_v17 = vpop.f32.mrf.mxu1 }
 0x6fe   :  { %v17521_v63 = vld [vmem:[#allocation13 + $0x1c0c] sm:$0xf]  ;;  %v11982_v39 = vor.u32 %v16637_v18, %v11979_v16  ;;  %v10633_v12 = vadd.f32 %v10632_v17, %v10620_v25  ;;  %v17403_v18 = vld [vmem:[#allocation13 + $0x1854] sm:$0xf0]  ;;  %v16065_v16 = vld [vmem:[#allocation13 + $0x2050] sm:$0xf] }
 0x6ff   :  { %10961 = vmatpush.bf16.msra.mxu3 %v16198_v28  ;;  %10925 = vmatpush.bf16.msra.mxu0 %v12526_v38  ;;  %v7897_v28 = vpack.c.b16 %v6707_v9, %v6707_v9  ;;  %v17249_v38 = vld [vmem:[#allocation13 + $0x138c] sm:$0xf]  ;;  %v14155_v9 = vld [vmem:[#allocation13 + $0x11f0] sm:$0xf0]  ;;  %v14841_v17 = vld [vmem:[#allocation13 + $0x16c0] sm:$0xf] }
 0x700   :  { %v14430_v29 = vor.u32 %v17249_v38, %v14427_v30  ;;  %v10646_v15 = vadd.f32 %v10645_v0, %v10633_v12  ;;  %v15113_v0 = vld [vmem:[#allocation13 + $0x18e0] sm:$0xf]  ;;  %v16977_v38 = vld [vmem:[#allocation13 + $0xb0c] sm:$0xf]  ;;  %v13339_v30 = vld [vmem:[#allocation13 + $0xb90] sm:$0xf0]  ;;  %v14842_v46 = vor.u32 %v17369_v43, %v14841_v17 }
 0x701   :  { %10949 = vmatpush.bf16.msra.mxu2 %v14974_v20  ;;  %10888 = vmatpush.bf16.msrb.mxu1 %v14426_v45  ;;  %v15518_v20 = vor.u32 %v17521_v63, %v15515_v56  ;;  %v17487_v45 = vld [vmem:[#allocation13 + $0x1afc] sm:$0xf]  ;;  %v15114_v13 = vor.u32 %v17437_v60, %v15113_v0  ;;  %v17675_v63 = vld [vmem:[#allocation13 + $0x20d4] sm:$0xf0]  ;;  %v13889_v56 = vld [vmem:[#allocation13 + $0xf50] sm:$0xf]  ;;  %v13342_v42 = vor.u32 %v16977_v38, %v13339_v30 }
 0x702   :  { %16521 = vmatmul.msk.bf16.vlgmr.msrb.gmra.mxu3 %vm9060_vm11, %v18388_v27  ;;  %v17097_v12 = vld [vmem:[#allocation13 + $0xec4] sm:$0xf0]  ;;  %v14569_v60 = vld [vmem:[#allocation13 + $0x14a0] sm:$0xf] }
 0x703   :  { %10962 = vmatpush.bf16.msra.mxu3 %v16062_v44  ;;  %10926 = vmatpush.bf16.msra.mxu0 %v12390_v23  ;;  %v9147_v44 = vsel %vm9064_vm10, %v7897_v28, 0  ;;  %v15379_v23 = vld [vmem:[#allocation13 + $0x1b80] sm:$0xf0]  ;;  %v18880_v57 = vpop.f32.mrf.mxu0  ;;  %v16202_v28 = vor.u32 %v17709_v32, %v16201_v36  ;;  %v17301_v36 = vld [vmem:[#allocation13 + $0x1524] sm:$0xf0] }
 0x704   :  { %v15382_v50 = vor.u32 %v17487_v45, %v15379_v23  ;;  %v13753_v45 = vld [vmem:[#allocation13 + $0xe40] sm:$0xf]  ;;  %v13203_v23 = vld [vmem:[#allocation13 + $0xa80] sm:$0xf0] }
 0x705   :  { %10950 = vmatpush.bf16.msra.mxu2 %v14838_v33  ;;  %10889 = vmatpush.bf16.msrb.mxu1 %v14290_v49  ;;  %v17045_v33 = vld [vmem:[#allocation13 + $0xd2c] sm:$0xf]  ;;  %v15243_v49 = vld [vmem:[#allocation13 + $0x1a70] sm:$0xf0] }
 0x706   :  { %v15246_v31 = vor.u32 %v17453_v48, %v15243_v49  ;;  %v13617_v48 = vld [vmem:[#allocation13 + $0xd30] sm:$0xf]  ;;  %v16909_v49 = vld [vmem:[#allocation13 + $0x8ec] sm:$0xf] }
 0x707   :  { %10963 = vmatpush.bf16.msra.mxu3 %v15926_v41  ;;  %10927 = vmatpush.bf16.msra.mxu0 %v12254_v14  ;;  %v14291_v41 = vld [vmem:[#allocation13 + $0x1300] sm:$0xf0]  ;;  %v10659_v14 = vadd.f32 %v10658_v21, %v10646_v15  ;;  %v17131_v21 = vld [vmem:[#allocation13 + $0xfd4] sm:$0xf0]  ;;  %v13070_v32 = vor.u32 %v16909_v49, %v13067_v51  ;;  %v13073_v49 = vld [vmem:[#allocation13 + $0x8f0] sm:$0xf] }
 0x708   :  { %v14294_v61 = vor.u32 %v17215_v2, %v14291_v41  ;;  %v13754_v2 = vor.u32 %v17097_v12, %v13753_v45  ;;  %v14705_v41 = vld [vmem:[#allocation13 + $0x15b0] sm:$0xf]  ;;  %v17335_v15 = vld [vmem:[#allocation13 + $0x1634] sm:$0xf0]  ;;  %v17505_v45 = vld [vmem:[#allocation13 + $0x1b84] sm:$0xf0] }
 0x709   :  { %10951 = vmatpush.bf16.msra.mxu2 %v14702_v11  ;;  %10890 = vmatpush.bf16.msrb.mxu1 %v14154_v55  ;;  %11399 = vst [vmem:[%s19046_s9 + $0xb0] sm:$0xff] %v10659_v14  ;;  %v13614_v11 = vor.u32 %v17045_v33, %v13611_v24  ;;  %v10634_v55 = vpop.f32.mrf.mxu1  ;;  %v17607_v24 = vld [vmem:[#allocation13 + $0x1eb4] sm:$0xf0]  ;;  %v14706_v14 = vor.u32 %v17335_v15, %v14705_v41  ;;  %v14161_v15 = vld [vmem:[#allocation13 + $0x1170] sm:$0xf] }
 0x70a   :  { %v16791_v41 = vld [vmem:[#allocation13 + $0x534] sm:$0xf0] }
 0x70b   :  { %10964 = vmatpush.bf16.msra.mxu3 %v15790_v7  ;;  %10928 = vmatpush.bf16.msra.mxu0 %v12118_v53  ;;  %v10660_v7 = vpop.f32.mrf.mxu3  ;;  %v14158_v53 = vor.u32 %v17181_v5, %v14155_v9  ;;  %v10673_v25 = vpop.f32.mrf.mxu0  ;;  %v16893_v5 = vld [vmem:[#allocation13 + $0x864] sm:$0xf0] }
 0x70c   :  { %10891 = vmatmul.bf16.vlgmr.msrb.gmra.mxu1 %v18380_v4 }
 0x70d   :  { %10935 = vmatpush.bf16.msra.mxu1 %v14022_v59  ;;  %10952 = vmatpush.bf16.msra.mxu2 %v14566_v62  ;;  %v13475_v59 = vld [vmem:[#allocation13 + $0xca0] sm:$0xf0] }
 0x70e   :  { %v13478_v62 = vor.u32 %v17011_v52, %v13475_v59  ;;  %v14570_v52 = vor.u32 %v17301_v36, %v14569_v60  ;;  %v12801_v59 = vld [vmem:[#allocation13 + $0x6d0] sm:$0xf]  ;;  %v15115_v60 = vld [vmem:[#allocation13 + $0x1968] sm:$0xf0]  ;;  %v12393_v36 = vld [vmem:[#allocation13 + $0x3a0] sm:$0xf] }
 0x70f   :  { %10965 = vmatpush.bf16.msra.mxu3 %v15654_v10  ;;  %10929 = vmatpush.bf16.msra.mxu0 %v11982_v39  ;;  %v14026_v10 = vor.u32 %v17165_v37, %v14025_v26  ;;  %v16066_v39 = vor.u32 %v17675_v63, %v16065_v16  ;;  %v17573_v26 = vld [vmem:[#allocation13 + $0x1da4] sm:$0xf0]  ;;  %v3150_v37 = vperm.slane %v18831_v47, 7  ;;  %v17539_v16 = vld [vmem:[#allocation13 + $0x1c94] sm:$0xf0] }
 0x711   :  { %10936 = vmatpush.bf16.msra.mxu1 %v13886_v22  ;;  %10953 = vmatpush.bf16.msra.mxu2 %v14430_v29  ;;  %v14978_v22 = vor.u32 %v17403_v18, %v14977_v40  ;;  %v16943_v29 = vld [vmem:[#allocation13 + $0x9fc] sm:$0xf]  ;;  %v15521_v18 = vld [vmem:[#allocation13 + $0x1c10] sm:$0xf] }
 0x712   :  { %10930 = vmatmul.bf16.vlgmr.msra.gmra.mxu0 %v18370_v35  ;;  %v13206_v33 = vor.u32 %v16943_v29, %v13203_v23  ;;  %v15522_v43 = vor.u32 %v17539_v16, %v15521_v18  ;;  %v13209_v23 = vld [vmem:[#allocation13 + $0xa00] sm:$0xf]  ;;  %v16723_v18 = vld [vmem:[#allocation13 + $0x314] sm:$0xf0]  ;;  %v16842_v16 = vld [vmem:[#allocation13 + $0x6d4] sm:$0xf] }
 0x713   :  { %10966 = vmatpush.bf16.msra.mxu3 %v15518_v20  ;;  %10979 = vmatpush.bf16.msrb.mxu0 %v9147_v44  ;;  %v13890_v44 = vor.u32 %v17131_v21, %v13889_v56  ;;  %v15929_v20 = vld [vmem:[#allocation13 + $0x1f40] sm:$0xf]  ;;  %v10697_v54 = vpop.f32.mrf.mxu2  ;;  %v18890_v9 = vpop.f32.mrf.mxu0  ;;  %v13345_v56 = vld [vmem:[#allocation13 + $0xb10] sm:$0xf]  ;;  %v16995_v21 = vld [vmem:[#allocation13 + $0xb94] sm:$0xf0] }
 0x714   :  { %v15930_v58 = vor.u32 %v17641_v19, %v15929_v20  ;;  %v14297_v20 = vld [vmem:[#allocation13 + $0x1280] sm:$0xf] }
 0x715   :  { %10937 = vmatpush.bf16.msra.mxu1 %v13750_v8  ;;  %10954 = vmatpush.bf16.msra.mxu2 %v14294_v61  ;;  %v15793_v8 = vld [vmem:[#allocation13 + $0x1e30] sm:$0xf]  ;;  %v12937_v61 = vld [vmem:[#allocation13 + $0x7e0] sm:$0xf] }
 0x716   :  { %v15794_v0 = vor.u32 %v17607_v24, %v15793_v8  ;;  %v12938_v55 = vor.u32 %v16893_v5, %v12937_v61  ;;  %v15385_v19 = vld [vmem:[#allocation13 + $0x1b00] sm:$0xf]  ;;  %v17199_v8 = vld [vmem:[#allocation13 + $0x11f4] sm:$0xf0]  ;;  %v14027_v61 = vld [vmem:[#allocation13 + $0x10e8] sm:$0xf0] }
 0x717   :  { %10967 = vmatpush.bf16.msra.mxu3 %v15382_v50  ;;  %10980 = vmatpush.bf16.msrb.mxu0 %v16470_v34  ;;  %v17063_v50 = vld [vmem:[#allocation13 + $0xdb4] sm:$0xf0]  ;;  %v18888_v34 = vpop.f32.mrf.mxu3  ;;  %v15386_v24 = vor.u32 %v17505_v45, %v15385_v19 }
 0x718   :  { %v13618_v7 = vor.u32 %v17063_v50, %v13617_v48  ;;  %v15249_v48 = vld [vmem:[#allocation13 + $0x19f0] sm:$0xf]  ;;  %v17471_v50 = vld [vmem:[#allocation13 + $0x1a74] sm:$0xf0] }
 0x719   :  { %10938 = vmatpush.bf16.msra.mxu1 %v13614_v11  ;;  %10955 = vmatpush.bf16.msra.mxu2 %v14158_v53  ;;  %v15657_v11 = vld [vmem:[#allocation13 + $0x1d20] sm:$0xf]  ;;  %v16859_v53 = vld [vmem:[#allocation13 + $0x754] sm:$0xf0] }
 0x71a   :  { %v12802_v63 = vor.u32 %v16859_v53, %v12801_v59  ;;  %v13891_v59 = vld [vmem:[#allocation13 + $0xfd8] sm:$0xf0] }
 0x71b   :  { %10968 = vmatpush.bf16.msra.mxu3 %v15246_v31  ;;  %10981 = vmatpush.bf16.msrb.mxu0 %v16334_v3  ;;  %v13481_v31 = vld [vmem:[#allocation13 + $0xc20] sm:$0xf]  ;;  %v17029_v3 = vld [vmem:[#allocation13 + $0xca4] sm:$0xf0]  ;;  %v10699_v30 = vpop.f32.mrf.mxu2  ;;  %v10725_v17 = vpop.f32.mrf.mxu0 }
 0x71c   :  { %10956 = vmatmul.bf16.vlgmr.msra.gmra.mxu2 %v18380_v4  ;;  %v13482_v40 = vor.u32 %v17029_v3, %v13481_v31  ;;  %v12121_v17 = vld [vmem:[#allocation13 + $0x180] sm:$0xf] }
 0x71d   :  { %11000 = vmatpush.bf16.msrb.mxu2 %v14026_v10  ;;  %10939 = vmatpush.bf16.msra.mxu1 %v13478_v62  ;;  %v17267_v10 = vld [vmem:[#allocation13 + $0x1414] sm:$0xf0]  ;;  %v10672_v62 = vadd.f32 %v18880_v57, %v3150_v37  ;;  %v10684_v38 = vpop.f32.mrf.mxu1  ;;  %v13346_v57 = vor.u32 %v16995_v21, %v13345_v56  ;;  %v12939_v37 = vld [vmem:[#allocation13 + $0x868] sm:$0xf0]  ;;  %v17080_v56 = vld [vmem:[#allocation13 + $0xe44] sm:$0xf] }
 0x71e   :  { %10969 = vmatmul.bf16.vlgmr.msra.gmra.mxu3 %v18382_v6  ;;  %v13755_v21 = vld [vmem:[#allocation13 + $0xec8] sm:$0xf0] }
 0x71f   :  { %11013 = vmatpush.bf16.msrb.mxu3 %v15114_v13  ;;  %11026 = vmatpush.bf16.msra.mxu0 %v16202_v28  ;;  %v15658_v13 = vor.u32 %v17573_v26, %v15657_v11  ;;  %v14433_v28 = vld [vmem:[#allocation13 + $0x1390] sm:$0xf]  ;;  %v10712_v47 = vpop.f32.mrf.mxu3  ;;  %v16757_v11 = vld [vmem:[#allocation13 + $0x424] sm:$0xf0]  ;;  %v16876_v26 = vld [vmem:[#allocation13 + $0x7e4] sm:$0xf] }
 0x720   :  { %v14434_v25 = vor.u32 %v17267_v10, %v14433_v28  ;;  %v12394_v53 = vor.u32 %v16757_v11, %v12393_v36  ;;  %v17386_v28 = vld [vmem:[#allocation13 + $0x17d4] sm:$0xf]  ;;  %v14979_v10 = vld [vmem:[#allocation13 + $0x1858] sm:$0xf0]  ;;  %v16740_v36 = vld [vmem:[#allocation13 + $0x3a4] sm:$0xf] }
 0x721   :  { %11001 = vmatpush.bf16.msrb.mxu2 %v13890_v44  ;;  %10940 = vmatpush.bf16.msra.mxu1 %v13342_v42  ;;  %v10685_v44 = vadd.f32 %v10684_v38, %v10672_v62  ;;  %v17233_v42 = vld [vmem:[#allocation13 + $0x1304] sm:$0xf0]  ;;  %v12803_v62 = vld [vmem:[#allocation13 + $0x758] sm:$0xf0]  ;;  %v18902_v38 = vld [vmem:[#allocation13 + $0x2490] sm:$0x77] }
 0x722   :  { %16522 = vmatmul.msk.bf16.vlgmr.msrb.gmra.mxu0 %vm9060_vm11, %v18388_v27  ;;  %v6708_v19 = vunpack.c.l.b16 %v18902_v38  ;;  %v18915_v11 = vld [vmem:[#allocation14 + $0x18] sm:$0xff] }
 0x723   :  { %11014 = vmatpush.bf16.msrb.mxu3 %v14978_v22  ;;  %11027 = vmatpush.bf16.msra.mxu0 %v16066_v39  ;;  %v12665_v22 = vld [vmem:[#allocation13 + $0x5c0] sm:$0xf]  ;;  %v16825_v39 = vld [vmem:[#allocation13 + $0x644] sm:$0xf0]  ;;  %v10698_v12 = vadd.f32 %v10697_v54, %v10685_v44  ;;  %v16927_v54 = vld [vmem:[#allocation13 + $0x974] sm:$0xf0] }
 0x724   :  { %v12666_v29 = vor.u32 %v16825_v39, %v12665_v22  ;;  %v12806_v22 = vor.u32 %v16842_v16, %v12803_v62  ;;  %v17352_v39 = vld [vmem:[#allocation13 + $0x16c4] sm:$0xf]  ;;  %v14843_v44 = vld [vmem:[#allocation13 + $0x1748] sm:$0xf0] }
 0x725   :  { %11002 = vmatpush.bf16.msrb.mxu2 %v13754_v2  ;;  %10941 = vmatpush.bf16.msra.mxu1 %v13206_v33  ;;  %v14298_v2 = vor.u32 %v17233_v42, %v14297_v20  ;;  %v10711_v33 = vadd.f32 %v18888_v34, %v10698_v12  ;;  %v14162_v34 = vor.u32 %v17199_v8, %v14161_v15  ;;  %v16808_v20 = vld [vmem:[#allocation13 + $0x5c4] sm:$0xf]  ;;  %v12667_v42 = vld [vmem:[#allocation13 + $0x648] sm:$0xf0]  ;;  %v17046_v12 = vld [vmem:[#allocation13 + $0xd34] sm:$0xf] }
 0x726   :  { %v14846_v45 = vor.u32 %v17352_v39, %v14843_v44  ;;  %v16655_v15 = vld [vmem:[#allocation13 + $0xf4] sm:$0xf0]  ;;  %v16774_v8 = vld [vmem:[#allocation13 + $0x4b4] sm:$0xf]  ;;  %v16944_v39 = vld [vmem:[#allocation13 + $0xa04] sm:$0xf] }
 0x727   :  { %11015 = vmatpush.bf16.msrb.mxu3 %v14842_v46  ;;  %11028 = vmatpush.bf16.msra.mxu0 %v15930_v58  ;;  %v16961_v46 = vld [vmem:[#allocation13 + $0xa84] sm:$0xf0]  ;;  %v12529_v58 = vld [vmem:[#allocation13 + $0x4b0] sm:$0xf]  ;;  %v10724_v5 = vadd.f32 %v18890_v9, %v10711_v33  ;;  %v13074_v9 = vor.u32 %v16927_v54, %v13073_v49  ;;  %v12531_v33 = vld [vmem:[#allocation13 + $0x538] sm:$0xf0] }
 0x728   :  { %v13210_v51 = vor.u32 %v16961_v46, %v13209_v23  ;;  %v12670_v46 = vor.u32 %v16808_v20, %v12667_v42  ;;  %v17012_v54 = vld [vmem:[#allocation13 + $0xc24] sm:$0xf]  ;;  %v13211_v44 = vld [vmem:[#allocation13 + $0xa88] sm:$0xf0] }
 0x729   :  { %11003 = vmatpush.bf16.msrb.mxu2 %v13618_v7  ;;  %10942 = vmatpush.bf16.msra.mxu1 %v13070_v32  ;;  %v17420_v7 = vld [vmem:[#allocation13 + $0x18e4] sm:$0xf]  ;;  %v10686_v32 = vpop.f32.mrf.mxu1  ;;  %11400 = vst [vmem:[%s19046_s9 + $0xb8] sm:$0xff] %v10724_v5  ;;  %v14299_v20 = vld [vmem:[#allocation13 + $0x1308] sm:$0xf0] }
 0x72a   :  { %v15118_v3 = vor.u32 %v17420_v7, %v15115_v60  ;;  %v17284_v7 = vld [vmem:[#allocation13 + $0x14a4] sm:$0xf]  ;;  %v14571_v60 = vld [vmem:[#allocation13 + $0x1528] sm:$0xf0] }
 0x72b   :  { %11016 = vmatpush.bf16.msrb.mxu3 %v14706_v14  ;;  %11029 = vmatpush.bf16.msra.mxu0 %v15794_v0  ;;  %v17148_v14 = vld [vmem:[#allocation13 + $0x1064] sm:$0xf]  ;;  %v12530_v0 = vor.u32 %v16791_v41, %v12529_v58  ;;  %v17318_v58 = vld [vmem:[#allocation13 + $0x15b4] sm:$0xf]  ;;  %v11985_v41 = vld [vmem:[#allocation13 + $0x70] sm:$0xf] }
 0x72c   :  { %10943 = vmatmul.bf16.vlgmr.msra.gmra.mxu1 %v18372_v1  ;;  %v14030_v31 = vor.u32 %v17148_v14, %v14027_v61  ;;  %v13483_v14 = vld [vmem:[#allocation13 + $0xca8] sm:$0xf0]  ;;  %v11986_v5 = vor.u32 %v16655_v15, %v11985_v41  ;;  %v13075_v15 = vld [vmem:[#allocation13 + $0x978] sm:$0xf0] }
 0x72d   :  { %10987 = vmatpush.bf16.msrb.mxu1 %v12938_v55  ;;  %11004 = vmatpush.bf16.msrb.mxu2 %v13482_v40  ;;  %v15250_v55 = vor.u32 %v17471_v50, %v15249_v48  ;;  %v12257_v40 = vld [vmem:[#allocation13 + $0x290] sm:$0xf]  ;;  %v7898_v50 = vpack.c.b16 %v6708_v19, %v6708_v19  ;;  %v12395_v32 = vld [vmem:[#allocation13 + $0x428] sm:$0xf0]  ;;  %v16672_v19 = vld [vmem:[#allocation13 + $0x184] sm:$0xf] }
 0x72f   :  { %11017 = vmatpush.bf16.msrb.mxu3 %v14570_v52  ;;  %11030 = vmatpush.bf16.msra.mxu0 %v15658_v13  ;;  %v17114_v52 = vld [vmem:[#allocation13 + $0xf54] sm:$0xf]  ;;  %v12942_v13 = vor.u32 %v16876_v26, %v12939_v37  ;;  %v18904_v30 = vpop.f32.mrf.mxu0  ;;  %v13486_v26 = vor.u32 %v17012_v54, %v13483_v14  ;;  %v16473_v37 = vld [vmem:[#allocation13 + $0x2380] sm:$0xf]  ;;  %v16894_v54 = vld [vmem:[#allocation13 + $0x86c] sm:$0xf0] }
 0x730   :  { %v13894_v47 = vor.u32 %v17114_v52, %v13891_v59  ;;  %v12398_v52 = vor.u32 %v16740_v36, %v12395_v32  ;;  %v17250_v59 = vld [vmem:[#allocation13 + $0x1394] sm:$0xf] }
 0x731   :  { %10988 = vmatpush.bf16.msrb.mxu1 %v12802_v63  ;;  %11005 = vmatpush.bf16.msrb.mxu2 %v13346_v57  ;;  %v14982_v63 = vor.u32 %v17386_v28, %v14979_v10  ;;  %v13758_v57 = vor.u32 %v17080_v56, %v13755_v21  ;;  %v16706_v10 = vld [vmem:[#allocation13 + $0x294] sm:$0xf]  ;;  %v17692_v56 = vld [vmem:[#allocation13 + $0x2164] sm:$0xf] }
 0x733   :  { %11018 = vmatpush.bf16.msrb.mxu3 %v14434_v25  ;;  %11031 = vmatpush.bf16.msra.mxu0 %v15522_v43  ;;  %v12258_v25 = vor.u32 %v16723_v18, %v12257_v40  ;;  %v16689_v43 = vld [vmem:[#allocation13 + $0x204] sm:$0xf0]  ;;  %v18912_v49 = vpop.f32.mrf.mxu2  ;;  %v12259_v40 = vld [vmem:[#allocation13 + $0x318] sm:$0xf0] }
 0x734   :  { %v12122_v23 = vor.u32 %v16689_v43, %v12121_v17  ;;  %v12262_v17 = vor.u32 %v16706_v10, %v12259_v40  ;;  %v17216_v43 = vld [vmem:[#allocation13 + $0x1284] sm:$0xf]  ;;  %v16475_v10 = vld [vmem:[#allocation13 + $0x2408] sm:$0xf0]  ;;  %v17590_v40 = vld [vmem:[#allocation13 + $0x1e34] sm:$0xf] }
 0x735   :  { %10989 = vmatpush.bf16.msrb.mxu1 %v12666_v29  ;;  %11006 = vmatpush.bf16.msrb.mxu2 %v13210_v51  ;;  %v13619_v29 = vld [vmem:[#allocation13 + $0xdb8] sm:$0xf0]  ;;  %v14302_v41 = vor.u32 %v17216_v43, %v14299_v20  ;;  %v17556_v20 = vld [vmem:[#allocation13 + $0x1d24] sm:$0xf] }
 0x736   :  { %v13622_v48 = vor.u32 %v17046_v12, %v13619_v29  ;;  %v13214_v29 = vor.u32 %v16944_v39, %v13211_v44  ;;  %v16339_v43 = vld [vmem:[#allocation13 + $0x22f8] sm:$0xf0] }
 0x737   :  { %11019 = vmatpush.bf16.msrb.mxu3 %v14298_v2  ;;  %11032 = vmatpush.bf16.msra.mxu0 %v15386_v24  ;;  %v14707_v2 = vld [vmem:[#allocation13 + $0x1638] sm:$0xf0]  ;;  %v18910_v24 = vpop.f32.mrf.mxu3  ;;  %v10777_v61 = vpop.f32.mrf.mxu0 }
 0x738   :  { %v14710_v51 = vor.u32 %v17318_v58, %v14707_v2  ;;  %v16910_v58 = vld [vmem:[#allocation13 + $0x8f4] sm:$0xf]  ;;  %v6709_v2 = vunpack.c.h.b16 %v18902_v38  ;;  %v11987_v61 = vld [vmem:[#allocation13 + $0xf8] sm:$0xf0] }
 0x739   :  { %10990 = vmatpush.bf16.msrb.mxu1 %v12530_v0  ;;  %11007 = vmatpush.bf16.msrb.mxu2 %v13074_v9  ;;  %v12534_v0 = vor.u32 %v16774_v8, %v12531_v33  ;;  %v16978_v9 = vld [vmem:[#allocation13 + $0xb14] sm:$0xf]  ;;  %v14163_v33 = vld [vmem:[#allocation13 + $0x11f8] sm:$0xf0] }
 0x73a   :  { %v17182_v8 = vld [vmem:[#allocation13 + $0x1174] sm:$0xf]  ;;  %v7899_v36 = vpack.c.b16 %v6709_v2, %v6709_v2  ;;  %v17064_v2 = vld [vmem:[#allocation13 + $0xdbc] sm:$0xf0] }
 0x73b   :  { %11020 = vmatpush.bf16.msrb.mxu3 %v14162_v34  ;;  %11033 = vmatpush.bf16.msra.mxu0 %v15250_v55  ;;  %v9150_v34 = vsel %vm9064_vm10, %v7898_v50, 0  ;;  %v17777_v55 = vld [vmem:[#allocation13 + $0x2404] sm:$0xf0]  ;;  %v10751_v21 = vpop.f32.mrf.mxu2  ;;  %v16638_v50 = vld [vmem:[#allocation13 + $0x74] sm:$0xf]  ;;  %v14166_v32 = vor.u32 %v17182_v8, %v14163_v33 }
 0x73c   :  { %11008 = vmatmul.bf16.vlgmr.msrb.gmra.mxu2 %v18372_v1  ;;  %v16474_v28 = vor.u32 %v17777_v55, %v16473_v37  ;;  %v15931_v37 = vld [vmem:[#allocation13 + $0x1fc8] sm:$0xf0]  ;;  %v11990_v55 = vor.u32 %v16638_v50, %v11987_v61  ;;  %v16826_v21 = vld [vmem:[#allocation13 + $0x64c] sm:$0xf0]  ;;  %v17522_v33 = vld [vmem:[#allocation13 + $0x1c14] sm:$0xf] }
 0x73d   :  { %10991 = vmatpush.bf16.msrb.mxu1 %v12394_v53  ;;  %11052 = vmatpush.bf16.msra.mxu2 %v12942_v13  ;;  %v14435_v53 = vld [vmem:[#allocation13 + $0x1418] sm:$0xf0]  ;;  %v3151_v13 = vperm.slane %v18915_v11, 0  ;;  %v10736_v18 = vpop.f32.mrf.mxu1  ;;  %v16073_v50 = vld [vmem:[#allocation13 + $0x2058] sm:$0xf] }
 0x73e   :  { %11021 = vmatmul.bf16.vlgmr.msrb.gmra.mxu3 %v18380_v4  ;;  %11034 = vmatmul.bf16.vlgmr.msra.gmra.mxu0 %v18382_v6 }
 0x73f   :  { %11065 = vmatpush.bf16.msra.mxu3 %v14030_v31  ;;  %11078 = vmatpush.bf16.msrb.mxu0 %v15118_v3  ;;  %v14574_v31 = vor.u32 %v17284_v7, %v14571_v60  ;;  %v13347_v3 = vld [vmem:[#allocation13 + $0xb98] sm:$0xf0]  ;;  %v10764_v16 = vpop.f32.mrf.mxu3  ;;  %v10737_v42 = vadd.f32 %v10736_v18, %v3151_v13  ;;  %v13078_v60 = vor.u32 %v16910_v58, %v13075_v15  ;;  %v13625_v58 = vld [vmem:[#allocation13 + $0xd38] sm:$0xf] }
 0x740   :  { %v13350_v62 = vor.u32 %v16978_v9, %v13347_v3  ;;  %v12809_v9 = vld [vmem:[#allocation13 + $0x6d8] sm:$0xf]  ;;  %v16860_v3 = vld [vmem:[#allocation13 + $0x75c] sm:$0xf0]  ;;  %v15795_v18 = vld [vmem:[#allocation13 + $0x1eb8] sm:$0xf0]  ;;  %v13626_v61 = vor.u32 %v17064_v2, %v13625_v58 }
 0x741   :  { %10992 = vmatpush.bf16.msrb.mxu1 %v12258_v25  ;;  %11053 = vmatpush.bf16.msra.mxu2 %v12806_v22  ;;  %v14438_v25 = vor.u32 %v17250_v59, %v14435_v53  ;;  %v16203_v22 = vld [vmem:[#allocation13 + $0x21e8] sm:$0xf0]  ;;  %v10750_v14 = vadd.f32 %v18912_v49, %v10737_v42  ;;  %v17132_v59 = vld [vmem:[#allocation13 + $0xfdc] sm:$0xf0]  ;;  %v9153_v53 = vsel %vm9064_vm10, %v7899_v36, 0  ;;  %v12810_v16 = vor.u32 %v16860_v3, %v12809_v9 }
 0x742   :  { %v16206_v12 = vor.u32 %v17692_v56, %v16203_v22  ;;  %v17098_v22 = vld [vmem:[#allocation13 + $0xecc] sm:$0xf0]  ;;  %v15798_v44 = vor.u32 %v17590_v40, %v15795_v18  ;;  %v3152_v36 = vperm.slane %v18915_v11, 1  ;;  %v14985_v2 = vld [vmem:[#allocation13 + $0x17d8] sm:$0xf] }
 0x743   :  { %11066 = vmatpush.bf16.msra.mxu3 %v13894_v47  ;;  %11079 = vmatpush.bf16.msrb.mxu0 %v14982_v63  ;;  %v16337_v47 = vld [vmem:[#allocation13 + $0x2270] sm:$0xf]  ;;  %v17743_v63 = vld [vmem:[#allocation13 + $0x22f4] sm:$0xf0]  ;;  %v10763_v49 = vadd.f32 %v18910_v24, %v10750_v14 }
 0x744   :  { %v17642_v9 = vld [vmem:[#allocation13 + $0x1fcc] sm:$0xf0] }
 0x745   :  { %10993 = vmatpush.bf16.msrb.mxu1 %v12122_v23  ;;  %11054 = vmatpush.bf16.msra.mxu2 %v12670_v46  ;;  %v17658_v23 = vld [vmem:[#allocation13 + $0x2054] sm:$0xf]  ;;  %v16067_v46 = vld [vmem:[#allocation13 + $0x20d8] sm:$0xf0]  ;;  %v10738_v7 = vpop.f32.mrf.mxu1 }
 0x746   :  { %v16070_v38 = vor.u32 %v17658_v23, %v16067_v46  ;;  %v16792_v23 = vld [vmem:[#allocation13 + $0x53c] sm:$0xf0]  ;;  %v16758_v7 = vld [vmem:[#allocation13 + $0x42c] sm:$0xf0] }
 0x747   :  { %11067 = vmatpush.bf16.msra.mxu3 %v13758_v57  ;;  %11080 = vmatpush.bf16.msrb.mxu0 %v14846_v45  ;;  %v16338_v57 = vor.u32 %v17743_v63, %v16337_v47  ;;  %v12123_v45 = vld [vmem:[#allocation13 + $0x208] sm:$0xf0]  ;;  %v12673_v47 = vld [vmem:[#allocation13 + $0x5c8] sm:$0xf]  ;;  %v10776_v63 = vadd.f32 %v18904_v30, %v10763_v49 }
 0x748   :  { %v16209_v30 = vld [vmem:[#allocation13 + $0x2168] sm:$0xf] }
 0x749   :  { %10994 = vmatpush.bf16.msrb.mxu1 %v11986_v5  ;;  %11055 = vmatpush.bf16.msra.mxu2 %v12534_v0  ;;  %v14033_v5 = vld [vmem:[#allocation13 + $0x1068] sm:$0xf]  ;;  %v17166_v0 = vld [vmem:[#allocation13 + $0x10ec] sm:$0xf0] }
 0x74b   :  { %11068 = vmatpush.bf16.msra.mxu3 %v13622_v48  ;;  %11081 = vmatpush.bf16.msrb.mxu0 %v14710_v51  ;;  %v12126_v48 = vor.u32 %v16672_v19, %v12123_v45  ;;  %v12945_v51 = vld [vmem:[#allocation13 + $0x7e8] sm:$0xf]  ;;  %v17710_v19 = vld [vmem:[#allocation13 + $0x21ec] sm:$0xf0]  ;;  %v12674_v45 = vor.u32 %v16826_v21, %v12673_v47  ;;  %v15251_v47 = vld [vmem:[#allocation13 + $0x1a78] sm:$0xf0] }
 0x74c   :  { %10995 = vmatmul.bf16.vlgmr.msrb.gmra.mxu1 %v18370_v35  ;;  %v16210_v8 = vor.u32 %v17710_v19, %v16209_v30 }
 0x74d   :  { %11044 = vmatpush.bf16.msra.mxu1 %v9150_v34  ;;  %11056 = vmatpush.bf16.msra.mxu2 %v12398_v52  ;;  %v12946_v34 = vor.u32 %v16894_v54, %v12945_v51  ;;  %v13897_v52 = vld [vmem:[#allocation13 + $0xf58] sm:$0xf]  ;;  %v10788_v39 = vpop.f32.mrf.mxu1  ;;  %v17676_v51 = vld [vmem:[#allocation13 + $0x20dc] sm:$0xf0] }
 0x74e   :  { %v10789_v42 = vadd.f32 %v10788_v39, %v10776_v63  ;;  %v15801_v63 = vld [vmem:[#allocation13 + $0x1e38] sm:$0xf]  ;;  %v15121_v39 = vld [vmem:[#allocation13 + $0x18e8] sm:$0xf] }
 0x74f   :  { %11069 = vmatpush.bf16.msra.mxu3 %v13486_v26  ;;  %11082 = vmatpush.bf16.msrb.mxu0 %v14574_v31  ;;  %v17624_v26 = vld [vmem:[#allocation13 + $0x1f44] sm:$0xf]  ;;  %v14034_v31 = vor.u32 %v17166_v0, %v14033_v5  ;;  %v18923_v24 = vpop.f32.mrf.mxu0  ;;  %v12401_v5 = vld [vmem:[#allocation13 + $0x3a8] sm:$0xf] }
 0x750   :  { %v15934_v13 = vor.u32 %v17624_v26, %v15931_v37  ;;  %11401 = vst [vmem:[%s19046_s9 + $0xc0] sm:$0xff] %v10789_v42  ;;  %v16074_v26 = vor.u32 %v17676_v51, %v16073_v50  ;;  %v17488_v37 = vld [vmem:[#allocation13 + $0x1b04] sm:$0xf]  ;;  %v12402_v49 = vor.u32 %v16758_v7, %v12401_v5  ;;  %v13217_v42 = vld [vmem:[#allocation13 + $0xa08] sm:$0xf] }
 0x751   :  { %11045 = vmatpush.bf16.msra.mxu1 %v16474_v28  ;;  %11057 = vmatpush.bf16.msra.mxu2 %v12262_v17  ;;  %v17760_v28 = vld [vmem:[#allocation13 + $0x2384] sm:$0xf]  ;;  %v17726_v17 = vld [vmem:[#allocation13 + $0x2274] sm:$0xf]  ;;  %v13081_v50 = vld [vmem:[#allocation13 + $0x8f8] sm:$0xf] }
 0x752   :  { %v16478_v56 = vor.u32 %v17760_v28, %v16475_v10  ;;  %v16342_v46 = vor.u32 %v17726_v17, %v16339_v43  ;;  %v18937_v28 = vld [vmem:[#allocation13 + $0x2498] sm:$0x77]  ;;  %v12129_v17 = vld [vmem:[#allocation13 + $0x188] sm:$0xf]  ;;  %v16928_v51 = vld [vmem:[#allocation13 + $0x97c] sm:$0xf0] }
 0x753   :  { %11070 = vmatpush.bf16.msra.mxu3 %v13350_v62  ;;  %11083 = vmatpush.bf16.msrb.mxu0 %v14438_v25  ;;  %v13898_v62 = vor.u32 %v17132_v59, %v13897_v52  ;;  %v13761_v25 = vld [vmem:[#allocation13 + $0xe48] sm:$0xf]  ;;  %v10801_v54 = vpop.f32.mrf.mxu2  ;;  %v12265_v52 = vld [vmem:[#allocation13 + $0x298] sm:$0xf]  ;;  %v16724_v59 = vld [vmem:[#allocation13 + $0x31c] sm:$0xf0]  ;;  %v6710_v43 = vunpack.c.l.b16 %v18937_v28 }
 0x754   :  { %v17540_v7 = vld [vmem:[#allocation13 + $0x1c9c] sm:$0xf0] }
 0x755   :  { %11046 = vmatpush.bf16.msra.mxu1 %v16338_v57  ;;  %11058 = vmatpush.bf16.msra.mxu2 %v12126_v48  ;;  %v15659_v57 = vld [vmem:[#allocation13 + $0x1da8] sm:$0xf0]  ;;  %v15523_v48 = vld [vmem:[#allocation13 + $0x1c98] sm:$0xf0] }
 0x756   :  { %v15662_v15 = vor.u32 %v17556_v20, %v15659_v57  ;;  %v16690_v20 = vld [vmem:[#allocation13 + $0x20c] sm:$0xf0] }
 0x757   :  { %11071 = vmatpush.bf16.msra.mxu3 %v13214_v29  ;;  %11084 = vmatpush.bf16.msrb.mxu0 %v14302_v41  ;;  %v12537_v29 = vld [vmem:[#allocation13 + $0x4b8] sm:$0xf]  ;;  %v18934_v41 = vpop.f32.mrf.mxu3  ;;  %v10829_v0 = vpop.f32.mrf.mxu0  ;;  %v16962_v57 = vld [vmem:[#allocation13 + $0xa8c] sm:$0xf0] }
 0x758   :  { %v12538_v14 = vor.u32 %v16792_v23, %v12537_v29  ;;  %v15665_v29 = vld [vmem:[#allocation13 + $0x1d28] sm:$0xf]  ;;  %v17574_v23 = vld [vmem:[#allocation13 + $0x1dac] sm:$0xf0]  ;;  %v13218_v58 = vor.u32 %v16962_v57, %v13217_v42  ;;  %v15529_v0 = vld [vmem:[#allocation13 + $0x1c18] sm:$0xf] }
 0x759   :  { %11091 = vmatpush.bf16.msrb.mxu1 %v16206_v12  ;;  %11059 = vmatpush.bf16.msra.mxu2 %v11990_v55  ;;  %v13762_v12 = vor.u32 %v17098_v22, %v13761_v25  ;;  %v15387_v55 = vld [vmem:[#allocation13 + $0x1b88] sm:$0xf0]  ;;  %v12266_v25 = vor.u32 %v16724_v59, %v12265_v52  ;;  %v12811_v52 = vld [vmem:[#allocation13 + $0x760] sm:$0xf0] }
 0x75a   :  { %v15390_v40 = vor.u32 %v17488_v37, %v15387_v55  ;;  %v14849_v55 = vld [vmem:[#allocation13 + $0x16c8] sm:$0xf] }
 0x75b   :  { %11072 = vmatpush.bf16.msra.mxu3 %v13078_v60  ;;  %11085 = vmatpush.bf16.msrb.mxu0 %v14166_v32  ;;  %v17030_v60 = vld [vmem:[#allocation13 + $0xcac] sm:$0xf0]  ;;  %v10790_v32 = vpop.f32.mrf.mxu1  ;;  %v10803_v21 = vpop.f32.mrf.mxu2 }
 0x75c   :  { %16523 = vmatmul.msk.bf16.vlgmr.msra.gmra.mxu1 %vm9060_vm11, %v18388_v27  ;;  %11060 = vmatmul.bf16.vlgmr.msra.gmra.mxu2 %v18370_v35  ;;  %v13082_v32 = vor.u32 %v16928_v51, %v13081_v50 }
 0x75d   :  { %11092 = vmatpush.bf16.msrb.mxu1 %v16070_v38  ;;  %11109 = vmatpush.bf16.msrb.mxu2 %v9153_v53  ;;  %v13489_v38 = vld [vmem:[#allocation13 + $0xc28] sm:$0xf]  ;;  %v13353_v53 = vld [vmem:[#allocation13 + $0xb18] sm:$0xf] }
 0x75e   :  { %11073 = vmatmul.bf16.vlgmr.msra.gmra.mxu3 %v18372_v1  ;;  %11086 = vmatmul.bf16.vlgmr.msrb.gmra.mxu0 %v18380_v4  ;;  %v13490_v3 = vor.u32 %v17030_v60, %v13489_v38 }
 0x75f   :  { %11117 = vmatpush.bf16.msrb.mxu3 %v12946_v34  ;;  %11130 = vmatpush.bf16.msra.mxu0 %v14034_v31  ;;  %v15526_v34 = vor.u32 %v17522_v33, %v15523_v48  ;;  %v15937_v31 = vld [vmem:[#allocation13 + $0x1f48] sm:$0xf]  ;;  %v10816_v10 = vpop.f32.mrf.mxu3  ;;  %v7900_v33 = vpack.c.b16 %v6710_v43, %v6710_v43  ;;  %v16656_v48 = vld [vmem:[#allocation13 + $0xfc] sm:$0xf0]  ;;  %v16211_v43 = vld [vmem:[#allocation13 + $0x21f0] sm:$0xf0] }
 0x760   :  { %v15938_v18 = vor.u32 %v17642_v9, %v15937_v31  ;;  %v17370_v31 = vld [vmem:[#allocation13 + $0x174c] sm:$0xf0]  ;;  %v16481_v9 = vld [vmem:[#allocation13 + $0x2388] sm:$0xf] }
 0x761   :  { %11093 = vmatpush.bf16.msrb.mxu1 %v15934_v13  ;;  %11110 = vmatpush.bf16.msrb.mxu2 %v16478_v56  ;;  %v16996_v13 = vld [vmem:[#allocation13 + $0xb9c] sm:$0xf0]  ;;  %v14850_v10 = vor.u32 %v17370_v31, %v14849_v55  ;;  %v14851_v55 = vld [vmem:[#allocation13 + $0x1750] sm:$0xf0] }
 0x762   :  { %v17608_v56 = vld [vmem:[#allocation13 + $0x1ebc] sm:$0xf0]  ;;  %v13354_v22 = vor.u32 %v16996_v13, %v13353_v53  ;;  %v15393_v53 = vld [vmem:[#allocation13 + $0x1b08] sm:$0xf]  ;;  %v17506_v13 = vld [vmem:[#allocation13 + $0x1b8c] sm:$0xf0] }
 0x763   :  { %11118 = vmatpush.bf16.msrb.mxu3 %v12810_v16  ;;  %11131 = vmatpush.bf16.msra.mxu0 %v13898_v62  ;;  %v17454_v16 = vld [vmem:[#allocation13 + $0x19f4] sm:$0xf]  ;;  %v10802_v62 = vadd.f32 %v10801_v54, %v3152_v36  ;;  %v15802_v19 = vor.u32 %v17608_v56, %v15801_v63  ;;  %v16877_v54 = vld [vmem:[#allocation13 + $0x7ec] sm:$0xf]  ;;  %v10853_v60 = vpop.f32.mrf.mxu2  ;;  %v17744_v63 = vld [vmem:[#allocation13 + $0x22fc] sm:$0xf0]  ;;  %v15394_v21 = vor.u32 %v17506_v13, %v15393_v53 }
 0x764   :  { %v15254_v30 = vor.u32 %v17454_v16, %v15251_v47  ;;  %v16345_v47 = vld [vmem:[#allocation13 + $0x2278] sm:$0xf]  ;;  %v17591_v53 = vld [vmem:[#allocation13 + $0x1e3c] sm:$0xf]  ;;  %v15803_v13 = vld [vmem:[#allocation13 + $0x1ec0] sm:$0xf0] }
 0x765   :  { %11094 = vmatpush.bf16.msrb.mxu1 %v15798_v44  ;;  %11111 = vmatpush.bf16.msrb.mxu2 %v16342_v46  ;;  %v17438_v44 = vld [vmem:[#allocation13 + $0x196c] sm:$0xf0]  ;;  %v12130_v46 = vor.u32 %v16690_v20, %v12129_v17  ;;  %v17693_v17 = vld [vmem:[#allocation13 + $0x216c] sm:$0xf] }
 0x767   :  { %11119 = vmatpush.bf16.msrb.mxu3 %v12674_v45  ;;  %11132 = vmatpush.bf16.msra.mxu0 %v13762_v12  ;;  %v10815_v45 = vadd.f32 %v18934_v41, %v10802_v62  ;;  %v15122_v12 = vor.u32 %v17438_v44, %v15121_v39  ;;  %v15666_v41 = vor.u32 %v17574_v23, %v15665_v29  ;;  %v15257_v39 = vld [vmem:[#allocation13 + $0x19f8] sm:$0xf]  ;;  %v17472_v44 = vld [vmem:[#allocation13 + $0x1a7c] sm:$0xf0]  ;;  %v14577_v29 = vld [vmem:[#allocation13 + $0x14a8] sm:$0xf] }
 0x768   :  { %v17302_v23 = vld [vmem:[#allocation13 + $0x152c] sm:$0xf0] }
 0x769   :  { %11095 = vmatpush.bf16.msrb.mxu1 %v15662_v15  ;;  %11156 = vmatpush.bf16.msra.mxu2 %v16210_v8  ;;  %v17404_v15 = vld [vmem:[#allocation13 + $0x185c] sm:$0xf0]  ;;  %v11993_v8 = vld [vmem:[#allocation13 + $0x78] sm:$0xf]  ;;  %v10840_v38 = vpop.f32.mrf.mxu1  ;;  %v14578_v51 = vor.u32 %v17302_v23, %v14577_v29 }
 0x76a   :  { %v14986_v5 = vor.u32 %v17404_v15, %v14985_v2  ;;  %v11994_v36 = vor.u32 %v16656_v48, %v11993_v8  ;;  %v16775_v2 = vld [vmem:[#allocation13 + $0x4bc] sm:$0xf]  ;;  %v12539_v15 = vld [vmem:[#allocation13 + $0x540] sm:$0xf0] }
 0x76b   :  { %11120 = vmatpush.bf16.msrb.mxu3 %v12538_v14  ;;  %11133 = vmatpush.bf16.msra.mxu0 %v13626_v61  ;;  %v12947_v14 = vld [vmem:[#allocation13 + $0x870] sm:$0xf0]  ;;  %v10828_v61 = vadd.f32 %v18923_v24, %v10815_v45  ;;  %v15530_v24 = vor.u32 %v17540_v7, %v15529_v0  ;;  %v10855_v42 = vpop.f32.mrf.mxu2  ;;  %v16346_v45 = vor.u32 %v17744_v63, %v16345_v47  ;;  %v16075_v48 = vld [vmem:[#allocation13 + $0x20e0] sm:$0xf0]  ;;  %v14169_v63 = vld [vmem:[#allocation13 + $0x1178] sm:$0xf] }
 0x76c   :  { %16524 = vmatmul.msk.bf16.vlgmr.msrb.gmra.mxu2 %vm9060_vm11, %v18388_v27  ;;  %v12950_v37 = vor.u32 %v16877_v54, %v12947_v14  ;;  %v14987_v54 = vld [vmem:[#allocation13 + $0x1860] sm:$0xf0]  ;;  %v12542_v14 = vor.u32 %v16775_v2, %v12539_v15 }
 0x76d   :  { %11096 = vmatpush.bf16.msrb.mxu1 %v15526_v34  ;;  %11157 = vmatpush.bf16.msra.mxu2 %v16074_v26  ;;  %v9156_v34 = vsel %vm9064_vm10, %v7900_v33, 0  ;;  %v10841_v26 = vadd.f32 %v10840_v38, %v10828_v61  ;;  %v17659_v33 = vld [vmem:[#allocation13 + $0x205c] sm:$0xf]  ;;  %v14441_v61 = vld [vmem:[#allocation13 + $0x1398] sm:$0xf] }
 0x76e   :  { %v16078_v7 = vor.u32 %v17659_v33, %v16075_v48  ;;  %v16741_v38 = vld [vmem:[#allocation13 + $0x3ac] sm:$0xf]  ;;  %v13899_v15 = vld [vmem:[#allocation13 + $0xfe0] sm:$0xf0] }
 0x76f   :  { %11121 = vmatpush.bf16.msrb.mxu3 %v12402_v49  ;;  %11134 = vmatpush.bf16.msra.mxu0 %v13490_v3  ;;  %v17778_v49 = vld [vmem:[#allocation13 + $0x240c] sm:$0xf0]  ;;  %v16843_v3 = vld [vmem:[#allocation13 + $0x6dc] sm:$0xf]  ;;  %v10854_v59 = vadd.f32 %v10853_v60, %v10841_v26  ;;  %v18949_v56 = vpop.f32.mrf.mxu0  ;;  %v12403_v60 = vld [vmem:[#allocation13 + $0x430] sm:$0xf0] }
 0x770   :  { %v16482_v16 = vor.u32 %v17778_v49, %v16481_v9  ;;  %v12814_v62 = vor.u32 %v16843_v3, %v12811_v52  ;;  %v12406_v31 = vor.u32 %v16741_v38, %v12403_v60  ;;  %v14305_v9 = vld [vmem:[#allocation13 + $0x1288] sm:$0xf]  ;;  %v16707_v3 = vld [vmem:[#allocation13 + $0x29c] sm:$0xf]  ;;  %v12267_v52 = vld [vmem:[#allocation13 + $0x320] sm:$0xf0] }
 0x771   :  { %11097 = vmatpush.bf16.msrb.mxu1 %v15390_v40  ;;  %11158 = vmatpush.bf16.msra.mxu2 %v15938_v18  ;;  %v14713_v40 = vld [vmem:[#allocation13 + $0x15b8] sm:$0xf]  ;;  %v17336_v18 = vld [vmem:[#allocation13 + $0x163c] sm:$0xf0]  ;;  %11402 = vst [vmem:[%s19046_s9 + $0xc8] sm:$0xff] %v10854_v59  ;;  %v10842_v20 = vpop.f32.mrf.mxu1  ;;  %v12270_v47 = vor.u32 %v16707_v3, %v12267_v52 }
 0x772   :  { %v14714_v57 = vor.u32 %v17336_v18, %v14713_v40  ;;  %v12131_v20 = vld [vmem:[#allocation13 + $0x210] sm:$0xf0]  ;;  %v11995_v33 = vld [vmem:[#allocation13 + $0x100] sm:$0xf0] }
 0x773   :  { %11122 = vmatpush.bf16.msrb.mxu3 %v12266_v25  ;;  %11135 = vmatpush.bf16.msra.mxu0 %v13354_v22  ;;  %v16809_v25 = vld [vmem:[#allocation13 + $0x5cc] sm:$0xf]  ;;  %v12675_v22 = vld [vmem:[#allocation13 + $0x650] sm:$0xf0] }
 0x775   :  { %11098 = vmatpush.bf16.msrb.mxu1 %v15254_v30  ;;  %11159 = vmatpush.bf16.msra.mxu2 %v15802_v19  ;;  %v17421_v30 = vld [vmem:[#allocation13 + $0x18ec] sm:$0xf]  ;;  %v15123_v19 = vld [vmem:[#allocation13 + $0x1970] sm:$0xf0]  ;;  %v18953_v50 = vpop.f32.mrf.mxu3 }
 0x776   :  { %v15126_v8 = vor.u32 %v17421_v30, %v15123_v19  ;;  %v15667_v30 = vld [vmem:[#allocation13 + $0x1db0] sm:$0xf0] }
 0x777   :  { %11123 = vmatpush.bf16.msrb.mxu3 %v12130_v46  ;;  %11136 = vmatpush.bf16.msra.mxu0 %v13218_v58  ;;  %v15258_v46 = vor.u32 %v17472_v44, %v15257_v39  ;;  %v16214_v58 = vor.u32 %v17693_v17, %v16211_v43  ;;  %v10881_v0 = vpop.f32.mrf.mxu0  ;;  %v15806_v44 = vor.u32 %v17591_v53, %v15803_v13  ;;  %v14035_v17 = vld [vmem:[#allocation13 + $0x10f0] sm:$0xf0]  ;;  %v16673_v43 = vld [vmem:[#allocation13 + $0x18c] sm:$0xf]  ;;  %v13627_v53 = vld [vmem:[#allocation13 + $0xdc0] sm:$0xf0] }
 0x778   :  { %11099 = vmatmul.bf16.vlgmr.msrb.gmra.mxu1 %v18382_v6  ;;  %v12134_v23 = vor.u32 %v16673_v43, %v12131_v20  ;;  %v17455_v13 = vld [vmem:[#allocation13 + $0x19fc] sm:$0xf]  ;;  %v16217_v43 = vld [vmem:[#allocation13 + $0x2170] sm:$0xf]  ;;  %v17711_v20 = vld [vmem:[#allocation13 + $0x21f4] sm:$0xf0] }
 0x779   :  { %11143 = vmatpush.bf16.msra.mxu1 %v15122_v12  ;;  %11160 = vmatpush.bf16.msra.mxu2 %v15666_v41  ;;  %v12678_v12 = vor.u32 %v16809_v25, %v12675_v22  ;;  %v17387_v41 = vld [vmem:[#allocation13 + $0x17dc] sm:$0xf]  ;;  %v17149_v25 = vld [vmem:[#allocation13 + $0x106c] sm:$0xf]  ;;  %v6711_v22 = vunpack.c.h.b16 %v18937_v28 }
 0x77a   :  { %v14038_v28 = vor.u32 %v17149_v25, %v14035_v17  ;;  %v17183_v25 = vld [vmem:[#allocation13 + $0x117c] sm:$0xf]  ;;  %v17439_v17 = vld [vmem:[#allocation13 + $0x1974] sm:$0xf0] }
 0x77b   :  { %11124 = vmatpush.bf16.msrb.mxu3 %v11994_v36  ;;  %11137 = vmatpush.bf16.msra.mxu0 %v13082_v32  ;;  %v14990_v36 = vor.u32 %v17387_v41, %v14987_v54  ;;  %v17625_v32 = vld [vmem:[#allocation13 + $0x1f4c] sm:$0xf]  ;;  %v15531_v41 = vld [vmem:[#allocation13 + $0x1ca0] sm:$0xf0] }
 0x77d   :  { %11144 = vmatpush.bf16.msra.mxu1 %v14986_v5  ;;  %11161 = vmatpush.bf16.msra.mxu2 %v15530_v24  ;;  %v17268_v5 = vld [vmem:[#allocation13 + $0x141c] sm:$0xf0]  ;;  %v17234_v24 = vld [vmem:[#allocation13 + $0x130c] sm:$0xf0]  ;;  %v10868_v40 = vpop.f32.mrf.mxu3 }
 0x77e   :  { %11125 = vmatmul.bf16.vlgmr.msrb.gmra.mxu3 %v18370_v35  ;;  %11138 = vmatmul.bf16.vlgmr.msra.gmra.mxu0 %v18372_v1  ;;  %v14442_v26 = vor.u32 %v17268_v5, %v14441_v61  ;;  %v14306_v18 = vor.u32 %v17234_v24, %v14305_v9  ;;  %v14443_v61 = vld [vmem:[#allocation13 + $0x1420] sm:$0xf0]  ;;  %v17761_v9 = vld [vmem:[#allocation13 + $0x238c] sm:$0xf]  ;;  %v16483_v24 = vld [vmem:[#allocation13 + $0x2410] sm:$0xf0] }
 0x77f   :  { %11174 = vmatpush.bf16.msra.mxu3 %v9156_v34  ;;  %11182 = vmatpush.bf16.msrb.mxu0 %v12950_v37  ;;  %v15939_v34 = vld [vmem:[#allocation13 + $0x1fd0] sm:$0xf0]  ;;  %v17353_v37 = vld [vmem:[#allocation13 + $0x16cc] sm:$0xf]  ;;  %v10905_v39 = vpop.f32.mrf.mxu2  ;;  %v16486_v40 = vor.u32 %v17761_v9, %v16483_v24 }
 0x780   :  { %v15942_v49 = vor.u32 %v17625_v32, %v15939_v34  ;;  %v14854_v59 = vor.u32 %v17353_v37, %v14851_v55  ;;  %v17081_v32 = vld [vmem:[#allocation13 + $0xe4c] sm:$0xf]  ;;  %v13763_v34 = vld [vmem:[#allocation13 + $0xed0] sm:$0xf0] }
 0x781   :  { %11145 = vmatpush.bf16.msra.mxu1 %v14850_v10  ;;  %11162 = vmatpush.bf16.msra.mxu2 %v15394_v21  ;;  %v3153_v10 = vperm.slane %v18915_v11, 2  ;;  %v17200_v21 = vld [vmem:[#allocation13 + $0x11fc] sm:$0xf0]  ;;  %v13766_v52 = vor.u32 %v17081_v32, %v13763_v34  ;;  %v17643_v34 = vld [vmem:[#allocation13 + $0x1fd4] sm:$0xf0] }
 0x782   :  { %v14170_v19 = vor.u32 %v17200_v21, %v14169_v63 }
 0x783   :  { %11175 = vmatpush.bf16.msra.mxu3 %v16482_v16  ;;  %11183 = vmatpush.bf16.msrb.mxu0 %v12814_v62  ;;  %v17319_v16 = vld [vmem:[#allocation13 + $0x15bc] sm:$0xf]  ;;  %v14715_v62 = vld [vmem:[#allocation13 + $0x1640] sm:$0xf0]  ;;  %v10867_v29 = vadd.f32 %v18953_v50, %v3153_v10 }
 0x784   :  { %v14718_v42 = vor.u32 %v17319_v16, %v14715_v62  ;;  %v17727_v16 = vld [vmem:[#allocation13 + $0x227c] sm:$0xf]  ;;  %v16347_v62 = vld [vmem:[#allocation13 + $0x2300] sm:$0xf0] }
 0x785   :  { %11146 = vmatpush.bf16.msra.mxu1 %v14714_v57  ;;  %11163 = vmatpush.bf16.msra.mxu2 %v15258_v46  ;;  %v17557_v57 = vld [vmem:[#allocation13 + $0x1d2c] sm:$0xf]  ;;  %v17115_v46 = vld [vmem:[#allocation13 + $0xf5c] sm:$0xf]  ;;  %v10918_v54 = vpop.f32.mrf.mxu3  ;;  %v10880_v50 = vadd.f32 %v18949_v56, %v10867_v29 }
 0x786   :  { %v15670_v2 = vor.u32 %v17557_v57, %v15667_v30  ;;  %v13902_v5 = vor.u32 %v17115_v46, %v13899_v15  ;;  %v17217_v56 = vld [vmem:[#allocation13 + $0x128c] sm:$0xf]  ;;  %v14041_v57 = vld [vmem:[#allocation13 + $0x1070] sm:$0xf]  ;;  %v17167_v30 = vld [vmem:[#allocation13 + $0x10f4] sm:$0xf0] }
 0x787   :  { %11176 = vmatpush.bf16.msra.mxu3 %v16346_v45  ;;  %11184 = vmatpush.bf16.msrb.mxu0 %v12678_v12  ;;  %v17285_v45 = vld [vmem:[#allocation13 + $0x14ac] sm:$0xf]  ;;  %v14579_v12 = vld [vmem:[#allocation13 + $0x1530] sm:$0xf0]  ;;  %v10907_v60 = vpop.f32.mrf.mxu2  ;;  %v14993_v15 = vld [vmem:[#allocation13 + $0x17e0] sm:$0xf] }
 0x788   :  { %11164 = vmatmul.bf16.vlgmr.msra.gmra.mxu2 %v18382_v6  ;;  %v14582_v48 = vor.u32 %v17285_v45, %v14579_v12  ;;  %v16350_v12 = vor.u32 %v17727_v16, %v16347_v62  ;;  %v17013_v29 = vld [vmem:[#allocation13 + $0xc2c] sm:$0xf]  ;;  %v17371_v60 = vld [vmem:[#allocation13 + $0x1754] sm:$0xf0]  ;;  %v13083_v16 = vld [vmem:[#allocation13 + $0x980] sm:$0xf0] }
 0x789   :  { %11208 = vmatpush.bf16.msrb.mxu2 %v15126_v8  ;;  %11147 = vmatpush.bf16.msra.mxu1 %v14578_v51  ;;  %v16639_v8 = vld [vmem:[#allocation13 + $0x7c] sm:$0xf]  ;;  %v10892_v38 = vpop.f32.mrf.mxu1 }
 0x78a   :  { %v17523_v51 = vld [vmem:[#allocation13 + $0x1c1c] sm:$0xf]  ;;  %v11998_v0 = vor.u32 %v16639_v8, %v11995_v33  ;;  %v10893_v37 = vadd.f32 %v10892_v38, %v10880_v50  ;;  %v17405_v8 = vld [vmem:[#allocation13 + $0x1864] sm:$0xf0]  ;;  %v16081_v33 = vld [vmem:[#allocation13 + $0x2060] sm:$0xf] }
 0x78b   :  { %11221 = vmatpush.bf16.msrb.mxu3 %v16214_v58  ;;  %11185 = vmatpush.bf16.msrb.mxu0 %v12542_v14  ;;  %v7901_v58 = vpack.c.b16 %v6711_v22, %v6711_v22  ;;  %v17251_v14 = vld [vmem:[#allocation13 + $0x139c] sm:$0xf]  ;;  %v14171_v22 = vld [vmem:[#allocation13 + $0x1200] sm:$0xf0]  ;;  %v14857_v38 = vld [vmem:[#allocation13 + $0x16d0] sm:$0xf] }
 0x78c   :  { %v14446_v55 = vor.u32 %v17251_v14, %v14443_v61  ;;  %v10906_v3 = vadd.f32 %v10905_v39, %v10893_v37  ;;  %v15129_v39 = vld [vmem:[#allocation13 + $0x18f0] sm:$0xf]  ;;  %v16979_v14 = vld [vmem:[#allocation13 + $0xb1c] sm:$0xf]  ;;  %v13355_v61 = vld [vmem:[#allocation13 + $0xba0] sm:$0xf0]  ;;  %v14858_v9 = vor.u32 %v17371_v60, %v14857_v38 }
 0x78d   :  { %11209 = vmatpush.bf16.msrb.mxu2 %v14990_v36  ;;  %11148 = vmatpush.bf16.msra.mxu1 %v14442_v26  ;;  %v15534_v36 = vor.u32 %v17523_v51, %v15531_v41  ;;  %v17489_v26 = vld [vmem:[#allocation13 + $0x1b0c] sm:$0xf]  ;;  %v15130_v46 = vor.u32 %v17439_v17, %v15129_v39  ;;  %v17677_v51 = vld [vmem:[#allocation13 + $0x20e4] sm:$0xf0]  ;;  %v13905_v41 = vld [vmem:[#allocation13 + $0xf60] sm:$0xf]  ;;  %v13358_v32 = vor.u32 %v16979_v14, %v13355_v61 }
 0x78e   :  { %16525 = vmatmul.msk.bf16.vlgmr.msra.gmra.mxu3 %vm9060_vm11, %v18388_v27  ;;  %v17099_v37 = vld [vmem:[#allocation13 + $0xed4] sm:$0xf0]  ;;  %v14585_v17 = vld [vmem:[#allocation13 + $0x14b0] sm:$0xf] }
 0x78f   :  { %11222 = vmatpush.bf16.msrb.mxu3 %v16078_v7  ;;  %11186 = vmatpush.bf16.msrb.mxu0 %v12406_v31  ;;  %v9159_v7 = vsel %vm9064_vm10, %v7901_v58, 0  ;;  %v15395_v31 = vld [vmem:[#allocation13 + $0x1b90] sm:$0xf0]  ;;  %v18964_v63 = vpop.f32.mrf.mxu0  ;;  %v16218_v58 = vor.u32 %v17711_v20, %v16217_v43  ;;  %v17303_v43 = vld [vmem:[#allocation13 + $0x1534] sm:$0xf0] }
 0x790   :  { %v15398_v10 = vor.u32 %v17489_v26, %v15395_v31  ;;  %v13769_v26 = vld [vmem:[#allocation13 + $0xe50] sm:$0xf]  ;;  %v13219_v31 = vld [vmem:[#allocation13 + $0xa90] sm:$0xf0] }
 0x791   :  { %11210 = vmatpush.bf16.msrb.mxu2 %v14854_v59  ;;  %11149 = vmatpush.bf16.msra.mxu1 %v14306_v18  ;;  %v17047_v59 = vld [vmem:[#allocation13 + $0xd3c] sm:$0xf]  ;;  %v15259_v18 = vld [vmem:[#allocation13 + $0x1a80] sm:$0xf0] }
 0x792   :  { %v15262_v45 = vor.u32 %v17455_v13, %v15259_v18  ;;  %v13633_v13 = vld [vmem:[#allocation13 + $0xd40] sm:$0xf]  ;;  %v16911_v18 = vld [vmem:[#allocation13 + $0x8fc] sm:$0xf] }
 0x793   :  { %11223 = vmatpush.bf16.msrb.mxu3 %v15942_v49  ;;  %11187 = vmatpush.bf16.msrb.mxu0 %v12270_v47  ;;  %v14307_v49 = vld [vmem:[#allocation13 + $0x1310] sm:$0xf0]  ;;  %v10919_v47 = vadd.f32 %v10918_v54, %v10906_v3  ;;  %v17133_v54 = vld [vmem:[#allocation13 + $0xfe4] sm:$0xf0]  ;;  %v13086_v20 = vor.u32 %v16911_v18, %v13083_v16  ;;  %v13089_v18 = vld [vmem:[#allocation13 + $0x900] sm:$0xf] }
 0x794   :  { %v14310_v21 = vor.u32 %v17217_v56, %v14307_v49  ;;  %v13770_v56 = vor.u32 %v17099_v37, %v13769_v26  ;;  %v14721_v49 = vld [vmem:[#allocation13 + $0x15c0] sm:$0xf]  ;;  %v17337_v3 = vld [vmem:[#allocation13 + $0x1644] sm:$0xf0]  ;;  %v17507_v26 = vld [vmem:[#allocation13 + $0x1b94] sm:$0xf0] }
 0x795   :  { %11211 = vmatpush.bf16.msrb.mxu2 %v14718_v42  ;;  %11150 = vmatpush.bf16.msra.mxu1 %v14170_v19  ;;  %11403 = vst [vmem:[%s19046_s9 + $0xd0] sm:$0xff] %v10919_v47  ;;  %v13630_v42 = vor.u32 %v17047_v59, %v13627_v53  ;;  %v10894_v19 = vpop.f32.mrf.mxu1  ;;  %v17609_v53 = vld [vmem:[#allocation13 + $0x1ec4] sm:$0xf0]  ;;  %v14722_v47 = vor.u32 %v17337_v3, %v14721_v49  ;;  %v14177_v3 = vld [vmem:[#allocation13 + $0x1180] sm:$0xf] }
 0x796   :  { %v16793_v49 = vld [vmem:[#allocation13 + $0x544] sm:$0xf0] }
 0x797   :  { %11224 = vmatpush.bf16.msrb.mxu3 %v15806_v44  ;;  %11188 = vmatpush.bf16.msrb.mxu0 %v12134_v23  ;;  %v10920_v44 = vpop.f32.mrf.mxu3  ;;  %v14174_v23 = vor.u32 %v17183_v25, %v14171_v22  ;;  %v10933_v50 = vpop.f32.mrf.mxu0  ;;  %v16895_v25 = vld [vmem:[#allocation13 + $0x874] sm:$0xf0] }
 0x798   :  { %11151 = vmatmul.bf16.vlgmr.msra.gmra.mxu1 %v18380_v4 }
 0x799   :  { %11195 = vmatpush.bf16.msrb.mxu1 %v14038_v28  ;;  %11212 = vmatpush.bf16.msrb.mxu2 %v14582_v48  ;;  %v13491_v28 = vld [vmem:[#allocation13 + $0xcb0] sm:$0xf0] }
 0x79a   :  { %v13494_v48 = vor.u32 %v17013_v29, %v13491_v28  ;;  %v14586_v29 = vor.u32 %v17303_v43, %v14585_v17  ;;  %v12817_v28 = vld [vmem:[#allocation13 + $0x6e0] sm:$0xf]  ;;  %v15131_v17 = vld [vmem:[#allocation13 + $0x1978] sm:$0xf0]  ;;  %v12409_v43 = vld [vmem:[#allocation13 + $0x3b0] sm:$0xf] }
 0x79b   :  { %11225 = vmatpush.bf16.msrb.mxu3 %v15670_v2  ;;  %11189 = vmatpush.bf16.msrb.mxu0 %v11998_v0  ;;  %v14042_v2 = vor.u32 %v17167_v30, %v14041_v57  ;;  %v16082_v0 = vor.u32 %v17677_v51, %v16081_v33  ;;  %v17575_v57 = vld [vmem:[#allocation13 + $0x1db4] sm:$0xf0]  ;;  %v3154_v30 = vperm.slane %v18915_v11, 3  ;;  %v17541_v33 = vld [vmem:[#allocation13 + $0x1ca4] sm:$0xf0] }
 0x79d   :  { %11196 = vmatpush.bf16.msrb.mxu1 %v13902_v5  ;;  %11213 = vmatpush.bf16.msrb.mxu2 %v14446_v55  ;;  %v14994_v5 = vor.u32 %v17405_v8, %v14993_v15  ;;  %v16945_v55 = vld [vmem:[#allocation13 + $0xa0c] sm:$0xf]  ;;  %v15537_v8 = vld [vmem:[#allocation13 + $0x1c20] sm:$0xf] }
 0x79e   :  { %11190 = vmatmul.bf16.vlgmr.msrb.gmra.mxu0 %v18370_v35  ;;  %v13222_v59 = vor.u32 %v16945_v55, %v13219_v31  ;;  %v15538_v60 = vor.u32 %v17541_v33, %v15537_v8  ;;  %v13225_v31 = vld [vmem:[#allocation13 + $0xa10] sm:$0xf]  ;;  %v16725_v8 = vld [vmem:[#allocation13 + $0x324] sm:$0xf0]  ;;  %v16844_v33 = vld [vmem:[#allocation13 + $0x6e4] sm:$0xf] }
 0x79f   :  { %11226 = vmatpush.bf16.msrb.mxu3 %v15534_v36  ;;  %11239 = vmatpush.bf16.msra.mxu0 %v9159_v7  ;;  %v13906_v7 = vor.u32 %v17133_v54, %v13905_v41  ;;  %v15945_v36 = vld [vmem:[#allocation13 + $0x1f50] sm:$0xf]  ;;  %v10957_v62 = vpop.f32.mrf.mxu2  ;;  %v18974_v22 = vpop.f32.mrf.mxu0  ;;  %v13361_v41 = vld [vmem:[#allocation13 + $0xb20] sm:$0xf]  ;;  %v16997_v54 = vld [vmem:[#allocation13 + $0xba4] sm:$0xf0] }
 0x7a0   :  { %v15946_v24 = vor.u32 %v17643_v34, %v15945_v36  ;;  %v14313_v36 = vld [vmem:[#allocation13 + $0x1290] sm:$0xf] }
 0x7a1   :  { %11197 = vmatpush.bf16.msrb.mxu1 %v13766_v52  ;;  %11214 = vmatpush.bf16.msrb.mxu2 %v14310_v21  ;;  %v15809_v52 = vld [vmem:[#allocation13 + $0x1e40] sm:$0xf]  ;;  %v12953_v21 = vld [vmem:[#allocation13 + $0x7f0] sm:$0xf] }
 0x7a2   :  { %v15810_v39 = vor.u32 %v17609_v53, %v15809_v52  ;;  %v12954_v19 = vor.u32 %v16895_v25, %v12953_v21  ;;  %v15401_v34 = vld [vmem:[#allocation13 + $0x1b10] sm:$0xf]  ;;  %v17201_v52 = vld [vmem:[#allocation13 + $0x1204] sm:$0xf0]  ;;  %v14043_v21 = vld [vmem:[#allocation13 + $0x10f8] sm:$0xf0] }
 0x7a3   :  { %11227 = vmatpush.bf16.msrb.mxu3 %v15398_v10  ;;  %11240 = vmatpush.bf16.msra.mxu0 %v16486_v40  ;;  %v17065_v10 = vld [vmem:[#allocation13 + $0xdc4] sm:$0xf0]  ;;  %v18972_v40 = vpop.f32.mrf.mxu3  ;;  %v15402_v53 = vor.u32 %v17507_v26, %v15401_v34 }
 0x7a4   :  { %v13634_v44 = vor.u32 %v17065_v10, %v13633_v13  ;;  %v15265_v13 = vld [vmem:[#allocation13 + $0x1a00] sm:$0xf]  ;;  %v17473_v10 = vld [vmem:[#allocation13 + $0x1a84] sm:$0xf0] }
 0x7a5   :  { %11198 = vmatpush.bf16.msrb.mxu1 %v13630_v42  ;;  %11215 = vmatpush.bf16.msrb.mxu2 %v14174_v23  ;;  %v15673_v42 = vld [vmem:[#allocation13 + $0x1d30] sm:$0xf]  ;;  %v16861_v23 = vld [vmem:[#allocation13 + $0x764] sm:$0xf0] }
 0x7a6   :  { %v12818_v51 = vor.u32 %v16861_v23, %v12817_v28  ;;  %v13907_v28 = vld [vmem:[#allocation13 + $0xfe8] sm:$0xf0] }
 0x7a7   :  { %11228 = vmatpush.bf16.msrb.mxu3 %v15262_v45  ;;  %11241 = vmatpush.bf16.msra.mxu0 %v16350_v12  ;;  %v13497_v45 = vld [vmem:[#allocation13 + $0xc30] sm:$0xf]  ;;  %v17031_v12 = vld [vmem:[#allocation13 + $0xcb4] sm:$0xf0]  ;;  %v10959_v61 = vpop.f32.mrf.mxu2  ;;  %v10985_v38 = vpop.f32.mrf.mxu0 }
 0x7a8   :  { %11216 = vmatmul.bf16.vlgmr.msrb.gmra.mxu2 %v18380_v4  ;;  %v13498_v15 = vor.u32 %v17031_v12, %v13497_v45  ;;  %v12137_v38 = vld [vmem:[#allocation13 + $0x190] sm:$0xf] }
 0x7a9   :  { %11260 = vmatpush.bf16.msra.mxu2 %v14042_v2  ;;  %11199 = vmatpush.bf16.msrb.mxu1 %v13494_v48  ;;  %v17269_v2 = vld [vmem:[#allocation13 + $0x1424] sm:$0xf0]  ;;  %v10932_v48 = vadd.f32 %v18964_v63, %v3154_v30  ;;  %v10944_v14 = vpop.f32.mrf.mxu1  ;;  %v13362_v63 = vor.u32 %v16997_v54, %v13361_v41  ;;  %v12955_v30 = vld [vmem:[#allocation13 + $0x878] sm:$0xf0]  ;;  %v17082_v41 = vld [vmem:[#allocation13 + $0xe54] sm:$0xf] }
 0x7aa   :  { %11229 = vmatmul.bf16.vlgmr.msrb.gmra.mxu3 %v18382_v6  ;;  %v13771_v54 = vld [vmem:[#allocation13 + $0xed8] sm:$0xf0] }
 0x7ab   :  { %11273 = vmatpush.bf16.msra.mxu3 %v15130_v46  ;;  %11286 = vmatpush.bf16.msrb.mxu0 %v16218_v58  ;;  %v15674_v46 = vor.u32 %v17575_v57, %v15673_v42  ;;  %v14449_v58 = vld [vmem:[#allocation13 + $0x13a0] sm:$0xf]  ;;  %v10972_v11 = vpop.f32.mrf.mxu3  ;;  %v16759_v42 = vld [vmem:[#allocation13 + $0x434] sm:$0xf0]  ;;  %v16878_v57 = vld [vmem:[#allocation13 + $0x7f4] sm:$0xf] }
 0x7ac   :  { %v14450_v50 = vor.u32 %v17269_v2, %v14449_v58  ;;  %v12410_v23 = vor.u32 %v16759_v42, %v12409_v43  ;;  %v17388_v58 = vld [vmem:[#allocation13 + $0x17e4] sm:$0xf]  ;;  %v14995_v2 = vld [vmem:[#allocation13 + $0x1868] sm:$0xf0]  ;;  %v16742_v43 = vld [vmem:[#allocation13 + $0x3b4] sm:$0xf] }
 0x7ad   :  { %11261 = vmatpush.bf16.msra.mxu2 %v13906_v7  ;;  %11200 = vmatpush.bf16.msrb.mxu1 %v13358_v32  ;;  %v10945_v7 = vadd.f32 %v10944_v14, %v10932_v48  ;;  %v17235_v32 = vld [vmem:[#allocation13 + $0x1314] sm:$0xf0]  ;;  %v12819_v48 = vld [vmem:[#allocation13 + $0x768] sm:$0xf0]  ;;  %v18986_v14 = vld [vmem:[#allocation13 + $0x24a0] sm:$0x77] }
 0x7ae   :  { %16526 = vmatmul.msk.bf16.vlgmr.msra.gmra.mxu0 %vm9060_vm11, %v18388_v27  ;;  %v6712_v34 = vunpack.c.l.b16 %v18986_v14 }
 0x7af   :  { %11274 = vmatpush.bf16.msra.mxu3 %v14994_v5  ;;  %11287 = vmatpush.bf16.msrb.mxu0 %v16082_v0  ;;  %v12681_v5 = vld [vmem:[#allocation13 + $0x5d0] sm:$0xf]  ;;  %v16827_v0 = vld [vmem:[#allocation13 + $0x654] sm:$0xf0]  ;;  %v10958_v37 = vadd.f32 %v10957_v62, %v10945_v7  ;;  %v16929_v62 = vld [vmem:[#allocation13 + $0x984] sm:$0xf0] }
 0x7b0   :  { %v12682_v55 = vor.u32 %v16827_v0, %v12681_v5  ;;  %v12822_v5 = vor.u32 %v16844_v33, %v12819_v48  ;;  %v17354_v0 = vld [vmem:[#allocation13 + $0x16d4] sm:$0xf]  ;;  %v14859_v7 = vld [vmem:[#allocation13 + $0x1758] sm:$0xf0] }
 0x7b1   :  { %11262 = vmatpush.bf16.msra.mxu2 %v13770_v56  ;;  %11201 = vmatpush.bf16.msrb.mxu1 %v13222_v59  ;;  %v14314_v56 = vor.u32 %v17235_v32, %v14313_v36  ;;  %v10971_v59 = vadd.f32 %v18972_v40, %v10958_v37  ;;  %v14178_v40 = vor.u32 %v17201_v52, %v14177_v3  ;;  %v16810_v36 = vld [vmem:[#allocation13 + $0x5d4] sm:$0xf]  ;;  %v12683_v32 = vld [vmem:[#allocation13 + $0x658] sm:$0xf0]  ;;  %v17048_v37 = vld [vmem:[#allocation13 + $0xd44] sm:$0xf] }
 0x7b2   :  { %v14862_v26 = vor.u32 %v17354_v0, %v14859_v7  ;;  %v16657_v3 = vld [vmem:[#allocation13 + $0x104] sm:$0xf0]  ;;  %v16776_v52 = vld [vmem:[#allocation13 + $0x4c4] sm:$0xf]  ;;  %v16946_v0 = vld [vmem:[#allocation13 + $0xa14] sm:$0xf] }
 0x7b3   :  { %11275 = vmatpush.bf16.msra.mxu3 %v14858_v9  ;;  %11288 = vmatpush.bf16.msrb.mxu0 %v15946_v24  ;;  %v16963_v9 = vld [vmem:[#allocation13 + $0xa94] sm:$0xf0]  ;;  %v12545_v24 = vld [vmem:[#allocation13 + $0x4c0] sm:$0xf]  ;;  %v10984_v25 = vadd.f32 %v18974_v22, %v10971_v59  ;;  %v13090_v22 = vor.u32 %v16929_v62, %v13089_v18  ;;  %v12547_v59 = vld [vmem:[#allocation13 + $0x548] sm:$0xf0] }
 0x7b4   :  { %v13226_v16 = vor.u32 %v16963_v9, %v13225_v31  ;;  %v12686_v9 = vor.u32 %v16810_v36, %v12683_v32  ;;  %v17014_v62 = vld [vmem:[#allocation13 + $0xc34] sm:$0xf]  ;;  %v13227_v7 = vld [vmem:[#allocation13 + $0xa98] sm:$0xf0] }
 0x7b5   :  { %11263 = vmatpush.bf16.msra.mxu2 %v13634_v44  ;;  %11202 = vmatpush.bf16.msrb.mxu1 %v13086_v20  ;;  %v17422_v44 = vld [vmem:[#allocation13 + $0x18f4] sm:$0xf]  ;;  %v10946_v20 = vpop.f32.mrf.mxu1  ;;  %11404 = vst [vmem:[%s19046_s9 + $0xd8] sm:$0xff] %v10984_v25  ;;  %v14315_v36 = vld [vmem:[#allocation13 + $0x1318] sm:$0xf0] }
 0x7b6   :  { %v15134_v12 = vor.u32 %v17422_v44, %v15131_v17  ;;  %v17286_v44 = vld [vmem:[#allocation13 + $0x14b4] sm:$0xf]  ;;  %v14587_v17 = vld [vmem:[#allocation13 + $0x1538] sm:$0xf0] }
 0x7b7   :  { %11276 = vmatpush.bf16.msra.mxu3 %v14722_v47  ;;  %11289 = vmatpush.bf16.msrb.mxu0 %v15810_v39  ;;  %v17150_v47 = vld [vmem:[#allocation13 + $0x1074] sm:$0xf]  ;;  %v12546_v39 = vor.u32 %v16793_v49, %v12545_v24  ;;  %v17320_v24 = vld [vmem:[#allocation13 + $0x15c4] sm:$0xf]  ;;  %v12001_v49 = vld [vmem:[#allocation13 + $0x80] sm:$0xf] }
 0x7b8   :  { %11203 = vmatmul.bf16.vlgmr.msrb.gmra.mxu1 %v18372_v1  ;;  %v14046_v45 = vor.u32 %v17150_v47, %v14043_v21  ;;  %v13499_v47 = vld [vmem:[#allocation13 + $0xcb8] sm:$0xf0]  ;;  %v12002_v25 = vor.u32 %v16657_v3, %v12001_v49  ;;  %v16912_v49 = vld [vmem:[#allocation13 + $0x904] sm:$0xf]  ;;  %v13091_v3 = vld [vmem:[#allocation13 + $0x988] sm:$0xf0] }
 0x7b9   :  { %11247 = vmatpush.bf16.msra.mxu1 %v12954_v19  ;;  %11264 = vmatpush.bf16.msra.mxu2 %v13498_v15  ;;  %v15266_v19 = vor.u32 %v17473_v10, %v15265_v13  ;;  %v12273_v15 = vld [vmem:[#allocation13 + $0x2a0] sm:$0xf]  ;;  %v7902_v10 = vpack.c.b16 %v6712_v34, %v6712_v34  ;;  %v12411_v20 = vld [vmem:[#allocation13 + $0x438] sm:$0xf0]  ;;  %v13502_v42 = vor.u32 %v17014_v62, %v13499_v47  ;;  %v16674_v34 = vld [vmem:[#allocation13 + $0x194] sm:$0xf] }
 0x7ba   :  { %v12003_v62 = vld [vmem:[#allocation13 + $0x108] sm:$0xf0] }
 0x7bb   :  { %11277 = vmatpush.bf16.msra.mxu3 %v14586_v29  ;;  %11290 = vmatpush.bf16.msrb.mxu0 %v15674_v46  ;;  %v17116_v29 = vld [vmem:[#allocation13 + $0xf64] sm:$0xf]  ;;  %v12958_v46 = vor.u32 %v16878_v57, %v12955_v30  ;;  %v18988_v61 = vpop.f32.mrf.mxu0  ;;  %v16489_v57 = vld [vmem:[#allocation13 + $0x2390] sm:$0xf]  ;;  %v17779_v30 = vld [vmem:[#allocation13 + $0x2414] sm:$0xf0] }
 0x7bc   :  { %v13910_v11 = vor.u32 %v17116_v29, %v13907_v28  ;;  %v17252_v29 = vld [vmem:[#allocation13 + $0x13a4] sm:$0xf]  ;;  %v14451_v28 = vld [vmem:[#allocation13 + $0x1428] sm:$0xf0] }
 0x7bd   :  { %11248 = vmatpush.bf16.msra.mxu1 %v12818_v51  ;;  %11265 = vmatpush.bf16.msra.mxu2 %v13362_v63  ;;  %v14998_v51 = vor.u32 %v17388_v58, %v14995_v2  ;;  %v13774_v63 = vor.u32 %v17082_v41, %v13771_v54  ;;  %v16490_v58 = vor.u32 %v17779_v30, %v16489_v57  ;;  %v16708_v2 = vld [vmem:[#allocation13 + $0x2a4] sm:$0xf]  ;;  %v17694_v41 = vld [vmem:[#allocation13 + $0x2174] sm:$0xf]  ;;  %v16491_v57 = vld [vmem:[#allocation13 + $0x2418] sm:$0xf0] }
 0x7be   :  { %v17592_v30 = vld [vmem:[#allocation13 + $0x1e44] sm:$0xf] }
 0x7bf   :  { %11278 = vmatpush.bf16.msra.mxu3 %v14450_v50  ;;  %11291 = vmatpush.bf16.msrb.mxu0 %v15538_v60  ;;  %v12274_v50 = vor.u32 %v16725_v8, %v12273_v15  ;;  %v16691_v60 = vld [vmem:[#allocation13 + $0x214] sm:$0xf0]  ;;  %v18996_v18 = vpop.f32.mrf.mxu2  ;;  %v12275_v15 = vld [vmem:[#allocation13 + $0x328] sm:$0xf0] }
 0x7c0   :  { %v12138_v31 = vor.u32 %v16691_v60, %v12137_v38  ;;  %v12278_v38 = vor.u32 %v16708_v2, %v12275_v15  ;;  %v17218_v60 = vld [vmem:[#allocation13 + $0x1294] sm:$0xf]  ;;  %v15675_v15 = vld [vmem:[#allocation13 + $0x1db8] sm:$0xf0] }
 0x7c1   :  { %11249 = vmatpush.bf16.msra.mxu1 %v12682_v55  ;;  %11266 = vmatpush.bf16.msra.mxu2 %v13226_v16  ;;  %v13635_v55 = vld [vmem:[#allocation13 + $0xdc8] sm:$0xf0]  ;;  %v17558_v2 = vld [vmem:[#allocation13 + $0x1d34] sm:$0xf] }
 0x7c2   :  { %v13638_v13 = vor.u32 %v17048_v37, %v13635_v55  ;;  %v13230_v55 = vor.u32 %v16946_v0, %v13227_v7 }
 0x7c3   :  { %11279 = vmatpush.bf16.msra.mxu3 %v14314_v56  ;;  %11292 = vmatpush.bf16.msrb.mxu0 %v15402_v53  ;;  %v14723_v56 = vld [vmem:[#allocation13 + $0x1648] sm:$0xf0]  ;;  %v18994_v53 = vpop.f32.mrf.mxu3  ;;  %v11037_v21 = vpop.f32.mrf.mxu0 }
 0x7c4   :  { %v14726_v16 = vor.u32 %v17320_v24, %v14723_v56  ;;  %v14318_v24 = vor.u32 %v17218_v60, %v14315_v36  ;;  %v16083_v56 = vld [vmem:[#allocation13 + $0x20e8] sm:$0xf0] }
 0x7c5   :  { %11250 = vmatpush.bf16.msra.mxu1 %v12546_v39  ;;  %11267 = vmatpush.bf16.msra.mxu2 %v13090_v22  ;;  %v12550_v39 = vor.u32 %v16776_v52, %v12547_v59  ;;  %v13363_v22 = vld [vmem:[#allocation13 + $0xba8] sm:$0xf0]  ;;  %v17184_v59 = vld [vmem:[#allocation13 + $0x1184] sm:$0xf] }
 0x7c6   :  { %v15267_v60 = vld [vmem:[#allocation13 + $0x1a88] sm:$0xf0] }
 0x7c7   :  { %11280 = vmatpush.bf16.msra.mxu3 %v14178_v40  ;;  %11293 = vmatpush.bf16.msrb.mxu0 %v15266_v19  ;;  %v9162_v40 = vsel %vm9064_vm10, %v7902_v10, 0  ;;  %v14590_v19 = vor.u32 %v17286_v44, %v14587_v17  ;;  %v11011_v54 = vpop.f32.mrf.mxu2  ;;  %v17626_v44 = vld [vmem:[#allocation13 + $0x1f54] sm:$0xf]  ;;  %v15947_v17 = vld [vmem:[#allocation13 + $0x1fd8] sm:$0xf0] }
 0x7c8   :  { %11268 = vmatmul.bf16.vlgmr.msra.gmra.mxu2 %v18372_v1  ;;  %v17490_v54 = vld [vmem:[#allocation13 + $0x1b14] sm:$0xf] }
 0x7c9   :  { %11251 = vmatpush.bf16.msra.mxu1 %v12410_v23  ;;  %11312 = vmatpush.bf16.msrb.mxu2 %v12958_v46  ;;  %v18999_v23 = vld [vmem:[#allocation14 + $0x18] sm:$0xff]  ;;  %v10996_v8 = vpop.f32.mrf.mxu1 }
 0x7ca   :  { %11281 = vmatmul.bf16.vlgmr.msra.gmra.mxu3 %v18380_v4  ;;  %11294 = vmatmul.bf16.vlgmr.msrb.gmra.mxu0 %v18382_v6  ;;  %v3155_v46 = vperm.slane %v18999_v23, 4 }
 0x7cb   :  { %11325 = vmatpush.bf16.msrb.mxu3 %v14046_v45  ;;  %11338 = vmatpush.bf16.msra.mxu0 %v15134_v12  ;;  %v16980_v45 = vld [vmem:[#allocation13 + $0xb24] sm:$0xf]  ;;  %v12414_v12 = vor.u32 %v16742_v43, %v12411_v20  ;;  %v11024_v33 = vpop.f32.mrf.mxu3 }
 0x7cc   :  { %v13366_v48 = vor.u32 %v16980_v45, %v13363_v22  ;;  %v10997_v32 = vadd.f32 %v10996_v8, %v3155_v46  ;;  %v16355_v46 = vld [vmem:[#allocation13 + $0x2308] sm:$0xf0]  ;;  %v17524_v8 = vld [vmem:[#allocation13 + $0x1c24] sm:$0xf] }
 0x7cd   :  { %11252 = vmatpush.bf16.msra.mxu1 %v12274_v50  ;;  %11313 = vmatpush.bf16.msrb.mxu2 %v12822_v5  ;;  %v14454_v50 = vor.u32 %v17252_v29, %v14451_v28  ;;  %v16219_v5 = vld [vmem:[#allocation13 + $0x21f8] sm:$0xf0]  ;;  %v17728_v28 = vld [vmem:[#allocation13 + $0x2284] sm:$0xf]  ;;  %v15539_v33 = vld [vmem:[#allocation13 + $0x1ca8] sm:$0xf0] }
 0x7ce   :  { %v16222_v37 = vor.u32 %v17694_v41, %v16219_v5  ;;  %v11010_v10 = vadd.f32 %v18996_v18, %v10997_v32  ;;  %v15950_v18 = vor.u32 %v17626_v44, %v15947_v17  ;;  %v15542_v41 = vor.u32 %v17524_v8, %v15539_v33 }
 0x7cf   :  { %11326 = vmatpush.bf16.msrb.mxu3 %v13910_v11  ;;  %11339 = vmatpush.bf16.msra.mxu0 %v14998_v51  ;;  %v16353_v11 = vld [vmem:[#allocation13 + $0x2280] sm:$0xf]  ;;  %v17745_v51 = vld [vmem:[#allocation13 + $0x2304] sm:$0xf0] }
 0x7d0   :  { %v11023_v20 = vadd.f32 %v18994_v53, %v11010_v10 }
 0x7d1   :  { %11253 = vmatpush.bf16.msra.mxu1 %v12138_v31  ;;  %11314 = vmatpush.bf16.msrb.mxu2 %v12686_v9  ;;  %v17660_v31 = vld [vmem:[#allocation13 + $0x2064] sm:$0xf]  ;;  %v6713_v9 = vunpack.c.h.b16 %v18986_v14  ;;  %v10998_v47 = vpop.f32.mrf.mxu1 }
 0x7d2   :  { %v16086_v21 = vor.u32 %v17660_v31, %v16083_v56  ;;  %v11036_v22 = vadd.f32 %v18988_v61, %v11023_v20  ;;  %v15678_v61 = vor.u32 %v17558_v2, %v15675_v15 }
 0x7d3   :  { %11327 = vmatpush.bf16.msrb.mxu3 %v13774_v63  ;;  %11340 = vmatpush.bf16.msra.mxu0 %v14862_v26  ;;  %v16354_v63 = vor.u32 %v17745_v51, %v16353_v11  ;;  %v12139_v26 = vld [vmem:[#allocation13 + $0x218] sm:$0xf0]  ;;  %v7903_v14 = vpack.c.b16 %v6713_v9, %v6713_v9 }
 0x7d4   :  { %v12142_v52 = vor.u32 %v16674_v34, %v12139_v26 }
 0x7d5   :  { %11254 = vmatpush.bf16.msra.mxu1 %v12002_v25  ;;  %11315 = vmatpush.bf16.msrb.mxu2 %v12550_v39  ;;  %v13094_v25 = vor.u32 %v16912_v49, %v13091_v3 }
 0x7d7   :  { %11328 = vmatpush.bf16.msrb.mxu3 %v13638_v13  ;;  %11341 = vmatpush.bf16.msra.mxu0 %v14726_v16  ;;  %v14179_v13 = vld [vmem:[#allocation13 + $0x1208] sm:$0xf0]  ;;  %v16640_v16 = vld [vmem:[#allocation13 + $0x84] sm:$0xf] }
 0x7d8   :  { %11255 = vmatmul.bf16.vlgmr.msra.gmra.mxu1 %v18370_v35  ;;  %v14182_v39 = vor.u32 %v17184_v59, %v14179_v13  ;;  %v12006_v43 = vor.u32 %v16640_v16, %v12003_v62 }
 0x7d9   :  { %11304 = vmatpush.bf16.msrb.mxu1 %v9162_v40  ;;  %11316 = vmatpush.bf16.msrb.mxu2 %v12414_v12  ;;  %v9165_v40 = vsel %vm9064_vm10, %v7903_v14, 0  ;;  %v11048_v53 = vpop.f32.mrf.mxu1 }
 0x7db   :  { %11329 = vmatpush.bf16.msrb.mxu3 %v13502_v42  ;;  %11342 = vmatpush.bf16.msra.mxu0 %v14590_v19  ;;  %v17762_v42 = vld [vmem:[#allocation13 + $0x2394] sm:$0xf]  ;;  %v15811_v19 = vld [vmem:[#allocation13 + $0x1ec8] sm:$0xf0]  ;;  %v11087_v45 = vpop.f32.mrf.mxu0 }
 0x7dc   :  { %v16494_v12 = vor.u32 %v17762_v42, %v16491_v57  ;;  %v15814_v29 = vor.u32 %v17592_v30, %v15811_v19 }
 0x7dd   :  { %11305 = vmatpush.bf16.msrb.mxu1 %v16490_v58  ;;  %11317 = vmatpush.bf16.msrb.mxu2 %v12278_v38  ;;  %v11049_v58 = vadd.f32 %v11048_v53, %v11036_v22  ;;  %v17456_v38 = vld [vmem:[#allocation13 + $0x1a04] sm:$0xf] }
 0x7de   :  { %v15270_v32 = vor.u32 %v17456_v38, %v15267_v60 }
 0x7df   :  { %11330 = vmatpush.bf16.msrb.mxu3 %v13366_v48  ;;  %11343 = vmatpush.bf16.msra.mxu0 %v14454_v50  ;;  %11405 = vst [vmem:[%s19046_s9 + $0xe0] sm:$0xff] %v11049_v58  ;;  %v11061_v48 = vpop.f32.mrf.mxu2  ;;  %v15403_v50 = vld [vmem:[#allocation13 + $0x1b98] sm:$0xf0] }
 0x7e0   :  { %v15406_v0 = vor.u32 %v17490_v54, %v15403_v50 }
 0x7e1   :  { %11306 = vmatpush.bf16.msrb.mxu1 %v16354_v63  ;;  %11318 = vmatpush.bf16.msrb.mxu2 %v12142_v52  ;;  %v11050_v51 = vpop.f32.mrf.mxu1 }
 0x7e3   :  { %11331 = vmatpush.bf16.msrb.mxu3 %v13230_v55  ;;  %11344 = vmatpush.bf16.msra.mxu0 %v14318_v24  ;;  %v11089_v11 = vpop.f32.mrf.mxu0 }
 0x7e5   :  { %11351 = vmatpush.bf16.msra.mxu1 %v16222_v37  ;;  %11319 = vmatpush.bf16.msrb.mxu2 %v12006_v43 }
 0x7e7   :  { %11332 = vmatpush.bf16.msrb.mxu3 %v13094_v25  ;;  %11345 = vmatpush.bf16.msra.mxu0 %v14182_v39  ;;  %v11063_v36 = vpop.f32.mrf.mxu2 }
 0x7e8   :  { %16527 = vmatmul.msk.bf16.vlgmr.msrb.gmra.mxu1 %vm9060_vm11, %v18388_v27  ;;  %11320 = vmatmul.bf16.vlgmr.msrb.gmra.mxu2 %v18370_v35  ;;  %v3156_v35 = vperm.slane %v18999_v23, 5 }
 0x7e9   :  { %11352 = vmatpush.bf16.msra.mxu1 %v16086_v21  ;;  %11369 = vmatpush.bf16.msra.mxu2 %v9165_v40  ;;  %v3158_v40 = vperm.slane %v18999_v23, 7 }
 0x7ea   :  { %11333 = vmatmul.bf16.vlgmr.msrb.gmra.mxu3 %v18372_v1  ;;  %11346 = vmatmul.bf16.vlgmr.msra.gmra.mxu0 %v18380_v4  ;;  %v16358_v1 = vor.u32 %v17728_v28, %v16355_v46  ;;  %v11074_v4 = vpop.f32.mrf.mxu3  ;;  %v11062_v7 = vadd.f32 %v11061_v48, %v3156_v35 }
 0x7ec   :  { %v11075_v63 = vadd.f32 %v11074_v4, %v11062_v7 }
 0x7ed   :  { %11353 = vmatpush.bf16.msra.mxu1 %v15950_v18  ;;  %11370 = vmatpush.bf16.msra.mxu2 %v16494_v12 }
 0x7ee   :  { %v11088_v34 = vadd.f32 %v11087_v45, %v11075_v63 }
 0x7ef   :  { %v11113_v37 = vpop.f32.mrf.mxu2 }
 0x7f1   :  { %11354 = vmatpush.bf16.msra.mxu1 %v15814_v29  ;;  %11371 = vmatpush.bf16.msra.mxu2 %v16358_v1  ;;  %v3121_v1 = vld [vmem:[#allocation14 + $0x20] sm:$0x3] }
 0x7f2   :  { %v11076_v5 = vpop.f32.mrf.mxu3  ;;  %v3160_v60 = vperm.slane %v3121_v1, 1 }
 0x7f5   :  { %11355 = vmatpush.bf16.msra.mxu1 %v15678_v61  ;;  %v11100_v26 = vpop.f32.mrf.mxu1 }
 0x7f6   :  { %v11101_v55 = vadd.f32 %v11100_v26, %v11088_v34 }
 0x7f7   :  { %v11115_v56 = vpop.f32.mrf.mxu2 }
 0x7f8   :  { %16528 = vmatmul.msk.bf16.vlgmr.msra.gmra.mxu2 %vm9060_vm11, %v18388_v27  ;;  %v11114_v31 = vadd.f32 %v11113_v37, %v11101_v55  ;;  %v3157_v27 = vperm.slane %v18999_v23, 6  ;;  %v3159_v23 = vperm.slane %v3121_v1, 0 }
 0x7f9   :  { %11356 = vmatpush.bf16.msra.mxu1 %v15542_v41 }
 0x7fa   :  { %11406 = vst [vmem:[%s19046_s9 + $0xe8] sm:$0xff] %v11114_v31 }
 0x7fb   :  { %v11139_v9 = vpop.f32.mrf.mxu0 }
 0x7fd   :  { %11357 = vmatpush.bf16.msra.mxu1 %v15406_v0  ;;  %v11102_v24 = vpop.f32.mrf.mxu1 }
 0x801   :  { %11358 = vmatpush.bf16.msra.mxu1 %v15270_v32  ;;  %v11126_v49 = vpop.f32.mrf.mxu3 }
 0x802   :  { %v11127_v13 = vadd.f32 %v11126_v49, %v3157_v27 }
 0x803   :  { %v11141_v3 = vpop.f32.mrf.mxu0 }
 0x804   :  { %11359 = vmatmul.bf16.vlgmr.msra.gmra.mxu1 %v18382_v6  ;;  %v11140_v16 = vadd.f32 %v11139_v9, %v11127_v13 }
 0x809   :  { %v11128_v52 = vpop.f32.mrf.mxu3 }
 0x80b   :  { %v11165_v59 = vpop.f32.mrf.mxu2 }
 0x811   :  { %v11178_v10 = vpop.f32.mrf.mxu3 }
 0x813   :  { %v11167_v47 = vpop.f32.mrf.mxu2 }
 0x815   :  { %v11152_v62 = vpop.f32.mrf.mxu1 }
 0x816   :  { %v11153_v6 = vadd.f32 %v11152_v62, %v11140_v16 }
 0x818   :  { %v11166_v21 = vadd.f32 %v11165_v59, %v11153_v6 }
 0x819   :  { %v11180_v39 = vpop.f32.mrf.mxu3 }
 0x81a   :  { %v11179_v25 = vadd.f32 %v11178_v10, %v11166_v21 }
 0x81b   :  { %v11191_v14 = vpop.f32.mrf.mxu0 }
 0x81c   :  { %11407 = vst [vmem:[%s19046_s9 + $0xf0] sm:$0xff] %v11179_v25  ;;  %v11192_v42 = vadd.f32 %v11191_v14, %v3158_v40 }
 0x81d   :  { %v11154_v44 = vpop.f32.mrf.mxu1 }
 0x823   :  { %v11193_v17 = vpop.f32.mrf.mxu0 }
 0x82b   :  { %v11217_v20 = vpop.f32.mrf.mxu2  ;;  %v11243_v18 = vpop.f32.mrf.mxu0 }
 0x82d   :  { %v11230_v43 = vpop.f32.mrf.mxu3 }
 0x833   :  { %v11219_v19 = vpop.f32.mrf.mxu2  ;;  %v11245_v22 = vpop.f32.mrf.mxu0 }
 0x835   :  { %v11232_v57 = vpop.f32.mrf.mxu3  ;;  %v11204_v30 = vpop.f32.mrf.mxu1 }
 0x836   :  { %v11205_v45 = vadd.f32 %v11204_v30, %v11192_v42 }
 0x838   :  { %v11218_v12 = vadd.f32 %v11217_v20, %v11205_v45 }
 0x83a   :  { %v11231_v53 = vadd.f32 %v11230_v43, %v11218_v12 }
 0x83c   :  { %v11244_v29 = vadd.f32 %v11243_v18, %v11231_v53 }
 0x83d   :  { %v11206_v28 = vpop.f32.mrf.mxu1 }
 0x83e   :  { %11408 = vst [vmem:[%s19046_s9 + $0xf8] sm:$0xff] %v11244_v29 }
 0x847   :  { %v11295_v46 = vpop.f32.mrf.mxu0 }
 0x84b   :  { %v11269_v2 = vpop.f32.mrf.mxu2 }
 0x84d   :  { %v11282_v58 = vpop.f32.mrf.mxu3 }
 0x84f   :  { %v11297_v15 = vpop.f32.mrf.mxu0 }
 0x853   :  { %v11271_v8 = vpop.f32.mrf.mxu2 }
 0x855   :  { %v11256_v4 = vpop.f32.mrf.mxu1  ;;  %v11284_v61 = vpop.f32.mrf.mxu3 }
 0x856   :  { %v11257_v33 = vadd.f32 %v11256_v4, %v3159_v23 }
 0x858   :  { %v11270_v48 = vadd.f32 %v11269_v2, %v11257_v33 }
 0x85a   :  { %v11283_v51 = vadd.f32 %v11282_v58, %v11270_v48 }
 0x85c   :  { %v11296_v35 = vadd.f32 %v11295_v46, %v11283_v51 }
 0x85d   :  { %v11258_v11 = vpop.f32.mrf.mxu1 }
 0x865   :  { %v11308_v54 = vpop.f32.mrf.mxu1 }
 0x866   :  { %v11309_v50 = vadd.f32 %v11308_v54, %v11296_v35 }
 0x867   :  { %v11347_v41 = vpop.f32.mrf.mxu0 }
 0x868   :  { %11409 = vst [vmem:[%s19046_s9 + $0x100] sm:$0xff] %v11309_v50 }
 0x86b   :  { %v11321_v0 = vpop.f32.mrf.mxu2 }
 0x86c   :  { %v11322_v32 = vadd.f32 %v11321_v0, %v3160_v60 }
 0x86d   :  { %v11334_v5 = vpop.f32.mrf.mxu3  ;;  %v11310_v38 = vpop.f32.mrf.mxu1 }
 0x86e   :  { %v11335_v34 = vadd.f32 %v11334_v5, %v11322_v32 }
 0x86f   :  { %v11349_v7 = vpop.f32.mrf.mxu0 }
 0x870   :  { %v11348_v26 = vadd.f32 %v11347_v41, %v11335_v34 }
 0x873   :  { %v11323_v63 = vpop.f32.mrf.mxu2 }
 0x875   :  { %v11336_v36 = vpop.f32.mrf.mxu3 }
 0x87b   :  { %v11373_v55 = vpop.f32.mrf.mxu2 }
 0x881   :  { %v11360_v37 = vpop.f32.mrf.mxu1 }
 0x882   :  { %v11361_v31 = vadd.f32 %v11360_v37, %v11348_v26 }
 0x883   :  { %v11375_v56 = vpop.f32.mrf.mxu2 }
 0x884   :  { %v11374_v9 = vadd.f32 %v11373_v55, %v11361_v31 }
 0x886   :  { %11410 = vst [vmem:[%s19046_s9 + $0x108] sm:$0xff] %v11374_v9 }
 0x889   :  { %v11362_v24 = vpop.f32.mrf.mxu1 }
 0x88a   :  { %11415 = vsyncpa [#allocation4], 1 }
 0x88b   :  { %11416 = vsyncpa [#allocation6], 1 }
 0x88c   :  { %11417 = vsyncpa [#allocation9], 1 }
 0x88d   :  { %11418 = vsyncpa [#allocation12], 1 }
 0x88e   :  { %11419 = vsyncpa [#allocation15], 1 }

</bundles_post_ra>
